<compile_context>
chip_gen: v7x
topology: tpu7x:2x2x1
jax: 0.10.0
libtpu: 0.0.40
codegen_flags: <defaults>
</compile_context>

<pallas_src>
import numpy as np
import jax
import jax.numpy as jnp
from jax.experimental import pallas as pl
from jax.experimental.pallas import tpu as pltpu


def _round_up(v, m):
    return ((v + m - 1) // m) * m


def _device_defaults():
    """(batch tile, vmem_limit_bytes) per TPU generation."""
    kind = ""
    try:
        kind = jax.devices()[0].device_kind.lower()
    except Exception:
        pass
    if "v5" in kind or "v6" in kind:          # 128 MiB VMEM
        return 128, 96 * 1024 * 1024
    return 64, 48 * 1024 * 1024               # v7x (64 MiB VMEM) / unknown


# ---------------------------------------------------------------------------
# The fused kernel (one grid step = bt images)
# ---------------------------------------------------------------------------
def _embnet_kernel(xc_ref, m1_ref, b1_ref, ac1_ref, m2_ref, b2_ref, ac2_ref,
                   fw1_ref, fb1_ref, af1_ref, fw2_ref, fb2_ref, af2_ref,
                   fw3_ref, fb3_ref, o_ref):
    bt = xc_ref.shape[0]
    cdt = m1_ref.dtype            # MXU operand dtype (bf16 default, f32 opt-in)

    def prelu(v, a_ref):
        a = a_ref[...]            # (1, 1) alpha, broadcasts
        return jnp.where(v >= 0.0, v, a * v)

    xc = xc_ref[...]              # (bt, 2, 16, 140): [:, r, k, 28*di + j]

    # ---- conv1 (5x5, 1->32) + 2x2 maxpool + bias + PReLU, 2 MXU dots --------
    # res[r][bk, 384*c + 32*q + co] = conv1 pre-act at (oh=2k+r, ow=2q+c, co);
    # rows k >= 12 are padding garbage, never consumed downstream.
    res = []
    for r in range(2):
        lhs = xc[:, r].reshape(bt * 16, 140).astype(cdt)
        res.append(jnp.dot(lhs, m1_ref[...],
                           preferred_element_type=jnp.float32))   # (bt*16, 768)
    pre = jnp.maximum(jnp.maximum(res[0][:, :384], res[0][:, 384:]),
                      jnp.maximum(res[1][:, :384], res[1][:, 384:]))
    # bias + PReLU after the pool (valid: bias commutes with max; alpha >= 0).
    z1 = prelu(pre + b1_ref[...], ac1_ref)          # (bt*16, 384)
    z1 = z1.reshape(bt, 16, 384)                    # (b, pooled row ph, 32*pw + ci)

    # ---- conv2 (5x5, 32->64): single K=1920 MXU dot (lane-aligned concat) ----
    lhs2 = jnp.concatenate(
        [z1[:, di:di + 8, :].reshape(bt * 8, 384) for di in range(5)],
        axis=1).astype(cdt)                         # (bt*8, 1920)
    y2 = jnp.dot(lhs2, m2_ref[...], preferred_element_type=jnp.float32)
    y2 = y2.reshape(bt, 8, 512)                     # lane = 64*ow + co (pre-bias)

    # ---- 2x2 maxpool fused into the FC1 contraction --------------------------
    # Row pool: max over (oh=2k, 2k+1).  Col pool: max over lane L and L+64
    # (ow pair); surviving values sit at lanes 128*q + co, other lanes hit zero
    # rows of the packed FC1 weight.  Bias + PReLU applied after the pool.
    b2 = b2_ref[...]                                # (1, 448), live lanes only
    h = None
    for k in range(4):
        rp = jnp.maximum(y2[:, 2 * k, :], y2[:, 2 * k + 1, :])    # (bt, 512)
        cp = jnp.maximum(rp[:, 0:448], rp[:, 64:512])             # (bt, 448)
        act = prelu(cp + b2, ac2_ref).astype(cdt)
        d = jnp.dot(act, fw1_ref[k], preferred_element_type=jnp.float32)
        h = d if h is None else h + d
    h = prelu(h + fb1_ref[...], af1_ref)
    h = prelu(jnp.dot(h.astype(cdt), fw2_ref[...],
                      preferred_element_type=jnp.float32) + fb2_ref[...], af2_ref)
    y = jnp.dot(h.astype(cdt), fw3_ref[...],
                preferred_element_type=jnp.float32) + fb3_ref[...]   # (bt, 128)

    # ---- L2 row-normalize (cols 2..127 are exactly zero; rsqrt goes to EUP) --
    ss = jnp.sum(y * y, axis=1, keepdims=True)
    o_ref[...] = y * jax.lax.rsqrt(jnp.maximum(ss, 1e-24))


# ---------------------------------------------------------------------------
# Forward wrapper: batch grid, resident single-buffered weights, lane-dense out
# ---------------------------------------------------------------------------
def embedding_net_l2_forward(x_nchw, pk, *, bt=None, vmem_limit_bytes=None):
    b = x_nchw.shape[0]
    assert x_nchw.shape[1:] == (1, 28, 28)

    d_bt, d_vmem = _device_defaults()
    bt = d_bt if bt is None else bt
    vmem_limit_bytes = d_vmem if vmem_limit_bytes is None else vmem_limit_bytes
    # Don't pad tiny batches up to a huge tile (the perf tile only matters when
    # the batch can fill it).  Keep bt a multiple of 8 for the output block.
    bt = max(8, min(bt, _round_up(b, 8)))
    bp = _round_up(b, bt)
    n_tiles = bp // bt
    # TODO(synk): for v7x dual-TensorCore utilization prefer batches that give
    # an even n_tiles; with n_tiles == 1 one core idles.

    # Layout plumbing in the wrapper: build the conv1 tap-concatenated LHS
    # xcat[n, r, k, 28*di + j] = x[n, 2k + r + di, j]  (rows >= 28 are zero pad)
    x = x_nchw.reshape(b, 28, 28)
    xr = jnp.pad(x, ((0, bp - b), (0, 8), (0, 0)))               # (bp, 36, 28)
    planes = []
    for r in range(2):
        taps = [xr[:, r + di::2, :][:, :16, :] for di in range(5)]  # (bp,16,28)
        planes.append(jnp.concatenate(taps, axis=-1))               # (bp,16,140)
    xcat = jnp.stack(planes, axis=1)                                # (bp,2,16,140)

    def resident(arr):
        nd = arr.ndim
        return pl.BlockSpec(arr.shape, lambda i: (0,) * nd,
                            pipeline_mode=pl.Buffered(1))   # constant index_map

    weights = [pk["m1"], pk["b1"], pk["ac1"], pk["m2"], pk["b2"], pk["ac2"],
               pk["fw1"], pk["fb1"], pk["af1"], pk["fw2"], pk["fb2"], pk["af2"],
               pk["fw3"], pk["fb3"]]

    in_specs = [pl.BlockSpec((bt, 2, 16, 140), lambda i: (i, 0, 0, 0))]
    in_specs += [resident(w) for w in weights]
    out_specs = pl.BlockSpec((bt, 128), lambda i: (i, 0))

    flops_per_tile = (
        2 * (2 * (bt * 16) * 140 * 768)     # conv1: 2 dots, K=140, N=768
        + 2 * (bt * 8) * 1920 * 512         # conv2: 1 dot, K=1920
        + 4 * (2 * bt * 448 * 256)          # fc1 (pool fused, 4 taps)
        + 2 * bt * 256 * 256                # fc2
        + 2 * bt * 256 * 128)               # fc3 (padded to 128 lanes)
    bytes_weights = sum(int(w.size) * w.dtype.itemsize for w in weights)
    cost = pl.CostEstimate(
        flops=int(flops_per_tile) * n_tiles,
        transcendentals=int(bp),
        bytes_accessed=int(xcat.size) * 4 + bytes_weights + bp * 128 * 4,
    )

    out = pl.pallas_call(
        _embnet_kernel,
        out_shape=jax.ShapeDtypeStruct((bp, 128), jnp.float32),
        grid=(n_tiles,),
        in_specs=in_specs,
        out_specs=out_specs,
        compiler_params=pltpu.CompilerParams(
            dimension_semantics=("parallel",),
            vmem_limit_bytes=vmem_limit_bytes,
        ),
        cost_estimate=cost,
    )(xcat, *weights)

    return out[:b, :2]


# ---------------------------------------------------------------------------
# Parameter construction (deterministic, synthetic) and offline packing
# ---------------------------------------------------------------------------
def init_params(key):
    ks = jax.random.split(key, 8)
    p = {}
    p["w1"] = jax.random.normal(ks[0], (5, 5, 32), jnp.float32) * 0.1        # (kh,kw,cout)
    p["bc1"] = jax.random.normal(ks[1], (32,), jnp.float32) * 0.01
    p["w2"] = jax.random.normal(ks[2], (5, 5, 32, 64), jnp.float32) * 0.03   # (kh,kw,cin,cout)
    p["bc2"] = jax.random.normal(ks[3], (64,), jnp.float32) * 0.01
    # FC1 rows in NHWC (ph, pw, c) flatten order (a torch NCHW-flatten
    # checkpoint would be converted by a one-time offline row permutation).
    p["fw1"] = jax.random.normal(ks[4], (1024, 256), jnp.float32) * 0.02
    p["fb1"] = jnp.zeros((256,), jnp.float32)
    p["fw2"] = jax.random.normal(ks[5], (256, 256), jnp.float32) * 0.05
    p["fb2"] = jnp.zeros((256,), jnp.float32)
    p["fw3"] = jax.random.normal(ks[6], (256, 2), jnp.float32) * 0.05
    p["fb3"] = jnp.zeros((2,), jnp.float32)
    for name in ("ac1", "ac2", "af1", "af2"):       # torch PReLU default alpha
        p[name] = jnp.array([0.25], jnp.float32)
    return p


def pack_params(p, compute_dtype=jnp.bfloat16):
    """One-time offline packing of the weights into the kernel's layouts.

    compute_dtype controls the MXU operand dtype (default bf16 with f32
    accumulation; pass jnp.float32 for bit-exact f32 parity at lower speed).
    """
    w1 = np.asarray(p["w1"], np.float32)
    bc1 = np.asarray(p["bc1"], np.float32)
    w2 = np.asarray(p["w2"], np.float32)
    bc2 = np.asarray(p["bc2"], np.float32)
    fw1 = np.asarray(p["fw1"], np.float32)
    fw2 = np.asarray(p["fw2"], np.float32)
    fw3 = np.asarray(p["fw3"], np.float32)

    # The kernel applies PReLU *after* the 2x2 max-pools, which is only valid
    # for alpha >= 0 (true for torch's default 0.25).
    assert float(np.asarray(p["ac1"]).min()) >= 0.0
    assert float(np.asarray(p["ac2"]).min()) >= 0.0

    # conv1 as a single (140, 768) shifted-weight matrix, shared by both output
    # row parities: row = 28*di + image-column j, col = 384*c + 32*q + co,
    # nonzero iff j == 2*q + c + dj.
    m1 = np.zeros((140, 768), np.float32)
    for di in range(5):
        for dj in range(5):
            for c in range(2):
                for q in range(12):
                    j = 2 * q + c + dj
                    m1[28 * di + j,
                       384 * c + 32 * q:384 * c + 32 * q + 32] = w1[di, dj]

    # conv2 as a single (1920, 512) shifted-weight matrix:
    # row = 384*di + 32*(ow+dj) + ci, col = 64*ow + co.
    m2 = np.zeros((1920, 512), np.float32)
    for di in range(5):
        for dj in range(5):
            for ow in range(8):
                m2[384 * di + 32 * (ow + dj):384 * di + 32 * (ow + dj) + 32,
                   64 * ow:64 * ow + 64] = w2[di, dj]

    # FC1 weight scattered into the fused-pool lane layout: per pooled row k,
    # only lanes 128*q + co are live; the rest stay zero (kills garbage lanes).
    fw1p = np.zeros((4, 448, 256), np.float32)
    for k in range(4):
        for q in range(4):
            base = (k * 4 + q) * 64
            fw1p[k, 128 * q:128 * q + 64, :] = fw1[base:base + 64, :]

    # conv2 bias tiled into the fused-pool lane layout (live lanes only).
    b2p = np.zeros((1, 448), np.float32)
    for q in range(4):
        b2p[0, 128 * q:128 * q + 64] = bc2

    # Final 256->2 projection padded to 128 lanes (lane-dense output store).
    fw3p = np.zeros((256, 128), np.float32)
    fw3p[:, :2] = fw3
    fb3p = np.zeros((1, 128), np.float32)
    fb3p[0, :2] = np.asarray(p["fb3"], np.float32)

    def scalar11(v):
        return jnp.asarray(np.asarray(v, np.float32).reshape(1, 1))

    cdt = compute_dtype
    return dict(
        m1=jnp.asarray(m1, dtype=cdt),
        b1=jnp.asarray(np.tile(bc1, 12)[None, :]),          # (1, 384) f32
        m2=jnp.asarray(m2, dtype=cdt),
        b2=jnp.asarray(b2p),                                 # (1, 448) f32
        fw1=jnp.asarray(fw1p, dtype=cdt),
        fb1=jnp.asarray(np.asarray(p["fb1"], np.float32)[None, :]),
        fw2=jnp.asarray(fw2, dtype=cdt),
        fb2=jnp.asarray(np.asarray(p["fb2"], np.float32)[None, :]),
        fw3=jnp.asarray(fw3p, dtype=cdt),
        fb3=jnp.asarray(fb3p),
        ac1=scalar11(p["ac1"]), ac2=scalar11(p["ac2"]),
        af1=scalar11(p["af1"]), af2=scalar11(p["af2"]),
    )


if __name__ == "__main__":
    key = jax.random.PRNGKey(0)
    kx, kp = jax.random.split(key)
    # input implied by the module: (B, 1, 28, 28) so the flatten gives 64*4*4
    x = jax.random.normal(kx, (2, 1, 28, 28), jnp.float32)
    params = init_params(kp)
    packed = pack_params(params)          # bf16 MXU operands, f32 accumulation

    fwd = jax.jit(embedding_net_l2_forward)
    out = jax.block_until_ready(fwd(x, packed))

    assert out.shape == (2, 2)
    norms = jnp.sqrt(jnp.sum(out * out, axis=1))
    assert bool(jnp.all(jnp.abs(norms - 1.0) < 1e-3))
    print("KERNEL_OK")
</pallas_src>

<mosaic_0001>
module attributes {stable_mosaic.version = 11 : i64} {
  func.func @_embnet_kernel(%arg0: i32, %arg1: memref<8x2x16x140xf32, #tpu.memory_space<vmem>>, %arg2: memref<140x768xbf16, #tpu.memory_space<vmem>>, %arg3: memref<1x384xf32, #tpu.memory_space<vmem>>, %arg4: memref<1x1xf32, #tpu.memory_space<vmem>>, %arg5: memref<1920x512xbf16, #tpu.memory_space<vmem>>, %arg6: memref<1x448xf32, #tpu.memory_space<vmem>>, %arg7: memref<1x1xf32, #tpu.memory_space<vmem>>, %arg8: memref<4x448x256xbf16, #tpu.memory_space<vmem>>, %arg9: memref<1x256xf32, #tpu.memory_space<vmem>>, %arg10: memref<1x1xf32, #tpu.memory_space<vmem>>, %arg11: memref<256x256xbf16, #tpu.memory_space<vmem>>, %arg12: memref<1x256xf32, #tpu.memory_space<vmem>>, %arg13: memref<1x1xf32, #tpu.memory_space<vmem>>, %arg14: memref<256x128xbf16, #tpu.memory_space<vmem>>, %arg15: memref<1x128xf32, #tpu.memory_space<vmem>>, %arg16: memref<8x128xf32, #tpu.memory_space<vmem>>) attributes {dimension_semantics = [#tpu.dimension_semantics<parallel>], iteration_bounds = array<i64: 1>, scalar_prefetch = 0 : i64, scratch_operands = 0 : i64, tpu.core_type = #tpu.core_type<tc>, window_params = [{transform_indices = @transform_0, window_bounds = array<i64: 8, 2, 16, 140>}, {pipeline_mode = #tpu.pipeline_mode<synchronous>, transform_indices = @transform_1, window_bounds = array<i64: 140, 768>}, {pipeline_mode = #tpu.pipeline_mode<synchronous>, transform_indices = @transform_2, window_bounds = array<i64: 1, 384>}, {pipeline_mode = #tpu.pipeline_mode<synchronous>, transform_indices = @transform_3, window_bounds = array<i64: 1, 1>}, {pipeline_mode = #tpu.pipeline_mode<synchronous>, transform_indices = @transform_4, window_bounds = array<i64: 1920, 512>}, {pipeline_mode = #tpu.pipeline_mode<synchronous>, transform_indices = @transform_5, window_bounds = array<i64: 1, 448>}, {pipeline_mode = #tpu.pipeline_mode<synchronous>, transform_indices = @transform_6, window_bounds = array<i64: 1, 1>}, {pipeline_mode = #tpu.pipeline_mode<synchronous>, transform_indices = @transform_7, window_bounds = array<i64: 4, 448, 256>}, {pipeline_mode = #tpu.pipeline_mode<synchronous>, transform_indices = @transform_8, window_bounds = array<i64: 1, 256>}, {pipeline_mode = #tpu.pipeline_mode<synchronous>, transform_indices = @transform_9, window_bounds = array<i64: 1, 1>}, {pipeline_mode = #tpu.pipeline_mode<synchronous>, transform_indices = @transform_10, window_bounds = array<i64: 256, 256>}, {pipeline_mode = #tpu.pipeline_mode<synchronous>, transform_indices = @transform_11, window_bounds = array<i64: 1, 256>}, {pipeline_mode = #tpu.pipeline_mode<synchronous>, transform_indices = @transform_12, window_bounds = array<i64: 1, 1>}, {pipeline_mode = #tpu.pipeline_mode<synchronous>, transform_indices = @transform_13, window_bounds = array<i64: 256, 128>}, {pipeline_mode = #tpu.pipeline_mode<synchronous>, transform_indices = @transform_14, window_bounds = array<i64: 1, 128>}, {transform_indices = @transform_15, window_bounds = array<i64: 8, 128>}]} {
    %c0 = arith.constant 0 : index
    %c0_0 = arith.constant 0 : index
    %c0_1 = arith.constant 0 : index
    %c0_2 = arith.constant 0 : index
    %0 = vector.load %arg1[%c0, %c0_0, %c0_1, %c0_2] : memref<8x2x16x140xf32, #tpu.memory_space<vmem>>, vector<8x2x16x140xf32>
    %1 = vector.extract_strided_slice %0 {offsets = [0, 0, 0, 0], sizes = [8, 1, 16, 140], strides = [1, 1, 1, 1]} : vector<8x2x16x140xf32> to vector<8x1x16x140xf32>
    %2 = vector.shape_cast %1 : vector<8x1x16x140xf32> to vector<8x16x140xf32>
    %3 = vector.shape_cast %2 : vector<8x16x140xf32> to vector<128x140xf32>
    %4 = arith.truncf %3 : vector<128x140xf32> to vector<128x140xbf16>
    %c0_3 = arith.constant 0 : index
    %c0_4 = arith.constant 0 : index
    %5 = vector.load %arg2[%c0_3, %c0_4] : memref<140x768xbf16, #tpu.memory_space<vmem>>, vector<140x768xbf16>
    %cst = arith.constant dense<0.000000e+00> : vector<128x768xf32>
    %6 = tpu.matmul %4, %5, %cst {dimension_numbers = #tpu.dot_dimension_numbers<[1], [0], [0], [1], [0, 0, 1, 1], [], []>} : vector<128x140xbf16>, vector<140x768xbf16>, vector<128x768xf32> -> vector<128x768xf32>
    %7 = vector.extract_strided_slice %0 {offsets = [0, 1, 0, 0], sizes = [8, 1, 16, 140], strides = [1, 1, 1, 1]} : vector<8x2x16x140xf32> to vector<8x1x16x140xf32>
    %8 = vector.shape_cast %7 : vector<8x1x16x140xf32> to vector<8x16x140xf32>
    %9 = vector.shape_cast %8 : vector<8x16x140xf32> to vector<128x140xf32>
    %10 = arith.truncf %9 : vector<128x140xf32> to vector<128x140xbf16>
    %c0_5 = arith.constant 0 : index
    %c0_6 = arith.constant 0 : index
    %11 = vector.load %arg2[%c0_5, %c0_6] : memref<140x768xbf16, #tpu.memory_space<vmem>>, vector<140x768xbf16>
    %cst_7 = arith.constant dense<0.000000e+00> : vector<128x768xf32>
    %12 = tpu.matmul %10, %11, %cst_7 {dimension_numbers = #tpu.dot_dimension_numbers<[1], [0], [0], [1], [0, 0, 1, 1], [], []>} : vector<128x140xbf16>, vector<140x768xbf16>, vector<128x768xf32> -> vector<128x768xf32>
    %13 = vector.extract_strided_slice %6 {offsets = [0, 0], sizes = [128, 384], strides = [1, 1]} : vector<128x768xf32> to vector<128x384xf32>
    %14 = vector.extract_strided_slice %6 {offsets = [0, 384], sizes = [128, 384], strides = [1, 1]} : vector<128x768xf32> to vector<128x384xf32>
    %15 = arith.maximumf %13, %14 : vector<128x384xf32>
    %16 = vector.extract_strided_slice %12 {offsets = [0, 0], sizes = [128, 384], strides = [1, 1]} : vector<128x768xf32> to vector<128x384xf32>
    %17 = vector.extract_strided_slice %12 {offsets = [0, 384], sizes = [128, 384], strides = [1, 1]} : vector<128x768xf32> to vector<128x384xf32>
    %18 = arith.maximumf %16, %17 : vector<128x384xf32>
    %19 = arith.maximumf %15, %18 : vector<128x384xf32>
    %c0_8 = arith.constant 0 : index
    %c0_9 = arith.constant 0 : index
    %20 = vector.load %arg3[%c0_8, %c0_9] : memref<1x384xf32, #tpu.memory_space<vmem>>, vector<1x384xf32>
    %21 = vector.broadcast %20 : vector<1x384xf32> to vector<128x384xf32>
    %22 = arith.addf %19, %21 : vector<128x384xf32>
    %c0_10 = arith.constant 0 : index
    %c0_11 = arith.constant 0 : index
    %23 = vector.load %arg4[%c0_10, %c0_11] : memref<1x1xf32, #tpu.memory_space<vmem>>, vector<1x1xf32>
    %cst_12 = arith.constant 0.000000e+00 : f32
    %24 = vector.broadcast %cst_12 : f32 to vector<128x384xf32>
    %25 = arith.cmpf oge, %22, %24 : vector<128x384xf32>
    %26 = vector.broadcast %23 : vector<1x1xf32> to vector<128x384xf32>
    %27 = arith.mulf %26, %22 : vector<128x384xf32>
    %28 = arith.select %25, %22, %27 : vector<128x384xi1>, vector<128x384xf32>
    %29 = vector.shape_cast %28 : vector<128x384xf32> to vector<8x16x384xf32>
    %30 = vector.extract_strided_slice %29 {offsets = [0, 0, 0], sizes = [8, 8, 384], strides = [1, 1, 1]} : vector<8x16x384xf32> to vector<8x8x384xf32>
    %31 = vector.shape_cast %30 : vector<8x8x384xf32> to vector<64x384xf32>
    %32 = vector.extract_strided_slice %29 {offsets = [0, 1, 0], sizes = [8, 8, 384], strides = [1, 1, 1]} : vector<8x16x384xf32> to vector<8x8x384xf32>
    %33 = vector.shape_cast %32 : vector<8x8x384xf32> to vector<64x384xf32>
    %34 = vector.extract_strided_slice %29 {offsets = [0, 2, 0], sizes = [8, 8, 384], strides = [1, 1, 1]} : vector<8x16x384xf32> to vector<8x8x384xf32>
    %35 = vector.shape_cast %34 : vector<8x8x384xf32> to vector<64x384xf32>
    %36 = vector.extract_strided_slice %29 {offsets = [0, 3, 0], sizes = [8, 8, 384], strides = [1, 1, 1]} : vector<8x16x384xf32> to vector<8x8x384xf32>
    %37 = vector.shape_cast %36 : vector<8x8x384xf32> to vector<64x384xf32>
    %38 = vector.extract_strided_slice %29 {offsets = [0, 4, 0], sizes = [8, 8, 384], strides = [1, 1, 1]} : vector<8x16x384xf32> to vector<8x8x384xf32>
    %39 = vector.shape_cast %38 : vector<8x8x384xf32> to vector<64x384xf32>
    %40 = tpu.concatenate %31, %33, %35, %37, %39 in 1 : vector<64x384xf32>, vector<64x384xf32>, vector<64x384xf32>, vector<64x384xf32>, vector<64x384xf32> -> vector<64x1920xf32>
    %41 = arith.truncf %40 : vector<64x1920xf32> to vector<64x1920xbf16>
    %c0_13 = arith.constant 0 : index
    %c0_14 = arith.constant 0 : index
    %42 = vector.load %arg5[%c0_13, %c0_14] : memref<1920x512xbf16, #tpu.memory_space<vmem>>, vector<1920x512xbf16>
    %cst_15 = arith.constant dense<0.000000e+00> : vector<64x512xf32>
    %43 = tpu.matmul %41, %42, %cst_15 {dimension_numbers = #tpu.dot_dimension_numbers<[1], [0], [0], [1], [0, 0, 1, 1], [], []>} : vector<64x1920xbf16>, vector<1920x512xbf16>, vector<64x512xf32> -> vector<64x512xf32>
    %44 = vector.shape_cast %43 : vector<64x512xf32> to vector<8x8x512xf32>
    %c0_16 = arith.constant 0 : index
    %c0_17 = arith.constant 0 : index
    %45 = vector.load %arg6[%c0_16, %c0_17] : memref<1x448xf32, #tpu.memory_space<vmem>>, vector<1x448xf32>
    %46 = vector.extract_strided_slice %44 {offsets = [0, 0, 0], sizes = [8, 1, 512], strides = [1, 1, 1]} : vector<8x8x512xf32> to vector<8x1x512xf32>
    %47 = vector.shape_cast %46 : vector<8x1x512xf32> to vector<8x512xf32>
    %48 = vector.extract_strided_slice %44 {offsets = [0, 1, 0], sizes = [8, 1, 512], strides = [1, 1, 1]} : vector<8x8x512xf32> to vector<8x1x512xf32>
    %49 = vector.shape_cast %48 : vector<8x1x512xf32> to vector<8x512xf32>
    %50 = arith.maximumf %47, %49 : vector<8x512xf32>
    %51 = vector.extract_strided_slice %50 {offsets = [0, 0], sizes = [8, 448], strides = [1, 1]} : vector<8x512xf32> to vector<8x448xf32>
    %52 = vector.extract_strided_slice %50 {offsets = [0, 64], sizes = [8, 448], strides = [1, 1]} : vector<8x512xf32> to vector<8x448xf32>
    %53 = arith.maximumf %51, %52 : vector<8x448xf32>
    %54 = vector.broadcast %45 : vector<1x448xf32> to vector<8x448xf32>
    %55 = arith.addf %53, %54 : vector<8x448xf32>
    %c0_18 = arith.constant 0 : index
    %c0_19 = arith.constant 0 : index
    %56 = vector.load %arg7[%c0_18, %c0_19] : memref<1x1xf32, #tpu.memory_space<vmem>>, vector<1x1xf32>
    %cst_20 = arith.constant 0.000000e+00 : f32
    %57 = vector.broadcast %cst_20 : f32 to vector<8x448xf32>
    %58 = arith.cmpf oge, %55, %57 : vector<8x448xf32>
    %59 = vector.broadcast %56 : vector<1x1xf32> to vector<8x448xf32>
    %60 = arith.mulf %59, %55 : vector<8x448xf32>
    %61 = arith.select %58, %55, %60 : vector<8x448xi1>, vector<8x448xf32>
    %62 = arith.truncf %61 : vector<8x448xf32> to vector<8x448xbf16>
    %c0_21 = arith.constant 0 : index
    %c0_22 = arith.constant 0 : index
    %c0_23 = arith.constant 0 : index
    %63 = vector.load %arg8[%c0_21, %c0_22, %c0_23] : memref<4x448x256xbf16, #tpu.memory_space<vmem>>, vector<1x448x256xbf16>
    %64 = vector.shape_cast %63 : vector<1x448x256xbf16> to vector<448x256xbf16>
    %cst_24 = arith.constant dense<0.000000e+00> : vector<8x256xf32>
    %65 = tpu.matmul %62, %64, %cst_24 {dimension_numbers = #tpu.dot_dimension_numbers<[1], [0], [0], [1], [0, 0, 1, 1], [], []>} : vector<8x448xbf16>, vector<448x256xbf16>, vector<8x256xf32> -> vector<8x256xf32>
    %66 = vector.extract_strided_slice %44 {offsets = [0, 2, 0], sizes = [8, 1, 512], strides = [1, 1, 1]} : vector<8x8x512xf32> to vector<8x1x512xf32>
    %67 = vector.shape_cast %66 : vector<8x1x512xf32> to vector<8x512xf32>
    %68 = vector.extract_strided_slice %44 {offsets = [0, 3, 0], sizes = [8, 1, 512], strides = [1, 1, 1]} : vector<8x8x512xf32> to vector<8x1x512xf32>
    %69 = vector.shape_cast %68 : vector<8x1x512xf32> to vector<8x512xf32>
    %70 = arith.maximumf %67, %69 : vector<8x512xf32>
    %71 = vector.extract_strided_slice %70 {offsets = [0, 0], sizes = [8, 448], strides = [1, 1]} : vector<8x512xf32> to vector<8x448xf32>
    %72 = vector.extract_strided_slice %70 {offsets = [0, 64], sizes = [8, 448], strides = [1, 1]} : vector<8x512xf32> to vector<8x448xf32>
    %73 = arith.maximumf %71, %72 : vector<8x448xf32>
    %74 = vector.broadcast %45 : vector<1x448xf32> to vector<8x448xf32>
    %75 = arith.addf %73, %74 : vector<8x448xf32>
    %c0_25 = arith.constant 0 : index
    %c0_26 = arith.constant 0 : index
    %76 = vector.load %arg7[%c0_25, %c0_26] : memref<1x1xf32, #tpu.memory_space<vmem>>, vector<1x1xf32>
    %cst_27 = arith.constant 0.000000e+00 : f32
    %77 = vector.broadcast %cst_27 : f32 to vector<8x448xf32>
    %78 = arith.cmpf oge, %75, %77 : vector<8x448xf32>
    %79 = vector.broadcast %76 : vector<1x1xf32> to vector<8x448xf32>
    %80 = arith.mulf %79, %75 : vector<8x448xf32>
    %81 = arith.select %78, %75, %80 : vector<8x448xi1>, vector<8x448xf32>
    %82 = arith.truncf %81 : vector<8x448xf32> to vector<8x448xbf16>
    %c1 = arith.constant 1 : index
    %c0_28 = arith.constant 0 : index
    %c0_29 = arith.constant 0 : index
    %83 = vector.load %arg8[%c1, %c0_28, %c0_29] : memref<4x448x256xbf16, #tpu.memory_space<vmem>>, vector<1x448x256xbf16>
    %84 = vector.shape_cast %83 : vector<1x448x256xbf16> to vector<448x256xbf16>
    %cst_30 = arith.constant dense<0.000000e+00> : vector<8x256xf32>
    %85 = tpu.matmul %82, %84, %cst_30 {dimension_numbers = #tpu.dot_dimension_numbers<[1], [0], [0], [1], [0, 0, 1, 1], [], []>} : vector<8x448xbf16>, vector<448x256xbf16>, vector<8x256xf32> -> vector<8x256xf32>
    %86 = arith.addf %65, %85 : vector<8x256xf32>
    %87 = vector.extract_strided_slice %44 {offsets = [0, 4, 0], sizes = [8, 1, 512], strides = [1, 1, 1]} : vector<8x8x512xf32> to vector<8x1x512xf32>
    %88 = vector.shape_cast %87 : vector<8x1x512xf32> to vector<8x512xf32>
    %89 = vector.extract_strided_slice %44 {offsets = [0, 5, 0], sizes = [8, 1, 512], strides = [1, 1, 1]} : vector<8x8x512xf32> to vector<8x1x512xf32>
    %90 = vector.shape_cast %89 : vector<8x1x512xf32> to vector<8x512xf32>
    %91 = arith.maximumf %88, %90 : vector<8x512xf32>
    %92 = vector.extract_strided_slice %91 {offsets = [0, 0], sizes = [8, 448], strides = [1, 1]} : vector<8x512xf32> to vector<8x448xf32>
    %93 = vector.extract_strided_slice %91 {offsets = [0, 64], sizes = [8, 448], strides = [1, 1]} : vector<8x512xf32> to vector<8x448xf32>
    %94 = arith.maximumf %92, %93 : vector<8x448xf32>
    %95 = vector.broadcast %45 : vector<1x448xf32> to vector<8x448xf32>
    %96 = arith.addf %94, %95 : vector<8x448xf32>
    %c0_31 = arith.constant 0 : index
    %c0_32 = arith.constant 0 : index
    %97 = vector.load %arg7[%c0_31, %c0_32] : memref<1x1xf32, #tpu.memory_space<vmem>>, vector<1x1xf32>
    %cst_33 = arith.constant 0.000000e+00 : f32
    %98 = vector.broadcast %cst_33 : f32 to vector<8x448xf32>
    %99 = arith.cmpf oge, %96, %98 : vector<8x448xf32>
    %100 = vector.broadcast %97 : vector<1x1xf32> to vector<8x448xf32>
    %101 = arith.mulf %100, %96 : vector<8x448xf32>
    %102 = arith.select %99, %96, %101 : vector<8x448xi1>, vector<8x448xf32>
    %103 = arith.truncf %102 : vector<8x448xf32> to vector<8x448xbf16>
    %c2 = arith.constant 2 : index
    %c0_34 = arith.constant 0 : index
    %c0_35 = arith.constant 0 : index
    %104 = vector.load %arg8[%c2, %c0_34, %c0_35] : memref<4x448x256xbf16, #tpu.memory_space<vmem>>, vector<1x448x256xbf16>
    %105 = vector.shape_cast %104 : vector<1x448x256xbf16> to vector<448x256xbf16>
    %cst_36 = arith.constant dense<0.000000e+00> : vector<8x256xf32>
    %106 = tpu.matmul %103, %105, %cst_36 {dimension_numbers = #tpu.dot_dimension_numbers<[1], [0], [0], [1], [0, 0, 1, 1], [], []>} : vector<8x448xbf16>, vector<448x256xbf16>, vector<8x256xf32> -> vector<8x256xf32>
    %107 = arith.addf %86, %106 : vector<8x256xf32>
    %108 = vector.extract_strided_slice %44 {offsets = [0, 6, 0], sizes = [8, 1, 512], strides = [1, 1, 1]} : vector<8x8x512xf32> to vector<8x1x512xf32>
    %109 = vector.shape_cast %108 : vector<8x1x512xf32> to vector<8x512xf32>
    %110 = vector.extract_strided_slice %44 {offsets = [0, 7, 0], sizes = [8, 1, 512], strides = [1, 1, 1]} : vector<8x8x512xf32> to vector<8x1x512xf32>
    %111 = vector.shape_cast %110 : vector<8x1x512xf32> to vector<8x512xf32>
    %112 = arith.maximumf %109, %111 : vector<8x512xf32>
    %113 = vector.extract_strided_slice %112 {offsets = [0, 0], sizes = [8, 448], strides = [1, 1]} : vector<8x512xf32> to vector<8x448xf32>
    %114 = vector.extract_strided_slice %112 {offsets = [0, 64], sizes = [8, 448], strides = [1, 1]} : vector<8x512xf32> to vector<8x448xf32>
    %115 = arith.maximumf %113, %114 : vector<8x448xf32>
    %116 = vector.broadcast %45 : vector<1x448xf32> to vector<8x448xf32>
    %117 = arith.addf %115, %116 : vector<8x448xf32>
    %c0_37 = arith.constant 0 : index
    %c0_38 = arith.constant 0 : index
    %118 = vector.load %arg7[%c0_37, %c0_38] : memref<1x1xf32, #tpu.memory_space<vmem>>, vector<1x1xf32>
    %cst_39 = arith.constant 0.000000e+00 : f32
    %119 = vector.broadcast %cst_39 : f32 to vector<8x448xf32>
    %120 = arith.cmpf oge, %117, %119 : vector<8x448xf32>
    %121 = vector.broadcast %118 : vector<1x1xf32> to vector<8x448xf32>
    %122 = arith.mulf %121, %117 : vector<8x448xf32>
    %123 = arith.select %120, %117, %122 : vector<8x448xi1>, vector<8x448xf32>
    %124 = arith.truncf %123 : vector<8x448xf32> to vector<8x448xbf16>
    %c3 = arith.constant 3 : index
    %c0_40 = arith.constant 0 : index
    %c0_41 = arith.constant 0 : index
    %125 = vector.load %arg8[%c3, %c0_40, %c0_41] : memref<4x448x256xbf16, #tpu.memory_space<vmem>>, vector<1x448x256xbf16>
    %126 = vector.shape_cast %125 : vector<1x448x256xbf16> to vector<448x256xbf16>
    %cst_42 = arith.constant dense<0.000000e+00> : vector<8x256xf32>
    %127 = tpu.matmul %124, %126, %cst_42 {dimension_numbers = #tpu.dot_dimension_numbers<[1], [0], [0], [1], [0, 0, 1, 1], [], []>} : vector<8x448xbf16>, vector<448x256xbf16>, vector<8x256xf32> -> vector<8x256xf32>
    %128 = arith.addf %107, %127 : vector<8x256xf32>
    %c0_43 = arith.constant 0 : index
    %c0_44 = arith.constant 0 : index
    %129 = vector.load %arg9[%c0_43, %c0_44] : memref<1x256xf32, #tpu.memory_space<vmem>>, vector<1x256xf32>
    %130 = vector.broadcast %129 : vector<1x256xf32> to vector<8x256xf32>
    %131 = arith.addf %128, %130 : vector<8x256xf32>
    %c0_45 = arith.constant 0 : index
    %c0_46 = arith.constant 0 : index
    %132 = vector.load %arg10[%c0_45, %c0_46] : memref<1x1xf32, #tpu.memory_space<vmem>>, vector<1x1xf32>
    %cst_47 = arith.constant 0.000000e+00 : f32
    %133 = vector.broadcast %cst_47 : f32 to vector<8x256xf32>
    %134 = arith.cmpf oge, %131, %133 : vector<8x256xf32>
    %135 = vector.broadcast %132 : vector<1x1xf32> to vector<8x256xf32>
    %136 = arith.mulf %135, %131 : vector<8x256xf32>
    %137 = arith.select %134, %131, %136 : vector<8x256xi1>, vector<8x256xf32>
    %138 = arith.truncf %137 : vector<8x256xf32> to vector<8x256xbf16>
    %c0_48 = arith.constant 0 : index
    %c0_49 = arith.constant 0 : index
    %139 = vector.load %arg11[%c0_48, %c0_49] : memref<256x256xbf16, #tpu.memory_space<vmem>>, vector<256x256xbf16>
    %cst_50 = arith.constant dense<0.000000e+00> : vector<8x256xf32>
    %140 = tpu.matmul %138, %139, %cst_50 {dimension_numbers = #tpu.dot_dimension_numbers<[1], [0], [0], [1], [0, 0, 1, 1], [], []>} : vector<8x256xbf16>, vector<256x256xbf16>, vector<8x256xf32> -> vector<8x256xf32>
    %c0_51 = arith.constant 0 : index
    %c0_52 = arith.constant 0 : index
    %141 = vector.load %arg12[%c0_51, %c0_52] : memref<1x256xf32, #tpu.memory_space<vmem>>, vector<1x256xf32>
    %142 = vector.broadcast %141 : vector<1x256xf32> to vector<8x256xf32>
    %143 = arith.addf %140, %142 : vector<8x256xf32>
    %c0_53 = arith.constant 0 : index
    %c0_54 = arith.constant 0 : index
    %144 = vector.load %arg13[%c0_53, %c0_54] : memref<1x1xf32, #tpu.memory_space<vmem>>, vector<1x1xf32>
    %cst_55 = arith.constant 0.000000e+00 : f32
    %145 = vector.broadcast %cst_55 : f32 to vector<8x256xf32>
    %146 = arith.cmpf oge, %143, %145 : vector<8x256xf32>
    %147 = vector.broadcast %144 : vector<1x1xf32> to vector<8x256xf32>
    %148 = arith.mulf %147, %143 : vector<8x256xf32>
    %149 = arith.select %146, %143, %148 : vector<8x256xi1>, vector<8x256xf32>
    %150 = arith.truncf %149 : vector<8x256xf32> to vector<8x256xbf16>
    %c0_56 = arith.constant 0 : index
    %c0_57 = arith.constant 0 : index
    %151 = vector.load %arg14[%c0_56, %c0_57] : memref<256x128xbf16, #tpu.memory_space<vmem>>, vector<256x128xbf16>
    %cst_58 = arith.constant dense<0.000000e+00> : vector<8x128xf32>
    %152 = tpu.matmul %150, %151, %cst_58 {dimension_numbers = #tpu.dot_dimension_numbers<[1], [0], [0], [1], [0, 0, 1, 1], [], []>} : vector<8x256xbf16>, vector<256x128xbf16>, vector<8x128xf32> -> vector<8x128xf32>
    %c0_59 = arith.constant 0 : index
    %c0_60 = arith.constant 0 : index
    %153 = vector.load %arg15[%c0_59, %c0_60] : memref<1x128xf32, #tpu.memory_space<vmem>>, vector<1x128xf32>
    %154 = vector.broadcast %153 : vector<1x128xf32> to vector<8x128xf32>
    %155 = arith.addf %152, %154 : vector<8x128xf32>
    %156 = arith.mulf %155, %155 : vector<8x128xf32>
    %cst_61 = arith.constant dense<0.000000e+00> : vector<8xf32>
    %157 = vector.multi_reduction <add>, %156, %cst_61 [1] : vector<8x128xf32> to vector<8xf32>
    %158 = vector.shape_cast %157 : vector<8xf32> to vector<8x1xf32>
    %cst_62 = arith.constant 1.000000e-24 : f32
    %159 = vector.broadcast %cst_62 : f32 to vector<8x1xf32>
    %160 = arith.maximumf %158, %159 : vector<8x1xf32>
    %161 = math.rsqrt %160 : vector<8x1xf32>
    %162 = vector.broadcast %161 : vector<8x1xf32> to vector<8x128xf32>
    %163 = arith.mulf %155, %162 : vector<8x128xf32>
    %c0_63 = arith.constant 0 : index
    %c0_64 = arith.constant 0 : index
    %164 = vector.load %arg16[%c0_63, %c0_64] : memref<8x128xf32, #tpu.memory_space<vmem>>, vector<8x128xf32>
    tpu.vector_store %arg16[%c0_63, %c0_64], %163 {strides = array<i32>} : memref<8x128xf32, #tpu.memory_space<vmem>>, vector<8x128xf32>,
    return
  }
  func.func @transform_0(%arg0: i32) -> (i32, i32, i32, i32) {
    %c0_i32 = arith.constant 0 : i32
    %c0_i32_0 = arith.constant 0 : i32
    %c0_i32_1 = arith.constant 0 : i32
    %c0_i32_2 = arith.constant 0 : i32
    return %arg0, %c0_i32, %c0_i32_0, %c0_i32_1 : i32, i32, i32, i32
  }
  func.func @transform_1(%arg0: i32) -> (i32, i32) {
    %c0_i32 = arith.constant 0 : i32
    %c0_i32_0 = arith.constant 0 : i32
    %c0_i32_1 = arith.constant 0 : i32
    return %c0_i32, %c0_i32_0 : i32, i32
  }
  func.func @transform_2(%arg0: i32) -> (i32, i32) {
    %c0_i32 = arith.constant 0 : i32
    %c0_i32_0 = arith.constant 0 : i32
    %c0_i32_1 = arith.constant 0 : i32
    return %c0_i32, %c0_i32_0 : i32, i32
  }
  func.func @transform_3(%arg0: i32) -> (i32, i32) {
    %c0_i32 = arith.constant 0 : i32
    %c0_i32_0 = arith.constant 0 : i32
    %c0_i32_1 = arith.constant 0 : i32
    return %c0_i32, %c0_i32_0 : i32, i32
  }
  func.func @transform_4(%arg0: i32) -> (i32, i32) {
    %c0_i32 = arith.constant 0 : i32
    %c0_i32_0 = arith.constant 0 : i32
    %c0_i32_1 = arith.constant 0 : i32
    return %c0_i32, %c0_i32_0 : i32, i32
  }
  func.func @transform_5(%arg0: i32) -> (i32, i32) {
    %c0_i32 = arith.constant 0 : i32
    %c0_i32_0 = arith.constant 0 : i32
    %c0_i32_1 = arith.constant 0 : i32
    return %c0_i32, %c0_i32_0 : i32, i32
  }
  func.func @transform_6(%arg0: i32) -> (i32, i32) {
    %c0_i32 = arith.constant 0 : i32
    %c0_i32_0 = arith.constant 0 : i32
    %c0_i32_1 = arith.constant 0 : i32
    return %c0_i32, %c0_i32_0 : i32, i32
  }
  func.func @transform_7(%arg0: i32) -> (i32, i32, i32) {
    %c0_i32 = arith.constant 0 : i32
    %c0_i32_0 = arith.constant 0 : i32
    %c0_i32_1 = arith.constant 0 : i32
    %c0_i32_2 = arith.constant 0 : i32
    return %c0_i32, %c0_i32_0, %c0_i32_1 : i32, i32, i32
  }
  func.func @transform_8(%arg0: i32) -> (i32, i32) {
    %c0_i32 = arith.constant 0 : i32
    %c0_i32_0 = arith.constant 0 : i32
    %c0_i32_1 = arith.constant 0 : i32
    return %c0_i32, %c0_i32_0 : i32, i32
  }
  func.func @transform_9(%arg0: i32) -> (i32, i32) {
    %c0_i32 = arith.constant 0 : i32
    %c0_i32_0 = arith.constant 0 : i32
    %c0_i32_1 = arith.constant 0 : i32
    return %c0_i32, %c0_i32_0 : i32, i32
  }
  func.func @transform_10(%arg0: i32) -> (i32, i32) {
    %c0_i32 = arith.constant 0 : i32
    %c0_i32_0 = arith.constant 0 : i32
    %c0_i32_1 = arith.constant 0 : i32
    return %c0_i32, %c0_i32_0 : i32, i32
  }
  func.func @transform_11(%arg0: i32) -> (i32, i32) {
    %c0_i32 = arith.constant 0 : i32
    %c0_i32_0 = arith.constant 0 : i32
    %c0_i32_1 = arith.constant 0 : i32
    return %c0_i32, %c0_i32_0 : i32, i32
  }
  func.func @transform_12(%arg0: i32) -> (i32, i32) {
    %c0_i32 = arith.constant 0 : i32
    %c0_i32_0 = arith.constant 0 : i32
    %c0_i32_1 = arith.constant 0 : i32
    return %c0_i32, %c0_i32_0 : i32, i32
  }
  func.func @transform_13(%arg0: i32) -> (i32, i32) {
    %c0_i32 = arith.constant 0 : i32
    %c0_i32_0 = arith.constant 0 : i32
    %c0_i32_1 = arith.constant 0 : i32
    return %c0_i32, %c0_i32_0 : i32, i32
  }
  func.func @transform_14(%arg0: i32) -> (i32, i32) {
    %c0_i32 = arith.constant 0 : i32
    %c0_i32_0 = arith.constant 0 : i32
    %c0_i32_1 = arith.constant 0 : i32
    return %c0_i32, %c0_i32_0 : i32, i32
  }
  func.func @transform_15(%arg0: i32) -> (i32, i32) {
    %c0_i32 = arith.constant 0 : i32
    %c0_i32_0 = arith.constant 0 : i32
    return %arg0, %c0_i32 : i32, i32
  }
}

</mosaic_0001>

<bundles_post_ra>
// kernel: embedding_net_l2_forward.1
= control target key start
LH: loop header
LB: loop body
LE: loop exit
PB: predicated region body
PF: predicated region fallthrough
CT: control target
= control target key end

     0   :  { %vm457_vm0 = vcmask 97280   ;;  %vm482_vm1 = vcmask 1045504   ;;  %s11616_s30 = smov 64   ;;  %s16950_s1 = inlined_call_operand.vmem [shape: bf16[140,768], index: 1, kind: input, shape index: {}]   ;;  %s16951_s0 = inlined_call_operand.vmem [shape: f32[8,2,16,140], index: 0, kind: input, shape index: {}]   ;;  %s16952_s3 = inlined_call_operand.<no memory space> [shape: f32[1,1], index: 3, kind: input, shape index: {}]   ;;  %s16953_s6 = inlined_call_operand.<no memory space> [shape: f32[1,1], index: 6, kind: input, shape index: {}]   ;;  %s16954_s4 = inlined_call_operand.vmem [shape: bf16[1920,512], index: 4, kind: input, shape index: {}]   ;;  %s16955_s2 = inlined_call_operand.vmem [shape: f32[1,384], index: 2, kind: input, shape index: {}]   ;;  %s16956_s9 = inlined_call_operand.<no memory space> [shape: f32[1,1], index: 9, kind: input, shape index: {}]   ;;  %s16957_s7 = inlined_call_operand.vmem [shape: bf16[4,448,256], index: 7, kind: input, shape index: {}]   ;;  %s16958_s5 = inlined_call_operand.vmem [shape: f32[1,448], index: 5, kind: input, shape index: {}]   ;;  %s16959_s10 = inlined_call_operand.vmem [shape: bf16[256,256], index: 10, kind: input, shape index: {}]   ;;  %s16960_s12 = inlined_call_operand.<no memory space> [shape: f32[1,1], index: 12, kind: input, shape index: {}]   ;;  %s16961_s13 = inlined_call_operand.vmem [shape: bf16[256,128], index: 13, kind: input, shape index: {}]   ;;  %s16962_s8 = inlined_call_operand.vmem [shape: f32[1,256], index: 8, kind: input, shape index: {}]   ;;  %s16963_s11 = inlined_call_operand.vmem [shape: f32[1,256], index: 11, kind: input, shape index: {}]   ;;  %s16964_s14 = inlined_call_operand.vmem [shape: f32[1,128], index: 14, kind: input, shape index: {}]   ;;  %s16965_s15 = inlined_call_operand.vmem [shape: f32[8,128], index: 15, kind: output, shape index: {}]  }
   0x1   :  { %v11700_v0 = vld [vmem:[%s16950_s1 + $0x4] ss:$24 sps:$4 sm:$0xff]   ;;  %v11711_v2 = vld [vmem:[%s16950_s1] ss:$24 sps:$4 sm:$0xff]   ;;  %v11722_v4 = vld [vmem:[%s16950_s1 + $0x34] ss:$24 sps:$4 sm:$0xff]  }
   0x2   :  { %v11705_v1 = vld [vmem:[%s16950_s1 + $0xc] ss:$24 sps:$4 sm:$0xff]   ;;  %501 = vmatprep.subr.bf16.mxu0 %v11700_v0  ;;  %v11716_v3 = vld [vmem:[%s16950_s1 + $0x8] ss:$24 sps:$4 sm:$0xff]   ;;  %v11729_v5 = vld [vmem:[%s16950_s1 + $0x3c] ss:$24 sps:$4 sm:$0xff]  }
   0x3   :  { %614 = vmatprep.subr.bf16.mxu1 %v11705_v1  ;;  %502 = vmatpush1.bf16.msra.mxu0 %v11711_v2  ;;  %v11734_v6 = vld [vmem:[%s16950_s1 + $0x30] ss:$24 sps:$4 sm:$0xff]   ;;  %v11746_v8 = vld [vmem:[%s16950_s1 + $0x64] ss:$24 sps:$4 sm:$0xff]   ;;  %v11756_v10 = vld [vmem:[%s16950_s1 + $0x60] ss:$24 sps:$4 sm:$0xff]  }
   0x4   :  { %615 = vmatpush1.bf16.msra.mxu1 %v11716_v3  ;;  %503 = vmatprep.subr.bf16.mxu0 %v11722_v4  ;;  %v11740_v7 = vld [vmem:[%s16950_s1 + $0x38] ss:$24 sps:$4 sm:$0xff]   ;;  %v11751_v9 = vld [vmem:[%s16950_s1 + $0x6c] ss:$24 sps:$4 sm:$0xff]   ;;  %v11761_v11 = vld [vmem:[%s16950_s1 + $0x68] ss:$24 sps:$4 sm:$0xff]  }
   0x5   :  { %616 = vmatprep.subr.bf16.mxu1 %v11729_v5  ;;  %v11768_v12 = vld [vmem:[%s16950_s1 + $0x94] ss:$24 sps:$4 sm:$0xff]   ;;  %v11780_v14 = vld [vmem:[%s16950_s1 + $0x90] ss:$24 sps:$4 sm:$0xff]   ;;  %v11792_v16 = vld [vmem:[%s16950_s1 + $0xc4] ss:$24 sps:$4 sm:$0xff]  }
   0x6   :  { %v11775_v13 = vld [vmem:[%s16950_s1 + $0x9c] ss:$24 sps:$4 sm:$0xff]   ;;  %v11787_v15 = vld [vmem:[%s16950_s1 + $0x98] ss:$24 sps:$4 sm:$0xff]   ;;  %v11799_v17 = vld [vmem:[%s16950_s1 + $0xcc] ss:$24 sps:$4 sm:$0xff]  }
   0x7   :  { %504 = vmatpush1.bf16.msra.mxu0 %v11734_v6  ;;  %v11804_v18 = vld [vmem:[%s16950_s1 + $0xc0] ss:$24 sps:$4 sm:$0xff]   ;;  %v11816_v20 = vld [vmem:[%s16950_s1 + $0xf4] ss:$24 sps:$4 sm:$0xff]   ;;  %v11828_v22 = vld [vmem:[%s16950_s1 + $0xf0] ss:$24 sps:$4 sm:$0xff]  }
   0x8   :  { %617 = vmatpush1.bf16.msra.mxu1 %v11740_v7  ;;  %505 = vmatprep.subr.bf16.mxu0 %v11746_v8  ;;  %v11809_v19 = vld [vmem:[%s16950_s1 + $0xc8] ss:$24 sps:$4 sm:$0xff]   ;;  %v11823_v21 = vld [vmem:[%s16950_s1 + $0xfc] ss:$24 sps:$4 sm:$0xff]   ;;  %v11835_v23 = vld [vmem:[%s16950_s1 + $0xf8] ss:$24 sps:$4 sm:$0xff]  }
   0x9   :  { %618 = vmatprep.subr.bf16.mxu1 %v11751_v9  ;;  %v11840_v24 = vld [vmem:[%s16950_s1 + $0x124] ss:$24 sps:$4 sm:$0xff]   ;;  %v11852_v26 = vld [vmem:[%s16950_s1 + $0x120] ss:$24 sps:$4 sm:$0xff]   ;;  %v60_v28 = vld [vmem:[%s16951_s0 + $0x8] sm:$0xff] }
   0xa   :  { %v11847_v25 = vld [vmem:[%s16950_s1 + $0x12c] ss:$24 sps:$4 sm:$0xff]   ;;  %v11859_v27 = vld [vmem:[%s16950_s1 + $0x128] ss:$24 sps:$4 sm:$0xff]   ;;  %v62_v29 = vld [vmem:[%s16951_s0 + $0x18] sm:$0xff] }
   0xb   :  { %506 = vmatpush1.bf16.msra.mxu0 %v11756_v10  ;;  %v11872_v30 = vld [vmem:[%s16950_s1 + $0x154] ss:$24 sps:$4 sm:$0xff]   ;;  %v11879_v32 = vpack.c.bf16 %v62_v29, %v60_v28  ;;  %v11884_v33 = vld [vmem:[%s16950_s1 + $0x150] ss:$24 sps:$4 sm:$0xff]   ;;  %v59_v39 = vld [vmem:[%s16951_s0] sm:$0xff] }
   0xc   :  { %619 = vmatpush1.bf16.msra.mxu1 %v11761_v11  ;;  %507 = vmatprep.subr.bf16.mxu0 %v11768_v12  ;;  %v11877_v31 = vld [vmem:[%s16950_s1 + $0x15c] ss:$24 sps:$4 sm:$0xff]   ;;  %v11889_v34 = vld [vmem:[%s16950_s1 + $0x158] ss:$24 sps:$4 sm:$0xff]   ;;  %v68_v44 = vld [vmem:[%s16951_s0 + $0x48] sm:$0xff] }
   0xd   :  { %620 = vmatprep.subr.bf16.mxu1 %v11775_v13  ;;  %v11894_v35 = vld [vmem:[%s16950_s1 + $0x184] ss:$24 sps:$4 sm:$0x3f]   ;;  %9180 = vmatprep.mubr.msk.bf16.mxu0 %vm457_vm0, %v11879_v32  ;;  %v10464_v37 = vld [vmem:[%s16950_s1 + $0x180] ss:$24 sps:$4 sm:$0x3f]  }
   0xe   :  { %9189 = vmatprep.mubr.msk.bf16.mxu1 %vm457_vm0, %v11879_v32  ;;  %v11905_v36 = vld [vmem:[%s16950_s1 + $0x18c] ss:$24 sps:$4 sm:$0x3f]   ;;  %v10465_v38 = vld [vmem:[%s16950_s1 + $0x188] ss:$24 sps:$4 sm:$0x3f]  }
   0xf   :  { %508 = vmatpush1.bf16.msra.mxu0 %v11780_v14  ;;  %v61_v40 = vld [vmem:[%s16951_s0 + $0x10] sm:$0xff]  ;;  %v11928_v41 = vsel %vm482_vm1, %v10464_v37, 0  ;;  %v11931_v42 = vsel %vm482_vm1, %v10465_v38, 0  ;;  %v70_v45 = vld [vmem:[%s16951_s0 + $0x58] sm:$0xff]  ;;  %v67_v50 = vld [vmem:[%s16951_s0 + $0x40] sm:$0xff] }
  0x10   :  { %621 = vmatpush1.bf16.msra.mxu1 %v11787_v15  ;;  %509 = vmatprep.subr.bf16.mxu0 %v11792_v16  ;;  %v11936_v43 = vld [vmem:[%s16950_s1 + $0x14] ss:$24 sps:$4 sm:$0xff]   ;;  %v11944_v46 = vpack.c.bf16 %v61_v40, %v59_v39  ;;  %v11951_v47 = vld [vmem:[%s16950_s1 + $0x10] ss:$24 sps:$4 sm:$0xff]   ;;  %v11955_v48 = vpack.c.bf16 %v70_v45, %v68_v44  ;;  %v11960_v49 = vld [vmem:[%s16950_s1 + $0x44] ss:$24 sps:$4 sm:$0xff]  }
  0x11   :  { %622 = vmatprep.subr.bf16.mxu1 %v11799_v17  ;;  %v69_v51 = vld [vmem:[%s16951_s0 + $0x50] sm:$0xff]  ;;  %v11975_v52 = vld [vmem:[%s16950_s1 + $0x40] ss:$24 sps:$4 sm:$0xff]   ;;  %v76_v53 = vld [vmem:[%s16951_s0 + $0x88] sm:$0xff] }
  0x12   :  { %v78_v54 = vld [vmem:[%s16951_s0 + $0x98] sm:$0xff]  ;;  %v11990_v55 = vld [vmem:[%s16950_s1 + $0x74] ss:$24 sps:$4 sm:$0xff]   ;;  %v11994_v56 = vpack.c.bf16 %v69_v51, %v67_v50  ;;  %v12003_v58 = vld [vmem:[%s16950_s1 + $0x70] ss:$24 sps:$4 sm:$0xff]  }
  0x13   :  { %510 = vmatpush1.bf16.msra.mxu0 %v11804_v18  ;;  %v11998_v57 = vpack.c.bf16 %v78_v54, %v76_v53  ;;  %v12010_v59 = vld [vmem:[%s16950_s1 + $0xa4] ss:$24 sps:$4 sm:$0xff]   ;;  %v77_v61 = vld [vmem:[%s16951_s0 + $0x90] sm:$0xff]  ;;  %v12029_v62 = vld [vmem:[%s16950_s1 + $0xa0] ss:$24 sps:$4 sm:$0xff]  }
  0x14   :  { %623 = vmatpush1.bf16.msra.mxu1 %v11809_v19  ;;  %511 = vmatprep.subr.bf16.mxu0 %v11816_v20  ;;  %v75_v60 = vld [vmem:[%s16951_s0 + $0x80] sm:$0xff]  ;;  %v84_v63 = vld [vmem:[%s16951_s0 + $0xc8] sm:$0xff]  ;;  %v94_v28 = vld [vmem:[%s16951_s0 + $0x118] sm:$0xff] }
  0x15   :  { %624 = vmatprep.subr.bf16.mxu1 %v11823_v21  ;;  %v12085_v29 = vld [vmem:[%s16950_s1 + $0x100] ss:$24 sps:$4 sm:$0xff]   ;;  %v12103_v39 = vld [vmem:[%s16950_s1 + $0x130] ss:$24 sps:$4 sm:$0xff]  }
  0x16   :  { %v100_v40 = vld [vmem:[%s16951_s0 + $0x148] sm:$0xff]  ;;  %v102_v44 = vld [vmem:[%s16951_s0 + $0x158] sm:$0xff] }
  0x17   :  { %512 = vmatpush1.bf16.msra.mxu0 %v11828_v22  ;;  %v12135_v45 = vld [vmem:[%s16950_s1 + $0x160] ss:$24 sps:$4 sm:$0xff]   ;;  %v12142_v50 = vld [vmem:[%s16950_s1 + $0x194] ss:$24 sps:$4 sm:$0x3f]  }
  0x18   :  { %625 = vmatpush1.bf16.msra.mxu1 %v11835_v23  ;;  %513 = vmatprep.subr.bf16.mxu0 %v11840_v24  ;;  %v10492_v51 = vld [vmem:[%s16950_s1 + $0x190] ss:$24 sps:$4 sm:$0x3f]  }
  0x19   :  { %626 = vmatprep.subr.bf16.mxu1 %v11847_v25  ;;  %v108_v54 = vld [vmem:[%s16951_s0 + $0x188] sm:$0xff] }
  0x1b   :  { %514 = vmatpush1.bf16.msra.mxu0 %v11852_v26 }
  0x1c   :  { %627 = vmatpush1.bf16.msra.mxu1 %v11859_v27  ;;  %515 = vmatprep.subr.bf16.mxu0 %v11872_v30 }
  0x1d   :  { %628 = vmatprep.subr.bf16.mxu1 %v11877_v31 }
  0x1f   :  { %516 = vmatpush1.bf16.msra.mxu0 %v11884_v33 }
  0x20   :  { %629 = vmatpush1.bf16.msra.mxu1 %v11889_v34  ;;  %9179 = vmatprep.subr.msk.bf16.mxu0 %vm482_vm1, %v11894_v35 }
  0x21   :  { %9188 = vmatprep.subr.msk.bf16.mxu1 %vm482_vm1, %v11905_v36 }
  0x23   :  { %518 = vmatpush1.bf16.msra.mxu0 %v11928_v41 }
  0x24   :  { %631 = vmatpush1.bf16.msra.mxu1 %v11931_v42  ;;  %727 = vmatprep.subr.bf16.mxu0 %v11936_v43 }
  0x25   :  { %880 = vmatprep.subr.bf16.mxu1 %v11700_v0  ;;  %v86_v0 = vld [vmem:[%s16951_s0 + $0xd8] sm:$0xff] }
  0x26   :  { %534 = vmatmul.mubr.bf16.vlgmr.msra.gmra.mrb[0].mxu0 %v11944_v46 }
  0x27   :  { %647 = vmatmul.mubr.bf16.vlgmr.msra.gmra.mrb[0].mxu1 %v11944_v46  ;;  %728 = vmatpush1.bf16.msra.mxu0 %v11951_v47 }
  0x28   :  { %881 = vmatpush1.bf16.msra.mxu1 %v11711_v2  ;;  %9181 = vmatprep.mubr.msk.bf16.mxu0 %vm457_vm0, %v11955_v48  ;;  %v12042_v2 = vld [vmem:[%s16950_s1 + $0xd4] ss:$24 sps:$4 sm:$0xff]  }
  0x29   :  { %9190 = vmatprep.mubr.msk.bf16.mxu1 %vm457_vm0, %v11955_v48  ;;  %729 = vmatprep.subr.bf16.mxu0 %v11960_v49 }
  0x2a   :  { %882 = vmatprep.subr.bf16.mxu1 %v11722_v4  ;;  %v12044_v4 = vpack.c.bf16 %v77_v61, %v75_v60  ;;  %v110_v60 = vld [vmem:[%s16951_s0 + $0x198] sm:$0xff] }
  0x2b   :  { %730 = vmatpush1.bf16.msra.mxu0 %v11975_v52 }
  0x2c   :  { %883 = vmatpush1.bf16.msra.mxu1 %v11734_v6  ;;  %731 = vmatprep.subr.bf16.mxu0 %v11990_v55  ;;  %v12046_v6 = vpack.c.bf16 %v86_v0, %v84_v63  ;;  %v12184_v63 = vpack.c.bf16 %v110_v60, %v108_v54  ;;  %v118_v0 = vld [vmem:[%s16951_s0 + $0x1d8] sm:$0xff] }
  0x2d   :  { %884 = vmatprep.subr.bf16.mxu1 %v11746_v8  ;;  %v12053_v8 = vld [vmem:[%s16950_s1 + $0xd0] ss:$24 sps:$4 sm:$0xff]   ;;  %v74_v54 = vld [vmem:[%s16951_s0 + $0x78] sm:$0xff] }
  0x2e   :  { %544 = vmatmul.mubr.bf16.gmra.mrb[4].mxu0 %v11994_v56 }
  0x2f   :  { %657 = vmatmul.mubr.bf16.gmra.mrb[4].mxu1 %v11994_v56  ;;  %9182 = vmatprep.mubr.msk.bf16.mxu0 %vm457_vm0, %v11998_v57 }
  0x30   :  { %9191 = vmatprep.mubr.msk.bf16.mxu1 %vm457_vm0, %v11998_v57  ;;  %732 = vmatpush1.bf16.msra.mxu0 %v12003_v58 }
  0x31   :  { %885 = vmatpush1.bf16.msra.mxu1 %v11756_v10  ;;  %733 = vmatprep.subr.bf16.mxu0 %v12010_v59  ;;  %v12060_v10 = vld [vmem:[%s16950_s1 + $0x104] ss:$24 sps:$4 sm:$0xff]  }
  0x32   :  { %886 = vmatprep.subr.bf16.mxu1 %v11768_v12  ;;  %v83_v12 = vld [vmem:[%s16951_s0 + $0xc0] sm:$0xff] }
  0x34   :  { %734 = vmatpush1.bf16.msra.mxu0 %v12029_v62 }
  0x35   :  { %887 = vmatpush1.bf16.msra.mxu1 %v11780_v14  ;;  %735 = vmatprep.subr.bf16.mxu0 %v12042_v2  ;;  %v85_v14 = vld [vmem:[%s16951_s0 + $0xd0] sm:$0xff] }
  0x36   :  { %888 = vmatprep.subr.bf16.mxu1 %v11792_v16  ;;  %554 = vmatmul.mubr.bf16.gmra.mrb[8].mxu0 %v12044_v4  ;;  %v92_v16 = vld [vmem:[%s16951_s0 + $0x108] sm:$0xff]  ;;  %v12094_v37 = vpack.c.bf16 %v85_v14, %v83_v12 }
  0x37   :  { %667 = vmatmul.mubr.bf16.gmra.mrb[8].mxu1 %v12044_v4  ;;  %9183 = vmatprep.mubr.msk.bf16.mxu0 %vm457_vm0, %v12046_v6  ;;  %v12096_v38 = vpack.c.bf16 %v94_v28, %v92_v16  ;;  %v115_v16 = vld [vmem:[%s16951_s0 + $0x1c0] sm:$0xff]  ;;  %v117_v28 = vld [vmem:[%s16951_s0 + $0x1d0] sm:$0xff] }
  0x38   :  { %9192 = vmatprep.mubr.msk.bf16.mxu1 %vm457_vm0, %v12046_v6  ;;  %736 = vmatpush1.bf16.msra.mxu0 %v12053_v8 }
  0x39   :  { %889 = vmatpush1.bf16.msra.mxu1 %v11804_v18  ;;  %737 = vmatprep.subr.bf16.mxu0 %v12060_v10  ;;  %v12092_v18 = vld [vmem:[%s16950_s1 + $0x134] ss:$24 sps:$4 sm:$0xff]  }
  0x3a   :  { %890 = vmatprep.subr.bf16.mxu1 %v11816_v20  ;;  %v12110_v20 = vld [vmem:[%s16950_s1 + $0x164] ss:$24 sps:$4 sm:$0xff]  }
  0x3c   :  { %738 = vmatpush1.bf16.msra.mxu0 %v12085_v29 }
  0x3d   :  { %891 = vmatpush1.bf16.msra.mxu1 %v11828_v22  ;;  %739 = vmatprep.subr.bf16.mxu0 %v12092_v18  ;;  %v91_v22 = vld [vmem:[%s16951_s0 + $0x100] sm:$0xff] }
  0x3e   :  { %892 = vmatprep.subr.bf16.mxu1 %v11840_v24  ;;  %564 = vmatmul.mubr.bf16.gmra.mrb[12].mxu0 %v12094_v37  ;;  %v93_v24 = vld [vmem:[%s16951_s0 + $0x110] sm:$0xff] }
  0x3f   :  { %677 = vmatmul.mubr.bf16.gmra.mrb[12].mxu1 %v12094_v37  ;;  %9184 = vmatprep.mubr.msk.bf16.mxu0 %vm457_vm0, %v12096_v38  ;;  %v12147_v53 = vpack.c.bf16 %v93_v24, %v91_v22  ;;  %v64_v22 = vld [vmem:[%s16951_s0 + $0x28] sm:$0xff]  ;;  %v66_v24 = vld [vmem:[%s16951_s0 + $0x38] sm:$0xff] }
  0x40   :  { %9193 = vmatprep.mubr.msk.bf16.mxu1 %vm457_vm0, %v12096_v38  ;;  %740 = vmatpush1.bf16.msra.mxu0 %v12103_v39 }
  0x41   :  { %893 = vmatpush1.bf16.msra.mxu1 %v11852_v26  ;;  %741 = vmatprep.subr.bf16.mxu0 %v12110_v20  ;;  %v12149_v26 = vpack.c.bf16 %v102_v44, %v100_v40  ;;  %v12226_v40 = vpack.c.bf16 %v117_v28, %v115_v16  ;;  %v12228_v44 = vpack.c.bf16 %v66_v24, %v64_v22  ;;  %v10507_v16 = vld [vmem:[%s16954_s4 + $0x44] ss:$16 sps:$4 sm:$0xff]   ;;  %v10510_v28 = vld [vmem:[%s16954_s4 + $0x4c] ss:$16 sps:$4 sm:$0xff]   ;;  %v10505_v22 = vld [vmem:[%s16954_s4 + $0x40] ss:$16 sps:$4 sm:$0xff]  }
  0x42   :  { %894 = vmatprep.subr.bf16.mxu1 %v11872_v30  ;;  %v12158_v30 = vsel %vm482_vm1, %v10492_v51, 0  ;;  %v63_v51 = vld [vmem:[%s16951_s0 + $0x20] sm:$0xff]  ;;  %v10508_v24 = vld [vmem:[%s16954_s4 + $0x48] ss:$16 sps:$4 sm:$0xff]  }
  0x44   :  { %742 = vmatpush1.bf16.msra.mxu0 %v12135_v45 }
  0x45   :  { %895 = vmatpush1.bf16.msra.mxu1 %v11884_v33  ;;  %9197 = vmatprep.subr.msk.bf16.mxu0 %vm482_vm1, %v12142_v50  ;;  %v99_v33 = vld [vmem:[%s16951_s0 + $0x140] sm:$0xff] }
  0x46   :  { %9206 = vmatprep.subr.msk.bf16.mxu1 %vm482_vm1, %v11894_v35  ;;  %574 = vmatmul.mubr.bf16.gmra.mrb[16].mxu0 %v12147_v53  ;;  %v101_v35 = vld [vmem:[%s16951_s0 + $0x150] sm:$0xff] }
  0x47   :  { %687 = vmatmul.mubr.bf16.gmra.mrb[16].mxu1 %v12147_v53  ;;  %9185 = vmatprep.mubr.msk.bf16.mxu0 %vm457_vm0, %v12149_v26  ;;  %v12182_v61 = vpack.c.bf16 %v101_v35, %v99_v33  ;;  %v65_v33 = vld [vmem:[%s16951_s0 + $0x30] sm:$0xff]  ;;  %v72_v35 = vld [vmem:[%s16951_s0 + $0x68] sm:$0xff] }
  0x48   :  { %9194 = vmatprep.mubr.msk.bf16.mxu1 %vm457_vm0, %v12149_v26  ;;  %744 = vmatpush1.bf16.msra.mxu0 %v12158_v30  ;;  %v12250_v60 = vpack.c.bf16 %v74_v54, %v72_v35  ;;  %v10519_v35 = vld [vmem:[%s16954_s4 + $0x84] ss:$16 sps:$4 sm:$0xff]   ;;  %v10522_v54 = vld [vmem:[%s16954_s4 + $0x8c] ss:$16 sps:$4 sm:$0xff]  }
  0x49   :  { %897 = vmatpush1.bf16.msra.mxu1 %v11928_v41  ;;  %993 = vmatprep.subr.bf16.mxu0 %v11705_v1  ;;  %v107_v1 = vld [vmem:[%s16951_s0 + $0x180] sm:$0xff]  ;;  %v109_v41 = vld [vmem:[%s16951_s0 + $0x190] sm:$0xff] }
  0x4a   :  { %1106 = vmatprep.subr.bf16.mxu1 %v11936_v43  ;;  %v116_v43 = vld [vmem:[%s16951_s0 + $0x1c8] sm:$0xff]  ;;  %v12204_v12 = vpack.c.bf16 %v109_v41, %v107_v1  ;;  %v71_v1 = vld [vmem:[%s16951_s0 + $0x60] sm:$0xff]  ;;  %v73_v41 = vld [vmem:[%s16951_s0 + $0x70] sm:$0xff] }
  0x4b   :  { %v12206_v14 = vpack.c.bf16 %v118_v0, %v116_v43  ;;  %v10501_v43 = vld [vmem:[%s16954_s4 + $0x24] ss:$16 sps:$4 sm:$0xff]   ;;  %v10504_v0 = vld [vmem:[%s16954_s4 + $0x2c] ss:$16 sps:$4 sm:$0xff]  }
  0x4e   :  { %584 = vmatmul.mubr.bf16.gmra.mrb[20].mxu0 %v12182_v61 }
  0x4f   :  { %697 = vmatmul.mubr.bf16.gmra.mrb[20].mxu1 %v12182_v61  ;;  %9186 = vmatprep.mubr.msk.bf16.mxu0 %vm457_vm0, %v12184_v63 }
  0x50   :  { %9195 = vmatprep.mubr.msk.bf16.mxu1 %vm457_vm0, %v12184_v63 }
  0x56   :  { %594 = vmatmul.mubr.bf16.gmra.mrb[24].mxu0 %v12204_v12 }
  0x57   :  { %707 = vmatmul.mubr.bf16.gmra.mrb[24].mxu1 %v12204_v12  ;;  %9187 = vmatprep.mubr.msk.bf16.mxu0 %vm457_vm0, %v12206_v14 }
  0x58   :  { %9196 = vmatprep.mubr.msk.bf16.mxu1 %vm457_vm0, %v12206_v14 }
  0x5e   :  { %604 = vmatmul.mubr.bf16.gmra.mrb[28].mxu0 %v12226_v40 }
  0x5f   :  { %717 = vmatmul.mubr.bf16.gmra.mrb[28].mxu1 %v12226_v40  ;;  %9198 = vmatprep.mubr.msk.bf16.mxu0 %vm457_vm0, %v11879_v32  ;;  %v12248_v32 = vpack.c.bf16 %v65_v33, %v63_v51  ;;  %v10511_v51 = vld [vmem:[%s16954_s4 + $0x60] ss:$16 sps:$4 sm:$0xff]   ;;  %v10514_v33 = vld [vmem:[%s16954_s4 + $0x68] ss:$16 sps:$4 sm:$0xff]  }
  0x60   :  { %9207 = vmatprep.mubr.msk.bf16.mxu1 %vm457_vm0, %v12228_v44 }
  0x66   :  { %760 = vmatmul.mubr.bf16.vlgmr.msra.gmra.mrb[32].mxu0 %v11944_v46  ;;  %v82_v46 = vld [vmem:[%s16951_s0 + $0xb8] sm:$0xff] }
  0x67   :  { %913 = vmatmul.mubr.bf16.vlgmr.msra.gmra.mrb[32].mxu1 %v12248_v32  ;;  %994 = vmatpush1.bf16.msra.mxu0 %v11716_v3  ;;  %v80_v3 = vld [vmem:[%s16951_s0 + $0xa8] sm:$0xff] }
  0x68   :  { %1107 = vmatpush1.bf16.msra.mxu1 %v11951_v47  ;;  %9199 = vmatprep.mubr.msk.bf16.mxu0 %vm457_vm0, %v11955_v48  ;;  %v12274_v47 = vpack.c.bf16 %v73_v41, %v71_v1  ;;  %v12278_v48 = vpack.c.bf16 %v82_v46, %v80_v3  ;;  %v10525_v1 = vld [vmem:[%s16954_s4 + $0xa4] ss:$16 sps:$4 sm:$0xff]   ;;  %v10528_v41 = vld [vmem:[%s16954_s4 + $0xac] ss:$16 sps:$4 sm:$0xff]   ;;  %v10523_v3 = vld [vmem:[%s16954_s4 + $0xa0] ss:$16 sps:$4 sm:$0xff]  }
  0x69   :  { %9208 = vmatprep.mubr.msk.bf16.mxu1 %vm457_vm0, %v12250_v60  ;;  %995 = vmatprep.subr.bf16.mxu0 %v11729_v5  ;;  %v79_v5 = vld [vmem:[%s16951_s0 + $0xa0] sm:$0xff]  ;;  %v10526_v46 = vld [vmem:[%s16954_s4 + $0xa8] ss:$16 sps:$4 sm:$0xff]  }
  0x6a   :  { %1108 = vmatprep.subr.bf16.mxu1 %v11960_v49  ;;  %v90_v49 = vld [vmem:[%s16951_s0 + $0xf8] sm:$0xff] }
  0x6b   :  { %996 = vmatpush1.bf16.msra.mxu0 %v11740_v7  ;;  %v81_v7 = vld [vmem:[%s16951_s0 + $0xb0] sm:$0xff] }
  0x6c   :  { %1109 = vmatpush1.bf16.msra.mxu1 %v11975_v52  ;;  %997 = vmatprep.subr.bf16.mxu0 %v11751_v9  ;;  %v88_v9 = vld [vmem:[%s16951_s0 + $0xe8] sm:$0xff]  ;;  %v12304_v52 = vpack.c.bf16 %v81_v7, %v79_v5  ;;  %v10529_v5 = vld [vmem:[%s16954_s4 + $0xc0] ss:$16 sps:$4 sm:$0xff]  }
  0x6d   :  { %1110 = vmatprep.subr.bf16.mxu1 %v11990_v55  ;;  %v12306_v55 = vpack.c.bf16 %v90_v49, %v88_v9  ;;  %v10532_v7 = vld [vmem:[%s16954_s4 + $0xc8] ss:$16 sps:$4 sm:$0xff]   ;;  %v10537_v9 = vld [vmem:[%s16954_s4 + $0xe4] ss:$16 sps:$4 sm:$0xff]   ;;  %v10540_v49 = vld [vmem:[%s16954_s4 + $0xec] ss:$16 sps:$4 sm:$0xff]  }
  0x6e   :  { %770 = vmatmul.mubr.bf16.gmra.mrb[36].mxu0 %v11994_v56  ;;  %v98_v56 = vld [vmem:[%s16951_s0 + $0x138] sm:$0xff] }
  0x6f   :  { %923 = vmatmul.mubr.bf16.gmra.mrb[36].mxu1 %v12274_v47  ;;  %9200 = vmatprep.mubr.msk.bf16.mxu0 %vm457_vm0, %v11998_v57 }
  0x70   :  { %9209 = vmatprep.mubr.msk.bf16.mxu1 %vm457_vm0, %v12278_v48  ;;  %998 = vmatpush1.bf16.msra.mxu0 %v11761_v11  ;;  %v87_v11 = vld [vmem:[%s16951_s0 + $0xe0] sm:$0xff] }
  0x71   :  { %1111 = vmatpush1.bf16.msra.mxu1 %v12003_v58  ;;  %999 = vmatprep.subr.bf16.mxu0 %v11775_v13  ;;  %v89_v13 = vld [vmem:[%s16951_s0 + $0xf0] sm:$0xff] }
  0x72   :  { %1112 = vmatprep.subr.bf16.mxu1 %v12010_v59  ;;  %v12337_v57 = vpack.c.bf16 %v89_v13, %v87_v11  ;;  %v106_v59 = vld [vmem:[%s16951_s0 + $0x178] sm:$0xff]  ;;  %v10543_v11 = vld [vmem:[%s16954_s4 + $0x104] ss:$16 sps:$4 sm:$0xff]  }
  0x73   :  { %v10546_v13 = vld [vmem:[%s16954_s4 + $0x10c] ss:$16 sps:$4 sm:$0xff]  }
  0x74   :  { %1000 = vmatpush1.bf16.msra.mxu0 %v11787_v15  ;;  %v20_v15 = vstv %s16952_s3 }
  0x75   :  { %1113 = vmatpush1.bf16.msra.mxu1 %v12029_v62  ;;  %1001 = vmatprep.subr.bf16.mxu0 %v11799_v17  ;;  %v96_v17 = vld [vmem:[%s16951_s0 + $0x128] sm:$0xff]  ;;  %21 = vst [vmem:[#allocation2] sm:$0x1] %v20_v15  ;;  %v10541_v15 = vld [vmem:[%s16954_s4 + $0x100] ss:$16 sps:$4 sm:$0xff]  }
  0x76   :  { %1114 = vmatprep.subr.bf16.mxu1 %v12042_v2  ;;  %780 = vmatmul.mubr.bf16.gmra.mrb[40].mxu0 %v12044_v4  ;;  %v12339_v58 = vpack.c.bf16 %v98_v56, %v96_v17  ;;  %v16966_v4 = vmov 0   ;;  %v10544_v17 = vld [vmem:[%s16954_s4 + $0x108] ss:$16 sps:$4 sm:$0xff]   ;;  %v10549_v56 = vld [vmem:[%s16954_s4 + $0x124] ss:$16 sps:$4 sm:$0xff]  }
  0x77   :  { %933 = vmatmul.mubr.bf16.gmra.mrb[40].mxu1 %v12304_v52  ;;  %9201 = vmatprep.mubr.msk.bf16.mxu0 %vm457_vm0, %v12046_v6 }
  0x78   :  { %9210 = vmatprep.mubr.msk.bf16.mxu1 %vm457_vm0, %v12306_v55  ;;  %1002 = vmatpush1.bf16.msra.mxu0 %v11809_v19  ;;  %v95_v19 = vld [vmem:[%s16951_s0 + $0x120] sm:$0xff] }
  0x79   :  { %1115 = vmatpush1.bf16.msra.mxu1 %v12053_v8  ;;  %1003 = vmatprep.subr.bf16.mxu0 %v11823_v21  ;;  %v97_v21 = vld [vmem:[%s16951_s0 + $0x130] sm:$0xff]  ;;  %v114_v8 = vld [vmem:[%s16951_s0 + $0x1b8] sm:$0xff] }
  0x7a   :  { %1116 = vmatprep.subr.bf16.mxu1 %v12060_v10  ;;  %v848_v2 = vpack.c.bf16 %v97_v21, %v95_v19  ;;  %10410 = vset.pattern.permute.xlu0 %v16966_v4  ;;  %v10550_v19 = vld [vmem:[%s16954_s4 + $0x128] ss:$16 sps:$4 sm:$0xff]   ;;  %v10555_v21 = vld [vmem:[%s16954_s4 + $0x144] ss:$16 sps:$4 sm:$0xff]  }
  0x7b   :  { %10411 = vset.pattern.permute.xlu1 %v16966_v4 }
  0x7c   :  { %1004 = vmatpush1.bf16.msra.mxu0 %v11835_v23  ;;  %v22_v23 = vstv %s16953_s6  ;;  %v9233_v62 = vld [vmem:[#allocation2] ss:$0 sm:$0xff] }
  0x7d   :  { %1117 = vmatpush1.bf16.msra.mxu1 %v12085_v29  ;;  %1005 = vmatprep.subr.bf16.mxu0 %v11847_v25  ;;  %v104_v25 = vld [vmem:[%s16951_s0 + $0x168] sm:$0xff]  ;;  %23 = vst [vmem:[#allocation3] sm:$0x1] %v22_v23 }
  0x7e   :  { %1118 = vmatprep.subr.bf16.mxu1 %v12092_v18  ;;  %790 = vmatmul.mubr.bf16.gmra.mrb[44].mxu0 %v12094_v37  ;;  %v851_v6 = vpack.c.bf16 %v106_v59, %v104_v25  ;;  %v111_v18 = vld [vmem:[%s16951_s0 + $0x1a0] sm:$0xff]  ;;  %v120_v37 = vld [vmem:[%s16951_s0 + $0x1e8] sm:$0xff] }
  0x7f   :  { %943 = vmatmul.mubr.bf16.gmra.mrb[44].mxu1 %v12337_v57  ;;  %9202 = vmatprep.mubr.msk.bf16.mxu0 %vm457_vm0, %v12096_v38  ;;  %v122_v38 = vld [vmem:[%s16951_s0 + $0x1f8] sm:$0xff]  ;;  %v10553_v25 = vld [vmem:[%s16954_s4 + $0x140] ss:$16 sps:$4 sm:$0xff]  }
  0x80   :  { %9211 = vmatprep.mubr.msk.bf16.mxu1 %vm457_vm0, %v12339_v58  ;;  %1006 = vmatpush1.bf16.msra.mxu0 %v11859_v27  ;;  %v103_v27 = vld [vmem:[%s16951_s0 + $0x160] sm:$0xff]  ;;  %v10558_v23 = vld [vmem:[%s16954_s4 + $0x14c] ss:$16 sps:$4 sm:$0xff]   ;;  %v10556_v59 = vld [vmem:[%s16954_s4 + $0x148] ss:$16 sps:$4 sm:$0xff]  }
  0x81   :  { %1119 = vmatpush1.bf16.msra.mxu1 %v12103_v39  ;;  %1007 = vmatprep.subr.bf16.mxu0 %v11877_v31  ;;  %v105_v31 = vld [vmem:[%s16951_s0 + $0x170] sm:$0xff] }
  0x82   :  { %1120 = vmatprep.subr.bf16.mxu1 %v12110_v20  ;;  %1483 = vperm.xlu0 %10410, %v9233_v62   ;;  %v850_v10 = vpack.c.bf16 %v105_v31, %v103_v27  ;;  %v855_v20 = vpack.c.bf16 %v122_v38, %v120_v37  ;;  %v10561_v62 = vld [vmem:[%s16954_s4 + $0x164] ss:$16 sps:$4 sm:$0xff]   ;;  %v10562_v27 = vld [vmem:[%s16954_s4 + $0x168] ss:$16 sps:$4 sm:$0xff]   ;;  %v10565_v38 = vld [vmem:[%s16954_s4 + $0x180] ss:$16 sps:$4 sm:$0xff]  }
  0x84   :  { %1008 = vmatpush1.bf16.msra.mxu0 %v11889_v34  ;;  %v9714_v34 = vld [vmem:[#allocation3] ss:$0 sm:$0xff] }
  0x85   :  { %1121 = vmatpush1.bf16.msra.mxu1 %v12135_v45  ;;  %9215 = vmatprep.subr.msk.bf16.mxu0 %vm482_vm1, %v11905_v36  ;;  %v112_v36 = vld [vmem:[%s16951_s0 + $0x1a8] sm:$0xff]  ;;  %v119_v45 = vld [vmem:[%s16951_s0 + $0x1e0] sm:$0xff] }
  0x86   :  { %9224 = vmatprep.subr.msk.bf16.mxu1 %vm482_vm1, %v12142_v50  ;;  %800 = vmatmul.mubr.bf16.gmra.mrb[48].mxu0 %v12147_v53  ;;  %v853_v29 = vpack.c.bf16 %v114_v8, %v112_v36  ;;  %v121_v50 = vld [vmem:[%s16951_s0 + $0x1f0] sm:$0xff] }
  0x87   :  { %953 = vmatmul.mubr.bf16.gmra.mrb[48].mxu1 %v848_v2  ;;  %9203 = vmatprep.mubr.msk.bf16.mxu0 %vm457_vm0, %v12149_v26  ;;  %v12422_v53 = vpack.c.bf16 %v121_v50, %v119_v45  ;;  %v10495_v26 = vld [vmem:[%s16954_s4 + $0x4] ss:$16 sps:$4 sm:$0xff]   ;;  %v10568_v45 = vld [vmem:[%s16954_s4 + $0x188] ss:$16 sps:$4 sm:$0xff]   ;;  %v10570_v50 = vld [vmem:[%s16954_s4 + $0x18c] ss:$16 sps:$4 sm:$0xff]  }
  0x88   :  { %9212 = vmatprep.mubr.msk.bf16.mxu1 %vm457_vm0, %v851_v6  ;;  %1010 = vmatpush1.bf16.msra.mxu0 %v11931_v42  ;;  %v113_v42 = vld [vmem:[%s16951_s0 + $0x1b0] sm:$0xff] }
  0x89   :  { %1123 = vmatpush1.bf16.msra.mxu1 %v12158_v30  ;;  %6531 = vperm.xlu0 %10410, %v9714_v34   ;;  %v852_v39 = vpack.c.bf16 %v113_v42, %v111_v18  ;;  %v10493_v30 = vld [vmem:[%s16954_s4] ss:$16 sps:$4 sm:$0xff]  }
  0x8a   :  { %4957 = vmatprep.subr.bf16.mxu0 %v10495_v26  ;;  %v10576_v26 = vld [vmem:[%s16954_s4 + $0x1ac] ss:$16 sps:$4 sm:$0xff]  }
  0x8e   :  { %810 = vmatmul.mubr.bf16.gmra.mrb[52].mxu0 %v12182_v61  ;;  %v10496_v61 = vld [vmem:[%s16954_s4 + $0x8] ss:$16 sps:$4 sm:$0xff]  }
  0x8f   :  { %963 = vmatmul.mubr.bf16.gmra.mrb[52].mxu1 %v850_v10  ;;  %9204 = vmatprep.mubr.msk.bf16.mxu0 %vm457_vm0, %v12184_v63  ;;  %v10498_v63 = vld [vmem:[%s16954_s4 + $0xc] ss:$16 sps:$4 sm:$0xff]  }
  0x90   :  { %9213 = vmatprep.mubr.msk.bf16.mxu1 %vm457_vm0, %v853_v29  ;;  %5541 = vmatprep.subr.bf16.mxu1 %v10498_v63 }
  0x96   :  { %820 = vmatmul.mubr.bf16.gmra.mrb[56].mxu0 %v12204_v12  ;;  %v10499_v12 = vld [vmem:[%s16954_s4 + $0x20] ss:$16 sps:$4 sm:$0xff]  }
  0x97   :  { %973 = vmatmul.mubr.bf16.gmra.mrb[56].mxu1 %v852_v39  ;;  %9205 = vmatprep.mubr.msk.bf16.mxu0 %vm457_vm0, %v12206_v14  ;;  %v10502_v14 = vld [vmem:[%s16954_s4 + $0x28] ss:$16 sps:$4 sm:$0xff]  }
  0x98   :  { %9214 = vmatprep.mubr.msk.bf16.mxu1 %vm457_vm0, %v855_v20 }
  0x9e   :  { %830 = vmatmul.mubr.bf16.gmra.mrb[60].mxu0 %v12226_v40  ;;  %v10513_v40 = vld [vmem:[%s16954_s4 + $0x64] ss:$16 sps:$4 sm:$0xff]  }
  0x9f   :  { %983 = vmatmul.mubr.bf16.gmra.mrb[60].mxu1 %v12422_v53  ;;  %9216 = vmatprep.mubr.msk.bf16.mxu0 %vm457_vm0, %v12228_v44 }
  0xa0   :  { %9225 = vmatprep.mubr.msk.bf16.mxu1 %vm457_vm0, %v12228_v44  ;;  %v10516_v44 = vld [vmem:[%s16954_s4 + $0x6c] ss:$16 sps:$4 sm:$0xff]  }
  0xa6   :  { %1026 = vmatmul.mubr.bf16.vlgmr.msra.gmra.mrb[64].mxu0 %v12248_v32 }
  0xa7   :  { %1139 = vmatmul.mubr.bf16.vlgmr.msra.gmra.mrb[64].mxu1 %v12248_v32  ;;  %9217 = vmatprep.mubr.msk.bf16.mxu0 %vm457_vm0, %v12250_v60  ;;  %v10517_v32 = vld [vmem:[%s16954_s4 + $0x80] ss:$16 sps:$4 sm:$0xff]  }
  0xa8   :  { %9226 = vmatprep.mubr.msk.bf16.mxu1 %vm457_vm0, %v12250_v60  ;;  %4958 = vmatpush1.bf16.msra.mxu0 %v10493_v30  ;;  %v10520_v60 = vld [vmem:[%s16954_s4 + $0x88] ss:$16 sps:$4 sm:$0xff]   ;;  %v10571_v30 = vld [vmem:[%s16954_s4 + $0x1a0] ss:$16 sps:$4 sm:$0xff]  }
  0xa9   :  { %5542 = vmatpush1.bf16.msra.mxu1 %v10496_v61  ;;  %4959 = vmatprep.subr.bf16.mxu0 %v10501_v43  ;;  %v10574_v61 = vld [vmem:[%s16954_s4 + $0x1a8] ss:$16 sps:$4 sm:$0xff]  }
  0xaa   :  { %5543 = vmatprep.subr.bf16.mxu1 %v10504_v0 }
  0xac   :  { %4960 = vmatpush1.bf16.msra.mxu0 %v10499_v12 }
  0xad   :  { %5544 = vmatpush1.bf16.msra.mxu1 %v10502_v14  ;;  %4961 = vmatprep.subr.bf16.mxu0 %v10507_v16 }
  0xae   :  { %1036 = vmatmul.mubr.bf16.gmra.mrb[68].mxu0 %v12274_v47  ;;  %5545 = vmatprep.subr.bf16.mxu1 %v10510_v28 }
  0xaf   :  { %1149 = vmatmul.mubr.bf16.gmra.mrb[68].mxu1 %v12274_v47  ;;  %9218 = vmatprep.mubr.msk.bf16.mxu0 %vm457_vm0, %v12278_v48  ;;  %v10531_v47 = vld [vmem:[%s16954_s4 + $0xc4] ss:$16 sps:$4 sm:$0xff]  }
  0xb0   :  { %9227 = vmatprep.mubr.msk.bf16.mxu1 %vm457_vm0, %v12278_v48  ;;  %4962 = vmatpush1.bf16.msra.mxu0 %v10505_v22  ;;  %v10534_v48 = vld [vmem:[%s16954_s4 + $0xcc] ss:$16 sps:$4 sm:$0xff]  }
  0xb1   :  { %5546 = vmatpush1.bf16.msra.mxu1 %v10508_v24  ;;  %4963 = vmatprep.subr.bf16.mxu0 %v10513_v40 }
  0xb2   :  { %5547 = vmatprep.subr.bf16.mxu1 %v10516_v44  ;;  %v10579_v44 = vld [vmem:[%s16954_s4 + $0x1c4] ss:$16 sps:$4 sm:$0xff]  }
  0xb4   :  { %4964 = vmatpush1.bf16.msra.mxu0 %v10511_v51  ;;  %v10582_v51 = vld [vmem:[%s16954_s4 + $0x1cc] ss:$16 sps:$4 sm:$0xff]  }
  0xb5   :  { %5548 = vmatpush1.bf16.msra.mxu1 %v10514_v33  ;;  %4965 = vmatprep.subr.bf16.mxu0 %v10519_v35  ;;  %v10577_v33 = vld [vmem:[%s16954_s4 + $0x1c0] ss:$16 sps:$4 sm:$0xff]   ;;  %v10580_v35 = vld [vmem:[%s16954_s4 + $0x1c8] ss:$16 sps:$4 sm:$0xff]  }
  0xb6   :  { %1046 = vmatmul.mubr.bf16.gmra.mrb[72].mxu0 %v12304_v52  ;;  %5549 = vmatprep.subr.bf16.mxu1 %v10522_v54 }
  0xb7   :  { %1159 = vmatmul.mubr.bf16.gmra.mrb[72].mxu1 %v12304_v52  ;;  %9219 = vmatprep.mubr.msk.bf16.mxu0 %vm457_vm0, %v12306_v55  ;;  %v10535_v52 = vld [vmem:[%s16954_s4 + $0xe0] ss:$16 sps:$4 sm:$0xff]  }
  0xb8   :  { %9228 = vmatprep.mubr.msk.bf16.mxu1 %vm457_vm0, %v12306_v55  ;;  %4966 = vmatpush1.bf16.msra.mxu0 %v10517_v32  ;;  %v10538_v55 = vld [vmem:[%s16954_s4 + $0xe8] ss:$16 sps:$4 sm:$0xff]  }
  0xb9   :  { %5550 = vmatpush1.bf16.msra.mxu1 %v10520_v60  ;;  %4967 = vmatprep.subr.bf16.mxu0 %v10525_v1 }
  0xba   :  { %5551 = vmatprep.subr.bf16.mxu1 %v10528_v41 }
  0xbc   :  { %4968 = vmatpush1.bf16.msra.mxu0 %v10523_v3 }
  0xbd   :  { %5552 = vmatpush1.bf16.msra.mxu1 %v10526_v46  ;;  %4969 = vmatprep.subr.bf16.mxu0 %v10531_v47  ;;  %v10585_v47 = vld [vmem:[%s16954_s4 + $0x1e4] ss:$16 sps:$4 sm:$0xff]  }
  0xbe   :  { %1056 = vmatmul.mubr.bf16.gmra.mrb[76].mxu0 %v12337_v57  ;;  %5553 = vmatprep.subr.bf16.mxu1 %v10534_v48  ;;  %v10588_v48 = vld [vmem:[%s16954_s4 + $0x1ec] ss:$16 sps:$4 sm:$0xff]  }
  0xbf   :  { %1169 = vmatmul.mubr.bf16.gmra.mrb[76].mxu1 %v12337_v57  ;;  %9220 = vmatprep.mubr.msk.bf16.mxu0 %vm457_vm0, %v12339_v58  ;;  %v10552_v57 = vld [vmem:[%s16954_s4 + $0x12c] ss:$16 sps:$4 sm:$0xff]  }
  0xc0   :  { %9229 = vmatprep.mubr.msk.bf16.mxu1 %vm457_vm0, %v12339_v58  ;;  %4970 = vmatpush1.bf16.msra.mxu0 %v10529_v5  ;;  %v10547_v58 = vld [vmem:[%s16954_s4 + $0x120] ss:$16 sps:$4 sm:$0xff]  }
  0xc1   :  { %5554 = vmatpush1.bf16.msra.mxu1 %v10532_v7  ;;  %4971 = vmatprep.subr.bf16.mxu0 %v10537_v9  ;;  %v10583_v9 = vld [vmem:[%s16954_s4 + $0x1e0] ss:$16 sps:$4 sm:$0xff]  }
  0xc2   :  { %5555 = vmatprep.subr.bf16.mxu1 %v10540_v49  ;;  %v10586_v49 = vld [vmem:[%s16954_s4 + $0x1e8] ss:$16 sps:$4 sm:$0xff]  }
  0xc4   :  { %4972 = vmatpush1.bf16.msra.mxu0 %v10535_v52 }
  0xc5   :  { %5556 = vmatpush1.bf16.msra.mxu1 %v10538_v55  ;;  %4973 = vmatprep.subr.bf16.mxu0 %v10543_v11 }
  0xc6   :  { %1066 = vmatmul.mubr.bf16.gmra.mrb[80].mxu0 %v848_v2  ;;  %5557 = vmatprep.subr.bf16.mxu1 %v10546_v13 }
  0xc7   :  { %1179 = vmatmul.mubr.bf16.gmra.mrb[80].mxu1 %v848_v2  ;;  %9221 = vmatprep.mubr.msk.bf16.mxu0 %vm457_vm0, %v851_v6  ;;  %v10564_v2 = vld [vmem:[%s16954_s4 + $0x16c] ss:$16 sps:$4 sm:$0xff]  }
  0xc8   :  { %9230 = vmatprep.mubr.msk.bf16.mxu1 %vm457_vm0, %v851_v6  ;;  %4974 = vmatpush1.bf16.msra.mxu0 %v10541_v15  ;;  %v10559_v6 = vld [vmem:[%s16954_s4 + $0x160] ss:$16 sps:$4 sm:$0xff]  }
  0xc9   :  { %5558 = vmatpush1.bf16.msra.mxu1 %v10544_v17  ;;  %4975 = vmatprep.subr.bf16.mxu0 %v10549_v56 }
  0xca   :  { %5559 = vmatprep.subr.bf16.mxu1 %v10552_v57 }
  0xcc   :  { %4976 = vmatpush1.bf16.msra.mxu0 %v10547_v58 }
  0xcd   :  { %5560 = vmatpush1.bf16.msra.mxu1 %v10550_v19  ;;  %4977 = vmatprep.subr.bf16.mxu0 %v10555_v21 }
  0xce   :  { %1076 = vmatmul.mubr.bf16.gmra.mrb[84].mxu0 %v850_v10  ;;  %5561 = vmatprep.subr.bf16.mxu1 %v10558_v23  ;;  %v10591_v23 = vld [vmem:[%s16954_s4 + $0x204] ss:$16 sps:$4 sm:$0xff]  }
  0xcf   :  { %1189 = vmatmul.mubr.bf16.gmra.mrb[84].mxu1 %v850_v10  ;;  %9222 = vmatprep.mubr.msk.bf16.mxu0 %vm457_vm0, %v853_v29 }
  0xd0   :  { %9231 = vmatprep.mubr.msk.bf16.mxu1 %vm457_vm0, %v853_v29  ;;  %4978 = vmatpush1.bf16.msra.mxu0 %v10553_v25  ;;  %v10594_v25 = vld [vmem:[%s16954_s4 + $0x20c] ss:$16 sps:$4 sm:$0xff]  }
  0xd1   :  { %5562 = vmatpush1.bf16.msra.mxu1 %v10556_v59  ;;  %4979 = vmatprep.subr.bf16.mxu0 %v10561_v62 }
  0xd2   :  { %5563 = vmatprep.subr.bf16.mxu1 %v10564_v2 }
  0xd4   :  { %4980 = vmatpush1.bf16.msra.mxu0 %v10559_v6 }
  0xd5   :  { %5564 = vmatpush1.bf16.msra.mxu1 %v10562_v27 }
  0xd6   :  { %1086 = vmatmul.mubr.bf16.gmra.mrb[88].mxu0 %v852_v39  ;;  %5565 = vmatprep.subr.bf16.mxu1 %v10570_v50 }
  0xd7   :  { %1199 = vmatmul.mubr.bf16.gmra.mrb[88].mxu1 %v852_v39  ;;  %9223 = vmatprep.mubr.msk.bf16.mxu0 %vm457_vm0, %v855_v20  ;;  %v10567_v39 = vld [vmem:[%s16954_s4 + $0x184] ss:$16 sps:$4 sm:$0xff]  }
  0xd8   :  { %9232 = vmatprep.mubr.msk.bf16.mxu1 %vm457_vm0, %v855_v20  ;;  %4981 = vmatprep.subr.bf16.mxu0 %v10567_v39 }
  0xd9   :  { %4982 = vmatpush1.bf16.msra.mxu0 %v10565_v38  ;;  %5566 = vmatpush1.bf16.msra.mxu1 %v10568_v45 }
  0xda   :  { %5567 = vmatprep.subr.bf16.mxu1 %v10576_v26 }
  0xdd   :  { %5568 = vmatpush1.bf16.msra.mxu1 %v10574_v61 }
  0xde   :  { %1096 = vmatmul.mubr.bf16.gmra.mrb[92].mxu0 %v12422_v53  ;;  %5569 = vmatprep.subr.bf16.mxu1 %v10582_v51 }
  0xdf   :  { %1209 = vmatmul.mubr.bf16.gmra.mrb[92].mxu1 %v12422_v53  ;;  %v10573_v53 = vld [vmem:[%s16954_s4 + $0x1a4] ss:$16 sps:$4 sm:$0xff]  }
  0xe0   :  { %4983 = vmatprep.subr.bf16.mxu0 %v10573_v53 }
  0xe1   :  { %4984 = vmatpush1.bf16.msra.mxu0 %v10571_v30  ;;  %5570 = vmatpush1.bf16.msra.mxu1 %v10580_v35 }
  0xe2   :  { %4985 = vmatprep.subr.bf16.mxu0 %v10579_v44  ;;  %5571 = vmatprep.subr.bf16.mxu1 %v10588_v48 }
  0xe5   :  { %4986 = vmatpush1.bf16.msra.mxu0 %v10577_v33  ;;  %5572 = vmatpush1.bf16.msra.mxu1 %v10586_v49 }
  0xe6   :  { %4987 = vmatprep.subr.bf16.mxu0 %v10585_v47  ;;  %5614 = vmatprep.subr.bf16.mxu1 %v10594_v25 }
  0xe9   :  { %4988 = vmatpush1.bf16.msra.mxu0 %v10583_v9 }
  0xea   :  { %5030 = vmatprep.subr.bf16.mxu0 %v10591_v23 }
  0xf9   :  { %v12606_v31 = vpop.f32.mrb[0].mxu0 }
  0xfa   :  { %v12608_v34 = vpop.f32.mrb[0].mxu1  ;;  %v12610_v36 = vpop.f32.mrb[1].mxu0 }
  0xfb   :  { %v12612_v8 = vpop.f32.mrb[1].mxu1  ;;  %v12616_v29 = vpop.f32.mrb[2].mxu0 }
  0xfc   :  { %v12618_v18 = vpop.f32.mrb[2].mxu1  ;;  %v12620_v42 = vpop.f32.mrb[3].mxu0 }
  0xfd   :  { %v12622_v37 = vpop.f32.mrb[3].mxu1 }
 0x101   :  { %v12650_v63 = vpop.f32.mrb[4].mxu0 }
 0x102   :  { %v12652_v43 = vpop.f32.mrb[4].mxu1  ;;  %v12654_v0 = vpop.f32.mrb[5].mxu0 }
 0x103   :  { %v12656_v12 = vpop.f32.mrb[5].mxu1  ;;  %v12660_v16 = vpop.f32.mrb[6].mxu0 }
 0x104   :  { %v12662_v28 = vpop.f32.mrb[6].mxu1  ;;  %v12664_v22 = vpop.f32.mrb[7].mxu0 }
 0x105   :  { %v12666_v24 = vpop.f32.mrb[7].mxu1 }
 0x106   :  { %17066 = vst [vmem:[#allocation6_spill] sm:$0xff] %v12666_v24 }
 0x109   :  { %v12682_v54 = vpop.f32.mrb[8].mxu0 }
 0x10a   :  { %17067 = vst [vmem:[#allocation7_spill] sm:$0xff] %v12682_v54  ;;  %v12684_v32 = vpop.f32.mrb[8].mxu1  ;;  %v12686_v60 = vpop.f32.mrb[9].mxu0 }
 0x10b   :  { %17068 = vst [vmem:[#allocation8_spill] sm:$0xff] %v12686_v60  ;;  %v12688_v1 = vpop.f32.mrb[9].mxu1  ;;  %v12692_v3 = vpop.f32.mrb[10].mxu0 }
 0x10c   :  { %17069 = vst [vmem:[#allocation9_spill] sm:$0xff] %v12688_v1  ;;  %17070 = vst [vmem:[#allocation10_spill] sm:$0xff] %v12692_v3  ;;  %v12694_v46 = vpop.f32.mrb[10].mxu1  ;;  %v12702_v5 = vpop.f32.mrb[11].mxu0 }
 0x10d   :  { %17071 = vst [vmem:[#allocation11_spill] sm:$0xff] %v12702_v5  ;;  %v12704_v7 = vpop.f32.mrb[11].mxu1 }
 0x10e   :  { %17072 = vst [vmem:[#allocation12_spill] sm:$0xff] %v12704_v7 }
 0x111   :  { %v12714_v55 = vpop.f32.mrb[12].mxu0 }
 0x112   :  { %17073 = vst [vmem:[#allocation13_spill] sm:$0xff] %v12714_v55  ;;  %v12716_v11 = vpop.f32.mrb[12].mxu1  ;;  %v12718_v13 = vpop.f32.mrb[13].mxu0 }
 0x113   :  { %17074 = vst [vmem:[#allocation14_spill] sm:$0xff] %v12718_v13  ;;  %v12720_v15 = vpop.f32.mrb[13].mxu1  ;;  %v12724_v56 = vpop.f32.mrb[14].mxu0 }
 0x114   :  { %17075 = vst [vmem:[#allocation15_spill] sm:$0xff] %v12720_v15  ;;  %17076 = vst [vmem:[#allocation16_spill] sm:$0xff] %v12724_v56  ;;  %v12726_v57 = vpop.f32.mrb[14].mxu1  ;;  %v12728_v58 = vpop.f32.mrb[15].mxu0 }
 0x115   :  { %17077 = vst [vmem:[#allocation17_spill] sm:$0xff] %v12726_v57  ;;  %17078 = vst [vmem:[#allocation18_spill] sm:$0xff] %v12728_v58  ;;  %v12730_v19 = vpop.f32.mrb[15].mxu1 }
 0x116   :  { %17079 = vst [vmem:[#allocation19_spill] sm:$0xff] %v12730_v19 }
 0x119   :  { %v12740_v59 = vpop.f32.mrb[16].mxu0 }
 0x11a   :  { %17080 = vst [vmem:[#allocation20_spill] sm:$0xff] %v12740_v59  ;;  %v12742_v62 = vpop.f32.mrb[16].mxu1  ;;  %v12744_v2 = vpop.f32.mrb[17].mxu0 }
 0x11b   :  { %17081 = vst [vmem:[#allocation21_spill] sm:$0xff] %v12744_v2  ;;  %v12746_v6 = vpop.f32.mrb[17].mxu1  ;;  %v12750_v38 = vpop.f32.mrb[18].mxu0 }
 0x11c   :  { %17082 = vst [vmem:[#allocation22_spill] sm:$0xff] %v12746_v6  ;;  %17083 = vst [vmem:[#allocation23_spill] sm:$0xff] %v12750_v38  ;;  %v12752_v39 = vpop.f32.mrb[18].mxu1  ;;  %v12754_v45 = vpop.f32.mrb[19].mxu0 }
 0x11d   :  { %17084 = vst [vmem:[#allocation24_spill] sm:$0xff] %v12754_v45  ;;  %v12756_v50 = vpop.f32.mrb[19].mxu1 }
 0x11e   :  { %17085 = vst [vmem:[#allocation25_spill] sm:$0xff] %v12756_v50 }
 0x121   :  { %v12760_v26 = vpop.f32.mrb[20].mxu0 }
 0x122   :  { %17086 = vst [vmem:[#allocation26_spill] sm:$0xff] %v12760_v26  ;;  %v12762_v30 = vpop.f32.mrb[20].mxu1  ;;  %v12764_v61 = vpop.f32.mrb[21].mxu0 }
 0x123   :  { %17087 = vst [vmem:[#allocation27_spill] sm:$0xff] %v12764_v61  ;;  %v12766_v44 = vpop.f32.mrb[21].mxu1  ;;  %v12770_v33 = vpop.f32.mrb[22].mxu0 }
 0x124   :  { %17088 = vst [vmem:[#allocation28_spill] sm:$0xff] %v12766_v44  ;;  %17089 = vst [vmem:[#allocation29_spill] sm:$0xff] %v12770_v33  ;;  %v12772_v35 = vpop.f32.mrb[22].mxu1  ;;  %v12774_v47 = vpop.f32.mrb[23].mxu0 }
 0x125   :  { %17090 = vst [vmem:[#allocation30_spill] sm:$0xff] %v12774_v47  ;;  %v12776_v48 = vpop.f32.mrb[23].mxu1 }
 0x126   :  { %17091 = vst [vmem:[#allocation31_spill] sm:$0xff] %v12776_v48 }
 0x129   :  { %v12780_v49 = vpop.f32.mrb[24].mxu0 }
 0x12a   :  { %17092 = vst [vmem:[#allocation32_spill] sm:$0xff] %v12780_v49  ;;  %v12782_v23 = vpop.f32.mrb[24].mxu1  ;;  %v12784_v25 = vpop.f32.mrb[25].mxu0 }
 0x12b   :  { %17093 = vst [vmem:[#allocation33_spill] sm:$0xff] %v12782_v23  ;;  %17094 = vst [vmem:[#allocation34_spill] sm:$0xff] %v12784_v25  ;;  %v12786_v4 = vpop.f32.mrb[25].mxu1  ;;  %v12790_v53 = vpop.f32.mrb[26].mxu0 }
 0x12c   :  { %17095 = vst [vmem:[#allocation35_spill] sm:$0xff] %v12786_v4  ;;  %17096 = vst [vmem:[#allocation36_spill] sm:$0xff] %v12790_v53  ;;  %v12792_v27 = vpop.f32.mrb[26].mxu1  ;;  %v12794_v21 = vpop.f32.mrb[27].mxu0 }
 0x12d   :  { %17097 = vst [vmem:[#allocation37_spill] sm:$0xff] %v12792_v27  ;;  %17098 = vst [vmem:[#allocation38_spill] sm:$0xff] %v12794_v21  ;;  %v12796_v17 = vpop.f32.mrb[27].mxu1 }
 0x12e   :  { %17099 = vst [vmem:[#allocation39_spill] sm:$0xff] %v12796_v17 }
 0x131   :  { %v12800_v52 = vpop.f32.mrb[28].mxu0 }
 0x132   :  { %17100 = vst [vmem:[#allocation40_spill] sm:$0xff] %v12800_v52  ;;  %v12802_v41 = vpop.f32.mrb[28].mxu1  ;;  %v12804_v40 = vpop.f32.mrb[29].mxu0 }
 0x133   :  { %17101 = vst [vmem:[#allocation41_spill] sm:$0xff] %v12802_v41  ;;  %17102 = vst [vmem:[#allocation42_spill] sm:$0xff] %v12804_v40  ;;  %v12806_v14 = vpop.f32.mrb[29].mxu1  ;;  %v12810_v20 = vpop.f32.mrb[30].mxu0 }
 0x134   :  { %17103 = vst [vmem:[#allocation43_spill] sm:$0xff] %v12806_v14  ;;  %17104 = vst [vmem:[#allocation44_spill] sm:$0xff] %v12810_v20  ;;  %v12812_v10 = vpop.f32.mrb[30].mxu1  ;;  %v12814_v4 = vpop.f32.mrb[31].mxu0 }
 0x135   :  { %17105 = vst [vmem:[#allocation45_spill] sm:$0xff] %v12814_v4  ;;  %v12816_v49 = vpop.f32.mrb[31].mxu1  ;;  %v1365_v4 = vlaneseq }
 0x136   :  { %17106 = vst [vmem:[#allocation46_spill] sm:$0xff] %v12816_v49 }
 0x139   :  { %v12820_v17 = vpop.f32.mrb[32].mxu0 }
 0x13a   :  { %v12822_v53 = vpop.f32.mrb[32].mxu1  ;;  %v12826_v33 = vpop.f32.mrb[33].mxu0  ;;  %v17146_v48 = vmax.f32 %v12610_v36, %v12820_v17 }
 0x13b   :  { %v12828_v51 = vpop.f32.mrb[33].mxu1  ;;  %v12832_v52 = vpop.f32.mrb[34].mxu0 }
 0x13c   :  { %v12834_v44 = vpop.f32.mrb[34].mxu1  ;;  %v12838_v49 = vpop.f32.mrb[35].mxu0  ;;  %v17149_v36 = vmax.f32 %v12620_v42, %v12832_v52 }
 0x13d   :  { %v12840_v20 = vpop.f32.mrb[35].mxu1 }
 0x141   :  { %v12844_v26 = vpop.f32.mrb[36].mxu0 }
 0x142   :  { %v12846_v50 = vpop.f32.mrb[36].mxu1  ;;  %v12850_v38 = vpop.f32.mrb[37].mxu0 }
 0x143   :  { %v12852_v6 = vpop.f32.mrb[37].mxu1  ;;  %v12856_v59 = vpop.f32.mrb[38].mxu0 }
 0x144   :  { %v12858_v19 = vpop.f32.mrb[38].mxu1  ;;  %v12862_v56 = vpop.f32.mrb[39].mxu0 }
 0x145   :  { %17107 = vst [vmem:[#allocation47_spill] sm:$0xff] %v12862_v56  ;;  %v12864_v15 = vpop.f32.mrb[39].mxu1 }
 0x149   :  { %v12868_v55 = vpop.f32.mrb[40].mxu0 }
 0x14a   :  { %17108 = vst [vmem:[#allocation48_spill] sm:$0xff] %v12868_v55  ;;  %v12870_v7 = vpop.f32.mrb[40].mxu1  ;;  %v12874_v3 = vpop.f32.mrb[41].mxu0 }
 0x14b   :  { %17109 = vst [vmem:[#allocation49_spill] sm:$0xff] %v12870_v7  ;;  %17110 = vst [vmem:[#allocation50_spill] sm:$0xff] %v12874_v3  ;;  %v12876_v1 = vpop.f32.mrb[41].mxu1  ;;  %v12880_v54 = vpop.f32.mrb[42].mxu0 }
 0x14c   :  { %17111 = vst [vmem:[#allocation51_spill] sm:$0xff] %v12880_v54  ;;  %v12882_v24 = vpop.f32.mrb[42].mxu1  ;;  %v12886_v56 = vpop.f32.mrb[43].mxu0 }
 0x14d   :  { %17112 = vst [vmem:[#allocation52_spill] sm:$0xff] %v12882_v24  ;;  %17113 = vst [vmem:[#allocation53_spill] sm:$0xff] %v12886_v56  ;;  %v12888_v7 = vpop.f32.mrb[43].mxu1 }
 0x151   :  { %v12892_v55 = vpop.f32.mrb[44].mxu0 }
 0x152   :  { %17114 = vst [vmem:[#allocation54_spill] sm:$0xff] %v12892_v55  ;;  %v12894_v60 = vpop.f32.mrb[44].mxu1  ;;  %v12898_v3 = vpop.f32.mrb[45].mxu0 }
 0x153   :  { %17115 = vst [vmem:[#allocation55_spill] sm:$0xff] %v12894_v60  ;;  %17116 = vst [vmem:[#allocation56_spill] sm:$0xff] %v12898_v3  ;;  %v12900_v24 = vpop.f32.mrb[45].mxu1  ;;  %v12904_v54 = vpop.f32.mrb[46].mxu0 }
 0x154   :  { %17117 = vst [vmem:[#allocation57_spill] sm:$0xff] %v12904_v54  ;;  %v12906_v5 = vpop.f32.mrb[46].mxu1  ;;  %v12910_v56 = vpop.f32.mrb[47].mxu0 }
 0x155   :  { %17118 = vst [vmem:[#allocation58_spill] sm:$0xff] %v12906_v5  ;;  %17119 = vst [vmem:[#allocation59_spill] sm:$0xff] %v12910_v56  ;;  %v12912_v60 = vpop.f32.mrb[47].mxu1 }
 0x159   :  { %v12916_v55 = vpop.f32.mrb[48].mxu0 }
 0x15a   :  { %17120 = vst [vmem:[#allocation60_spill] sm:$0xff] %v12916_v55  ;;  %v12918_v13 = vpop.f32.mrb[48].mxu1  ;;  %v12922_v3 = vpop.f32.mrb[49].mxu0 }
 0x15b   :  { %17121 = vst [vmem:[#allocation61_spill] sm:$0xff] %v12922_v3  ;;  %v12924_v5 = vpop.f32.mrb[49].mxu1  ;;  %v12928_v54 = vpop.f32.mrb[50].mxu0 }
 0x15c   :  { %17122 = vst [vmem:[#allocation62_spill] sm:$0xff] %v12928_v54  ;;  %v12930_v58 = vpop.f32.mrb[50].mxu1  ;;  %v12934_v56 = vpop.f32.mrb[51].mxu0 }
 0x15d   :  { %17123 = vst [vmem:[#allocation63_spill] sm:$0xff] %v12930_v58  ;;  %17124 = vst [vmem:[#allocation64_spill] sm:$0xff] %v12934_v56  ;;  %v12936_v57 = vpop.f32.mrb[51].mxu1 }
 0x161   :  { %v12940_v55 = vpop.f32.mrb[52].mxu0 }
 0x162   :  { %17125 = vst [vmem:[#allocation65_spill] sm:$0xff] %v12940_v55  ;;  %v12942_v2 = vpop.f32.mrb[52].mxu1  ;;  %v12946_v3 = vpop.f32.mrb[53].mxu0 }
 0x163   :  { %17126 = vst [vmem:[#allocation66_spill] sm:$0xff] %v12942_v2  ;;  %17127 = vst [vmem:[#allocation67_spill] sm:$0xff] %v12946_v3  ;;  %v12948_v58 = vpop.f32.mrb[53].mxu1  ;;  %v12952_v54 = vpop.f32.mrb[54].mxu0 }
 0x164   :  { %17128 = vst [vmem:[#allocation68_spill] sm:$0xff] %v12952_v54  ;;  %v12954_v45 = vpop.f32.mrb[54].mxu1  ;;  %v12958_v56 = vpop.f32.mrb[55].mxu0 }
 0x165   :  { %17129 = vst [vmem:[#allocation69_spill] sm:$0xff] %v12954_v45  ;;  %17130 = vst [vmem:[#allocation70_spill] sm:$0xff] %v12958_v56  ;;  %v12960_v2 = vpop.f32.mrb[55].mxu1 }
 0x169   :  { %v12964_v55 = vpop.f32.mrb[56].mxu0 }
 0x16a   :  { %17131 = vst [vmem:[#allocation71_spill] sm:$0xff] %v12964_v55  ;;  %v12966_v61 = vpop.f32.mrb[56].mxu1  ;;  %v12970_v3 = vpop.f32.mrb[57].mxu0 }
 0x16b   :  { %17132 = vst [vmem:[#allocation72_spill] sm:$0xff] %v12966_v61  ;;  %17133 = vst [vmem:[#allocation73_spill] sm:$0xff] %v12970_v3  ;;  %v12972_v45 = vpop.f32.mrb[57].mxu1  ;;  %v12976_v54 = vpop.f32.mrb[58].mxu0 }
 0x16c   :  { %17134 = vst [vmem:[#allocation74_spill] sm:$0xff] %v12976_v54  ;;  %v12978_v47 = vpop.f32.mrb[58].mxu1  ;;  %v12982_v56 = vpop.f32.mrb[59].mxu0 }
 0x16d   :  { %17135 = vst [vmem:[#allocation75_spill] sm:$0xff] %v12978_v47  ;;  %17136 = vst [vmem:[#allocation76_spill] sm:$0xff] %v12982_v56  ;;  %v12984_v61 = vpop.f32.mrb[59].mxu1 }
 0x16e   :  { %17137 = vst [vmem:[#allocation77_spill] sm:$0xff] %v12984_v61 }
 0x171   :  { %v12988_v55 = vpop.f32.mrb[60].mxu0 }
 0x172   :  { %17138 = vst [vmem:[#allocation78_spill] sm:$0xff] %v12988_v55  ;;  %v12990_v25 = vpop.f32.mrb[60].mxu1  ;;  %v12994_v3 = vpop.f32.mrb[61].mxu0 }
 0x173   :  { %17139 = vst [vmem:[#allocation79_spill] sm:$0xff] %v12990_v25  ;;  %17140 = vst [vmem:[#allocation80_spill] sm:$0xff] %v12994_v3  ;;  %v12996_v47 = vpop.f32.mrb[61].mxu1  ;;  %v13000_v54 = vpop.f32.mrb[62].mxu0 }
 0x174   :  { %17141 = vst [vmem:[#allocation81_spill] sm:$0xff] %v12996_v47  ;;  %17142 = vst [vmem:[#allocation82_spill] sm:$0xff] %v13000_v54  ;;  %v13002_v21 = vpop.f32.mrb[62].mxu1  ;;  %v13006_v56 = vpop.f32.mrb[63].mxu0 }
 0x175   :  { %17143 = vst [vmem:[#allocation83_spill] sm:$0xff] %v13002_v21  ;;  %17144 = vst [vmem:[#allocation84_spill] sm:$0xff] %v13006_v56  ;;  %v13008_v25 = vpop.f32.mrb[63].mxu1  ;;  %v17147_v56 = vmax.f32 %v12606_v31, %v12612_v8  ;;  %v17151_v31 = vmax.f32 %v12618_v18, %v12838_v49  ;;  %v17154_v18 = vmax.f32 %v12654_v0, %v12844_v26 }
 0x176   :  { %17145 = vst [vmem:[#allocation85_spill] sm:$0xff] %v13008_v25  ;;  %v17156_v49 = vmax.f32 %v12652_v43, %v12850_v38  ;;  %v17161_v43 = vld [vmem:[#allocation47_spill] sm:$0xff] }
 0x177   :  { %v17162_v38 = vmax.f32 %v12662_v28, %v17161_v43 }
 0x179   :  { %v1027_v55 = vpop.f32.mrb[64].mxu0 }
 0x17a   :  { %v1140_v40 = vpop.f32.mrb[64].mxu1  ;;  %v1029_v27 = vpop.f32.mrb[65].mxu0 }
 0x17b   :  { %v1268_v47 = vmax.f32 %v12828_v51, %v1140_v40  ;;  %v1142_v9 = vpop.f32.mrb[65].mxu1  ;;  %v1267_v3 = vmax.f32 %v12822_v53, %v1029_v27  ;;  %v1031_v21 = vpop.f32.mrb[66].mxu0  ;;  %v17148_v51 = vmax.f32 %v12608_v34, %v12826_v33  ;;  %v13042_v34 = vshrl.u32 %v1365_v4, 7 }
 0x17c   :  { %v1269_v41 = vmax.f32 %v1027_v55, %v1142_v9  ;;  %v1144_v23 = vpop.f32.mrb[66].mxu1  ;;  %v1033_v61 = vpop.f32.mrb[67].mxu0 }
 0x17d   :  { %v1316_v54 = vmax.f32 %v17146_v48, %v1268_v47  ;;  %v1271_v25 = vmax.f32 %v12840_v20, %v1144_v23  ;;  %v1146_v14 = vpop.f32.mrb[67].mxu1  ;;  %v1315_v40 = vmax.f32 %v17147_v56, %v1267_v3  ;;  %v1270_v55 = vmax.f32 %v12834_v44, %v1033_v61  ;;  %17152 = vst [vmem:[#allocation86_spill] sm:$0xff] %v13042_v34 }
 0x17e   :  { %v13024_v27 = vmax.f32 %v17148_v51, %v1269_v41  ;;  %v1272_v53 = vmax.f32 %v1031_v21, %v1146_v14  ;;  %v17150_v20 = vmax.f32 %v12616_v29, %v12622_v37  ;;  %v13047_v37 = vsub.s32 1, %v13042_v34 }
 0x17f   :  { %v13030_v17 = vmax.f32 %v17149_v36, %v1271_v25  ;;  %v17158_v25 = vmax.f32 %v12664_v22, %v12856_v59 }
 0x180   :  { %v13035_v47 = vmax.f32 %v17150_v20, %v1270_v55  ;;  %v13040_v8 = vmax.f32 %v17151_v31, %v1272_v53  ;;  %17153 = vst [vmem:[#allocation87_spill] sm:$0xff] %v13047_v37  ;;  %v17159_v55 = vld [vmem:[#allocation6_spill] sm:$0xff] }
 0x181   :  { %v1037_v41 = vpop.f32.mrb[68].mxu0 }
 0x182   :  { %v1150_v3 = vpop.f32.mrb[68].mxu1  ;;  %v1039_v56 = vpop.f32.mrb[69].mxu0 }
 0x183   :  { %v1274_v14 = vmax.f32 %v12852_v6, %v1150_v3  ;;  %v1152_v42 = vpop.f32.mrb[69].mxu1  ;;  %v1273_v52 = vmax.f32 %v12846_v50, %v1039_v56  ;;  %v1041_v61 = vpop.f32.mrb[70].mxu0  ;;  %v13056_v6 = vld [vmem:[%s16955_s2] sm:$0x7]  ;;  %v17155_v50 = vmax.f32 %v12650_v63, %v12656_v12  ;;  %v17160_v63 = vmax.f32 %v12660_v16, %v17159_v55 }
 0x184   :  { %v1275_v21 = vmax.f32 %v1037_v41, %v1152_v42  ;;  %v1154_v29 = vpop.f32.mrb[70].mxu1  ;;  %v1043_v33 = vpop.f32.mrb[71].mxu0 }
 0x185   :  { %v1322_v44 = vmax.f32 %v17154_v18, %v1274_v14  ;;  %v1277_v4 = vmax.f32 %v12864_v15, %v1154_v29  ;;  %v1156_v48 = vpop.f32.mrb[71].mxu1  ;;  %v1321_v9 = vmax.f32 %v17155_v50, %v1273_v52  ;;  %v1276_v0 = vmax.f32 %v12858_v19, %v1043_v33  ;;  %v13095_v42 = vpop.permute.xlu0 %1483  ;;  %v17163_v29 = vld [vmem:[#allocation49_spill] sm:$0xff] }
 0x186   :  { %v13064_v23 = vmax.f32 %v17156_v49, %v1275_v21  ;;  %v1278_v26 = vmax.f32 %v1041_v61, %v1156_v48  ;;  %v13068_v15 = vsub.s32 0, %v13042_v34  ;;  %v13087_v19 = vrot.slane %v13056_v6, %v13047_v37  ;;  %v17165_v48 = vld [vmem:[#allocation48_spill] sm:$0xff]  ;;  %v17167_v49 = vld [vmem:[#allocation7_spill] sm:$0xff] }
 0x187   :  { %v13073_v51 = vmax.f32 %v17158_v25, %v1277_v4  ;;  %v13078_v12 = vmax.f32 %v17160_v63, %v1276_v0  ;;  %v17168_v0 = vld [vmem:[#allocation9_spill] sm:$0xff] }
 0x188   :  { %17157 = vst [vmem:[#allocation88_spill] sm:$0xff] %v13068_v15  ;;  %v13083_v53 = vmax.f32 %v17162_v38, %v1278_v26  ;;  %v13091_v22 = vrot.slane %v13056_v6, %v13068_v15  ;;  %v1387_v16 = vadd.f32 %v13087_v19, %v1322_v44  ;;  %v1381_v28 = vadd.f32 %v13087_v19, %v1316_v54  ;;  %v17164_v44 = vld [vmem:[#allocation8_spill] sm:$0xff] }
 0x189   :  { %v1047_v36 = vpop.f32.mrb[72].mxu0  ;;  %v17166_v50 = vmax.f32 %v17164_v44, %v17165_v48  ;;  %v17169_v26 = vmax.f32 %v17167_v49, %v17168_v0  ;;  %v17172_v38 = vld [vmem:[#allocation52_spill] sm:$0xff]  ;;  %v17174_v44 = vld [vmem:[#allocation11_spill] sm:$0xff] }
 0x18a   :  { %v1160_v20 = vpop.f32.mrb[72].mxu1  ;;  %v1049_v59 = vpop.f32.mrb[73].mxu0  ;;  %v1386_v52 = vadd.f32 %v13091_v22, %v1321_v9  ;;  %v1380_v21 = vadd.f32 %v13091_v22, %v1315_v40  ;;  %v1493_v4 = vmul.f32 %v13095_v42, %v1387_v16  ;;  %vm1436_vm2 = vcmp.ge.f32.partialorder %v1387_v16, 0.0  ;;  %v17170_v9 = vld [vmem:[#allocation50_spill] sm:$0xff]  ;;  %v17175_v48 = vld [vmem:[#allocation51_spill] sm:$0xff]  ;;  %v17178_v49 = vld [vmem:[#allocation12_spill] sm:$0xff] }
 0x18b   :  { %v1162_v31 = vpop.f32.mrb[73].mxu1  ;;  %v1051_v41 = vpop.f32.mrb[74].mxu0  ;;  %v1280_v61 = vmax.f32 %v12876_v1, %v1160_v20  ;;  %v1279_v18 = vmax.f32 %v17163_v29, %v1049_v59  ;;  %v1487_v40 = vmul.f32 %v13095_v42, %v1381_v28  ;;  %v17171_v55 = vmax.f32 %v12684_v32, %v17170_v9 }
 0x18c   :  { %v1164_v3 = vpop.f32.mrb[74].mxu1  ;;  %v1053_v14 = vpop.f32.mrb[75].mxu0  ;;  %v1281_v33 = vmax.f32 %v1047_v36, %v1162_v31  ;;  %v1492_v1 = vmul.f32 %v13095_v42, %v1386_v52  ;;  %vm1430_vm3 = vcmp.ge.f32.partialorder %v1381_v28, 0.0  ;;  %vm1435_vm4 = vcmp.ge.f32.partialorder %v1386_v52, 0.0 }
 0x18d   :  { %v1166_v56 = vpop.f32.mrb[75].mxu1  ;;  %v13105_v54 = vmax.f32 %v17166_v50, %v1280_v61  ;;  %v13110_v25 = vmax.f32 %v17169_v26, %v1279_v18  ;;  %v1283_v43 = vmax.f32 %v12888_v7, %v1164_v3  ;;  %v1282_v36 = vmax.f32 %v17172_v38, %v1053_v14 }
 0x18e   :  { %v13117_v63 = vmax.f32 %v17171_v55, %v1281_v33  ;;  %v1486_v31 = vmul.f32 %v13095_v42, %v1380_v21  ;;  %v13122_v18 = vsel %vm1436_vm2, %v1387_v16, %v1493_v4  ;;  %v17176_v50 = vmax.f32 %v17174_v44, %v17175_v48  ;;  %v17177_v33 = vld [vmem:[#allocation10_spill] sm:$0xff]  ;;  %v10589_v4 = vld [vmem:[%s16954_s4 + $0x200] ss:$16 sps:$4 sm:$0xff]  }
 0x18f   :  { %17173 = vst [vmem:[#allocation6_spill] sm:$0xff] %v13122_v18  ;;  %v17179_v7 = vmax.f32 %v17177_v33, %v17178_v49  ;;  %v1284_v14 = vmax.f32 %v1051_v41, %v1166_v56  ;;  %vm1429_vm5 = vcmp.ge.f32.partialorder %v1380_v21, 0.0  ;;  %v13134_v38 = vsel %vm1435_vm4, %v1386_v52, %v1492_v1  ;;  %v10592_v56 = vld [vmem:[%s16954_s4 + $0x208] ss:$16 sps:$4 sm:$0xff]  }
 0x190   :  { %v13127_v32 = vmax.f32 %v17176_v50, %v1283_v43  ;;  %17180 = vst [vmem:[#allocation47_spill] sm:$0xff] %v13134_v38  ;;  %v13136_v16 = vsel %vm1430_vm3, %v1381_v28, %v1487_v40  ;;  %v17182_v43 = vld [vmem:[#allocation53_spill] sm:$0xff]  ;;  %v13151_v52 = vsel %vm1429_vm5, %v1380_v21, %v1486_v31  ;;  %v17186_v31 = vld [vmem:[#allocation55_spill] sm:$0xff]  ;;  %vm1630_vm3 = vcmask 1046528  }
 0x191   :  { %v1057_v20 = vpop.f32.mrb[76].mxu0  ;;  %v13132_v3 = vmax.f32 %v17179_v7, %v1282_v36  ;;  %17181 = vst [vmem:[#allocation49_spill] sm:$0xff] %v13136_v16  ;;  %v17183_v44 = vmax.f32 %v12694_v46, %v17182_v43  ;;  %v2018_v41 = vpack.c.bf16 %v13122_v18, %v13136_v16  ;;  %17185 = vst [vmem:[#allocation48_spill] sm:$0xff] %v13151_v52  ;;  %v10597_v46 = vld [vmem:[%s16954_s4 + $0x224] ss:$16 sps:$4 sm:$0xff]  }
 0x192   :  { %v1170_v59 = vpop.f32.mrb[76].mxu1  ;;  %v1059_v61 = vpop.f32.mrb[77].mxu0  ;;  %v2017_v28 = vpack.c.bf16 %v13134_v38, %v13151_v52  ;;  %v10600_v40 = vld [vmem:[%s16954_s4 + $0x22c] ss:$16 sps:$4 sm:$0xff]   ;;  %v10595_v21 = vld [vmem:[%s16954_s4 + $0x220] ss:$16 sps:$4 sm:$0xff]  }
 0x193   :  { %v1172_v29 = vpop.f32.mrb[77].mxu1  ;;  %v1061_v0 = vpop.f32.mrb[78].mxu0  ;;  %v13144_v48 = vmax.f32 %v17183_v44, %v1284_v14  ;;  %4989 = vmatprep.mubr.bf16.mxu0 %v2018_v41  ;;  %5573 = vmatprep.mubr.bf16.mxu1 %v2018_v41  ;;  %v1286_v1 = vmax.f32 %v12900_v24, %v1170_v59  ;;  %v10598_v36 = vld [vmem:[%s16954_s4 + $0x228] ss:$16 sps:$4 sm:$0xff]   ;;  %v1285_v50 = vmax.f32 %v17186_v31, %v1059_v61  ;;  %v10603_v24 = vld [vmem:[%s16954_s4 + $0x244] ss:$16 sps:$4 sm:$0xff]  }
 0x194   :  { %v1174_v26 = vpop.f32.mrb[78].mxu1  ;;  %v1063_v9 = vpop.f32.mrb[79].mxu0  ;;  %v1287_v33 = vmax.f32 %v1057_v20, %v1172_v29  ;;  %4990 = vmatmul.mubr.bf16.vlgmr.msra.gmra.mrb[96].mxu0 %v2017_v28  ;;  %5574 = vmatmul.mubr.bf16.vlgmr.msra.gmra.mrb[96].mxu1 %v2017_v28  ;;  %v10606_v59 = vld [vmem:[%s16954_s4 + $0x24c] ss:$16 sps:$4 sm:$0xff]   ;;  %v17187_v20 = vld [vmem:[#allocation14_spill] sm:$0xff] }
 0x195   :  { %v1176_v55 = vpop.f32.mrb[79].mxu1  ;;  %17184 = vst [vmem:[#allocation8_spill] sm:$0xff] %v13144_v48  ;;  %v1289_v14 = vmax.f32 %v12912_v60, %v1174_v26  ;;  %5031 = vmatpush1.bf16.msra.mxu0 %v10589_v4  ;;  %5615 = vmatpush1.bf16.msra.mxu1 %v10592_v56  ;;  %v17188_v61 = vld [vmem:[#allocation54_spill] sm:$0xff]  ;;  %v17190_v31 = vld [vmem:[#allocation13_spill] sm:$0xff]  ;;  %v17191_v28 = vld [vmem:[#allocation15_spill] sm:$0xff] }
 0x196   :  { %v17189_v29 = vmax.f32 %v17187_v20, %v17188_v61  ;;  %v17192_v37 = vmax.f32 %v17190_v31, %v17191_v28  ;;  %v17193_v26 = vld [vmem:[#allocation56_spill] sm:$0xff]  ;;  %5032 = vmatprep.subr.bf16.mxu0 %v10597_v46  ;;  %5616 = vmatprep.subr.bf16.mxu1 %v10600_v40  ;;  %v17195_v4 = vld [vmem:[#allocation18_spill] sm:$0xff]  ;;  %v17196_v56 = vld [vmem:[#allocation57_spill] sm:$0xff] }
 0x197   :  { %v17194_v15 = vmax.f32 %v12716_v11, %v17193_v26  ;;  %v17197_v38 = vmax.f32 %v17195_v4, %v17196_v56  ;;  %v10601_v46 = vld [vmem:[%s16954_s4 + $0x240] ss:$16 sps:$4 sm:$0xff]   ;;  %v17209_v56 = vld [vmem:[#allocation20_spill] sm:$0xff] }
 0x198   :  { %v1334_v41 = vmax.f32 %v17189_v29, %v1286_v1  ;;  %v1333_v60 = vmax.f32 %v17192_v37, %v1285_v50  ;;  %v17198_v1 = vld [vmem:[#allocation58_spill] sm:$0xff]  ;;  %v1290_v50 = vmax.f32 %v1061_v0, %v1176_v55 }
 0x199   :  { %v13169_v49 = vpop.f32.mrb[80].mxu0  ;;  %v13187_v48 = vmax.f32 %v17194_v15, %v1287_v33  ;;  %v13194_v52 = vmax.f32 %v17197_v38, %v1289_v14  ;;  %v1288_v20 = vmax.f32 %v17198_v1, %v1063_v9  ;;  %v17199_v15 = vld [vmem:[#allocation16_spill] sm:$0xff]  ;;  %v17200_v33 = vld [vmem:[#allocation19_spill] sm:$0xff]  ;;  %5033 = vmatpush1.bf16.msra.mxu0 %v10595_v21  ;;  %5617 = vmatpush1.bf16.msra.mxu1 %v10598_v36  ;;  %v17202_v21 = vld [vmem:[#allocation17_spill] sm:$0xff] }
 0x19a   :  { %v1180_v7 = vpop.f32.mrb[80].mxu1  ;;  %v1069_v43 = vpop.f32.mrb[81].mxu0  ;;  %v1399_v11 = vadd.f32 %v13087_v19, %v1334_v41  ;;  %v17201_v29 = vmax.f32 %v17199_v15, %v17200_v33  ;;  %v1398_v40 = vadd.f32 %v13091_v22, %v1333_v60  ;;  %v10604_v0 = vld [vmem:[%s16954_s4 + $0x248] ss:$16 sps:$4 sm:$0xff]   ;;  %v10609_v55 = vld [vmem:[%s16954_s4 + $0x264] ss:$16 sps:$4 sm:$0xff]   ;;  %5034 = vmatprep.subr.bf16.mxu0 %v10603_v24  ;;  %5618 = vmatprep.subr.bf16.mxu1 %v10606_v59 }
 0x19b   :  { %v1182_v44 = vpop.f32.mrb[81].mxu1  ;;  %v13189_v18 = vpop.f32.mrb[82].mxu0  ;;  %v1292_v38 = vmax.f32 %v12924_v5, %v1180_v7  ;;  %v1291_v9 = vmax.f32 %v12918_v13, %v1069_v43  ;;  %v10612_v14 = vld [vmem:[%s16954_s4 + $0x26c] ss:$16 sps:$4 sm:$0xff]   ;;  %v1393_v5 = vadd.f32 %v13087_v19, %v13105_v54  ;;  %v1392_v13 = vadd.f32 %v13091_v22, %v13110_v25  ;;  %v10607_v41 = vld [vmem:[%s16954_s4 + $0x260] ss:$16 sps:$4 sm:$0xff]  }
 0x19c   :  { %v1184_v16 = vpop.f32.mrb[82].mxu1  ;;  %v13197_v61 = vpop.f32.mrb[83].mxu0  ;;  %v13205_v31 = vmax.f32 %v17201_v29, %v1288_v20  ;;  %v17203_v36 = vld [vmem:[#allocation59_spill] sm:$0xff]  ;;  %v1505_v26 = vmul.f32 %v13095_v42, %v1399_v11  ;;  %v17206_v54 = vld [vmem:[#allocation21_spill] sm:$0xff]  ;;  %v17207_v24 = vld [vmem:[#allocation60_spill] sm:$0xff]  ;;  %vm1448_vm6 = vcmp.ge.f32.partialorder %v1399_v11, 0.0 }
 0x19d   :  { %v13199_v37 = vpop.f32.mrb[83].mxu1  ;;  %v17204_v7 = vmax.f32 %v17202_v21, %v17203_v36  ;;  %v17208_v59 = vmax.f32 %v17206_v54, %v17207_v24  ;;  %v10610_v25 = vld [vmem:[%s16954_s4 + $0x268] ss:$16 sps:$4 sm:$0xff]   ;;  %v10615_v15 = vld [vmem:[%s16954_s4 + $0x284] ss:$16 sps:$4 sm:$0xff]   ;;  %5035 = vmatpush1.bf16.msra.mxu0 %v10601_v46  ;;  %5619 = vmatpush1.bf16.msra.mxu1 %v10604_v0  ;;  %v1293_v21 = vmax.f32 %v13169_v49, %v1182_v44  ;;  %vm1447_vm7 = vcmp.ge.f32.partialorder %v1398_v40, 0.0 }
 0x19e   :  { %v17210_v1 = vld [vmem:[#allocation22_spill] sm:$0xff]  ;;  %v10618_v36 = vld [vmem:[%s16954_s4 + $0x28c] ss:$16 sps:$4 sm:$0xff]   ;;  %v1499_v54 = vmul.f32 %v13095_v42, %v1393_v5  ;;  %5036 = vmatprep.subr.bf16.mxu0 %v10609_v55  ;;  %5620 = vmatprep.subr.bf16.mxu1 %v10612_v14  ;;  %v1295_v24 = vmax.f32 %v12936_v57, %v1184_v16  ;;  %vm1442_vm8 = vcmp.ge.f32.partialorder %v1393_v5, 0.0  ;;  %v1498_v49 = vmul.f32 %v13095_v42, %v1392_v13  ;;  %v17216_v57 = vld [vmem:[#allocation24_spill] sm:$0xff] }
 0x19f   :  { %v13229_v43 = vmax.f32 %v17204_v7, %v1290_v50  ;;  %v13240_v4 = vmax.f32 %v17208_v59, %v1292_v38  ;;  %v17211_v20 = vmax.f32 %v17209_v56, %v17210_v1  ;;  %v1504_v38 = vmul.f32 %v13095_v42, %v1398_v40  ;;  %v17212_v44 = vld [vmem:[#allocation61_spill] sm:$0xff]  ;;  %v17217_v16 = vld [vmem:[#allocation62_spill] sm:$0xff] }
 0x1a0   :  { %v17213_v0 = vmax.f32 %v12742_v62, %v17212_v44  ;;  %vm1441_vm9 = vcmp.ge.f32.partialorder %v1392_v13, 0.0  ;;  %v13277_v1 = vsel %vm1448_vm6, %v1399_v11, %v1505_v26  ;;  %v17218_v14 = vmax.f32 %v17216_v57, %v17217_v16  ;;  %v10616_v26 = vld [vmem:[%s16954_s4 + $0x288] ss:$16 sps:$4 sm:$0xff]  }
 0x1a1   :  { %17205 = vst [vmem:[#allocation7_spill] sm:$0xff] %v13229_v43  ;;  %v13234_v28 = vpop.f32.mrb[84].mxu0  ;;  %v13248_v50 = vmax.f32 %v17211_v20, %v1291_v9  ;;  %17214 = vst [vmem:[#allocation9_spill] sm:$0xff] %v13277_v1  ;;  %v13279_v55 = vsel %vm1447_vm7, %v1398_v40, %v1504_v38  ;;  %5037 = vmatpush1.bf16.msra.mxu0 %v10607_v41  ;;  %5621 = vmatpush1.bf16.msra.mxu1 %v10610_v25  ;;  %v10613_v43 = vld [vmem:[%s16954_s4 + $0x280] ss:$16 sps:$4 sm:$0xff]  }
 0x1a2   :  { %v1190_v60 = vpop.f32.mrb[84].mxu1  ;;  %v1079_v33 = vpop.f32.mrb[85].mxu0  ;;  %v13274_v56 = vmax.f32 %v17213_v0, %v1293_v21  ;;  %17215 = vst [vmem:[#allocation50_spill] sm:$0xff] %v13279_v55  ;;  %v13284_v20 = vmax.f32 %v17218_v14, %v1295_v24  ;;  %v13289_v62 = vsel %vm1442_vm8, %v1393_v5, %v1499_v54  ;;  %v17219_v21 = vld [vmem:[#allocation63_spill] sm:$0xff]  ;;  %v1296_v11 = vmax.f32 %v13189_v18, %v13199_v37  ;;  %v17224_v18 = vld [vmem:[#allocation64_spill] sm:$0xff] }
 0x1a3   :  { %v13253_v29 = vpop.f32.mrb[85].mxu1  ;;  %v13260_v9 = vpop.f32.mrb[86].mxu0  ;;  %v1294_v44 = vmax.f32 %v17219_v21, %v13197_v61  ;;  %5038 = vmatprep.subr.bf16.mxu0 %v10615_v15  ;;  %v13295_v40 = vsel %vm1441_vm9, %v1392_v13, %v1498_v49  ;;  %v2033_v41 = vpack.c.bf16 %v13277_v1, %v13289_v62  ;;  %5622 = vmatprep.subr.bf16.mxu1 %v10618_v36  ;;  %v17221_v38 = vld [vmem:[#allocation23_spill] sm:$0xff]  ;;  %v17222_v61 = vld [vmem:[#allocation25_spill] sm:$0xff]  ;;  %v10621_v36 = vld [vmem:[%s16954_s4 + $0x2a4] ss:$16 sps:$4 sm:$0xff]  }
 0x1a4   :  { %v13262_v7 = vpop.f32.mrb[86].mxu1  ;;  %v13266_v59 = vpop.f32.mrb[87].mxu0  ;;  %17220 = vst [vmem:[#allocation52_spill] sm:$0xff] %v13295_v40  ;;  %v17223_v54 = vmax.f32 %v17221_v38, %v17222_v61  ;;  %v17225_v37 = vmax.f32 %v12752_v39, %v17224_v18  ;;  %v2032_v15 = vpack.c.bf16 %v13279_v55, %v13295_v40  ;;  %v1298_v49 = vmax.f32 %v12948_v58, %v1190_v60  ;;  %v10624_v0 = vld [vmem:[%s16954_s4 + $0x2ac] ss:$16 sps:$4 sm:$0xff]   ;;  %v17227_v60 = vld [vmem:[#allocation66_spill] sm:$0xff] }
 0x1a5   :  { %v13268_v46 = vpop.f32.mrb[87].mxu1  ;;  %4999 = vmatprep.mubr.bf16.mxu0 %v2033_v41  ;;  %5583 = vmatprep.mubr.bf16.mxu1 %v2033_v41  ;;  %v10619_v39 = vld [vmem:[%s16954_s4 + $0x2a0] ss:$16 sps:$4 sm:$0xff]   ;;  %v10622_v58 = vld [vmem:[%s16954_s4 + $0x2a8] ss:$16 sps:$4 sm:$0xff]   ;;  %v1297_v14 = vmax.f32 %v17227_v60, %v1079_v33  ;;  %v1299_v1 = vmax.f32 %v13234_v28, %v13253_v29 }
 0x1a6   :  { %v13309_v24 = vmax.f32 %v17223_v54, %v1294_v44  ;;  %v13314_v13 = vmax.f32 %v17225_v37, %v1296_v11  ;;  %v17050_v11 = vsub.s32 2, %v13042_v34  ;;  %5000 = vmatmul.mubr.bf16.gmra.mrb[100].mxu0 %v2032_v15  ;;  %5584 = vmatmul.mubr.bf16.gmra.mrb[100].mxu1 %v2032_v15  ;;  %v17228_v38 = vld [vmem:[#allocation27_spill] sm:$0xff]  ;;  %v17229_v41 = vld [vmem:[#allocation65_spill] sm:$0xff]  ;;  %v17232_v33 = vld [vmem:[#allocation28_spill] sm:$0xff] }
 0x1a7   :  { %v17230_v61 = vmax.f32 %v17228_v38, %v17229_v41  ;;  %5039 = vmatpush1.bf16.msra.mxu0 %v10613_v43  ;;  %5623 = vmatpush1.bf16.msra.mxu1 %v10616_v26  ;;  %v10627_v15 = vld [vmem:[%s16954_s4 + $0x2c4] ss:$16 sps:$4 sm:$0xff]   ;;  %v1301_v43 = vmax.f32 %v12960_v2, %v13262_v7  ;;  %v10630_v26 = vld [vmem:[%s16954_s4 + $0x2cc] ss:$16 sps:$4 sm:$0xff]   ;;  %v13378_v2 = vadd.f32 %v13091_v22, %v13035_v47 }
 0x1a8   :  { %17226 = vst [vmem:[#allocation11_spill] sm:$0xff] %v13314_v13  ;;  %v17231_v13 = vld [vmem:[#allocation26_spill] sm:$0xff]  ;;  %5040 = vmatprep.subr.bf16.mxu0 %v10621_v36  ;;  %5624 = vmatprep.subr.bf16.mxu1 %v10624_v0  ;;  %v13369_v28 = vrot.slane %v13056_v6, %v17050_v11  ;;  %v10625_v6 = vld [vmem:[%s16954_s4 + $0x2c0] ss:$16 sps:$4 sm:$0xff]   ;;  %v1405_v47 = vadd.f32 %v13087_v19, %v13240_v4  ;;  %v17251_v11 = vld [vmem:[#allocation32_spill] sm:$0xff] }
 0x1a9   :  { %v13302_v25 = vpop.f32.mrb[88].mxu0  ;;  %v1346_v54 = vmax.f32 %v17230_v61, %v1298_v49  ;;  %v17233_v60 = vmax.f32 %v17231_v13, %v17232_v33  ;;  %v17234_v49 = vld [vmem:[#allocation67_spill] sm:$0xff]  ;;  %v17237_v13 = vld [vmem:[#allocation69_spill] sm:$0xff]  ;;  %v17244_v33 = vld [vmem:[#allocation70_spill] sm:$0xff]  ;;  %vm1432_vm11 = vcmp.ge.f32.partialorder %v13378_v2, 0.0 }
 0x1aa   :  { %v13304_v5 = vpop.f32.mrb[88].mxu1  ;;  %v13325_v57 = vpop.f32.mrb[89].mxu0  ;;  %v17235_v38 = vmax.f32 %v12762_v30, %v17234_v49  ;;  %v1300_v36 = vmax.f32 %v17237_v13, %v13266_v59  ;;  %v1302_v30 = vmax.f32 %v13260_v9, %v13268_v46  ;;  %v17238_v9 = vld [vmem:[#allocation30_spill] sm:$0xff]  ;;  %v17239_v46 = vld [vmem:[#allocation68_spill] sm:$0xff]  ;;  %vm1454_vm13 = vcmp.ge.f32.partialorder %v1405_v47, 0.0 }
 0x1ab   :  { %v13327_v16 = vpop.f32.mrb[89].mxu1  ;;  %v13336_v21 = vpop.f32.mrb[90].mxu0  ;;  %v1345_v55 = vmax.f32 %v17233_v60, %v1297_v14  ;;  %v1411_v29 = vadd.f32 %v13087_v19, %v1346_v54  ;;  %5041 = vmatpush1.bf16.msra.mxu0 %v10619_v39  ;;  %5625 = vmatpush1.bf16.msra.mxu1 %v10622_v58  ;;  %v17241_v58 = vld [vmem:[#allocation29_spill] sm:$0xff]  ;;  %v17242_v14 = vld [vmem:[#allocation31_spill] sm:$0xff]  ;;  %v17245_v60 = vmax.f32 %v12772_v35, %v17244_v33  ;;  %v10633_v4 = vld [vmem:[%s16954_s4 + $0x2e4] ss:$16 sps:$4 sm:$0xff]  }
 0x1ac   :  { %v13338_v44 = vpop.f32.mrb[90].mxu1  ;;  %v13344_v18 = vpop.f32.mrb[91].mxu0  ;;  %v13359_v41 = vmax.f32 %v17235_v38, %v1299_v1  ;;  %v10628_v1 = vld [vmem:[%s16954_s4 + $0x2c8] ss:$16 sps:$4 sm:$0xff]   ;;  %v17243_v61 = vmax.f32 %v17241_v58, %v17242_v14  ;;  %5042 = vmatprep.subr.bf16.mxu0 %v10627_v15  ;;  %v10636_v38 = vld [vmem:[%s16954_s4 + $0x2ec] ss:$16 sps:$4 sm:$0xff]   ;;  %5626 = vmatprep.subr.bf16.mxu1 %v10630_v26  ;;  %v1304_v35 = vmax.f32 %v12972_v45, %v13304_v5 }
 0x1ad   :  { %v13346_v37 = vpop.f32.mrb[91].mxu1  ;;  %v1410_v7 = vadd.f32 %v13091_v22, %v1345_v55  ;;  %v17240_v55 = vmax.f32 %v17238_v9, %v17239_v46  ;;  %v13406_v49 = vmax.f32 %v17245_v60, %v1302_v30  ;;  %v10631_v15 = vld [vmem:[%s16954_s4 + $0x2e0] ss:$16 sps:$4 sm:$0xff]   ;;  %v10634_v30 = vld [vmem:[%s16954_s4 + $0x2e8] ss:$16 sps:$4 sm:$0xff]   ;;  %v1388_v45 = vadd.f32 %v13369_v28, %v13064_v23 }
 0x1ae   :  { %17236 = vst [vmem:[#allocation51_spill] sm:$0xff] %v13359_v41  ;;  %v13401_v54 = vmax.f32 %v17243_v61, %v1300_v36  ;;  %v1404_v36 = vadd.f32 %v13091_v22, %v13248_v50  ;;  %v17247_v9 = vld [vmem:[#allocation72_spill] sm:$0xff]  ;;  %v13436_v50 = vadd.f32 %v13369_v28, %v13024_v27  ;;  %v1390_v5 = vadd.f32 %v13087_v19, %v13073_v51  ;;  %v17248_v33 = vld [vmem:[#allocation34_spill] sm:$0xff]  ;;  %v17249_v27 = vld [vmem:[#allocation71_spill] sm:$0xff] }
 0x1af   :  { %v13396_v39 = vmax.f32 %v17240_v55, %v1301_v43  ;;  %17246 = vst [vmem:[#allocation10_spill] sm:$0xff] %v13406_v49  ;;  %v1303_v46 = vmax.f32 %v17247_v9, %v13325_v57  ;;  %v1517_v26 = vmul.f32 %v13095_v42, %v1411_v29  ;;  %vm1460_vm10 = vcmp.ge.f32.partialorder %v1411_v29, 0.0  ;;  %5043 = vmatpush1.bf16.msra.mxu0 %v10625_v6  ;;  %v17252_v23 = vld [vmem:[#allocation35_spill] sm:$0xff]  ;;  %v10639_v6 = vld [vmem:[%s16954_s4 + $0x304] ss:$16 sps:$4 sm:$0xff]  }
 0x1b0   :  { %v1516_v57 = vmul.f32 %v13095_v42, %v1410_v7  ;;  %5627 = vmatpush1.bf16.msra.mxu1 %v10628_v1  ;;  %v17250_v60 = vmax.f32 %v17248_v33, %v17249_v27  ;;  %v17253_v34 = vmax.f32 %v17251_v11, %v17252_v23  ;;  %v13458_v51 = vadd.f32 %v13087_v19, %v13030_v17 }
 0x1b1   :  { %v13387_v59 = vpop.f32.mrb[92].mxu0  ;;  %v1511_v41 = vmul.f32 %v13095_v42, %v1405_v47  ;;  %vm1459_vm12 = vcmp.ge.f32.partialorder %v1410_v7, 0.0  ;;  %5044 = vmatprep.subr.bf16.mxu0 %v10633_v4  ;;  %5628 = vmatprep.subr.bf16.mxu1 %v10636_v38  ;;  %v1389_v11 = vadd.f32 %v13091_v22, %v13078_v12  ;;  %v1510_v17 = vmul.f32 %v13095_v42, %v1404_v36 }
 0x1b2   :  { %v13389_v0 = vpop.f32.mrb[92].mxu1  ;;  %v13414_v43 = vpop.f32.mrb[93].mxu0  ;;  %v1352_v9 = vmax.f32 %v17250_v60, %v1304_v35  ;;  %v13454_v49 = vmax.f32 %v17253_v34, %v1303_v46  ;;  %v10642_v34 = vld [vmem:[%s16954_s4 + $0x30c] ss:$16 sps:$4 sm:$0xff]   ;;  %v1489_v1 = vmul.f32 %v13095_v42, %v13378_v2  ;;  %vm1453_vm14 = vcmp.ge.f32.partialorder %v1404_v36, 0.0 }
 0x1b3   :  { %v13416_v13 = vpop.f32.mrb[93].mxu1  ;;  %v13430_v55 = vpop.f32.mrb[94].mxu0  ;;  %v13474_v4 = vsel %vm1460_vm10, %v1411_v29, %v1517_v26  ;;  %v1305_v38 = vmax.f32 %v13302_v25, %v13327_v16  ;;  %v17254_v35 = vld [vmem:[#allocation77_spill] sm:$0xff]  ;;  %vm1437_vm15 = vcmp.ge.f32.partialorder %v1388_v45, 0.0  ;;  %v1494_v33 = vmul.f32 %v13095_v42, %v1388_v45  ;;  %5045 = vmatpush1.bf16.msra.mxu0 %v10631_v15  ;;  %v10640_v25 = vld [vmem:[%s16954_s4 + $0x308] ss:$16 sps:$4 sm:$0xff]  }
 0x1b4   :  { %v13432_v58 = vpop.f32.mrb[94].mxu1  ;;  %v13443_v14 = vpop.f32.mrb[95].mxu0  ;;  %v1307_v46 = vmax.f32 %v17254_v35, %v13338_v44  ;;  %v1496_v12 = vmul.f32 %v13095_v42, %v1390_v5  ;;  %v13483_v27 = vsel %vm1459_vm12, %v1410_v7, %v1516_v57  ;;  %5629 = vmatpush1.bf16.msra.mxu1 %v10634_v30  ;;  %v10637_v29 = vld [vmem:[%s16954_s4 + $0x300] ss:$16 sps:$4 sm:$0xff]   ;;  %vm1439_vm0 = vcmp.ge.f32.partialorder %v1390_v5, 0.0  ;;  %v17259_v7 = vld [vmem:[#allocation38_spill] sm:$0xff]  ;;  %5046 = vmatprep.subr.bf16.mxu0 %v10639_v6 }
 0x1b5   :  { %v13445_v61 = vpop.f32.mrb[95].mxu1  ;;  %v13492_v16 = vsel %vm1454_vm13, %v1405_v47, %v1511_v41  ;;  %v17255_v44 = vld [vmem:[#allocation33_spill] sm:$0xff]  ;;  %v17260_v15 = vld [vmem:[#allocation74_spill] sm:$0xff]  ;;  %5630 = vmatprep.subr.bf16.mxu1 %v10642_v34  ;;  %v13511_v47 = vsel %vm1453_vm14, %v1404_v36, %v1510_v17  ;;  %v13521_v34 = vadd.f32 %v13369_v28, %v13040_v8  ;;  %vm1438_vm2 = vcmp.ge.f32.partialorder %v1389_v11, 0.0  ;;  %v17265_v17 = vld [vmem:[#allocation39_spill] sm:$0xff] }
 0x1b6   :  { %v17256_v26 = vld [vmem:[#allocation73_spill] sm:$0xff]  ;;  %v17261_v30 = vmax.f32 %v17259_v7, %v17260_v15  ;;  %v10645_v35 = vld [vmem:[%s16954_s4 + $0x324] ss:$16 sps:$4 sm:$0xff]   ;;  %v2048_v6 = vpack.c.bf16 %v13474_v4, %v13492_v16  ;;  %v2047_v36 = vpack.c.bf16 %v13483_v27, %v13511_v47  ;;  %vm1433_vm9 = vcmp.ge.f32.partialorder %v13458_v51, 0.0 }
 0x1b7   :  { %v17257_v60 = vmax.f32 %v17255_v44, %v17256_v26  ;;  %v10648_v41 = vld [vmem:[%s16954_s4 + $0x32c] ss:$16 sps:$4 sm:$0xff]   ;;  %17263 = vst [vmem:[#allocation53_spill] sm:$0xff] %v13521_v34  ;;  %v1495_v26 = vmul.f32 %v13095_v42, %v1389_v11  ;;  %v17268_v15 = vld [vmem:[#allocation76_spill] sm:$0xff]  ;;  %v13546_v34 = vsel %vm1437_vm15, %v1388_v45, %v1494_v33  ;;  %v13563_v45 = vsel %vm1432_vm11, %v13378_v2, %v1489_v1 }
 0x1b8   :  { %v13502_v57 = vmax.f32 %v17261_v30, %v1307_v46  ;;  %v1308_v46 = vmax.f32 %v13336_v21, %v13346_v37  ;;  %v17267_v7 = vld [vmem:[#allocation37_spill] sm:$0xff]  ;;  %5009 = vmatprep.mubr.bf16.mxu0 %v2048_v6  ;;  %5593 = vmatprep.mubr.bf16.mxu1 %v2048_v6  ;;  %17271 = vst [vmem:[#allocation55_spill] sm:$0xff] %v13563_v45  ;;  %vm1431_vm13 = vcmp.ge.f32.partialorder %v13436_v50, 0.0 }
 0x1b9   :  { %v13497_v23 = vmax.f32 %v17257_v60, %v1305_v38  ;;  %v17262_v38 = vld [vmem:[#allocation75_spill] sm:$0xff]  ;;  %v13526_v60 = vadd.f32 %v13087_v19, %v13127_v32  ;;  %v17269_v30 = vmax.f32 %v17267_v7, %v17268_v15  ;;  %5010 = vmatmul.mubr.bf16.gmra.mrb[104].mxu0 %v2047_v36  ;;  %5594 = vmatmul.mubr.bf16.gmra.mrb[104].mxu1 %v2047_v36  ;;  %v17273_v36 = vld [vmem:[#allocation78_spill] sm:$0xff] }
 0x1ba   :  { %v1306_v44 = vmax.f32 %v17262_v38, %v13344_v18  ;;  %v17264_v18 = vld [vmem:[#allocation36_spill] sm:$0xff]  ;;  %v17270_v38 = vld [vmem:[#allocation81_spill] sm:$0xff]  ;;  %v1417_v33 = vadd.f32 %v13087_v19, %v1352_v9  ;;  %5047 = vmatpush1.bf16.msra.mxu0 %v10637_v29  ;;  %5631 = vmatpush1.bf16.msra.mxu1 %v10640_v25  ;;  %v13578_v7 = vadd.f32 %v13369_v28, %v13117_v63 }
 0x1bb   :  { %17258 = vst [vmem:[#allocation12_spill] sm:$0xff] %v13497_v23  ;;  %v17266_v21 = vmax.f32 %v17264_v18, %v17265_v17  ;;  %v13538_v8 = vmax.f32 %v17269_v30, %v1308_v46  ;;  %v1310_v32 = vmax.f32 %v17270_v38, %v13389_v0  ;;  %v10643_v23 = vld [vmem:[%s16954_s4 + $0x320] ss:$16 sps:$4 sm:$0xff]   ;;  %v10646_v46 = vld [vmem:[%s16954_s4 + $0x328] ss:$16 sps:$4 sm:$0xff]   ;;  %5048 = vmatprep.subr.bf16.mxu0 %v10645_v35  ;;  %vm1445_vm4 = vcmp.ge.f32.partialorder %v13526_v60, 0.0 }
 0x1bc   :  { %v10651_v0 = vld [vmem:[%s16954_s4 + $0x344] ss:$16 sps:$4 sm:$0xff]   ;;  %v10654_v6 = vld [vmem:[%s16954_s4 + $0x34c] ss:$16 sps:$4 sm:$0xff]   ;;  %5632 = vmatprep.subr.bf16.mxu1 %v10648_v41  ;;  %v13584_v9 = vmul.f32 %v13095_v42, %v13526_v60  ;;  %v13588_v1 = vadd.f32 %v13091_v22, %v13132_v3  ;;  %v1416_v63 = vadd.f32 %v13091_v22, %v13454_v49  ;;  %v10652_v29 = vld [vmem:[%s16954_s4 + $0x348] ss:$16 sps:$4 sm:$0xff]  }
 0x1bd   :  { %v13533_v37 = vmax.f32 %v17266_v21, %v1306_v44  ;;  %v13549_v44 = vsel %vm1439_vm0, %v1390_v5, %v1496_v12  ;;  %v13567_v5 = vadd.f32 %v13369_v28, %v13083_v53  ;;  %v17272_v12 = vld [vmem:[#allocation42_spill] sm:$0xff]  ;;  %v13574_v21 = vsel %vm1438_vm2, %v1389_v11, %v1495_v26  ;;  %v17275_v53 = vld [vmem:[#allocation79_spill] sm:$0xff]  ;;  %v17276_v25 = vld [vmem:[#allocation40_spill] sm:$0xff] }
 0x1be   :  { %v17274_v18 = vmax.f32 %v17272_v12, %v17273_v36  ;;  %v1309_v2 = vmax.f32 %v17275_v53, %v13414_v43  ;;  %v13592_v11 = vadd.f32 %v13087_v19, %v13194_v52  ;;  %v10649_v43 = vld [vmem:[%s16954_s4 + $0x340] ss:$16 sps:$4 sm:$0xff]   ;;  %v1311_v26 = vmax.f32 %v13387_v59, %v13416_v13  ;;  %v10657_v30 = vld [vmem:[%s16954_s4 + $0x364] ss:$16 sps:$4 sm:$0xff]   ;;  %v10660_v38 = vld [vmem:[%s16954_s4 + $0x36c] ss:$16 sps:$4 sm:$0xff]   ;;  %5049 = vmatpush1.bf16.msra.mxu0 %v10643_v23 }
 0x1bf   :  { %v17277_v35 = vld [vmem:[#allocation43_spill] sm:$0xff]  ;;  %v17279_v49 = vld [vmem:[#allocation85_spill] sm:$0xff]  ;;  %vm1466_vm5 = vcmp.ge.f32.partialorder %v1417_v33, 0.0  ;;  %v1523_v12 = vmul.f32 %v13095_v42, %v1417_v33  ;;  %5633 = vmatpush1.bf16.msra.mxu1 %v10646_v46  ;;  %5050 = vmatprep.subr.bf16.mxu0 %v10651_v0  ;;  %v17285_v23 = vld [vmem:[#allocation82_spill] sm:$0xff]  ;;  %vm1465_vm7 = vcmp.ge.f32.partialorder %v1416_v63, 0.0  ;;  %vm1444_vm10 = vcmp.ge.f32.partialorder %v13588_v1, 0.0 }
 0x1c0   :  { %v1358_v17 = vmax.f32 %v17274_v18, %v1310_v32  ;;  %v17278_v41 = vmax.f32 %v17276_v25, %v17277_v35  ;;  %v1313_v15 = vmax.f32 %v17279_v49, %v13432_v58  ;;  %v13619_v32 = vadd.f32 %v13091_v22, %v13205_v31  ;;  %v17280_v59 = vld [vmem:[#allocation83_spill] sm:$0xff]  ;;  %v17281_v18 = vld [vmem:[#allocation41_spill] sm:$0xff]  ;;  %5634 = vmatprep.subr.bf16.mxu1 %v10654_v6  ;;  %v10658_v6 = vld [vmem:[%s16954_s4 + $0x368] ss:$16 sps:$4 sm:$0xff]  }
 0x1c1   :  { %v1312_v13 = vmax.f32 %v17280_v59, %v13443_v14  ;;  %v1522_v31 = vmul.f32 %v13095_v42, %v1416_v63  ;;  %v17284_v25 = vld [vmem:[#allocation45_spill] sm:$0xff]  ;;  %v17287_v14 = vld [vmem:[#allocation44_spill] sm:$0xff]  ;;  %vm1451_vm11 = vcmp.ge.f32.partialorder %v13592_v11, 0.0 }
 0x1c2   :  { %v1423_v3 = vadd.f32 %v13087_v19, %v1358_v17  ;;  %v1357_v52 = vmax.f32 %v17278_v41, %v1309_v2  ;;  %v17282_v17 = vld [vmem:[#allocation80_spill] sm:$0xff]  ;;  %v17286_v46 = vmax.f32 %v17284_v25, %v17285_v23  ;;  %v17288_v41 = vld [vmem:[#allocation46_spill] sm:$0xff]  ;;  %v10655_v0 = vld [vmem:[%s16954_s4 + $0x360] ss:$16 sps:$4 sm:$0xff]   ;;  %5051 = vmatpush1.bf16.msra.mxu0 %v10649_v43  ;;  %v1501_v25 = vmul.f32 %v13095_v42, %v13588_v1 }
 0x1c3   :  { %v17283_v53 = vmax.f32 %v17281_v18, %v17282_v17  ;;  %v17289_v49 = vmax.f32 %v17287_v14, %v17288_v41  ;;  %v17290_v18 = vld [vmem:[#allocation84_spill] sm:$0xff]  ;;  %5635 = vmatpush1.bf16.msra.mxu1 %v10652_v29  ;;  %5052 = vmatprep.subr.bf16.mxu0 %v10657_v30  ;;  %v13679_v43 = vadd.f32 %v13369_v28, %v13187_v48  ;;  %v10661_v30 = vld [vmem:[%s16954_s4 + $0x380] ss:$16 sps:$4 sm:$0xff]   ;;  %vm1450_vm12 = vcmp.ge.f32.partialorder %v13619_v32, 0.0 }
 0x1c4   :  { %vm1472_vm6 = vcmp.ge.f32.partialorder %v1423_v3, 0.0  ;;  %v1529_v58 = vmul.f32 %v13095_v42, %v1423_v3  ;;  %v1422_v36 = vadd.f32 %v13091_v22, %v1357_v52  ;;  %v13635_v35 = vmax.f32 %v17286_v46, %v1313_v15  ;;  %5636 = vmatprep.subr.bf16.mxu1 %v10660_v38  ;;  %v10664_v38 = vld [vmem:[%s16954_s4 + $0x388] ss:$16 sps:$4 sm:$0xff]  }
 0x1c5   :  { %v13629_v2 = vmax.f32 %v17283_v53, %v1311_v26  ;;  %v13640_v59 = vmax.f32 %v17289_v49, %v1312_v13  ;;  %v1314_v52 = vmax.f32 %v13430_v55, %v13445_v61  ;;  %v10663_v13 = vld [vmem:[%s16954_s4 + $0x384] ss:$16 sps:$4 sm:$0xff]   ;;  %v10666_v55 = vld [vmem:[%s16954_s4 + $0x38c] ss:$16 sps:$4 sm:$0xff]   ;;  %v13660_v61 = vsel %vm1466_vm5, %v1417_v33, %v1523_v12 }
 0x1c6   :  { %v13650_v26 = vsel %vm1472_vm6, %v1423_v3, %v1529_v58  ;;  %vm1471_vm8 = vcmp.ge.f32.partialorder %v1422_v36, 0.0  ;;  %v1528_v15 = vmul.f32 %v13095_v42, %v1422_v36  ;;  %v17291_v17 = vmax.f32 %v12812_v10, %v17290_v18  ;;  %v17293_v33 = vld [vmem:[#allocation48_spill] sm:$0xff]  ;;  %v10672_v49 = vld [vmem:[%s16954_s4 + $0x3ac] ss:$16 sps:$4 sm:$0xff]   ;;  %5053 = vmatpush1.bf16.msra.mxu0 %v10655_v0 }
 0x1c7   :  { %v1632_v3 = vrot.slane %v13563_v45, 1  ;;  %v1641_v58 = vrot.slane %v13574_v21, 1  ;;  %v2063_v10 = vpack.c.bf16 %v13650_v26, %v13660_v61  ;;  %v1631_v12 = vrot.slane %v17293_v33, 1  ;;  %5637 = vmatpush1.bf16.msra.mxu1 %v10658_v6  ;;  %5054 = vmatprep.subr.bf16.mxu0 %v10663_v13  ;;  %v17295_v6 = vld [vmem:[#allocation49_spill] sm:$0xff]  ;;  %v17296_v13 = vld [vmem:[#allocation6_spill] sm:$0xff] }
 0x1c8   :  { %v13665_v53 = vmax.f32 %v17291_v17, %v1314_v52  ;;  %v13672_v23 = vsel %vm1471_vm8, %v1422_v36, %v1528_v15  ;;  %v1508_v29 = vmul.f32 %v13095_v42, %v13592_v11  ;;  %v13684_v46 = vsel %vm1465_vm7, %v1416_v63, %v1522_v31  ;;  %v17294_v36 = vld [vmem:[#allocation47_spill] sm:$0xff]  ;;  %v10669_v31 = vld [vmem:[%s16954_s4 + $0x3a4] ss:$16 sps:$4 sm:$0xff]   ;;  %5638 = vmatprep.subr.bf16.mxu1 %v10666_v55  ;;  %v10676_v33 = vld [vmem:[%s16954_s4 + $0x3c8] ss:$16 sps:$4 sm:$0xff]  }
 0x1c9   :  { %17292 = vst [vmem:[#allocation14_spill] sm:$0xff] %v13672_v23  ;;  %v1640_v14 = vrot.slane %v17294_v36, 1  ;;  %v1507_v48 = vmul.f32 %v13095_v42, %v13619_v32  ;;  %v1408_v41 = vadd.f32 %v13087_v19, %v13284_v20  ;;  %5019 = vmatprep.mubr.bf16.mxu0 %v2063_v10  ;;  %5603 = vmatprep.mubr.bf16.mxu1 %v2063_v10  ;;  %v1643_v55 = vrot.slane %v17296_v13, 1 }
 0x1ca   :  { %v2062_v63 = vpack.c.bf16 %v13672_v23, %v13684_v46  ;;  %v1407_v52 = vadd.f32 %v13091_v22, %v13309_v24  ;;  %v1633_v20 = vsel %vm1630_vm3, %v1631_v12, %v1632_v3  ;;  %v13713_v18 = vmul.f32 %v13095_v42, %v13567_v5  ;;  %5055 = vmatpush1.bf16.msra.mxu0 %v10661_v30 }
 0x1cb   :  { %v1642_v15 = vsel %vm1630_vm3, %v1640_v14, %v1641_v58  ;;  %v1414_v17 = vadd.f32 %v13087_v19, %v13396_v39  ;;  %v13720_v24 = vmul.f32 %v13095_v42, %v13578_v7  ;;  %v13726_v0 = vsel %vm1445_vm4, %v13526_v60, %v13584_v9  ;;  %v10667_v39 = vld [vmem:[%s16954_s4 + $0x3a0] ss:$16 sps:$4 sm:$0xff]   ;;  %v10670_v9 = vld [vmem:[%s16954_s4 + $0x3a8] ss:$16 sps:$4 sm:$0xff]   ;;  %5639 = vmatpush1.bf16.msra.mxu1 %v10664_v38 }
 0x1cc   :  { %v2020_v10 = vpack.c.bf16 %v1642_v15, %v1633_v20  ;;  %v1634_v3 = vrot.slane %v17295_v6, 1  ;;  %v1413_v58 = vadd.f32 %v13091_v22, %v13401_v54  ;;  %5020 = vmatmul.mubr.bf16.gmra.mrb[108].mxu0 %v2062_v63  ;;  %5604 = vmatmul.mubr.bf16.gmra.mrb[108].mxu1 %v2062_v63  ;;  %v13738_v12 = vsel %vm1444_vm10, %v13588_v1, %v1501_v25  ;;  %v10675_v1 = vld [vmem:[%s16954_s4 + $0x3c4] ss:$16 sps:$4 sm:$0xff]  }
 0x1cd   :  { %17297 = vst [vmem:[#allocation54_spill] sm:$0xff] %v13738_v12  ;;  %v13742_v60 = vmul.f32 %v13095_v42, %v13679_v43  ;;  %v13747_v54 = vsel %vm1451_vm11, %v13592_v11, %v1508_v29  ;;  %v1644_v25 = vrot.slane %v13549_v44, 1  ;;  %v13759_v14 = vsel %vm1450_vm12, %v13619_v32, %v1507_v48  ;;  %5056 = vmatprep.subr.bf16.mxu0 %v10669_v31  ;;  %v10678_v32 = vld [vmem:[%s16954_s4 + $0x3cc] ss:$16 sps:$4 sm:$0xff]  }
 0x1ce   :  { %5062 = vmatprep.mubr.bf16.mxu0 %v2020_v10  ;;  %5646 = vmatprep.mubr.bf16.mxu1 %v2020_v10  ;;  %17298 = vst [vmem:[#allocation13_spill] sm:$0xff] %v13759_v14  ;;  %v1514_v11 = vmul.f32 %v13095_v42, %v1408_v41  ;;  %v1513_v29 = vmul.f32 %v13095_v42, %v1407_v52  ;;  %vm1457_vm14 = vcmp.ge.f32.partialorder %v1408_v41, 0.0  ;;  %vm1456_vm15 = vcmp.ge.f32.partialorder %v1407_v52, 0.0 }
 0x1cf   :  { %v1520_v63 = vmul.f32 %v13095_v42, %v1414_v17  ;;  %v1420_v20 = vadd.f32 %v13087_v19, %v13502_v57  ;;  %5640 = vmatprep.subr.bf16.mxu1 %v10672_v49  ;;  %v13772_v48 = vadd.f32 %v13369_v28, %v13274_v56  ;;  %vm1463_vm0 = vcmp.ge.f32.partialorder %v1414_v17, 0.0  ;;  %5057 = vmatpush1.bf16.msra.mxu0 %v10667_v39  ;;  %v10673_v56 = vld [vmem:[%s16954_s4 + $0x3c0] ss:$16 sps:$4 sm:$0xff]   ;;  %v10681_v39 = vld [vmem:[%s16954_s4 + $0x3e4] ss:$16 sps:$4 sm:$0xff]  }
 0x1d0   :  { %v1519_v30 = vmul.f32 %v13095_v42, %v1413_v58  ;;  %v1490_v38 = vmul.f32 %v13095_v42, %v13458_v51  ;;  %vm1462_vm2 = vcmp.ge.f32.partialorder %v1413_v58, 0.0  ;;  %v1426_v57 = vadd.f32 %v13087_v19, %v13635_v35  ;;  %5641 = vmatpush1.bf16.msra.mxu1 %v10670_v9  ;;  %5058 = vmatprep.subr.bf16.mxu0 %v10675_v1  ;;  %v10684_v9 = vld [vmem:[%s16954_s4 + $0x3ec] ss:$16 sps:$4 sm:$0xff]  }
 0x1d1   :  { %v1649_v31 = vrot.slane %v13295_v40, 1  ;;  %v1650_v49 = vrot.slane %v13738_v12, 1  ;;  %v13781_v15 = vsel %vm1457_vm14, %v1408_v41, %v1514_v11  ;;  %v13783_v10 = vsel %vm1456_vm15, %v1407_v52, %v1513_v29  ;;  %5642 = vmatprep.subr.bf16.mxu1 %v10678_v32  ;;  %v17299_v40 = vld [vmem:[#allocation9_spill] sm:$0xff] }
 0x1d2   :  { %v1659_v19 = vrot.slane %v13759_v14, 1  ;;  %v13795_v35 = vsel %vm1433_vm9, %v13458_v51, %v1490_v38  ;;  %v13797_v41 = vsel %vm1463_vm0, %v1414_v17, %v1520_v63  ;;  %v1526_v52 = vmul.f32 %v13095_v42, %v1420_v20 }
 0x1d3   :  { %v1635_v11 = vrot.slane %v13795_v35, 1  ;;  %v1645_v29 = vsel %vm1630_vm3, %v1643_v55, %v1644_v25  ;;  %v13809_v51 = vsel %vm1462_vm2, %v1413_v58, %v1519_v30  ;;  %vm1469_vm4 = vcmp.ge.f32.partialorder %v1420_v20, 0.0  ;;  %5059 = vmatpush1.bf16.msra.mxu0 %v10673_v56  ;;  %v10679_v58 = vld [vmem:[%s16954_s4 + $0x3e0] ss:$16 sps:$4 sm:$0xff]   ;;  %v10682_v25 = vld [vmem:[%s16954_s4 + $0x3e8] ss:$16 sps:$4 sm:$0xff]  }
 0x1d4   :  { %v1653_v17 = vrot.slane %v13726_v0, 1  ;;  %v1662_v1 = vrot.slane %v13747_v54, 1  ;;  %vm1443_vm5 = vcmp.ge.f32.partialorder %v13578_v7, 0.0  ;;  %v1532_v63 = vmul.f32 %v13095_v42, %v1426_v57  ;;  %5643 = vmatpush1.bf16.msra.mxu1 %v10676_v33  ;;  %5060 = vmatprep.subr.bf16.mxu0 %v10681_v39  ;;  %v10690_v33 = vld [vmem:[%s16954_s4 + $0x40c] ss:$16 sps:$4 sm:$0xff]   ;;  %v17300_v56 = vld [vmem:[#allocation50_spill] sm:$0xff] }
 0x1d5   :  { %v1636_v32 = vsel %vm1630_vm3, %v1634_v3, %v1635_v11  ;;  %v1652_v38 = vrot.slane %v13289_v62, 1  ;;  %v1661_v12 = vrot.slane %v17299_v40, 1  ;;  %v13820_v55 = vadd.f32 %v13091_v22, %v13533_v37  ;;  %5644 = vmatprep.subr.bf16.mxu1 %v10684_v9  ;;  %v10687_v37 = vld [vmem:[%s16954_s4 + $0x404] ss:$16 sps:$4 sm:$0xff]  }
 0x1d6   :  { %vm1475_vm6 = vcmp.ge.f32.partialorder %v1426_v57, 0.0  ;;  %v1488_v3 = vmul.f32 %v13095_v42, %v13436_v50  ;;  %v13830_v30 = vpack.c.bf16 %v1645_v29, %v1636_v32  ;;  %v13833_v11 = vsel %vm1469_vm4, %v1420_v20, %v1526_v52 }
 0x1d7   :  { %v1658_v14 = vrot.slane %v17300_v56, 1  ;;  %v1654_v45 = vsel %vm1630_vm3, %v1652_v38, %v1653_v17  ;;  %v1663_v29 = vsel %vm1630_vm3, %v1661_v12, %v1662_v1  ;;  %v13846_v20 = vadd.f32 %v13091_v22, %v13640_v59  ;;  %5061 = vmatpush1.bf16.msra.mxu0 %v10679_v58 }
 0x1d8   :  { %v13848_v52 = vpack.c.bf16 %v1663_v29, %v1654_v45  ;;  %v1670_v39 = vrot.slane %v13492_v16, 1  ;;  %v1671_v9 = vrot.slane %v13781_v15, 1  ;;  %v13853_v32 = vsel %vm1475_vm6, %v1426_v57, %v1532_v63  ;;  %5645 = vmatpush1.bf16.msra.mxu1 %v10682_v25  ;;  %v10685_v45 = vld [vmem:[%s16954_s4 + $0x400] ss:$16 sps:$4 sm:$0xff]   ;;  %5103 = vmatprep.subr.bf16.mxu0 %v10687_v37  ;;  %v10688_v57 = vld [vmem:[%s16954_s4 + $0x408] ss:$16 sps:$4 sm:$0xff]  }
 0x1d9   :  { %v1660_v36 = vsel %vm1630_vm3, %v1658_v14, %v1659_v19  ;;  %v1679_v56 = vrot.slane %v13474_v4, 1  ;;  %v1680_v17 = vrot.slane %v13797_v41, 1  ;;  %vm1449_vm7 = vcmp.ge.f32.partialorder %v13679_v43, 0.0  ;;  %5687 = vmatprep.subr.bf16.mxu1 %v10690_v33 }
 0x1da   :  { %v13862_v22 = vsel %vm1431_vm13, %v13436_v50, %v1488_v3  ;;  %v1651_v59 = vsel %vm1630_vm3, %v1649_v31, %v1650_v49  ;;  %v1672_v12 = vsel %vm1630_vm3, %v1670_v39, %v1671_v9  ;;  %v1688_v19 = vrot.slane %v13660_v61, 1  ;;  %v10693_v31 = vld [vmem:[%s16954_s4 + $0x424] ss:$16 sps:$4 sm:$0xff]   ;;  %v10696_v49 = vld [vmem:[%s16954_s4 + $0x42c] ss:$16 sps:$4 sm:$0xff]  }
 0x1db   :  { %v2019_v14 = vpack.c.bf16 %v13546_v34, %v13862_v22  ;;  %v1681_v50 = vsel %vm1630_vm3, %v1679_v56, %v1680_v17  ;;  %v1689_v1 = vrot.slane %v13833_v11, 1  ;;  %v2035_v63 = vpack.c.bf16 %v1660_v36, %v1651_v59  ;;  %v17301_v36 = vld [vmem:[#allocation51_spill] sm:$0xff] }
 0x1dc   :  { %v13883_v38 = vpack.c.bf16 %v1681_v50, %v1672_v12  ;;  %v1697_v58 = vrot.slane %v13650_v26, 1  ;;  %v1698_v25 = vrot.slane %v13853_v32, 1  ;;  %v13891_v3 = vsel %vm1449_vm7, %v13679_v43, %v13742_v60  ;;  %v10691_v43 = vld [vmem:[%s16954_s4 + $0x420] ss:$16 sps:$4 sm:$0xff]   ;;  %v10694_v60 = vld [vmem:[%s16954_s4 + $0x428] ss:$16 sps:$4 sm:$0xff]  }
 0x1dd   :  { %v1412_v37 = vadd.f32 %v13369_v28, %v17301_v36  ;;  %5063 = vmatmul.mubr.bf16.vlgmr.msra.gmra.mrb[96].mxu0 %v2019_v14  ;;  %5647 = vmatmul.mubr.bf16.vlgmr.msra.gmra.mrb[96].mxu1 %v2019_v14  ;;  %v1677_v33 = vrot.slane %v13809_v51, 1  ;;  %v1690_v56 = vsel %vm1630_vm3, %v1688_v19, %v1689_v1  ;;  %vm1440_vm8 = vcmp.ge.f32.partialorder %v13567_v5, 0.0  ;;  %v10697_v36 = vld [vmem:[%s16954_s4 + $0x440] ss:$16 sps:$4 sm:$0xff]  }
 0x1de   :  { %v1525_v29 = vmul.f32 %v13095_v42, %v13820_v55  ;;  %v1531_v39 = vmul.f32 %v13095_v42, %v13846_v20  ;;  %5072 = vmatprep.mubr.bf16.mxu0 %v2035_v63  ;;  %5104 = vmatpush1.bf16.msra.mxu0 %v10685_v45  ;;  %v1668_v9 = vrot.slane %v13783_v10, 1  ;;  %v1699_v17 = vsel %vm1630_vm3, %v1697_v58, %v1698_v25  ;;  %v10699_v45 = vld [vmem:[%s16954_s4 + $0x444] ss:$16 sps:$4 sm:$0xff]  }
 0x1df   :  { %vm1468_vm9 = vcmp.ge.f32.partialorder %v13820_v55, 0.0  ;;  %vm1474_vm10 = vcmp.ge.f32.partialorder %v13846_v20, 0.0  ;;  %5656 = vmatprep.mubr.bf16.mxu1 %v2035_v63  ;;  %5688 = vmatpush1.bf16.msra.mxu1 %v10688_v57  ;;  %v1676_v59 = vrot.slane %v13483_v27, 1  ;;  %v13916_v12 = vpack.c.bf16 %v1699_v17, %v1690_v56  ;;  %v10702_v57 = vld [vmem:[%s16954_s4 + $0x44c] ss:$16 sps:$4 sm:$0xff]  }
 0x1e0   :  { %v13922_v14 = vsel %vm1443_vm5, %v13578_v7, %v13720_v24  ;;  %vm1455_vm11 = vcmp.ge.f32.partialorder %v13772_v48, 0.0  ;;  %5105 = vmatprep.subr.bf16.mxu0 %v10693_v31  ;;  %5689 = vmatprep.subr.bf16.mxu1 %v10696_v49  ;;  %v1667_v50 = vrot.slane %v13511_v47, 1  ;;  %v1749_v19 = vrot.slane %v13726_v0, 2 }
 0x1e1   :  { %v1678_v1 = vsel %vm1630_vm3, %v1676_v59, %v1677_v33  ;;  %v1748_v63 = vrot.slane %v13289_v62, 2  ;;  %v1757_v58 = vrot.slane %v17299_v40, 2  ;;  %v1758_v7 = vrot.slane %v13747_v54, 2 }
 0x1e2   :  { %v1518_v24 = vmul.f32 %v13095_v42, %v1412_v37  ;;  %v13938_v31 = vsel %vm1468_vm9, %v13820_v55, %v1525_v29  ;;  %v13943_v49 = vsel %vm1474_vm10, %v13846_v20, %v1531_v39  ;;  %5106 = vmatpush1.bf16.msra.mxu0 %v10691_v43  ;;  %v2034_v25 = vpack.c.bf16 %v13891_v3, %v13922_v14  ;;  %v10700_v55 = vld [vmem:[%s16954_s4 + $0x448] ss:$16 sps:$4 sm:$0xff]   ;;  %v10705_v43 = vld [vmem:[%s16954_s4 + $0x464] ss:$16 sps:$4 sm:$0xff]  }
 0x1e3   :  { %17302 = vst [vmem:[#allocation15_spill] sm:$0xff] %v13938_v31  ;;  %vm1461_vm12 = vcmp.ge.f32.partialorder %v1412_v37, 0.0  ;;  %5690 = vmatpush1.bf16.msra.mxu1 %v10694_v60  ;;  %5107 = vmatprep.subr.bf16.mxu0 %v10699_v45  ;;  %v1669_v33 = vsel %vm1630_vm3, %v1667_v50, %v1668_v9  ;;  %v1750_v20 = vsel %vm482_vm1, %v1748_v63, %v1749_v19  ;;  %v10708_v60 = vld [vmem:[%s16954_s4 + $0x46c] ss:$16 sps:$4 sm:$0xff]   ;;  %v1767_v9 = vrot.slane %v13781_v15, 2 }
 0x1e4   :  { %v1759_v56 = vsel %vm482_vm1, %v1757_v58, %v1758_v7  ;;  %v1512_v29 = vmul.f32 %v13095_v42, %v13772_v48  ;;  %5691 = vmatprep.subr.bf16.mxu1 %v10702_v57  ;;  %v2050_v39 = vpack.c.bf16 %v1678_v1, %v1669_v33  ;;  %v1695_v45 = vrot.slane %v13943_v49, 1  ;;  %v10703_v63 = vld [vmem:[%s16954_s4 + $0x460] ss:$16 sps:$4 sm:$0xff]  }
 0x1e5   :  { %v13964_v17 = vpack.c.bf16 %v1759_v56, %v1750_v20  ;;  %5073 = vmatmul.mubr.bf16.gmra.mrb[100].mxu0 %v2034_v25  ;;  %5657 = vmatmul.mubr.bf16.gmra.mrb[100].mxu1 %v2034_v25  ;;  %v1766_v59 = vrot.slane %v13492_v16, 2  ;;  %v1775_v57 = vrot.slane %v13474_v4, 2  ;;  %v1776_v50 = vrot.slane %v13797_v41, 2 }
 0x1e6   :  { %v13972_v19 = vsel %vm1461_vm12, %v1412_v37, %v1518_v24  ;;  %v1424_v1 = vadd.f32 %v13369_v28, %v13629_v2  ;;  %5082 = vmatprep.mubr.bf16.mxu0 %v2050_v39  ;;  %5108 = vmatpush1.bf16.msra.mxu0 %v10697_v36  ;;  %v1686_v58 = vrot.slane %v13938_v31, 1  ;;  %v1694_v7 = vrot.slane %v13672_v23, 1  ;;  %v10706_v37 = vld [vmem:[%s16954_s4 + $0x468] ss:$16 sps:$4 sm:$0xff]   ;;  %v10711_v2 = vld [vmem:[%s16954_s4 + $0x484] ss:$16 sps:$4 sm:$0xff]  }
 0x1e7   :  { %5666 = vmatprep.mubr.bf16.mxu1 %v2050_v39  ;;  %5692 = vmatpush1.bf16.msra.mxu1 %v10700_v55  ;;  %v17303_v24 = vld [vmem:[#allocation53_spill] sm:$0xff]  ;;  %v1768_v36 = vsel %vm482_vm1, %v1766_v59, %v1767_v9  ;;  %v1777_v33 = vsel %vm482_vm1, %v1775_v57, %v1776_v50  ;;  %v1785_v20 = vrot.slane %v13833_v11, 2  ;;  %v1784_v39 = vrot.slane %v13660_v61, 2  ;;  %v17304_v57 = vld [vmem:[#allocation12_spill] sm:$0xff] }
 0x1e8   :  { %v1491_v25 = vmul.f32 %v13095_v42, %v17303_v24  ;;  %5109 = vmatprep.subr.bf16.mxu0 %v10705_v43  ;;  %5693 = vmatprep.subr.bf16.mxu1 %v10708_v60  ;;  %v10714_v55 = vld [vmem:[%s16954_s4 + $0x48c] ss:$16 sps:$4 sm:$0xff]   ;;  %v13995_v56 = vpack.c.bf16 %v1777_v33, %v1768_v36  ;;  %v1793_v23 = vrot.slane %v13650_v26, 2  ;;  %v1794_v31 = vrot.slane %v13853_v32, 2  ;;  %v10709_v36 = vld [vmem:[%s16954_s4 + $0x480] ss:$16 sps:$4 sm:$0xff]  }
 0x1e9   :  { %vm1434_vm13 = vcmp.ge.f32.partialorder %v17303_v24, 0.0  ;;  %v14005_v43 = vsel %vm1440_vm8, %v13567_v5, %v13713_v18  ;;  %v1685_v60 = vrot.slane %v13684_v46, 1  ;;  %v1696_v9 = vsel %vm1630_vm3, %v1694_v7, %v1695_v45 }
 0x1ea   :  { %v14012_v59 = vsel %vm1455_vm11, %v13772_v48, %v1512_v29  ;;  %v1418_v50 = vadd.f32 %v13369_v28, %v17304_v57  ;;  %5110 = vmatpush1.bf16.msra.mxu0 %v10703_v63  ;;  %v1786_v5 = vsel %vm482_vm1, %v1784_v39, %v1785_v20  ;;  %v1795_v18 = vsel %vm482_vm1, %v1793_v23, %v1794_v31  ;;  %v10712_v48 = vld [vmem:[%s16954_s4 + $0x488] ss:$16 sps:$4 sm:$0xff]   ;;  %v10717_v23 = vld [vmem:[%s16954_s4 + $0x4a4] ss:$16 sps:$4 sm:$0xff]   ;;  %v10720_v31 = vld [vmem:[%s16954_s4 + $0x4ac] ss:$16 sps:$4 sm:$0xff]  }
 0x1eb   :  { %5694 = vmatpush1.bf16.msra.mxu1 %v10706_v37  ;;  %v2049_v45 = vpack.c.bf16 %v13972_v19, %v14012_v59  ;;  %5111 = vmatprep.subr.bf16.mxu0 %v10711_v2  ;;  %v1687_v29 = vsel %vm1630_vm3, %v1685_v60, %v1686_v58  ;;  %v14027_v63 = vpack.c.bf16 %v1795_v18, %v1786_v5  ;;  %vm1473_vm14 = vcmp.ge.f32.partialorder %v1424_v1, 0.0  ;;  %v10715_v20 = vld [vmem:[%s16954_s4 + $0x4a0] ss:$16 sps:$4 sm:$0xff]  }
 0x1ec   :  { %v1530_v7 = vmul.f32 %v13095_v42, %v1424_v1  ;;  %5695 = vmatprep.subr.bf16.mxu1 %v10714_v55  ;;  %v2065_v33 = vpack.c.bf16 %v1696_v9, %v1687_v29  ;;  %v14039_v37 = vsel %vm1434_vm13, %v17303_v24, %v1491_v25  ;;  %v1647_v58 = vrot.slane %v14005_v43, 1  ;;  %v10718_v55 = vld [vmem:[%s16954_s4 + $0x4a8] ss:$16 sps:$4 sm:$0xff]   ;;  %v10723_v24 = vld [vmem:[%s16954_s4 + $0x4c4] ss:$16 sps:$4 sm:$0xff]  }
 0x1ed   :  { %5083 = vmatmul.mubr.bf16.gmra.mrb[104].mxu0 %v2049_v45  ;;  %5667 = vmatmul.mubr.bf16.gmra.mrb[104].mxu1 %v2049_v45  ;;  %v1524_v2 = vmul.f32 %v13095_v42, %v1418_v50  ;;  %vm1467_vm15 = vcmp.ge.f32.partialorder %v1418_v50, 0.0  ;;  %v1638_v25 = vrot.slane %v14039_v37, 1  ;;  %v1646_v39 = vrot.slane %v13546_v34, 1  ;;  %v10726_v9 = vld [vmem:[%s16954_s4 + $0x4cc] ss:$16 sps:$4 sm:$0xff]  }
 0x1ee   :  { %5092 = vmatprep.mubr.bf16.mxu0 %v2065_v33  ;;  %5112 = vmatpush1.bf16.msra.mxu0 %v10709_v36  ;;  %v14054_v60 = vsel %vm1473_vm14, %v1424_v1, %v1530_v7  ;;  %v1637_v57 = vrot.slane %v13862_v22, 1  ;;  %v10721_v18 = vld [vmem:[%s16954_s4 + $0x4c0] ss:$16 sps:$4 sm:$0xff]   ;;  %v10724_v45 = vld [vmem:[%s16954_s4 + $0x4c8] ss:$16 sps:$4 sm:$0xff]   ;;  %vm1823_vm0 = vcmask 1044480  }
 0x1ef   :  { %5676 = vmatprep.mubr.bf16.mxu1 %v2065_v33  ;;  %5696 = vmatpush1.bf16.msra.mxu1 %v10712_v48  ;;  %v1648_v36 = vsel %vm1630_vm3, %v1646_v39, %v1647_v58  ;;  %v14061_v5 = vsel %vm1467_vm15, %v1418_v50, %v1524_v2  ;;  %v10729_v50 = vld [vmem:[%s16954_s4 + $0x4e4] ss:$16 sps:$4 sm:$0xff]   ;;  %v10732_v7 = vld [vmem:[%s16954_s4 + $0x4ec] ss:$16 sps:$4 sm:$0xff]   ;;  %v10727_v33 = vld [vmem:[%s16954_s4 + $0x4e0] ss:$16 sps:$4 sm:$0xff]  }
 0x1f0   :  { %5113 = vmatprep.subr.bf16.mxu0 %v10717_v23  ;;  %5697 = vmatprep.subr.bf16.mxu1 %v10720_v31  ;;  %v2064_v1 = vpack.c.bf16 %v14054_v60, %v14061_v5  ;;  %v1639_v48 = vsel %vm1630_vm3, %v1637_v57, %v1638_v25  ;;  %v1837_v23 = vrot.slane %v13549_v44, 3  ;;  %v10730_v31 = vld [vmem:[%s16954_s4 + $0x4e8] ss:$16 sps:$4 sm:$0xff]   ;;  %v10735_v58 = vld [vmem:[%s16954_s4 + $0x504] ss:$16 sps:$4 sm:$0xff]   ;;  %vm1920_vm2 = vcmask 1043456  }
 0x1f1   :  { %v2022_v29 = vpack.c.bf16 %v1648_v36, %v1639_v48  ;;  %v10738_v2 = vld [vmem:[%s16954_s4 + $0x50c] ss:$16 sps:$4 sm:$0xff]   ;;  %v10736_v25 = vld [vmem:[%s16954_s4 + $0x508] ss:$16 sps:$4 sm:$0xff]   ;;  %v10741_v39 = vld [vmem:[%s16954_s4 + $0x524] ss:$16 sps:$4 sm:$0xff]  }
 0x1f2   :  { %5114 = vmatpush1.bf16.msra.mxu0 %v10715_v20  ;;  %v1836_v20 = vrot.slane %v17296_v13, 3  ;;  %v10744_v36 = vld [vmem:[%s16954_s4 + $0x52c] ss:$16 sps:$4 sm:$0xff]   ;;  %vm6809_vm15 = vcmask 1041409  }
 0x1f3   :  { %5698 = vmatpush1.bf16.msra.mxu1 %v10718_v55  ;;  %5115 = vmatprep.subr.bf16.mxu0 %v10723_v24  ;;  %v10733_v55 = vld [vmem:[%s16954_s4 + $0x500] ss:$16 sps:$4 sm:$0xff]   ;;  %v1827_v24 = vrot.slane %v17295_v6, 3 }
 0x1f4   :  { %5699 = vmatprep.subr.bf16.mxu1 %v10726_v9  ;;  %v1828_v9 = vrot.slane %v13795_v35, 3  ;;  %v1838_v57 = vsel %vm1823_vm0, %v1836_v20, %v1837_v23  ;;  %v1855_v23 = vrot.slane %v13747_v54, 3  ;;  %v10745_v20 = vld [vmem:[%s16954_s4 + $0x540] ss:$16 sps:$4 sm:$0xff]  }
 0x1f5   :  { %5093 = vmatmul.mubr.bf16.gmra.mrb[108].mxu0 %v2064_v1  ;;  %5677 = vmatmul.mubr.bf16.gmra.mrb[108].mxu1 %v2064_v1  ;;  %v10739_v1 = vld [vmem:[%s16954_s4 + $0x520] ss:$16 sps:$4 sm:$0xff]  }
 0x1f6   :  { %5116 = vmatpush1.bf16.msra.mxu0 %v10721_v18  ;;  %5135 = vmatprep.mubr.bf16.mxu0 %v2022_v29  ;;  %v1829_v18 = vsel %vm1823_vm0, %v1827_v24, %v1828_v9  ;;  %v1864_v9 = vrot.slane %v13781_v15, 3 }
 0x1f7   :  { %5700 = vmatpush1.bf16.msra.mxu1 %v10724_v45  ;;  %5719 = vmatprep.mubr.bf16.mxu1 %v2022_v29  ;;  %v10742_v45 = vld [vmem:[%s16954_s4 + $0x528] ss:$16 sps:$4 sm:$0xff]   ;;  %v14114_v48 = vpack.c.bf16 %v1838_v57, %v1829_v18  ;;  %v10747_v29 = vld [vmem:[%s16954_s4 + $0x544] ss:$16 sps:$4 sm:$0xff]   ;;  %v1872_v57 = vrot.slane %v13474_v4, 3 }
 0x1f8   :  { %5117 = vmatprep.subr.bf16.mxu0 %v10729_v50  ;;  %5701 = vmatprep.subr.bf16.mxu1 %v10732_v7  ;;  %v1845_v50 = vrot.slane %v13289_v62, 3  ;;  %v1846_v7 = vrot.slane %v13726_v0, 3  ;;  %v10756_v18 = vld [vmem:[%s16954_s4 + $0x56c] ss:$16 sps:$4 sm:$0xff]  }
 0x1fa   :  { %5118 = vmatpush1.bf16.msra.mxu0 %v10727_v33  ;;  %v1854_v33 = vrot.slane %v17299_v40, 3 }
 0x1fb   :  { %5702 = vmatpush1.bf16.msra.mxu1 %v10730_v31  ;;  %5119 = vmatprep.subr.bf16.mxu0 %v10735_v58  ;;  %v10750_v31 = vld [vmem:[%s16954_s4 + $0x54c] ss:$16 sps:$4 sm:$0xff]   ;;  %v1847_v58 = vsel %vm1823_vm0, %v1845_v50, %v1846_v7  ;;  %v10754_v50 = vld [vmem:[%s16954_s4 + $0x568] ss:$16 sps:$4 sm:$0xff]  }
 0x1fc   :  { %5703 = vmatprep.subr.bf16.mxu1 %v10738_v2  ;;  %v1856_v2 = vsel %vm1823_vm0, %v1854_v33, %v1855_v23  ;;  %v10759_v33 = vld [vmem:[%s16954_s4 + $0x584] ss:$16 sps:$4 sm:$0xff]   ;;  %v1881_v23 = vrot.slane %v13660_v61, 3 }
 0x1fd   :  { %v14134_v24 = vpack.c.bf16 %v1856_v2, %v1847_v58  ;;  %v1890_v58 = vrot.slane %v13650_v26, 3  ;;  %v1891_v2 = vrot.slane %v13853_v32, 3 }
 0x1fe   :  { %5120 = vmatpush1.bf16.msra.mxu0 %v10733_v55  ;;  %v10748_v55 = vld [vmem:[%s16954_s4 + $0x548] ss:$16 sps:$4 sm:$0xff]  }
 0x1ff   :  { %5704 = vmatpush1.bf16.msra.mxu1 %v10736_v25  ;;  %5121 = vmatprep.subr.bf16.mxu0 %v10741_v39  ;;  %v10753_v25 = vld [vmem:[%s16954_s4 + $0x564] ss:$16 sps:$4 sm:$0xff]   ;;  %v1863_v39 = vrot.slane %v13492_v16, 3 }
 0x200   :  { %5705 = vmatprep.subr.bf16.mxu1 %v10744_v36  ;;  %v1873_v36 = vrot.slane %v13797_v41, 3 }
 0x202   :  { %5122 = vmatpush1.bf16.msra.mxu0 %v10739_v1  ;;  %v1865_v1 = vsel %vm1823_vm0, %v1863_v39, %v1864_v9  ;;  %v17305_v39 = vld [vmem:[#allocation7_spill] sm:$0xff] }
 0x203   :  { %5706 = vmatpush1.bf16.msra.mxu1 %v10742_v45  ;;  %5123 = vmatprep.subr.bf16.mxu0 %v10747_v29  ;;  %v1874_v45 = vsel %vm1823_vm0, %v1872_v57, %v1873_v36  ;;  %v10751_v29 = vld [vmem:[%s16954_s4 + $0x560] ss:$16 sps:$4 sm:$0xff]   ;;  %v1403_v9 = vadd.f32 %v13369_v28, %v17305_v39  ;;  %v1961_v39 = vrot.slane %v13781_v15, 4 }
 0x204   :  { %5707 = vmatprep.subr.bf16.mxu1 %v10750_v31  ;;  %v14154_v7 = vpack.c.bf16 %v1874_v45, %v1865_v1  ;;  %v1882_v31 = vrot.slane %v13833_v11, 3  ;;  %v10757_v57 = vld [vmem:[%s16954_s4 + $0x580] ss:$16 sps:$4 sm:$0xff]   ;;  %v17306_v1 = vld [vmem:[#allocation8_spill] sm:$0xff] }
 0x205   :  { %v10760_v45 = vld [vmem:[%s16954_s4 + $0x588] ss:$16 sps:$4 sm:$0xff]   ;;  %vm1452_vm4 = vcmp.ge.f32.partialorder %v1403_v9, 0.0  ;;  %v10769_v15 = vld [vmem:[%s16954_s4 + $0x5c0] ss:$16 sps:$4 sm:$0xff]  }
 0x206   :  { %5124 = vmatpush1.bf16.msra.mxu0 %v10745_v20  ;;  %v10762_v20 = vld [vmem:[%s16954_s4 + $0x58c] ss:$16 sps:$4 sm:$0xff]  }
 0x207   :  { %5708 = vmatpush1.bf16.msra.mxu1 %v10748_v55  ;;  %5125 = vmatprep.subr.bf16.mxu0 %v10753_v25  ;;  %v1883_v55 = vsel %vm1823_vm0, %v1881_v23, %v1882_v31  ;;  %v1892_v25 = vsel %vm1823_vm0, %v1890_v58, %v1891_v2  ;;  %v10765_v23 = vld [vmem:[%s16954_s4 + $0x5a4] ss:$16 sps:$4 sm:$0xff]   ;;  %v10768_v31 = vld [vmem:[%s16954_s4 + $0x5ac] ss:$16 sps:$4 sm:$0xff]   ;;  %v1942_v58 = vrot.slane %v13289_v62, 4  ;;  %v1509_v2 = vmul.f32 %v13095_v42, %v1403_v9 }
 0x208   :  { %5709 = vmatprep.subr.bf16.mxu1 %v10756_v18  ;;  %v14173_v36 = vpack.c.bf16 %v1892_v25, %v1883_v55  ;;  %v1397_v18 = vadd.f32 %v13369_v28, %v17306_v1  ;;  %v10763_v55 = vld [vmem:[%s16954_s4 + $0x5a0] ss:$16 sps:$4 sm:$0xff]   ;;  %v10766_v62 = vld [vmem:[%s16954_s4 + $0x5a8] ss:$16 sps:$4 sm:$0xff]   ;;  %v1960_v1 = vrot.slane %v13492_v16, 4 }
 0x209   :  { %v10777_v16 = vld [vmem:[%s16954_s4 + $0x5e4] ss:$16 sps:$4 sm:$0xff]  }
 0x20a   :  { %5126 = vmatpush1.bf16.msra.mxu0 %v10751_v29  ;;  %v1943_v29 = vrot.slane %v13726_v0, 4  ;;  %v1503_v25 = vmul.f32 %v13095_v42, %v1397_v18  ;;  %vm1446_vm5 = vcmp.ge.f32.partialorder %v1397_v18, 0.0 }
 0x20b   :  { %5710 = vmatpush1.bf16.msra.mxu1 %v10754_v50  ;;  %5127 = vmatprep.subr.bf16.mxu0 %v10759_v33  ;;  %v1951_v50 = vrot.slane %v17299_v40, 4  ;;  %v1952_v33 = vrot.slane %v13747_v54, 4  ;;  %v10771_v40 = vld [vmem:[%s16954_s4 + $0x5c4] ss:$16 sps:$4 sm:$0xff]  }
 0x20c   :  { %5711 = vmatprep.subr.bf16.mxu1 %v10762_v20  ;;  %v1944_v0 = vsel %vm1920_vm2, %v1942_v58, %v1943_v29  ;;  %v14212_v29 = vsel %vm1452_vm4, %v1403_v9, %v1509_v2  ;;  %v17307_v58 = vld [vmem:[#allocation10_spill] sm:$0xff]  ;;  %v1979_v9 = vrot.slane %v13833_v11, 4  ;;  %v17308_v2 = vld [vmem:[#allocation11_spill] sm:$0xff] }
 0x20d   :  { %v1953_v20 = vsel %vm1920_vm2, %v1951_v50, %v1952_v33  ;;  %v1415_v50 = vadd.f32 %v13369_v28, %v17307_v58  ;;  %v10775_v11 = vld [vmem:[%s16954_s4 + $0x5e0] ss:$16 sps:$4 sm:$0xff]  }
 0x20e   :  { %5128 = vmatpush1.bf16.msra.mxu0 %v10757_v57  ;;  %v14203_v54 = vpack.c.bf16 %v1953_v20, %v1944_v0  ;;  %v10774_v57 = vld [vmem:[%s16954_s4 + $0x5cc] ss:$16 sps:$4 sm:$0xff]   ;;  %v14221_v0 = vsel %vm1446_vm5, %v1397_v18, %v1503_v25  ;;  %v1978_v20 = vrot.slane %v13660_v61, 4  ;;  %v1987_v25 = vrot.slane %v13650_v26, 4  ;;  %v10783_v26 = vld [vmem:[%s16954_s4 + $0x604] ss:$16 sps:$4 sm:$0xff]  }
 0x20f   :  { %5712 = vmatpush1.bf16.msra.mxu1 %v10760_v45  ;;  %5129 = vmatprep.subr.bf16.mxu0 %v10765_v23  ;;  %v1969_v45 = vrot.slane %v13474_v4, 4  ;;  %v1970_v23 = vrot.slane %v13797_v41, 4  ;;  %v10772_v4 = vld [vmem:[%s16954_s4 + $0x5c8] ss:$16 sps:$4 sm:$0xff]   ;;  %v10780_v18 = vld [vmem:[%s16954_s4 + $0x5ec] ss:$16 sps:$4 sm:$0xff]  }
 0x210   :  { %5713 = vmatprep.subr.bf16.mxu1 %v10768_v31  ;;  %v1962_v31 = vsel %vm1920_vm2, %v1960_v1, %v1961_v39  ;;  %v1521_v39 = vmul.f32 %v13095_v42, %v1415_v50  ;;  %v1980_v1 = vsel %vm1920_vm2, %v1978_v20, %v1979_v9  ;;  %vm1464_vm6 = vcmp.ge.f32.partialorder %v1415_v50, 0.0  ;;  %v10781_v9 = vld [vmem:[%s16954_s4 + $0x600] ss:$16 sps:$4 sm:$0xff]  }
 0x211   :  { %v1971_v33 = vsel %vm1920_vm2, %v1969_v45, %v1970_v23  ;;  %v1664_v45 = vrot.slane %v13891_v3, 1  ;;  %v1421_v20 = vadd.f32 %v13369_v28, %v13538_v8  ;;  %v10787_v8 = vld [vmem:[%s16954_s4 + $0x620] ss:$16 sps:$4 sm:$0xff]  }
 0x212   :  { %5130 = vmatpush1.bf16.msra.mxu0 %v10763_v55  ;;  %v14229_v41 = vpack.c.bf16 %v1971_v33, %v1962_v31  ;;  %v1409_v55 = vadd.f32 %v13369_v28, %v17308_v2  ;;  %v1655_v31 = vrot.slane %v13922_v14, 1 }
 0x213   :  { %5714 = vmatpush1.bf16.msra.mxu1 %v10766_v62  ;;  %5131 = vmatprep.subr.bf16.mxu0 %v10771_v40  ;;  %v1988_v62 = vrot.slane %v13853_v32, 4  ;;  %v1665_v40 = vrot.slane %v14212_v29, 1  ;;  %v1656_v32 = vrot.slane %v14221_v0, 1  ;;  %vm1470_vm9 = vcmp.ge.f32.partialorder %v1421_v20, 0.0 }
 0x214   :  { %5715 = vmatprep.subr.bf16.mxu1 %v10774_v57  ;;  %v10778_v57 = vld [vmem:[%s16954_s4 + $0x5e8] ss:$16 sps:$4 sm:$0xff]   ;;  %v1515_v58 = vmul.f32 %v13095_v42, %v1409_v55  ;;  %vm1458_vm7 = vcmp.ge.f32.partialorder %v1409_v55, 0.0 }
 0x215   :  { %v1989_v61 = vsel %vm1920_vm2, %v1987_v25, %v1988_v62  ;;  %v1666_v33 = vsel %vm1630_vm3, %v1664_v45, %v1665_v40  ;;  %v1657_v2 = vsel %vm1630_vm3, %v1655_v31, %v1656_v32  ;;  %v10789_v25 = vld [vmem:[%s16954_s4 + $0x624] ss:$16 sps:$4 sm:$0xff]   ;;  %v10793_v32 = vld [vmem:[%s16954_s4 + $0x640] ss:$16 sps:$4 sm:$0xff]  }
 0x216   :  { %5132 = vmatpush1.bf16.msra.mxu0 %v10769_v15  ;;  %v14255_v23 = vpack.c.bf16 %v1989_v61, %v1980_v1  ;;  %v10786_v15 = vld [vmem:[%s16954_s4 + $0x60c] ss:$16 sps:$4 sm:$0xff]   ;;  %v1673_v61 = vrot.slane %v14012_v59, 1 }
 0x217   :  { %5716 = vmatpush1.bf16.msra.mxu1 %v10772_v4  ;;  %5133 = vmatprep.subr.bf16.mxu0 %v10777_v16  ;;  %v14263_v4 = vsel %vm1464_vm6, %v1415_v50, %v1521_v39  ;;  %v1427_v16 = vadd.f32 %v13369_v28, %v13665_v53  ;;  %v10784_v50 = vld [vmem:[%s16954_s4 + $0x608] ss:$16 sps:$4 sm:$0xff]   ;;  %v2037_v53 = vpack.c.bf16 %v1666_v33, %v1657_v2  ;;  %v1682_v39 = vrot.slane %v13972_v19, 1  ;;  %v10798_v1 = vld [vmem:[%s16954_s4 + $0x64c] ss:$16 sps:$4 sm:$0xff]  }
 0x218   :  { %5717 = vmatprep.subr.bf16.mxu1 %v10780_v18  ;;  %v14271_v18 = vsel %vm1458_vm7, %v1409_v55, %v1515_v58  ;;  %v10792_v55 = vld [vmem:[%s16954_s4 + $0x62c] ss:$16 sps:$4 sm:$0xff]   ;;  %v1683_v62 = vrot.slane %v14263_v4, 1  ;;  %v10801_v33 = vld [vmem:[%s16954_s4 + $0x664] ss:$16 sps:$4 sm:$0xff]  }
 0x219   :  { %v1533_v28 = vmul.f32 %v13095_v42, %v1427_v16  ;;  %vm1476_vm8 = vcmp.ge.f32.partialorder %v1427_v16, 0.0  ;;  %v1674_v40 = vrot.slane %v14271_v18, 1  ;;  %v10799_v2 = vld [vmem:[%s16954_s4 + $0x660] ss:$16 sps:$4 sm:$0xff]  }
 0x21a   :  { %5134 = vmatpush1.bf16.msra.mxu0 %v10775_v11  ;;  %v1527_v11 = vmul.f32 %v13095_v42, %v1421_v20  ;;  %v1684_v42 = vsel %vm1630_vm3, %v1682_v39, %v1683_v62 }
 0x21b   :  { %5718 = vmatpush1.bf16.msra.mxu1 %v10778_v57  ;;  %5176 = vmatprep.subr.bf16.mxu0 %v10783_v26  ;;  %v10795_v57 = vld [vmem:[%s16954_s4 + $0x644] ss:$16 sps:$4 sm:$0xff]   ;;  %v14306_v26 = vsel %vm1476_vm8, %v1427_v16, %v1533_v28  ;;  %v1675_v45 = vsel %vm1630_vm3, %v1673_v61, %v1674_v40  ;;  %v10804_v16 = vld [vmem:[%s16954_s4 + $0x66c] ss:$16 sps:$4 sm:$0xff]   ;;  %v10805_v28 = vld [vmem:[%s16954_s4 + $0x680] ss:$16 sps:$4 sm:$0xff]  }
 0x21c   :  { %5760 = vmatprep.subr.bf16.mxu1 %v10786_v15  ;;  %v14312_v58 = vsel %vm1470_vm9, %v1421_v20, %v1527_v11  ;;  %v10796_v15 = vld [vmem:[%s16954_s4 + $0x648] ss:$16 sps:$4 sm:$0xff]   ;;  %v2052_v31 = vpack.c.bf16 %v1684_v42, %v1675_v45  ;;  %v10813_v11 = vld [vmem:[%s16954_s4 + $0x6a4] ss:$16 sps:$4 sm:$0xff]   ;;  %v1731_v61 = vrot.slane %v13795_v35, 2  ;;  %v1739_v42 = vrot.slane %v17296_v13, 2 }
 0x21d   :  { %5136 = vmatmul.mubr.bf16.vlgmr.msra.gmra.mrb[96].mxu0 %v13830_v30  ;;  %v1692_v20 = vrot.slane %v14312_v58, 1  ;;  %v10808_v40 = vld [vmem:[%s16954_s4 + $0x688] ss:$16 sps:$4 sm:$0xff]   ;;  %v10822_v45 = vld [vmem:[%s16954_s4 + $0x6cc] ss:$16 sps:$4 sm:$0xff]   ;;  %vm6811_vm8 = vcmask 1042434  }
 0x21e   :  { %5720 = vmatmul.mubr.bf16.vlgmr.msra.gmra.mrb[96].mxu1 %v13830_v30  ;;  %5145 = vmatprep.mubr.bf16.mxu0 %v2037_v53  ;;  %v10790_v30 = vld [vmem:[%s16954_s4 + $0x628] ss:$16 sps:$4 sm:$0xff]  }
 0x21f   :  { %5177 = vmatpush1.bf16.msra.mxu0 %v10781_v9  ;;  %5729 = vmatprep.mubr.bf16.mxu1 %v2037_v53  ;;  %v1701_v9 = vrot.slane %v14306_v26, 1  ;;  %v10802_v53 = vld [vmem:[%s16954_s4 + $0x668] ss:$16 sps:$4 sm:$0xff]  }
 0x220   :  { %5761 = vmatpush1.bf16.msra.mxu1 %v10784_v50  ;;  %5178 = vmatprep.subr.bf16.mxu0 %v10789_v25  ;;  %v1700_v50 = vrot.slane %v14054_v60, 1  ;;  %v10810_v25 = vld [vmem:[%s16954_s4 + $0x68c] ss:$16 sps:$4 sm:$0xff]  }
 0x221   :  { %5762 = vmatprep.subr.bf16.mxu1 %v10792_v55  ;;  %v1691_v55 = vrot.slane %v14061_v5, 1 }
 0x222   :  { %v1702_v62 = vsel %vm1630_vm3, %v1700_v50, %v1701_v9  ;;  %v10820_v9 = vld [vmem:[%s16954_s4 + $0x6c8] ss:$16 sps:$4 sm:$0xff]   ;;  %v10828_v50 = vld [vmem:[%s16954_s4 + $0x6ec] ss:$16 sps:$4 sm:$0xff]  }
 0x223   :  { %5179 = vmatpush1.bf16.msra.mxu0 %v10787_v8  ;;  %v1693_v8 = vsel %vm1630_vm3, %v1691_v55, %v1692_v20  ;;  %v10825_v20 = vld [vmem:[%s16954_s4 + $0x6e4] ss:$16 sps:$4 sm:$0xff]   ;;  %v10829_v55 = vld [vmem:[%s16954_s4 + $0x700] ss:$16 sps:$4 sm:$0xff]  }
 0x224   :  { %5763 = vmatpush1.bf16.msra.mxu1 %v10790_v30  ;;  %5180 = vmatprep.subr.bf16.mxu0 %v10795_v57  ;;  %v2067_v39 = vpack.c.bf16 %v1702_v62, %v1693_v8  ;;  %v10816_v30 = vld [vmem:[%s16954_s4 + $0x6ac] ss:$16 sps:$4 sm:$0xff]   ;;  %v1740_v57 = vrot.slane %v13549_v44, 2  ;;  %v10832_v62 = vld [vmem:[%s16954_s4 + $0x708] ss:$16 sps:$4 sm:$0xff]  }
 0x225   :  { %5146 = vmatmul.mubr.bf16.gmra.mrb[100].mxu0 %v13848_v52  ;;  %5764 = vmatprep.subr.bf16.mxu1 %v10798_v1  ;;  %v10811_v1 = vld [vmem:[%s16954_s4 + $0x6a0] ss:$16 sps:$4 sm:$0xff]   ;;  %v10840_v8 = vld [vmem:[%s16954_s4 + $0x72c] ss:$16 sps:$4 sm:$0xff]  }
 0x226   :  { %5730 = vmatmul.mubr.bf16.gmra.mrb[100].mxu1 %v13848_v52  ;;  %5155 = vmatprep.mubr.bf16.mxu0 %v2052_v31  ;;  %v10807_v52 = vld [vmem:[%s16954_s4 + $0x684] ss:$16 sps:$4 sm:$0xff]  }
 0x227   :  { %5181 = vmatpush1.bf16.msra.mxu0 %v10793_v32  ;;  %5739 = vmatprep.mubr.bf16.mxu1 %v2052_v31  ;;  %v10814_v32 = vld [vmem:[%s16954_s4 + $0x6a8] ss:$16 sps:$4 sm:$0xff]   ;;  %v1741_v31 = vsel %vm482_vm1, %v1739_v42, %v1740_v57  ;;  %v10841_v57 = vld [vmem:[%s16954_s4 + $0x740] ss:$16 sps:$4 sm:$0xff]   ;;  %v10852_v42 = vld [vmem:[%s16954_s4 + $0x76c] ss:$16 sps:$4 sm:$0xff]  }
 0x228   :  { %5765 = vmatpush1.bf16.msra.mxu1 %v10796_v15  ;;  %5182 = vmatprep.subr.bf16.mxu0 %v10801_v33  ;;  %v1730_v15 = vrot.slane %v17295_v6, 2  ;;  %v10817_v33 = vld [vmem:[%s16954_s4 + $0x6c0] ss:$16 sps:$4 sm:$0xff]  }
 0x229   :  { %5766 = vmatprep.subr.bf16.mxu1 %v10804_v16 }
 0x22a   :  { %v1732_v16 = vsel %vm482_vm1, %v1730_v15, %v1731_v61  ;;  %v10849_v61 = vld [vmem:[%s16954_s4 + $0x764] ss:$16 sps:$4 sm:$0xff]   ;;  %v10858_v15 = vld [vmem:[%s16954_s4 + $0x78c] ss:$16 sps:$4 sm:$0xff]  }
 0x22b   :  { %5183 = vmatpush1.bf16.msra.mxu0 %v10799_v2  ;;  %v2024_v2 = vpack.c.bf16 %v1741_v31, %v1732_v16  ;;  %v10853_v31 = vld [vmem:[%s16954_s4 + $0x780] ss:$16 sps:$4 sm:$0xff]   ;;  %v10861_v16 = vld [vmem:[%s16954_s4 + $0x7a4] ss:$16 sps:$4 sm:$0xff]  }
 0x22c   :  { %5767 = vmatpush1.bf16.msra.mxu1 %v10802_v53  ;;  %5184 = vmatprep.subr.bf16.mxu0 %v10807_v52  ;;  %v10823_v53 = vld [vmem:[%s16954_s4 + $0x6e0] ss:$16 sps:$4 sm:$0xff]   ;;  %v10826_v52 = vld [vmem:[%s16954_s4 + $0x6e8] ss:$16 sps:$4 sm:$0xff]  }
 0x22d   :  { %5156 = vmatmul.mubr.bf16.gmra.mrb[104].mxu0 %v13883_v38  ;;  %5768 = vmatprep.subr.bf16.mxu1 %v10810_v25  ;;  %v10831_v25 = vld [vmem:[%s16954_s4 + $0x704] ss:$16 sps:$4 sm:$0xff]  }
 0x22e   :  { %5740 = vmatmul.mubr.bf16.gmra.mrb[104].mxu1 %v13883_v38  ;;  %5165 = vmatprep.mubr.bf16.mxu0 %v2067_v39  ;;  %v10819_v38 = vld [vmem:[%s16954_s4 + $0x6c4] ss:$16 sps:$4 sm:$0xff]  }
 0x22f   :  { %5185 = vmatpush1.bf16.msra.mxu0 %v10805_v28  ;;  %5749 = vmatprep.mubr.bf16.mxu1 %v2067_v39  ;;  %v10837_v28 = vld [vmem:[%s16954_s4 + $0x724] ss:$16 sps:$4 sm:$0xff]   ;;  %v10838_v39 = vld [vmem:[%s16954_s4 + $0x728] ss:$16 sps:$4 sm:$0xff]  }
 0x230   :  { %5769 = vmatpush1.bf16.msra.mxu1 %v10808_v40  ;;  %5186 = vmatprep.subr.bf16.mxu0 %v10813_v11  ;;  %v10835_v40 = vld [vmem:[%s16954_s4 + $0x720] ss:$16 sps:$4 sm:$0xff]   ;;  %v10843_v11 = vld [vmem:[%s16954_s4 + $0x744] ss:$16 sps:$4 sm:$0xff]  }
 0x231   :  { %5770 = vmatprep.subr.bf16.mxu1 %v10816_v30  ;;  %v10846_v30 = vld [vmem:[%s16954_s4 + $0x74c] ss:$16 sps:$4 sm:$0xff]  }
 0x233   :  { %5187 = vmatpush1.bf16.msra.mxu0 %v10811_v1  ;;  %v10844_v1 = vld [vmem:[%s16954_s4 + $0x748] ss:$16 sps:$4 sm:$0xff]  }
 0x234   :  { %5771 = vmatpush1.bf16.msra.mxu1 %v10814_v32  ;;  %5188 = vmatprep.subr.bf16.mxu0 %v10819_v38  ;;  %v10847_v32 = vld [vmem:[%s16954_s4 + $0x760] ss:$16 sps:$4 sm:$0xff]   ;;  %v10850_v38 = vld [vmem:[%s16954_s4 + $0x768] ss:$16 sps:$4 sm:$0xff]  }
 0x235   :  { %5166 = vmatmul.mubr.bf16.gmra.mrb[108].mxu0 %v13916_v12  ;;  %5772 = vmatprep.subr.bf16.mxu1 %v10822_v45  ;;  %v10855_v45 = vld [vmem:[%s16954_s4 + $0x784] ss:$16 sps:$4 sm:$0xff]  }
 0x236   :  { %5750 = vmatmul.mubr.bf16.gmra.mrb[108].mxu1 %v13916_v12  ;;  %5208 = vmatprep.mubr.bf16.mxu0 %v2024_v2  ;;  %v10834_v12 = vld [vmem:[%s16954_s4 + $0x70c] ss:$16 sps:$4 sm:$0xff]  }
 0x237   :  { %5189 = vmatpush1.bf16.msra.mxu0 %v10817_v33  ;;  %5792 = vmatprep.mubr.bf16.mxu1 %v2024_v2  ;;  %v10856_v33 = vld [vmem:[%s16954_s4 + $0x788] ss:$16 sps:$4 sm:$0xff]   ;;  %v10859_v2 = vld [vmem:[%s16954_s4 + $0x7a0] ss:$16 sps:$4 sm:$0xff]  }
 0x238   :  { %5773 = vmatpush1.bf16.msra.mxu1 %v10820_v9  ;;  %5190 = vmatprep.subr.bf16.mxu0 %v10825_v20  ;;  %v10864_v9 = vld [vmem:[%s16954_s4 + $0x7ac] ss:$16 sps:$4 sm:$0xff]   ;;  %v10862_v20 = vld [vmem:[%s16954_s4 + $0x7a8] ss:$16 sps:$4 sm:$0xff]  }
 0x239   :  { %5774 = vmatprep.subr.bf16.mxu1 %v10828_v50  ;;  %v10867_v50 = vld [vmem:[%s16954_s4 + $0x7c4] ss:$16 sps:$4 sm:$0xff]  }
 0x23b   :  { %5191 = vmatpush1.bf16.msra.mxu0 %v10823_v53  ;;  %v10870_v53 = vld [vmem:[%s16954_s4 + $0x7cc] ss:$16 sps:$4 sm:$0xff]  }
 0x23c   :  { %5775 = vmatpush1.bf16.msra.mxu1 %v10826_v52  ;;  %5192 = vmatprep.subr.bf16.mxu0 %v10831_v25  ;;  %v10865_v52 = vld [vmem:[%s16954_s4 + $0x7c0] ss:$16 sps:$4 sm:$0xff]   ;;  %v10868_v25 = vld [vmem:[%s16954_s4 + $0x7c8] ss:$16 sps:$4 sm:$0xff]  }
 0x23d   :  { %5776 = vmatprep.subr.bf16.mxu1 %v10834_v12  ;;  %v10873_v12 = vld [vmem:[%s16954_s4 + $0x7e4] ss:$16 sps:$4 sm:$0xff]  }
 0x23f   :  { %5193 = vmatpush1.bf16.msra.mxu0 %v10829_v55  ;;  %v1737_v55 = vrot.slane %v13574_v21, 2 }
 0x240   :  { %5777 = vmatpush1.bf16.msra.mxu1 %v10832_v62  ;;  %5194 = vmatprep.subr.bf16.mxu0 %v10837_v28  ;;  %v10876_v62 = vld [vmem:[%s16954_s4 + $0x7ec] ss:$16 sps:$4 sm:$0xff]  }
 0x241   :  { %5778 = vmatprep.subr.bf16.mxu1 %v10840_v8  ;;  %v17309_v28 = vld [vmem:[#allocation47_spill] sm:$0xff] }
 0x242   :  { %v1736_v8 = vrot.slane %v17309_v28, 2 }
 0x243   :  { %5195 = vmatpush1.bf16.msra.mxu0 %v10835_v40  ;;  %v10871_v40 = vld [vmem:[%s16954_s4 + $0x7e0] ss:$16 sps:$4 sm:$0xff]  }
 0x244   :  { %5779 = vmatpush1.bf16.msra.mxu1 %v10838_v39  ;;  %5196 = vmatprep.subr.bf16.mxu0 %v10843_v11  ;;  %v17310_v39 = vld [vmem:[#allocation55_spill] sm:$0xff] }
 0x245   :  { %5780 = vmatprep.subr.bf16.mxu1 %v10846_v30  ;;  %v1728_v11 = vrot.slane %v17310_v39, 2  ;;  %v10874_v30 = vld [vmem:[%s16954_s4 + $0x7e8] ss:$16 sps:$4 sm:$0xff]  }
 0x247   :  { %5197 = vmatpush1.bf16.msra.mxu0 %v10841_v57  ;;  %v10879_v57 = vld [vmem:[%s16954_s4 + $0x804] ss:$16 sps:$4 sm:$0xff]  }
 0x248   :  { %5781 = vmatpush1.bf16.msra.mxu1 %v10844_v1  ;;  %5198 = vmatprep.subr.bf16.mxu0 %v10849_v61  ;;  %v17311_v1 = vld [vmem:[#allocation48_spill] sm:$0xff] }
 0x249   :  { %5782 = vmatprep.subr.bf16.mxu1 %v10852_v42  ;;  %v1727_v61 = vrot.slane %v17311_v1, 2  ;;  %v1738_v42 = vsel %vm482_vm1, %v1736_v8, %v1737_v55  ;;  %v17315_v55 = vld [vmem:[#allocation52_spill] sm:$0xff] }
 0x24b   :  { %5199 = vmatpush1.bf16.msra.mxu0 %v10847_v32  ;;  %v10882_v32 = vld [vmem:[%s16954_s4 + $0x80c] ss:$16 sps:$4 sm:$0xff]  }
 0x24c   :  { %5783 = vmatpush1.bf16.msra.mxu1 %v10850_v38  ;;  %5200 = vmatprep.subr.bf16.mxu0 %v10855_v45  ;;  %v1729_v38 = vsel %vm482_vm1, %v1727_v61, %v1728_v11  ;;  %v10892_v61 = vld [vmem:[%s16954_s4 + $0x848] ss:$16 sps:$4 sm:$0xff]  }
 0x24d   :  { %5784 = vmatprep.subr.bf16.mxu1 %v10858_v15  ;;  %v2023_v45 = vpack.c.bf16 %v1738_v42, %v1729_v38  ;;  %v10877_v15 = vld [vmem:[%s16954_s4 + $0x800] ss:$16 sps:$4 sm:$0xff]   ;;  %v10897_v42 = vld [vmem:[%s16954_s4 + $0x864] ss:$16 sps:$4 sm:$0xff]   ;;  %v10900_v38 = vld [vmem:[%s16954_s4 + $0x86c] ss:$16 sps:$4 sm:$0xff]  }
 0x24f   :  { %5201 = vmatpush1.bf16.msra.mxu0 %v10853_v31  ;;  %v10880_v31 = vld [vmem:[%s16954_s4 + $0x808] ss:$16 sps:$4 sm:$0xff]  }
 0x250   :  { %5785 = vmatpush1.bf16.msra.mxu1 %v10856_v33  ;;  %5202 = vmatprep.subr.bf16.mxu0 %v10861_v16  ;;  %v10885_v33 = vld [vmem:[%s16954_s4 + $0x824] ss:$16 sps:$4 sm:$0xff]   ;;  %v17312_v16 = vld [vmem:[#allocation13_spill] sm:$0xff] }
 0x251   :  { %5786 = vmatprep.subr.bf16.mxu1 %v10864_v9  ;;  %v1755_v9 = vrot.slane %v17312_v16, 2 }
 0x253   :  { %5203 = vmatpush1.bf16.msra.mxu0 %v10859_v2  ;;  %v10888_v2 = vld [vmem:[%s16954_s4 + $0x82c] ss:$16 sps:$4 sm:$0xff]  }
 0x254   :  { %5787 = vmatpush1.bf16.msra.mxu1 %v10862_v20  ;;  %5204 = vmatprep.subr.bf16.mxu0 %v10867_v50  ;;  %v17313_v20 = vld [vmem:[#allocation54_spill] sm:$0xff] }
 0x255   :  { %5788 = vmatprep.subr.bf16.mxu1 %v10870_v53  ;;  %v1746_v50 = vrot.slane %v17313_v20, 2  ;;  %v17314_v53 = vld [vmem:[#allocation50_spill] sm:$0xff] }
 0x257   :  { %5205 = vmatpush1.bf16.msra.mxu0 %v10865_v52  ;;  %v1754_v52 = vrot.slane %v17314_v53, 2 }
 0x258   :  { %5789 = vmatpush1.bf16.msra.mxu1 %v10868_v25  ;;  %5206 = vmatprep.subr.bf16.mxu0 %v10873_v12  ;;  %v10883_v25 = vld [vmem:[%s16954_s4 + $0x820] ss:$16 sps:$4 sm:$0xff]   ;;  %v10886_v12 = vld [vmem:[%s16954_s4 + $0x828] ss:$16 sps:$4 sm:$0xff]  }
 0x259   :  { %5790 = vmatprep.subr.bf16.mxu1 %v10876_v62  ;;  %v1745_v62 = vrot.slane %v17315_v55, 2  ;;  %v1756_v8 = vsel %vm482_vm1, %v1754_v52, %v1755_v9  ;;  %v1763_v9 = vrot.slane %v13511_v47, 2 }
 0x25b   :  { %5207 = vmatpush1.bf16.msra.mxu0 %v10871_v40  ;;  %v10891_v40 = vld [vmem:[%s16954_s4 + $0x844] ss:$16 sps:$4 sm:$0xff]   ;;  %v1747_v11 = vsel %vm482_vm1, %v1745_v62, %v1746_v50  ;;  %v10904_v62 = vld [vmem:[%s16954_s4 + $0x888] ss:$16 sps:$4 sm:$0xff]  }
 0x25c   :  { %5791 = vmatpush1.bf16.msra.mxu1 %v10874_v30  ;;  %5249 = vmatprep.subr.bf16.mxu0 %v10879_v57  ;;  %v2038_v30 = vpack.c.bf16 %v1756_v8, %v1747_v11  ;;  %v10889_v57 = vld [vmem:[%s16954_s4 + $0x840] ss:$16 sps:$4 sm:$0xff]   ;;  %v10903_v50 = vld [vmem:[%s16954_s4 + $0x884] ss:$16 sps:$4 sm:$0xff]   ;;  %v1834_v11 = vrot.slane %v13574_v21, 3 }
 0x25d   :  { %5833 = vmatprep.subr.bf16.mxu1 %v10882_v32  ;;  %v1773_v32 = vrot.slane %v13809_v51, 2  ;;  %v10909_v8 = vld [vmem:[%s16954_s4 + $0x8a4] ss:$16 sps:$4 sm:$0xff]  }
 0x25e   :  { %5209 = vmatmul.mubr.bf16.vlgmr.msra.gmra.mrb[96].mxu0 %v2023_v45 }
 0x25f   :  { %5793 = vmatmul.mubr.bf16.vlgmr.msra.gmra.mrb[96].mxu1 %v2023_v45  ;;  %5218 = vmatprep.mubr.bf16.mxu0 %v13964_v17  ;;  %v1764_v45 = vrot.slane %v13783_v10, 2 }
 0x260   :  { %5250 = vmatpush1.bf16.msra.mxu0 %v10877_v15  ;;  %5802 = vmatprep.mubr.bf16.mxu1 %v13964_v17  ;;  %v10894_v17 = vld [vmem:[%s16954_s4 + $0x84c] ss:$16 sps:$4 sm:$0xff]   ;;  %v1772_v15 = vrot.slane %v13483_v27, 2 }
 0x261   :  { %5834 = vmatpush1.bf16.msra.mxu1 %v10880_v31  ;;  %5251 = vmatprep.subr.bf16.mxu0 %v10885_v33  ;;  %v10895_v31 = vld [vmem:[%s16954_s4 + $0x860] ss:$16 sps:$4 sm:$0xff]   ;;  %v10898_v33 = vld [vmem:[%s16954_s4 + $0x868] ss:$16 sps:$4 sm:$0xff]   ;;  %v1765_v52 = vsel %vm482_vm1, %v1763_v9, %v1764_v45  ;;  %v1833_v45 = vrot.slane %v17309_v28, 3 }
 0x262   :  { %5835 = vmatprep.subr.bf16.mxu1 %v10888_v2  ;;  %v1774_v2 = vsel %vm482_vm1, %v1772_v15, %v1773_v32  ;;  %v10907_v32 = vld [vmem:[%s16954_s4 + $0x8a0] ss:$16 sps:$4 sm:$0xff]   ;;  %v10910_v15 = vld [vmem:[%s16954_s4 + $0x8a8] ss:$16 sps:$4 sm:$0xff]   ;;  %v10918_v9 = vld [vmem:[%s16954_s4 + $0x8cc] ss:$16 sps:$4 sm:$0xff]  }
 0x264   :  { %5252 = vmatpush1.bf16.msra.mxu0 %v10883_v25  ;;  %v2053_v25 = vpack.c.bf16 %v1774_v2, %v1765_v52  ;;  %v1824_v2 = vrot.slane %v17311_v1, 3 }
 0x265   :  { %5836 = vmatpush1.bf16.msra.mxu1 %v10886_v12  ;;  %5253 = vmatprep.subr.bf16.mxu0 %v10891_v40  ;;  %v10901_v12 = vld [vmem:[%s16954_s4 + $0x880] ss:$16 sps:$4 sm:$0xff]   ;;  %v1791_v40 = vrot.slane %v13943_v49, 2 }
 0x266   :  { %5219 = vmatmul.mubr.bf16.gmra.mrb[100].mxu0 %v2038_v30  ;;  %5837 = vmatprep.subr.bf16.mxu1 %v10894_v17  ;;  %v10912_v17 = vld [vmem:[%s16954_s4 + $0x8ac] ss:$16 sps:$4 sm:$0xff]  }
 0x267   :  { %5803 = vmatmul.mubr.bf16.gmra.mrb[100].mxu1 %v2038_v30  ;;  %5228 = vmatprep.mubr.bf16.mxu0 %v13995_v56  ;;  %v17316_v30 = vld [vmem:[#allocation15_spill] sm:$0xff] }
 0x268   :  { %5254 = vmatpush1.bf16.msra.mxu0 %v10889_v57  ;;  %5812 = vmatprep.mubr.bf16.mxu1 %v13995_v56  ;;  %v10906_v56 = vld [vmem:[%s16954_s4 + $0x88c] ss:$16 sps:$4 sm:$0xff]   ;;  %v1782_v57 = vrot.slane %v17316_v30, 2 }
 0x269   :  { %5838 = vmatpush1.bf16.msra.mxu1 %v10892_v61  ;;  %5255 = vmatprep.subr.bf16.mxu0 %v10897_v42  ;;  %v17317_v61 = vld [vmem:[#allocation14_spill] sm:$0xff] }
 0x26a   :  { %5839 = vmatprep.subr.bf16.mxu1 %v10900_v38  ;;  %v1790_v42 = vrot.slane %v17317_v61, 2  ;;  %v1825_v38 = vrot.slane %v17310_v39, 3 }
 0x26c   :  { %5256 = vmatpush1.bf16.msra.mxu0 %v10895_v31  ;;  %v1781_v31 = vrot.slane %v13684_v46, 2 }
 0x26d   :  { %5840 = vmatpush1.bf16.msra.mxu1 %v10898_v33  ;;  %5257 = vmatprep.subr.bf16.mxu0 %v10903_v50  ;;  %v1792_v33 = vsel %vm482_vm1, %v1790_v42, %v1791_v40  ;;  %v1835_v50 = vsel %vm1823_vm0, %v1833_v45, %v1834_v11  ;;  %v10921_v40 = vld [vmem:[%s16954_s4 + $0x8e4] ss:$16 sps:$4 sm:$0xff]   ;;  %v10919_v11 = vld [vmem:[%s16954_s4 + $0x8e0] ss:$16 sps:$4 sm:$0xff]   ;;  %v10928_v45 = vld [vmem:[%s16954_s4 + $0x908] ss:$16 sps:$4 sm:$0xff]  }
 0x26e   :  { %5229 = vmatmul.mubr.bf16.gmra.mrb[104].mxu0 %v2053_v25  ;;  %5841 = vmatprep.subr.bf16.mxu1 %v10906_v56  ;;  %v1783_v56 = vsel %vm482_vm1, %v1781_v31, %v1782_v57  ;;  %v10922_v57 = vld [vmem:[%s16954_s4 + $0x8e8] ss:$16 sps:$4 sm:$0xff]   ;;  %v10927_v42 = vld [vmem:[%s16954_s4 + $0x904] ss:$16 sps:$4 sm:$0xff]   ;;  %v10936_v31 = vld [vmem:[%s16954_s4 + $0x92c] ss:$16 sps:$4 sm:$0xff]  }
 0x26f   :  { %5813 = vmatmul.mubr.bf16.gmra.mrb[104].mxu1 %v2053_v25  ;;  %5238 = vmatprep.mubr.bf16.mxu0 %v14027_v63  ;;  %v2068_v52 = vpack.c.bf16 %v1792_v33, %v1783_v56  ;;  %v10913_v25 = vld [vmem:[%s16954_s4 + $0x8c0] ss:$16 sps:$4 sm:$0xff]   ;;  %v10940_v56 = vld [vmem:[%s16954_s4 + $0x948] ss:$16 sps:$4 sm:$0xff]  }
 0x270   :  { %5258 = vmatpush1.bf16.msra.mxu0 %v10901_v12  ;;  %5822 = vmatprep.mubr.bf16.mxu1 %v14027_v63  ;;  %v10915_v63 = vld [vmem:[%s16954_s4 + $0x8c4] ss:$16 sps:$4 sm:$0xff]   ;;  %v1826_v12 = vsel %vm1823_vm0, %v1824_v2, %v1825_v38  ;;  %v10925_v38 = vld [vmem:[%s16954_s4 + $0x900] ss:$16 sps:$4 sm:$0xff]   ;;  %v10942_v2 = vld [vmem:[%s16954_s4 + $0x94c] ss:$16 sps:$4 sm:$0xff]  }
 0x271   :  { %5842 = vmatpush1.bf16.msra.mxu1 %v10904_v62  ;;  %5259 = vmatprep.subr.bf16.mxu0 %v10909_v8  ;;  %v10916_v62 = vld [vmem:[%s16954_s4 + $0x8c8] ss:$16 sps:$4 sm:$0xff]   ;;  %v2026_v8 = vpack.c.bf16 %v1835_v50, %v1826_v12  ;;  %v10931_v33 = vld [vmem:[%s16954_s4 + $0x920] ss:$16 sps:$4 sm:$0xff]  }
 0x272   :  { %5843 = vmatprep.subr.bf16.mxu1 %v10912_v17  ;;  %v10924_v17 = vld [vmem:[%s16954_s4 + $0x8ec] ss:$16 sps:$4 sm:$0xff]   ;;  %v10937_v50 = vld [vmem:[%s16954_s4 + $0x940] ss:$16 sps:$4 sm:$0xff]  }
 0x273   :  { %v10943_v12 = vld [vmem:[%s16954_s4 + $0x960] ss:$16 sps:$4 sm:$0xff]  }
 0x274   :  { %5260 = vmatpush1.bf16.msra.mxu0 %v10907_v32  ;;  %v10930_v32 = vld [vmem:[%s16954_s4 + $0x90c] ss:$16 sps:$4 sm:$0xff]  }
 0x275   :  { %5844 = vmatpush1.bf16.msra.mxu1 %v10910_v15  ;;  %5261 = vmatprep.subr.bf16.mxu0 %v10915_v63  ;;  %v10933_v15 = vld [vmem:[%s16954_s4 + $0x924] ss:$16 sps:$4 sm:$0xff]   ;;  %v10934_v63 = vld [vmem:[%s16954_s4 + $0x928] ss:$16 sps:$4 sm:$0xff]  }
 0x276   :  { %5239 = vmatmul.mubr.bf16.gmra.mrb[108].mxu0 %v2068_v52  ;;  %5845 = vmatprep.subr.bf16.mxu1 %v10918_v9  ;;  %v10939_v9 = vld [vmem:[%s16954_s4 + $0x944] ss:$16 sps:$4 sm:$0xff]  }
 0x277   :  { %5823 = vmatmul.mubr.bf16.gmra.mrb[108].mxu1 %v2068_v52  ;;  %5281 = vmatprep.mubr.bf16.mxu0 %v2026_v8  ;;  %v10945_v52 = vld [vmem:[%s16954_s4 + $0x964] ss:$16 sps:$4 sm:$0xff]  }
 0x278   :  { %5262 = vmatpush1.bf16.msra.mxu0 %v10913_v25  ;;  %5865 = vmatprep.mubr.bf16.mxu1 %v2026_v8  ;;  %v10948_v25 = vld [vmem:[%s16954_s4 + $0x96c] ss:$16 sps:$4 sm:$0xff]   ;;  %v10951_v8 = vld [vmem:[%s16954_s4 + $0x984] ss:$16 sps:$4 sm:$0xff]  }
 0x279   :  { %5846 = vmatpush1.bf16.msra.mxu1 %v10916_v62  ;;  %5263 = vmatprep.subr.bf16.mxu0 %v10921_v40  ;;  %v10946_v62 = vld [vmem:[%s16954_s4 + $0x968] ss:$16 sps:$4 sm:$0xff]   ;;  %v10954_v40 = vld [vmem:[%s16954_s4 + $0x98c] ss:$16 sps:$4 sm:$0xff]  }
 0x27a   :  { %5847 = vmatprep.subr.bf16.mxu1 %v10924_v17  ;;  %v10949_v17 = vld [vmem:[%s16954_s4 + $0x980] ss:$16 sps:$4 sm:$0xff]  }
 0x27c   :  { %5264 = vmatpush1.bf16.msra.mxu0 %v10919_v11  ;;  %v10952_v11 = vld [vmem:[%s16954_s4 + $0x988] ss:$16 sps:$4 sm:$0xff]  }
 0x27d   :  { %5848 = vmatpush1.bf16.msra.mxu1 %v10922_v57  ;;  %5265 = vmatprep.subr.bf16.mxu0 %v10927_v42  ;;  %v10957_v57 = vld [vmem:[%s16954_s4 + $0x9a4] ss:$16 sps:$4 sm:$0xff]   ;;  %v10960_v42 = vld [vmem:[%s16954_s4 + $0x9ac] ss:$16 sps:$4 sm:$0xff]  }
 0x27e   :  { %5849 = vmatprep.subr.bf16.mxu1 %v10930_v32  ;;  %v10955_v32 = vld [vmem:[%s16954_s4 + $0x9a0] ss:$16 sps:$4 sm:$0xff]  }
 0x280   :  { %5266 = vmatpush1.bf16.msra.mxu0 %v10925_v38  ;;  %v10958_v38 = vld [vmem:[%s16954_s4 + $0x9a8] ss:$16 sps:$4 sm:$0xff]  }
 0x281   :  { %5850 = vmatpush1.bf16.msra.mxu1 %v10928_v45  ;;  %5267 = vmatprep.subr.bf16.mxu0 %v10933_v15  ;;  %v10963_v45 = vld [vmem:[%s16954_s4 + $0x9c4] ss:$16 sps:$4 sm:$0xff]   ;;  %v10966_v15 = vld [vmem:[%s16954_s4 + $0x9cc] ss:$16 sps:$4 sm:$0xff]  }
 0x282   :  { %5851 = vmatprep.subr.bf16.mxu1 %v10936_v31  ;;  %v10961_v31 = vld [vmem:[%s16954_s4 + $0x9c0] ss:$16 sps:$4 sm:$0xff]  }
 0x284   :  { %5268 = vmatpush1.bf16.msra.mxu0 %v10931_v33  ;;  %v10964_v33 = vld [vmem:[%s16954_s4 + $0x9c8] ss:$16 sps:$4 sm:$0xff]  }
 0x285   :  { %5852 = vmatpush1.bf16.msra.mxu1 %v10934_v63  ;;  %5269 = vmatprep.subr.bf16.mxu0 %v10939_v9  ;;  %v10969_v63 = vld [vmem:[%s16954_s4 + $0x9e4] ss:$16 sps:$4 sm:$0xff]   ;;  %v1743_v9 = vrot.slane %v14005_v43, 2 }
 0x286   :  { %5853 = vmatprep.subr.bf16.mxu1 %v10942_v2  ;;  %v10972_v2 = vld [vmem:[%s16954_s4 + $0x9ec] ss:$16 sps:$4 sm:$0xff]  }
 0x288   :  { %5270 = vmatpush1.bf16.msra.mxu0 %v10937_v50  ;;  %v1852_v50 = vrot.slane %v17312_v16, 3 }
 0x289   :  { %5854 = vmatpush1.bf16.msra.mxu1 %v10940_v56  ;;  %5271 = vmatprep.subr.bf16.mxu0 %v10945_v52  ;;  %v1742_v56 = vrot.slane %v13546_v34, 2  ;;  %v10967_v52 = vld [vmem:[%s16954_s4 + $0x9e0] ss:$16 sps:$4 sm:$0xff]  }
 0x28a   :  { %5855 = vmatprep.subr.bf16.mxu1 %v10948_v25  ;;  %v1734_v25 = vrot.slane %v14039_v37, 2 }
 0x28c   :  { %5272 = vmatpush1.bf16.msra.mxu0 %v10943_v12  ;;  %v10970_v12 = vld [vmem:[%s16954_s4 + $0x9e8] ss:$16 sps:$4 sm:$0xff]  }
 0x28d   :  { %5856 = vmatpush1.bf16.msra.mxu1 %v10946_v62  ;;  %5273 = vmatprep.subr.bf16.mxu0 %v10951_v8  ;;  %v10975_v62 = vld [vmem:[%s16954_s4 + $0xa04] ss:$16 sps:$4 sm:$0xff]   ;;  %v1843_v8 = vrot.slane %v17313_v20, 3 }
 0x28e   :  { %5857 = vmatprep.subr.bf16.mxu1 %v10954_v40  ;;  %v1851_v40 = vrot.slane %v17314_v53, 3 }
 0x290   :  { %5274 = vmatpush1.bf16.msra.mxu0 %v10949_v17  ;;  %v1733_v17 = vrot.slane %v13862_v22, 2 }
 0x291   :  { %5858 = vmatpush1.bf16.msra.mxu1 %v10952_v11  ;;  %5275 = vmatprep.subr.bf16.mxu0 %v10957_v57  ;;  %v1744_v11 = vsel %vm482_vm1, %v1742_v56, %v1743_v9  ;;  %v10978_v57 = vld [vmem:[%s16954_s4 + $0xa0c] ss:$16 sps:$4 sm:$0xff]   ;;  %v10981_v9 = vld [vmem:[%s16954_s4 + $0xa24] ss:$16 sps:$4 sm:$0xff]   ;;  %v1870_v56 = vrot.slane %v13809_v51, 3 }
 0x292   :  { %5859 = vmatprep.subr.bf16.mxu1 %v10960_v42  ;;  %v1842_v42 = vrot.slane %v17315_v55, 3 }
 0x294   :  { %5276 = vmatpush1.bf16.msra.mxu0 %v10955_v32  ;;  %v1853_v32 = vsel %vm1823_vm0, %v1851_v40, %v1852_v50  ;;  %v10984_v50 = vld [vmem:[%s16954_s4 + $0xa2c] ss:$16 sps:$4 sm:$0xff]   ;;  %v10982_v40 = vld [vmem:[%s16954_s4 + $0xa28] ss:$16 sps:$4 sm:$0xff]  }
 0x295   :  { %5860 = vmatpush1.bf16.msra.mxu1 %v10958_v38  ;;  %5277 = vmatprep.subr.bf16.mxu0 %v10963_v45  ;;  %v1735_v38 = vsel %vm482_vm1, %v1733_v17, %v1734_v25  ;;  %v1760_v25 = vrot.slane %v13891_v3, 2  ;;  %v1751_v17 = vrot.slane %v13922_v14, 2 }
 0x296   :  { %5861 = vmatprep.subr.bf16.mxu1 %v10966_v15  ;;  %v2025_v45 = vpack.c.bf16 %v1744_v11, %v1735_v38  ;;  %v10973_v15 = vld [vmem:[%s16954_s4 + $0xa00] ss:$16 sps:$4 sm:$0xff]  }
 0x298   :  { %5278 = vmatpush1.bf16.msra.mxu0 %v10961_v31  ;;  %v1844_v31 = vsel %vm1823_vm0, %v1842_v42, %v1843_v8  ;;  %v1869_v8 = vrot.slane %v13483_v27, 3  ;;  %v10990_v42 = vld [vmem:[%s16954_s4 + $0xa4c] ss:$16 sps:$4 sm:$0xff]  }
 0x299   :  { %5862 = vmatpush1.bf16.msra.mxu1 %v10964_v33  ;;  %5279 = vmatprep.subr.bf16.mxu0 %v10969_v63  ;;  %v10976_v33 = vld [vmem:[%s16954_s4 + $0xa08] ss:$16 sps:$4 sm:$0xff]   ;;  %v2041_v63 = vpack.c.bf16 %v1853_v32, %v1844_v31  ;;  %v1860_v32 = vrot.slane %v13511_v47, 3  ;;  %v10985_v31 = vld [vmem:[%s16954_s4 + $0xa40] ss:$16 sps:$4 sm:$0xff]  }
 0x29a   :  { %5863 = vmatprep.subr.bf16.mxu1 %v10972_v2  ;;  %v1761_v2 = vrot.slane %v14212_v29, 2  ;;  %v1871_v38 = vsel %vm1823_vm0, %v1869_v8, %v1870_v56  ;;  %v10996_v56 = vld [vmem:[%s16954_s4 + $0xa6c] ss:$16 sps:$4 sm:$0xff]   ;;  %v1879_v8 = vrot.slane %v17316_v30, 3 }
 0x29c   :  { %5280 = vmatpush1.bf16.msra.mxu0 %v10967_v52  ;;  %v1752_v52 = vrot.slane %v14221_v0, 2  ;;  %v1762_v11 = vsel %vm482_vm1, %v1760_v25, %v1761_v2  ;;  %v10993_v2 = vld [vmem:[%s16954_s4 + $0xa64] ss:$16 sps:$4 sm:$0xff]   ;;  %v1770_v25 = vrot.slane %v14271_v18, 2 }
 0x29d   :  { %5864 = vmatpush1.bf16.msra.mxu1 %v10970_v12  ;;  %5322 = vmatprep.subr.bf16.mxu0 %v10975_v62  ;;  %v10979_v12 = vld [vmem:[%s16954_s4 + $0xa20] ss:$16 sps:$4 sm:$0xff]   ;;  %v1861_v62 = vrot.slane %v13783_v10, 3 }
 0x29e   :  { %5906 = vmatprep.subr.bf16.mxu1 %v10978_v57  ;;  %v10987_v57 = vld [vmem:[%s16954_s4 + $0xa44] ss:$16 sps:$4 sm:$0xff]  }
 0x29f   :  { %5282 = vmatmul.mubr.bf16.vlgmr.msra.gmra.mrb[96].mxu0 %v2025_v45 }
 0x2a0   :  { %5866 = vmatmul.mubr.bf16.vlgmr.msra.gmra.mrb[96].mxu1 %v2025_v45  ;;  %5291 = vmatprep.mubr.bf16.mxu0 %v2041_v63  ;;  %v1753_v45 = vsel %vm482_vm1, %v1751_v17, %v1752_v52  ;;  %v1888_v52 = vrot.slane %v13943_v49, 3  ;;  %v10994_v17 = vld [vmem:[%s16954_s4 + $0xa68] ss:$16 sps:$4 sm:$0xff]  }
 0x2a1   :  { %5323 = vmatpush1.bf16.msra.mxu0 %v10973_v15  ;;  %5875 = vmatprep.mubr.bf16.mxu1 %v2041_v63  ;;  %v2040_v15 = vpack.c.bf16 %v1762_v11, %v1753_v45  ;;  %v10988_v63 = vld [vmem:[%s16954_s4 + $0xa48] ss:$16 sps:$4 sm:$0xff]   ;;  %v1769_v11 = vrot.slane %v14012_v59, 2 }
 0x2a2   :  { %5907 = vmatpush1.bf16.msra.mxu1 %v10976_v33  ;;  %5324 = vmatprep.subr.bf16.mxu0 %v10981_v9  ;;  %v1862_v33 = vsel %vm1823_vm0, %v1860_v32, %v1861_v62  ;;  %v10991_v62 = vld [vmem:[%s16954_s4 + $0xa60] ss:$16 sps:$4 sm:$0xff]   ;;  %v11002_v32 = vld [vmem:[%s16954_s4 + $0xa8c] ss:$16 sps:$4 sm:$0xff]  }
 0x2a3   :  { %5908 = vmatprep.subr.bf16.mxu1 %v10984_v50  ;;  %v2056_v9 = vpack.c.bf16 %v1871_v38, %v1862_v33  ;;  %v1779_v50 = vrot.slane %v14263_v4, 2  ;;  %v1878_v38 = vrot.slane %v13684_v46, 3  ;;  %v10997_v33 = vld [vmem:[%s16954_s4 + $0xa80] ss:$16 sps:$4 sm:$0xff]  }
 0x2a5   :  { %5325 = vmatpush1.bf16.msra.mxu0 %v10979_v12  ;;  %v1778_v12 = vrot.slane %v13972_v19, 2 }
 0x2a6   :  { %5909 = vmatpush1.bf16.msra.mxu1 %v10982_v40  ;;  %5326 = vmatprep.subr.bf16.mxu0 %v10987_v57  ;;  %v1887_v40 = vrot.slane %v17317_v61, 3 }
 0x2a7   :  { %5292 = vmatmul.mubr.bf16.gmra.mrb[100].mxu0 %v2040_v15  ;;  %5910 = vmatprep.subr.bf16.mxu1 %v10990_v42  ;;  %v1780_v57 = vsel %vm482_vm1, %v1778_v12, %v1779_v50  ;;  %v10999_v42 = vld [vmem:[%s16954_s4 + $0xa84] ss:$16 sps:$4 sm:$0xff]   ;;  %v1788_v12 = vrot.slane %v14312_v58, 2 }
 0x2a8   :  { %5876 = vmatmul.mubr.bf16.gmra.mrb[100].mxu1 %v2040_v15  ;;  %5301 = vmatprep.mubr.bf16.mxu0 %v2056_v9  ;;  %v1889_v45 = vsel %vm1823_vm0, %v1887_v40, %v1888_v52  ;;  %v1771_v15 = vsel %vm482_vm1, %v1769_v11, %v1770_v25  ;;  %v11005_v50 = vld [vmem:[%s16954_s4 + $0xaa4] ss:$16 sps:$4 sm:$0xff]   ;;  %v11008_v52 = vld [vmem:[%s16954_s4 + $0xaac] ss:$16 sps:$4 sm:$0xff]   ;;  %v1840_v25 = vrot.slane %v14005_v43, 3  ;;  %v1831_v40 = vrot.slane %v14039_v37, 3 }
 0x2a9   :  { %5327 = vmatpush1.bf16.msra.mxu0 %v10985_v31  ;;  %5885 = vmatprep.mubr.bf16.mxu1 %v2056_v9  ;;  %v2055_v31 = vpack.c.bf16 %v1780_v57, %v1771_v15  ;;  %v11000_v9 = vld [vmem:[%s16954_s4 + $0xa88] ss:$16 sps:$4 sm:$0xff]   ;;  %v1787_v57 = vrot.slane %v14061_v5, 2 }
 0x2aa   :  { %5911 = vmatpush1.bf16.msra.mxu1 %v10988_v63  ;;  %5328 = vmatprep.subr.bf16.mxu0 %v10993_v2  ;;  %v1880_v63 = vsel %vm1823_vm0, %v1878_v38, %v1879_v8  ;;  %v11003_v8 = vld [vmem:[%s16954_s4 + $0xaa0] ss:$16 sps:$4 sm:$0xff]   ;;  %v11006_v11 = vld [vmem:[%s16954_s4 + $0xaa8] ss:$16 sps:$4 sm:$0xff]   ;;  %v11014_v38 = vld [vmem:[%s16954_s4 + $0xacc] ss:$16 sps:$4 sm:$0xff]  }
 0x2ab   :  { %5912 = vmatprep.subr.bf16.mxu1 %v10996_v56  ;;  %v2071_v2 = vpack.c.bf16 %v1889_v45, %v1880_v63  ;;  %v1797_v56 = vrot.slane %v14306_v26, 2  ;;  %v1830_v45 = vrot.slane %v13862_v22, 3  ;;  %v11009_v63 = vld [vmem:[%s16954_s4 + $0xac0] ss:$16 sps:$4 sm:$0xff]  }
 0x2ad   :  { %5329 = vmatpush1.bf16.msra.mxu0 %v10991_v62  ;;  %v1796_v62 = vrot.slane %v14054_v60, 2 }
 0x2ae   :  { %5913 = vmatpush1.bf16.msra.mxu1 %v10994_v17  ;;  %5330 = vmatprep.subr.bf16.mxu0 %v10999_v42  ;;  %v1839_v17 = vrot.slane %v13546_v34, 3 }
 0x2af   :  { %5302 = vmatmul.mubr.bf16.gmra.mrb[104].mxu0 %v2055_v31  ;;  %5914 = vmatprep.subr.bf16.mxu1 %v11002_v32  ;;  %v1798_v42 = vsel %vm482_vm1, %v1796_v62, %v1797_v56  ;;  %v11011_v32 = vld [vmem:[%s16954_s4 + $0xac4] ss:$16 sps:$4 sm:$0xff]  }
 0x2b0   :  { %5886 = vmatmul.mubr.bf16.gmra.mrb[104].mxu1 %v2055_v31  ;;  %5311 = vmatprep.mubr.bf16.mxu0 %v2071_v2  ;;  %v1841_v15 = vsel %vm1823_vm0, %v1839_v17, %v1840_v25  ;;  %v1789_v31 = vsel %vm482_vm1, %v1787_v57, %v1788_v12  ;;  %v11017_v56 = vld [vmem:[%s16954_s4 + $0xae4] ss:$16 sps:$4 sm:$0xff]   ;;  %v11015_v25 = vld [vmem:[%s16954_s4 + $0xae0] ss:$16 sps:$4 sm:$0xff]   ;;  %v11018_v12 = vld [vmem:[%s16954_s4 + $0xae8] ss:$16 sps:$4 sm:$0xff]  }
 0x2b1   :  { %5331 = vmatpush1.bf16.msra.mxu0 %v10997_v33  ;;  %5895 = vmatprep.mubr.bf16.mxu1 %v2071_v2  ;;  %v2070_v33 = vpack.c.bf16 %v1798_v42, %v1789_v31  ;;  %v11012_v2 = vld [vmem:[%s16954_s4 + $0xac8] ss:$16 sps:$4 sm:$0xff]   ;;  %v11023_v62 = vld [vmem:[%s16954_s4 + $0xb04] ss:$16 sps:$4 sm:$0xff]   ;;  %v11032_v57 = vld [vmem:[%s16954_s4 + $0xb2c] ss:$16 sps:$4 sm:$0xff]  }
 0x2b2   :  { %5915 = vmatpush1.bf16.msra.mxu1 %v11000_v9  ;;  %5332 = vmatprep.subr.bf16.mxu0 %v11005_v50  ;;  %v1832_v9 = vsel %vm1823_vm0, %v1830_v45, %v1831_v40  ;;  %v11021_v40 = vld [vmem:[%s16954_s4 + $0xb00] ss:$16 sps:$4 sm:$0xff]   ;;  %v11024_v17 = vld [vmem:[%s16954_s4 + $0xb08] ss:$16 sps:$4 sm:$0xff]   ;;  %v11038_v45 = vld [vmem:[%s16954_s4 + $0xb4c] ss:$16 sps:$4 sm:$0xff]  }
 0x2b3   :  { %5916 = vmatprep.subr.bf16.mxu1 %v11008_v52  ;;  %v2028_v50 = vpack.c.bf16 %v1841_v15, %v1832_v9  ;;  %v11020_v52 = vld [vmem:[%s16954_s4 + $0xaec] ss:$16 sps:$4 sm:$0xff]   ;;  %v11027_v42 = vld [vmem:[%s16954_s4 + $0xb20] ss:$16 sps:$4 sm:$0xff]   ;;  %v11036_v31 = vld [vmem:[%s16954_s4 + $0xb48] ss:$16 sps:$4 sm:$0xff]  }
 0x2b4   :  { %v11033_v15 = vld [vmem:[%s16954_s4 + $0xb40] ss:$16 sps:$4 sm:$0xff]   ;;  %vm6350_vm1 = vcmask 523264  }
 0x2b5   :  { %5333 = vmatpush1.bf16.msra.mxu0 %v11003_v8  ;;  %v11026_v8 = vld [vmem:[%s16954_s4 + $0xb0c] ss:$16 sps:$4 sm:$0xff]   ;;  %v11039_v9 = vld [vmem:[%s16954_s4 + $0xb60] ss:$16 sps:$4 sm:$0xff]  }
 0x2b6   :  { %5917 = vmatpush1.bf16.msra.mxu1 %v11006_v11  ;;  %5334 = vmatprep.subr.bf16.mxu0 %v11011_v32  ;;  %v11029_v11 = vld [vmem:[%s16954_s4 + $0xb24] ss:$16 sps:$4 sm:$0xff]   ;;  %v11030_v32 = vld [vmem:[%s16954_s4 + $0xb28] ss:$16 sps:$4 sm:$0xff]  }
 0x2b7   :  { %5312 = vmatmul.mubr.bf16.gmra.mrb[108].mxu0 %v2070_v33  ;;  %5918 = vmatprep.subr.bf16.mxu1 %v11014_v38  ;;  %v11035_v38 = vld [vmem:[%s16954_s4 + $0xb44] ss:$16 sps:$4 sm:$0xff]  }
 0x2b8   :  { %5896 = vmatmul.mubr.bf16.gmra.mrb[108].mxu1 %v2070_v33  ;;  %5354 = vmatprep.mubr.bf16.mxu0 %v2028_v50  ;;  %v11041_v33 = vld [vmem:[%s16954_s4 + $0xb64] ss:$16 sps:$4 sm:$0xff]  }
 0x2b9   :  { %5335 = vmatpush1.bf16.msra.mxu0 %v11009_v63  ;;  %5938 = vmatprep.mubr.bf16.mxu1 %v2028_v50  ;;  %v11044_v63 = vld [vmem:[%s16954_s4 + $0xb6c] ss:$16 sps:$4 sm:$0xff]   ;;  %v11047_v50 = vld [vmem:[%s16954_s4 + $0xb84] ss:$16 sps:$4 sm:$0xff]  }
 0x2ba   :  { %5919 = vmatpush1.bf16.msra.mxu1 %v11012_v2  ;;  %5336 = vmatprep.subr.bf16.mxu0 %v11017_v56  ;;  %v11042_v2 = vld [vmem:[%s16954_s4 + $0xb68] ss:$16 sps:$4 sm:$0xff]   ;;  %v11050_v56 = vld [vmem:[%s16954_s4 + $0xb8c] ss:$16 sps:$4 sm:$0xff]  }
 0x2bb   :  { %5920 = vmatprep.subr.bf16.mxu1 %v11020_v52  ;;  %v11045_v52 = vld [vmem:[%s16954_s4 + $0xb80] ss:$16 sps:$4 sm:$0xff]  }
 0x2bd   :  { %5337 = vmatpush1.bf16.msra.mxu0 %v11015_v25  ;;  %v11048_v25 = vld [vmem:[%s16954_s4 + $0xb88] ss:$16 sps:$4 sm:$0xff]  }
 0x2be   :  { %5921 = vmatpush1.bf16.msra.mxu1 %v11018_v12  ;;  %5338 = vmatprep.subr.bf16.mxu0 %v11023_v62  ;;  %v11053_v12 = vld [vmem:[%s16954_s4 + $0xba4] ss:$16 sps:$4 sm:$0xff]   ;;  %v11056_v62 = vld [vmem:[%s16954_s4 + $0xbac] ss:$16 sps:$4 sm:$0xff]  }
 0x2bf   :  { %5922 = vmatprep.subr.bf16.mxu1 %v11026_v8  ;;  %v11051_v8 = vld [vmem:[%s16954_s4 + $0xba0] ss:$16 sps:$4 sm:$0xff]  }
 0x2c1   :  { %5339 = vmatpush1.bf16.msra.mxu0 %v11021_v40  ;;  %v11054_v40 = vld [vmem:[%s16954_s4 + $0xba8] ss:$16 sps:$4 sm:$0xff]  }
 0x2c2   :  { %5923 = vmatpush1.bf16.msra.mxu1 %v11024_v17  ;;  %5340 = vmatprep.subr.bf16.mxu0 %v11029_v11  ;;  %v11059_v17 = vld [vmem:[%s16954_s4 + $0xbc4] ss:$16 sps:$4 sm:$0xff]   ;;  %v11062_v11 = vld [vmem:[%s16954_s4 + $0xbcc] ss:$16 sps:$4 sm:$0xff]  }
 0x2c3   :  { %5924 = vmatprep.subr.bf16.mxu1 %v11032_v57  ;;  %v11057_v57 = vld [vmem:[%s16954_s4 + $0xbc0] ss:$16 sps:$4 sm:$0xff]  }
 0x2c5   :  { %5341 = vmatpush1.bf16.msra.mxu0 %v11027_v42  ;;  %v11060_v42 = vld [vmem:[%s16954_s4 + $0xbc8] ss:$16 sps:$4 sm:$0xff]  }
 0x2c6   :  { %5925 = vmatpush1.bf16.msra.mxu1 %v11030_v32  ;;  %5342 = vmatprep.subr.bf16.mxu0 %v11035_v38  ;;  %v11065_v32 = vld [vmem:[%s16954_s4 + $0xbe4] ss:$16 sps:$4 sm:$0xff]   ;;  %v11068_v38 = vld [vmem:[%s16954_s4 + $0xbec] ss:$16 sps:$4 sm:$0xff]  }
 0x2c7   :  { %5926 = vmatprep.subr.bf16.mxu1 %v11038_v45  ;;  %v1858_v45 = vrot.slane %v14212_v29, 3 }
 0x2c9   :  { %5343 = vmatpush1.bf16.msra.mxu0 %v11033_v15  ;;  %v11063_v15 = vld [vmem:[%s16954_s4 + $0xbe0] ss:$16 sps:$4 sm:$0xff]  }
 0x2ca   :  { %5927 = vmatpush1.bf16.msra.mxu1 %v11036_v31  ;;  %5344 = vmatprep.subr.bf16.mxu0 %v11041_v33  ;;  %v11066_v31 = vld [vmem:[%s16954_s4 + $0xbe8] ss:$16 sps:$4 sm:$0xff]   ;;  %v11071_v33 = vld [vmem:[%s16954_s4 + $0xc04] ss:$16 sps:$4 sm:$0xff]  }
 0x2cb   :  { %5928 = vmatprep.subr.bf16.mxu1 %v11044_v63  ;;  %v1849_v63 = vrot.slane %v14221_v0, 3 }
 0x2cd   :  { %5345 = vmatpush1.bf16.msra.mxu0 %v11039_v9  ;;  %v1857_v9 = vrot.slane %v13891_v3, 3 }
 0x2ce   :  { %5929 = vmatpush1.bf16.msra.mxu1 %v11042_v2  ;;  %5346 = vmatprep.subr.bf16.mxu0 %v11047_v50  ;;  %v11074_v2 = vld [vmem:[%s16954_s4 + $0xc0c] ss:$16 sps:$4 sm:$0xff]   ;;  %v1848_v50 = vrot.slane %v13922_v14, 3 }
 0x2cf   :  { %5930 = vmatprep.subr.bf16.mxu1 %v11050_v56  ;;  %v1859_v56 = vsel %vm1823_vm0, %v1857_v9, %v1858_v45  ;;  %v1866_v45 = vrot.slane %v14012_v59, 3 }
 0x2d1   :  { %5347 = vmatpush1.bf16.msra.mxu0 %v11045_v52  ;;  %v11069_v52 = vld [vmem:[%s16954_s4 + $0xc00] ss:$16 sps:$4 sm:$0xff]  }
 0x2d2   :  { %5931 = vmatpush1.bf16.msra.mxu1 %v11048_v25  ;;  %5348 = vmatprep.subr.bf16.mxu0 %v11053_v12  ;;  %v1850_v25 = vsel %vm1823_vm0, %v1848_v50, %v1849_v63  ;;  %v11072_v12 = vld [vmem:[%s16954_s4 + $0xc08] ss:$16 sps:$4 sm:$0xff]   ;;  %v11092_v50 = vld [vmem:[%s16954_s4 + $0xc6c] ss:$16 sps:$4 sm:$0xff]  }
 0x2d3   :  { %5932 = vmatprep.subr.bf16.mxu1 %v11056_v62  ;;  %v2043_v62 = vpack.c.bf16 %v1859_v56, %v1850_v25  ;;  %v11084_v63 = vld [vmem:[%s16954_s4 + $0xc48] ss:$16 sps:$4 sm:$0xff]   ;;  %v1894_v56 = vrot.slane %v14306_v26, 3  ;;  %v1885_v25 = vrot.slane %v14312_v58, 3 }
 0x2d5   :  { %5349 = vmatpush1.bf16.msra.mxu0 %v11051_v8  ;;  %v11077_v8 = vld [vmem:[%s16954_s4 + $0xc24] ss:$16 sps:$4 sm:$0xff]  }
 0x2d6   :  { %5933 = vmatpush1.bf16.msra.mxu1 %v11054_v40  ;;  %5350 = vmatprep.subr.bf16.mxu0 %v11059_v17  ;;  %v11080_v40 = vld [vmem:[%s16954_s4 + $0xc2c] ss:$16 sps:$4 sm:$0xff]   ;;  %v1876_v17 = vrot.slane %v14263_v4, 3 }
 0x2d7   :  { %5934 = vmatprep.subr.bf16.mxu1 %v11062_v11  ;;  %v11075_v11 = vld [vmem:[%s16954_s4 + $0xc20] ss:$16 sps:$4 sm:$0xff]  }
 0x2d9   :  { %5351 = vmatpush1.bf16.msra.mxu0 %v11057_v57  ;;  %v1867_v57 = vrot.slane %v14271_v18, 3 }
 0x2da   :  { %5935 = vmatpush1.bf16.msra.mxu1 %v11060_v42  ;;  %5352 = vmatprep.subr.bf16.mxu0 %v11065_v32  ;;  %v1875_v42 = vrot.slane %v13972_v19, 3  ;;  %v11078_v32 = vld [vmem:[%s16954_s4 + $0xc28] ss:$16 sps:$4 sm:$0xff]  }
 0x2db   :  { %5936 = vmatprep.subr.bf16.mxu1 %v11068_v38  ;;  %v11086_v38 = vld [vmem:[%s16954_s4 + $0xc4c] ss:$16 sps:$4 sm:$0xff]  }
 0x2dd   :  { %5353 = vmatpush1.bf16.msra.mxu0 %v11063_v15  ;;  %v1877_v15 = vsel %vm1823_vm0, %v1875_v42, %v1876_v17  ;;  %v11096_v42 = vld [vmem:[%s16954_s4 + $0xc88] ss:$16 sps:$4 sm:$0xff]  }
 0x2de   :  { %5937 = vmatpush1.bf16.msra.mxu1 %v11066_v31  ;;  %5395 = vmatprep.subr.bf16.mxu0 %v11071_v33  ;;  %v11081_v31 = vld [vmem:[%s16954_s4 + $0xc40] ss:$16 sps:$4 sm:$0xff]   ;;  %v1868_v33 = vsel %vm1823_vm0, %v1866_v45, %v1867_v57  ;;  %v1934_v45 = vrot.slane %v13549_v44, 4  ;;  %v11107_v44 = vld [vmem:[%s16954_s4 + $0xcc4] ss:$16 sps:$4 sm:$0xff]  }
 0x2df   :  { %5979 = vmatprep.subr.bf16.mxu1 %v11074_v2  ;;  %v2058_v9 = vpack.c.bf16 %v1877_v15, %v1868_v33  ;;  %v11089_v2 = vld [vmem:[%s16954_s4 + $0xc64] ss:$16 sps:$4 sm:$0xff]   ;;  %v11099_v15 = vld [vmem:[%s16954_s4 + $0xca0] ss:$16 sps:$4 sm:$0xff]   ;;  %v1933_v33 = vrot.slane %v17296_v13, 4 }
 0x2e0   :  { %5355 = vmatmul.mubr.bf16.vlgmr.msra.gmra.mrb[96].mxu0 %v14114_v48  ;;  %v11105_v13 = vld [vmem:[%s16954_s4 + $0xcc0] ss:$16 sps:$4 sm:$0xff]  }
 0x2e1   :  { %5939 = vmatmul.mubr.bf16.vlgmr.msra.gmra.mrb[96].mxu1 %v14114_v48  ;;  %5364 = vmatprep.mubr.bf16.mxu0 %v2043_v62  ;;  %v11083_v48 = vld [vmem:[%s16954_s4 + $0xc44] ss:$16 sps:$4 sm:$0xff]  }
 0x2e2   :  { %5396 = vmatpush1.bf16.msra.mxu0 %v11069_v52  ;;  %5948 = vmatprep.mubr.bf16.mxu1 %v2043_v62  ;;  %v11087_v52 = vld [vmem:[%s16954_s4 + $0xc60] ss:$16 sps:$4 sm:$0xff]   ;;  %v11090_v62 = vld [vmem:[%s16954_s4 + $0xc68] ss:$16 sps:$4 sm:$0xff]  }
 0x2e3   :  { %5980 = vmatpush1.bf16.msra.mxu1 %v11072_v12  ;;  %5397 = vmatprep.subr.bf16.mxu0 %v11077_v8  ;;  %v1893_v12 = vrot.slane %v14054_v60, 3  ;;  %v11098_v8 = vld [vmem:[%s16954_s4 + $0xc8c] ss:$16 sps:$4 sm:$0xff]  }
 0x2e4   :  { %5981 = vmatprep.subr.bf16.mxu1 %v11080_v40  ;;  %v1884_v40 = vrot.slane %v14061_v5, 3 }
 0x2e5   :  { %v1895_v17 = vsel %vm1823_vm0, %v1893_v12, %v1894_v56  ;;  %v11114_v12 = vld [vmem:[%s16954_s4 + $0xce8] ss:$16 sps:$4 sm:$0xff]  }
 0x2e6   :  { %5398 = vmatpush1.bf16.msra.mxu0 %v11075_v11  ;;  %v11093_v11 = vld [vmem:[%s16954_s4 + $0xc80] ss:$16 sps:$4 sm:$0xff]   ;;  %v1886_v57 = vsel %vm1823_vm0, %v1884_v40, %v1885_v25  ;;  %v11125_v40 = vld [vmem:[%s16954_s4 + $0xd24] ss:$16 sps:$4 sm:$0xff]  }
 0x2e7   :  { %5982 = vmatpush1.bf16.msra.mxu1 %v11078_v32  ;;  %5399 = vmatprep.subr.bf16.mxu0 %v11083_v48  ;;  %v2073_v32 = vpack.c.bf16 %v1895_v17, %v1886_v57  ;;  %v11101_v48 = vld [vmem:[%s16954_s4 + $0xca4] ss:$16 sps:$4 sm:$0xff]   ;;  %v11111_v25 = vld [vmem:[%s16954_s4 + $0xce0] ss:$16 sps:$4 sm:$0xff]   ;;  %v11128_v17 = vld [vmem:[%s16954_s4 + $0xd2c] ss:$16 sps:$4 sm:$0xff]  }
 0x2e8   :  { %5365 = vmatmul.mubr.bf16.gmra.mrb[100].mxu0 %v14134_v24  ;;  %5983 = vmatprep.subr.bf16.mxu1 %v11086_v38  ;;  %v11104_v38 = vld [vmem:[%s16954_s4 + $0xcac] ss:$16 sps:$4 sm:$0xff]   ;;  %v11126_v57 = vld [vmem:[%s16954_s4 + $0xd28] ss:$16 sps:$4 sm:$0xff]  }
 0x2e9   :  { %5949 = vmatmul.mubr.bf16.gmra.mrb[100].mxu1 %v14134_v24  ;;  %5374 = vmatprep.mubr.bf16.mxu0 %v2058_v9  ;;  %v11095_v24 = vld [vmem:[%s16954_s4 + $0xc84] ss:$16 sps:$4 sm:$0xff]  }
 0x2ea   :  { %5400 = vmatpush1.bf16.msra.mxu0 %v11081_v31  ;;  %5958 = vmatprep.mubr.bf16.mxu1 %v2058_v9  ;;  %v1925_v31 = vrot.slane %v13795_v35, 4  ;;  %v1924_v9 = vrot.slane %v17295_v6, 4  ;;  %v1935_v35 = vsel %vm1920_vm2, %v1933_v33, %v1934_v45  ;;  %v11113_v6 = vld [vmem:[%s16954_s4 + $0xce4] ss:$16 sps:$4 sm:$0xff]   ;;  %v11138_v33 = vld [vmem:[%s16954_s4 + $0xd68] ss:$16 sps:$4 sm:$0xff]  }
 0x2eb   :  { %5984 = vmatpush1.bf16.msra.mxu1 %v11084_v63  ;;  %5401 = vmatprep.subr.bf16.mxu0 %v11089_v2  ;;  %v11102_v63 = vld [vmem:[%s16954_s4 + $0xca8] ss:$16 sps:$4 sm:$0xff]   ;;  %v11137_v45 = vld [vmem:[%s16954_s4 + $0xd64] ss:$16 sps:$4 sm:$0xff]  }
 0x2ec   :  { %5985 = vmatprep.subr.bf16.mxu1 %v11092_v50  ;;  %v1926_v2 = vsel %vm1920_vm2, %v1924_v9, %v1925_v31  ;;  %v11108_v50 = vld [vmem:[%s16954_s4 + $0xcc8] ss:$16 sps:$4 sm:$0xff]   ;;  %v11135_v31 = vld [vmem:[%s16954_s4 + $0xd60] ss:$16 sps:$4 sm:$0xff]  }
 0x2ed   :  { %v2030_v56 = vpack.c.bf16 %v1935_v35, %v1926_v2  ;;  %v11144_v9 = vld [vmem:[%s16954_s4 + $0xd88] ss:$16 sps:$4 sm:$0xff]   ;;  %v11149_v35 = vld [vmem:[%s16954_s4 + $0xda4] ss:$16 sps:$4 sm:$0xff]   ;;  %v11147_v2 = vld [vmem:[%s16954_s4 + $0xda0] ss:$16 sps:$4 sm:$0xff]  }
 0x2ee   :  { %5402 = vmatpush1.bf16.msra.mxu0 %v11087_v52  ;;  %v11116_v52 = vld [vmem:[%s16954_s4 + $0xcec] ss:$16 sps:$4 sm:$0xff]  }
 0x2ef   :  { %5986 = vmatpush1.bf16.msra.mxu1 %v11090_v62  ;;  %5403 = vmatprep.subr.bf16.mxu0 %v11095_v24  ;;  %v11119_v62 = vld [vmem:[%s16954_s4 + $0xd04] ss:$16 sps:$4 sm:$0xff]   ;;  %v11117_v24 = vld [vmem:[%s16954_s4 + $0xd00] ss:$16 sps:$4 sm:$0xff]  }
 0x2f0   :  { %5375 = vmatmul.mubr.bf16.gmra.mrb[104].mxu0 %v14154_v7  ;;  %5987 = vmatprep.subr.bf16.mxu1 %v11098_v8  ;;  %v11120_v8 = vld [vmem:[%s16954_s4 + $0xd08] ss:$16 sps:$4 sm:$0xff]  }
 0x2f1   :  { %5959 = vmatmul.mubr.bf16.gmra.mrb[104].mxu1 %v14154_v7  ;;  %5384 = vmatprep.mubr.bf16.mxu0 %v2073_v32  ;;  %v11110_v7 = vld [vmem:[%s16954_s4 + $0xccc] ss:$16 sps:$4 sm:$0xff]  }
 0x2f2   :  { %5404 = vmatpush1.bf16.msra.mxu0 %v11093_v11  ;;  %5968 = vmatprep.mubr.bf16.mxu1 %v2073_v32  ;;  %v11123_v11 = vld [vmem:[%s16954_s4 + $0xd20] ss:$16 sps:$4 sm:$0xff]   ;;  %v11134_v32 = vld [vmem:[%s16954_s4 + $0xd4c] ss:$16 sps:$4 sm:$0xff]  }
 0x2f3   :  { %5988 = vmatpush1.bf16.msra.mxu1 %v11096_v42  ;;  %5405 = vmatprep.subr.bf16.mxu0 %v11101_v48  ;;  %v11131_v42 = vld [vmem:[%s16954_s4 + $0xd44] ss:$16 sps:$4 sm:$0xff]   ;;  %v11129_v48 = vld [vmem:[%s16954_s4 + $0xd40] ss:$16 sps:$4 sm:$0xff]  }
 0x2f4   :  { %5989 = vmatprep.subr.bf16.mxu1 %v11104_v38  ;;  %v11132_v38 = vld [vmem:[%s16954_s4 + $0xd48] ss:$16 sps:$4 sm:$0xff]  }
 0x2f6   :  { %5406 = vmatpush1.bf16.msra.mxu0 %v11099_v15  ;;  %v11140_v15 = vld [vmem:[%s16954_s4 + $0xd6c] ss:$16 sps:$4 sm:$0xff]  }
 0x2f7   :  { %5990 = vmatpush1.bf16.msra.mxu1 %v11102_v63  ;;  %5407 = vmatprep.subr.bf16.mxu0 %v11107_v44  ;;  %v11143_v63 = vld [vmem:[%s16954_s4 + $0xd84] ss:$16 sps:$4 sm:$0xff]   ;;  %v11146_v44 = vld [vmem:[%s16954_s4 + $0xd8c] ss:$16 sps:$4 sm:$0xff]  }
 0x2f8   :  { %5385 = vmatmul.mubr.bf16.gmra.mrb[108].mxu0 %v14173_v36  ;;  %5991 = vmatprep.subr.bf16.mxu1 %v11110_v7  ;;  %v11141_v7 = vld [vmem:[%s16954_s4 + $0xd80] ss:$16 sps:$4 sm:$0xff]  }
 0x2f9   :  { %5969 = vmatmul.mubr.bf16.gmra.mrb[108].mxu1 %v14173_v36  ;;  %5427 = vmatprep.mubr.bf16.mxu0 %v2030_v56  ;;  %v11122_v36 = vld [vmem:[%s16954_s4 + $0xd0c] ss:$16 sps:$4 sm:$0xff]  }
 0x2fa   :  { %5408 = vmatpush1.bf16.msra.mxu0 %v11105_v13  ;;  %6011 = vmatprep.mubr.bf16.mxu1 %v2030_v56  ;;  %v11152_v13 = vld [vmem:[%s16954_s4 + $0xdac] ss:$16 sps:$4 sm:$0xff]   ;;  %v11155_v56 = vld [vmem:[%s16954_s4 + $0xdc4] ss:$16 sps:$4 sm:$0xff]  }
 0x2fb   :  { %5992 = vmatpush1.bf16.msra.mxu1 %v11108_v50  ;;  %5409 = vmatprep.subr.bf16.mxu0 %v11113_v6  ;;  %v11150_v50 = vld [vmem:[%s16954_s4 + $0xda8] ss:$16 sps:$4 sm:$0xff]   ;;  %v11158_v6 = vld [vmem:[%s16954_s4 + $0xdcc] ss:$16 sps:$4 sm:$0xff]  }
 0x2fc   :  { %5993 = vmatprep.subr.bf16.mxu1 %v11116_v52  ;;  %v11153_v52 = vld [vmem:[%s16954_s4 + $0xdc0] ss:$16 sps:$4 sm:$0xff]  }
 0x2fe   :  { %5410 = vmatpush1.bf16.msra.mxu0 %v11111_v25  ;;  %v11156_v25 = vld [vmem:[%s16954_s4 + $0xdc8] ss:$16 sps:$4 sm:$0xff]  }
 0x2ff   :  { %5994 = vmatpush1.bf16.msra.mxu1 %v11114_v12  ;;  %5411 = vmatprep.subr.bf16.mxu0 %v11119_v62  ;;  %v11161_v12 = vld [vmem:[%s16954_s4 + $0xde4] ss:$16 sps:$4 sm:$0xff]   ;;  %v1931_v62 = vrot.slane %v13574_v21, 4  ;;  %v11162_v21 = vld [vmem:[%s16954_s4 + $0xde8] ss:$16 sps:$4 sm:$0xff]  }
 0x300   :  { %5995 = vmatprep.subr.bf16.mxu1 %v11122_v36  ;;  %v11164_v36 = vld [vmem:[%s16954_s4 + $0xdec] ss:$16 sps:$4 sm:$0xff]  }
 0x302   :  { %5412 = vmatpush1.bf16.msra.mxu0 %v11117_v24  ;;  %v1930_v24 = vrot.slane %v17309_v28, 4  ;;  %v1921_v28 = vrot.slane %v17311_v1, 4  ;;  %v11168_v1 = vld [vmem:[%s16954_s4 + $0xe08] ss:$16 sps:$4 sm:$0xff]  }
 0x303   :  { %5996 = vmatpush1.bf16.msra.mxu1 %v11120_v8  ;;  %5413 = vmatprep.subr.bf16.mxu0 %v11125_v40  ;;  %v11159_v8 = vld [vmem:[%s16954_s4 + $0xde0] ss:$16 sps:$4 sm:$0xff]   ;;  %v1922_v40 = vrot.slane %v17310_v39, 4 }
 0x304   :  { %5997 = vmatprep.subr.bf16.mxu1 %v11128_v17  ;;  %v11167_v17 = vld [vmem:[%s16954_s4 + $0xe04] ss:$16 sps:$4 sm:$0xff]  }
 0x305   :  { %v1923_v39 = vsel %vm1920_vm2, %v1921_v28, %v1922_v40  ;;  %v1976_v40 = vrot.slane %v17316_v30, 4  ;;  %v1975_v28 = vrot.slane %v13684_v46, 4  ;;  %v11203_v30 = vld [vmem:[%s16954_s4 + $0xec4] ss:$16 sps:$4 sm:$0xff]   ;;  %v11204_v46 = vld [vmem:[%s16954_s4 + $0xec8] ss:$16 sps:$4 sm:$0xff]  }
 0x306   :  { %5414 = vmatpush1.bf16.msra.mxu0 %v11123_v11  ;;  %v1932_v11 = vsel %vm1920_vm2, %v1930_v24, %v1931_v62  ;;  %v11189_v62 = vld [vmem:[%s16954_s4 + $0xe80] ss:$16 sps:$4 sm:$0xff]   ;;  %v1985_v24 = vrot.slane %v13943_v49, 4 }
 0x307   :  { %5998 = vmatpush1.bf16.msra.mxu1 %v11126_v57  ;;  %5415 = vmatprep.subr.bf16.mxu0 %v11131_v42  ;;  %v11170_v57 = vld [vmem:[%s16954_s4 + $0xe0c] ss:$16 sps:$4 sm:$0xff]   ;;  %v2029_v42 = vpack.c.bf16 %v1932_v11, %v1923_v39  ;;  %v11195_v49 = vld [vmem:[%s16954_s4 + $0xea0] ss:$16 sps:$4 sm:$0xff]  }
 0x308   :  { %5999 = vmatprep.subr.bf16.mxu1 %v11134_v32  ;;  %v11165_v32 = vld [vmem:[%s16954_s4 + $0xe00] ss:$16 sps:$4 sm:$0xff]  }
 0x309   :  { %v11201_v39 = vld [vmem:[%s16954_s4 + $0xec0] ss:$16 sps:$4 sm:$0xff]  }
 0x30a   :  { %5416 = vmatpush1.bf16.msra.mxu0 %v11129_v48  ;;  %v11173_v48 = vld [vmem:[%s16954_s4 + $0xe24] ss:$16 sps:$4 sm:$0xff]  }
 0x30b   :  { %6000 = vmatpush1.bf16.msra.mxu1 %v11132_v38  ;;  %5417 = vmatprep.subr.bf16.mxu0 %v11137_v45  ;;  %v1949_v38 = vrot.slane %v17312_v16, 4  ;;  %v11176_v45 = vld [vmem:[%s16954_s4 + $0xe2c] ss:$16 sps:$4 sm:$0xff]   ;;  %v11174_v16 = vld [vmem:[%s16954_s4 + $0xe28] ss:$16 sps:$4 sm:$0xff]  }
 0x30c   :  { %6001 = vmatprep.subr.bf16.mxu1 %v11140_v15  ;;  %v1940_v15 = vrot.slane %v17313_v20, 4  ;;  %v11179_v20 = vld [vmem:[%s16954_s4 + $0xe44] ss:$16 sps:$4 sm:$0xff]  }
 0x30e   :  { %5418 = vmatpush1.bf16.msra.mxu0 %v11135_v31  ;;  %v1948_v31 = vrot.slane %v17314_v53, 4 }
 0x30f   :  { %6002 = vmatpush1.bf16.msra.mxu1 %v11138_v33  ;;  %5419 = vmatprep.subr.bf16.mxu0 %v11143_v63  ;;  %v11171_v33 = vld [vmem:[%s16954_s4 + $0xe20] ss:$16 sps:$4 sm:$0xff]   ;;  %v1939_v63 = vrot.slane %v17315_v55, 4  ;;  %v11180_v55 = vld [vmem:[%s16954_s4 + $0xe48] ss:$16 sps:$4 sm:$0xff]  }
 0x310   :  { %6003 = vmatprep.subr.bf16.mxu1 %v11146_v44  ;;  %v1950_v44 = vsel %vm1920_vm2, %v1948_v31, %v1949_v38  ;;  %v1936_v38 = vrot.slane %v13546_v34, 4  ;;  %v1927_v31 = vrot.slane %v13862_v22, 4  ;;  %v1945_v22 = vrot.slane %v13922_v14, 4 }
 0x311   :  { %v1941_v53 = vsel %vm1920_vm2, %v1939_v63, %v1940_v15  ;;  %v11210_v15 = vld [vmem:[%s16954_s4 + $0xee8] ss:$16 sps:$4 sm:$0xff]   ;;  %v1955_v63 = vrot.slane %v14212_v29, 4  ;;  %v1964_v29 = vrot.slane %v14271_v18, 4  ;;  %v1990_v18 = vrot.slane %v14054_v60, 4 }
 0x312   :  { %5420 = vmatpush1.bf16.msra.mxu0 %v11141_v7  ;;  %v2044_v7 = vpack.c.bf16 %v1950_v44, %v1941_v53  ;;  %v1954_v44 = vrot.slane %v13891_v3, 4  ;;  %v1963_v3 = vrot.slane %v14012_v59, 4 }
 0x313   :  { %6004 = vmatpush1.bf16.msra.mxu1 %v11144_v9  ;;  %5421 = vmatprep.subr.bf16.mxu0 %v11149_v35  ;;  %v11177_v9 = vld [vmem:[%s16954_s4 + $0xe40] ss:$16 sps:$4 sm:$0xff]   ;;  %v11185_v35 = vld [vmem:[%s16954_s4 + $0xe64] ss:$16 sps:$4 sm:$0xff]  }
 0x314   :  { %6005 = vmatprep.subr.bf16.mxu1 %v11152_v13  ;;  %v1967_v13 = vrot.slane %v13809_v51, 4  ;;  %v11183_v51 = vld [vmem:[%s16954_s4 + $0xe60] ss:$16 sps:$4 sm:$0xff]  }
 0x316   :  { %5422 = vmatpush1.bf16.msra.mxu0 %v11147_v2  ;;  %v11188_v2 = vld [vmem:[%s16954_s4 + $0xe6c] ss:$16 sps:$4 sm:$0xff]  }
 0x317   :  { %6006 = vmatpush1.bf16.msra.mxu1 %v11150_v50  ;;  %5423 = vmatprep.subr.bf16.mxu0 %v11155_v56  ;;  %v1958_v50 = vrot.slane %v13783_v10, 4  ;;  %v1966_v56 = vrot.slane %v13483_v27, 4  ;;  %v11191_v27 = vld [vmem:[%s16954_s4 + $0xe84] ss:$16 sps:$4 sm:$0xff]   ;;  %v11194_v10 = vld [vmem:[%s16954_s4 + $0xe8c] ss:$16 sps:$4 sm:$0xff]  }
 0x318   :  { %6007 = vmatprep.subr.bf16.mxu1 %v11158_v6  ;;  %v11186_v6 = vld [vmem:[%s16954_s4 + $0xe68] ss:$16 sps:$4 sm:$0xff]  }
 0x31a   :  { %5424 = vmatpush1.bf16.msra.mxu0 %v11153_v52  ;;  %v1957_v52 = vrot.slane %v13511_v47, 4  ;;  %v11192_v47 = vld [vmem:[%s16954_s4 + $0xe88] ss:$16 sps:$4 sm:$0xff]  }
 0x31b   :  { %6008 = vmatpush1.bf16.msra.mxu1 %v11156_v25  ;;  %5425 = vmatprep.subr.bf16.mxu0 %v11161_v12  ;;  %v1968_v25 = vsel %vm1920_vm2, %v1966_v56, %v1967_v13 }
 0x31c   :  { %6009 = vmatprep.subr.bf16.mxu1 %v11164_v36  ;;  %v11197_v36 = vld [vmem:[%s16954_s4 + $0xea4] ss:$16 sps:$4 sm:$0xff]  }
 0x31e   :  { %5426 = vmatpush1.bf16.msra.mxu0 %v11159_v8  ;;  %v11200_v8 = vld [vmem:[%s16954_s4 + $0xeac] ss:$16 sps:$4 sm:$0xff]  }
 0x31f   :  { %6010 = vmatpush1.bf16.msra.mxu1 %v11162_v21  ;;  %5468 = vmatprep.subr.bf16.mxu0 %v11167_v17  ;;  %v1984_v21 = vrot.slane %v17317_v61, 4  ;;  %v11198_v17 = vld [vmem:[%s16954_s4 + $0xea8] ss:$16 sps:$4 sm:$0xff]   ;;  %v1977_v61 = vsel %vm1920_vm2, %v1975_v28, %v1976_v40 }
 0x320   :  { %6052 = vmatprep.subr.bf16.mxu1 %v11170_v57 }
 0x321   :  { %5428 = vmatmul.mubr.bf16.vlgmr.msra.gmra.mrb[96].mxu0 %v2029_v42  ;;  %v1986_v11 = vsel %vm1920_vm2, %v1984_v21, %v1985_v24 }
 0x322   :  { %6012 = vmatmul.mubr.bf16.vlgmr.msra.gmra.mrb[96].mxu1 %v2029_v42  ;;  %5437 = vmatprep.mubr.bf16.mxu0 %v14203_v54  ;;  %v2074_v57 = vpack.c.bf16 %v1986_v11, %v1977_v61  ;;  %v11209_v42 = vld [vmem:[%s16954_s4 + $0xee4] ss:$16 sps:$4 sm:$0xff]  }
 0x323   :  { %5469 = vmatpush1.bf16.msra.mxu0 %v11165_v32  ;;  %6021 = vmatprep.mubr.bf16.mxu1 %v14203_v54  ;;  %v11182_v54 = vld [vmem:[%s16954_s4 + $0xe4c] ss:$16 sps:$4 sm:$0xff]   ;;  %v1937_v32 = vrot.slane %v14005_v43, 4  ;;  %v1928_v43 = vrot.slane %v14039_v37, 4  ;;  %v1946_v37 = vrot.slane %v14221_v0, 4  ;;  %v1972_v0 = vrot.slane %v13972_v19, 4 }
 0x324   :  { %6053 = vmatpush1.bf16.msra.mxu1 %v11168_v1  ;;  %5470 = vmatprep.subr.bf16.mxu0 %v11173_v48  ;;  %v11212_v1 = vld [vmem:[%s16954_s4 + $0xeec] ss:$16 sps:$4 sm:$0xff]   ;;  %v17318_v48 = vmov 0   ;;  %v1981_v19 = vrot.slane %v14061_v5, 4 }
 0x325   :  { %6054 = vmatprep.subr.bf16.mxu1 %v11176_v45  ;;  %v11207_v45 = vld [vmem:[%s16954_s4 + $0xee0] ss:$16 sps:$4 sm:$0xff]   ;;  %v1938_v34 = vsel %vm1920_vm2, %v1936_v38, %v1937_v32 }
 0x327   :  { %5471 = vmatpush1.bf16.msra.mxu0 %v11171_v33  ;;  %v1929_v33 = vsel %vm1920_vm2, %v1927_v31, %v1928_v43 }
 0x328   :  { %6055 = vmatpush1.bf16.msra.mxu1 %v11174_v16  ;;  %5472 = vmatprep.subr.bf16.mxu0 %v11179_v20  ;;  %v2031_v16 = vpack.c.bf16 %v1938_v34, %v1929_v33  ;;  %v1956_v20 = vsel %vm1920_vm2, %v1954_v44, %v1955_v63 }
 0x329   :  { %5438 = vmatmul.mubr.bf16.gmra.mrb[100].mxu0 %v2044_v7  ;;  %6056 = vmatprep.subr.bf16.mxu1 %v11182_v54  ;;  %v1947_v54 = vsel %vm1920_vm2, %v1945_v22, %v1946_v37 }
 0x32a   :  { %6022 = vmatmul.mubr.bf16.gmra.mrb[100].mxu1 %v2044_v7  ;;  %5447 = vmatprep.mubr.bf16.mxu0 %v14229_v41  ;;  %v2046_v53 = vpack.c.bf16 %v1956_v20, %v1947_v54  ;;  %v1973_v7 = vrot.slane %v14263_v4, 4  ;;  %v1982_v4 = vrot.slane %v14312_v58, 4 }
 0x32b   :  { %5473 = vmatpush1.bf16.msra.mxu0 %v11177_v9  ;;  %6031 = vmatprep.mubr.bf16.mxu1 %v14229_v41  ;;  %v1959_v41 = vsel %vm1920_vm2, %v1957_v52, %v1958_v50  ;;  %v1965_v9 = vsel %vm1920_vm2, %v1963_v3, %v1964_v29 }
 0x32c   :  { %6057 = vmatpush1.bf16.msra.mxu1 %v11180_v55  ;;  %5474 = vmatprep.subr.bf16.mxu0 %v11185_v35  ;;  %v2059_v12 = vpack.c.bf16 %v1968_v25, %v1959_v41  ;;  %v1974_v14 = vsel %vm1920_vm2, %v1972_v0, %v1973_v7  ;;  %v1991_v35 = vrot.slane %v14306_v26, 4  ;;  %v1983_v13 = vsel %vm1920_vm2, %v1981_v19, %v1982_v4 }
 0x32d   :  { %6058 = vmatprep.subr.bf16.mxu1 %v11188_v2  ;;  %v2061_v55 = vpack.c.bf16 %v1974_v14, %v1965_v9  ;;  %v24_v26 = vstv %s16956_s9 }
 0x32e   :  { %v1992_v59 = vsel %vm1920_vm2, %v1990_v18, %v1991_v35  ;;  %25 = vst [vmem:[#allocation4] sm:$0x1] %v24_v26  ;;  %v11215_v26 = vld [vmem:[%s16957_s7 + $0x1c4] ss:$8 sps:$4 sm:$0xff]  }
 0x32f   :  { %5475 = vmatpush1.bf16.msra.mxu0 %v11183_v51  ;;  %v2076_v2 = vpack.c.bf16 %v1992_v59, %v1983_v13 }
 0x330   :  { %6059 = vmatpush1.bf16.msra.mxu1 %v11186_v6  ;;  %5476 = vmatprep.subr.bf16.mxu0 %v11191_v27 }
 0x331   :  { %5448 = vmatmul.mubr.bf16.gmra.mrb[104].mxu0 %v2059_v12  ;;  %6060 = vmatprep.subr.bf16.mxu1 %v11194_v10 }
 0x332   :  { %6032 = vmatmul.mubr.bf16.gmra.mrb[104].mxu1 %v2059_v12  ;;  %5457 = vmatprep.mubr.bf16.mxu0 %v14255_v23 }
 0x333   :  { %5477 = vmatpush1.bf16.msra.mxu0 %v11189_v62  ;;  %6041 = vmatprep.mubr.bf16.mxu1 %v14255_v23  ;;  %v11206_v23 = vld [vmem:[%s16954_s4 + $0xecc] ss:$16 sps:$4 sm:$0xff]  }
 0x334   :  { %6061 = vmatpush1.bf16.msra.mxu1 %v11192_v47  ;;  %5478 = vmatprep.subr.bf16.mxu0 %v11197_v36 }
 0x335   :  { %6062 = vmatprep.subr.bf16.mxu1 %v11200_v8 }
 0x337   :  { %5479 = vmatpush1.bf16.msra.mxu0 %v11195_v49 }
 0x338   :  { %6063 = vmatpush1.bf16.msra.mxu1 %v11198_v17  ;;  %5480 = vmatprep.subr.bf16.mxu0 %v11203_v30 }
 0x339   :  { %5458 = vmatmul.mubr.bf16.gmra.mrb[108].mxu0 %v2074_v57  ;;  %6064 = vmatprep.subr.bf16.mxu1 %v11206_v23 }
 0x33a   :  { %6042 = vmatmul.mubr.bf16.gmra.mrb[108].mxu1 %v2074_v57  ;;  %5500 = vmatprep.mubr.bf16.mxu0 %v17318_v48 }
 0x33b   :  { %5481 = vmatpush1.bf16.msra.mxu0 %v11201_v39  ;;  %6084 = vmatprep.mubr.bf16.mxu1 %v17318_v48 }
 0x33c   :  { %6065 = vmatpush1.bf16.msra.mxu1 %v11204_v46  ;;  %5482 = vmatprep.subr.bf16.mxu0 %v11209_v42 }
 0x33d   :  { %6066 = vmatprep.subr.bf16.mxu1 %v11212_v1 }
 0x33f   :  { %5483 = vmatpush1.bf16.msra.mxu0 %v11207_v45 }
 0x340   :  { %6067 = vmatpush1.bf16.msra.mxu1 %v11210_v15  ;;  %7160 = vmatprep.subr.bf16.mxu0 %v11215_v26  ;;  %v11245_v26 = vld [vmem:[%s16957_s7 + $0x214] ss:$8 sps:$4 sm:$0xff]  }
 0x342   :  { %5501 = vmatmul.mubr.bf16.vlgmr.msra.gmra.mrb[96].mxu0 %v2031_v16 }
 0x343   :  { %6085 = vmatmul.mubr.bf16.vlgmr.msra.gmra.mrb[96].mxu1 %v2031_v16  ;;  %5510 = vmatprep.mubr.bf16.mxu0 %v17318_v48 }
 0x344   :  { %6094 = vmatprep.mubr.bf16.mxu1 %v17318_v48 }
 0x34a   :  { %5511 = vmatmul.mubr.bf16.gmra.mrb[100].mxu0 %v2046_v53 }
 0x34b   :  { %6095 = vmatmul.mubr.bf16.gmra.mrb[100].mxu1 %v2046_v53  ;;  %5520 = vmatprep.mubr.bf16.mxu0 %v17318_v48 }
 0x34c   :  { %6104 = vmatprep.mubr.bf16.mxu1 %v17318_v48 }
 0x352   :  { %5521 = vmatmul.mubr.bf16.gmra.mrb[104].mxu0 %v2061_v55 }
 0x353   :  { %6105 = vmatmul.mubr.bf16.gmra.mrb[104].mxu1 %v2061_v55  ;;  %5530 = vmatprep.mubr.bf16.mxu0 %v17318_v48 }
 0x354   :  { %6114 = vmatprep.mubr.bf16.mxu1 %v17318_v48 }
 0x35a   :  { %5531 = vmatmul.mubr.bf16.gmra.mrb[108].mxu0 %v2076_v2 }
 0x35b   :  { %6115 = vmatmul.mubr.bf16.gmra.mrb[108].mxu1 %v2076_v2  ;;  %v11213_v2 = vld [vmem:[%s16957_s7 + $0x1c0] ss:$8 sps:$4 sm:$0xff]  }
 0x35c   :  { %7161 = vmatpush1.bf16.msra.mxu0 %v11213_v2  ;;  %v11240_v2 = vld [vmem:[%s16957_s7 + $0x300] ss:$8 sps:$4 sm:$0xff]  }
 0x415   :  { %v5502_v50 = vpop.f32.mrb[96].mxu0 }
 0x416   :  { %v6158_v58 = vrot.slane %v5502_v50, 1  ;;  %v6086_v56 = vpop.f32.mrb[96].mxu1  ;;  %v5504_v60 = vpop.f32.mrb[97].mxu0 }
 0x417   :  { %v6160_v51 = vrot.slane %v6086_v56, 1  ;;  %v6088_v6 = vpop.f32.mrb[97].mxu1  ;;  %v5506_v52 = vpop.f32.mrb[98].mxu0  ;;  %v6159_v25 = vrot.slane %v5504_v60, 1 }
 0x418   :  { %v15344_v5 = vmax.f32 %v5502_v50, %v6158_v58  ;;  %v6090_v27 = vpop.f32.mrb[98].mxu1  ;;  %v5508_v10 = vpop.f32.mrb[99].mxu0  ;;  %v6161_v41 = vrot.slane %v6088_v6, 1  ;;  %v6162_v8 = vrot.slane %v5506_v52, 1  ;;  %v11216_v50 = vld [vmem:[%s16957_s7 + $0x2c0] ss:$8 sps:$4 sm:$0xff]  }
 0x419   :  { %v6092_v12 = vpop.f32.mrb[99].mxu1  ;;  %v15346_v62 = vmax.f32 %v6086_v56, %v6160_v51  ;;  %v15352_v47 = vmax.f32 %v5504_v60, %v6159_v25  ;;  %v6164_v36 = vrot.slane %v6090_v27, 1  ;;  %v6163_v1 = vrot.slane %v5508_v10, 1  ;;  %v11218_v58 = vld [vmem:[%s16957_s7 + $0x2c4] ss:$8 sps:$4 sm:$0xff]  }
 0x41a   :  { %6286 = vrot.lane.b32.xlu0 %v15344_v5, %s11616_s30  ;;  %v15354_v24 = vmax.f32 %v6088_v6, %v6161_v41  ;;  %v15364_v57 = vmax.f32 %v5506_v52, %v6162_v8  ;;  %v6165_v39 = vrot.slane %v6092_v12, 1  ;;  %7201 = vmatprep.subr.bf16.mxu1 %v11218_v58  ;;  %v11219_v52 = vld [vmem:[%s16957_s7 + $0x1d0] ss:$8 sps:$4 sm:$0xff]   ;;  %v11221_v25 = vld [vmem:[%s16957_s7 + $0x1d4] ss:$8 sps:$4 sm:$0xff]  }
 0x41b   :  { %6290 = vrot.lane.b32.xlu1 %v15346_v62, %s11616_s30  ;;  %v15362_v11 = vmax.f32 %v6090_v27, %v6164_v36  ;;  %v15388_v37 = vmax.f32 %v5508_v10, %v6163_v1  ;;  %v11222_v27 = vld [vmem:[%s16957_s7 + $0x2d0] ss:$8 sps:$4 sm:$0xff]   ;;  %7202 = vmatpush1.bf16.msra.mxu1 %v11216_v50  ;;  %v11224_v10 = vld [vmem:[%s16957_s7 + $0x2d4] ss:$8 sps:$4 sm:$0xff]  }
 0x41c   :  { %v15372_v48 = vmax.f32 %v6092_v12, %v6165_v39  ;;  %7162 = vmatprep.subr.bf16.mxu0 %v11221_v25  ;;  %7203 = vmatprep.subr.bf16.mxu1 %v11224_v10  ;;  %v11230_v39 = vld [vmem:[%s16957_s7 + $0x2e4] ss:$8 sps:$4 sm:$0xff]   ;;  %v11246_v50 = vld [vmem:[%s16957_s7 + $0x310] ss:$8 sps:$4 sm:$0xff]   ;;  %v11248_v58 = vld [vmem:[%s16957_s7 + $0x314] ss:$8 sps:$4 sm:$0xff]  }
 0x41d   :  { %v15356_v40 = vpop.f32.mrb[100].mxu0  ;;  %7163 = vmatpush1.bf16.msra.mxu0 %v11219_v52 }
 0x41e   :  { %v6096_v21 = vpop.f32.mrb[100].mxu1  ;;  %6288 = vrot.lane.b32.xlu0 %v15352_v47, %s11616_s30  ;;  %v5514_v49 = vpop.f32.mrb[101].mxu0 }
 0x41f   :  { %6292 = vrot.lane.b32.xlu1 %v15354_v24, %s11616_s30  ;;  %v6098_v17 = vpop.f32.mrb[101].mxu1  ;;  %v5516_v28 = vpop.f32.mrb[102].mxu0  ;;  %v6168_v30 = vrot.slane %v6096_v21, 1  ;;  %v6167_v7 = vrot.slane %v5514_v49, 1  ;;  %7204 = vmatpush1.bf16.msra.mxu1 %v11222_v27  ;;  %v11252_v27 = vld [vmem:[%s16957_s7 + $0x320] ss:$8 sps:$4 sm:$0xff]  }
 0x420   :  { %v6100_v23 = vpop.f32.mrb[102].mxu1  ;;  %v5518_v61 = vpop.f32.mrb[103].mxu0  ;;  %v6170_v34 = vrot.slane %v5516_v28, 1  ;;  %v6169_v44 = vrot.slane %v6098_v17, 1  ;;  %7205 = vmatprep.subr.bf16.mxu1 %v11230_v39 }
 0x421   :  { %v6102_v46 = vpop.f32.mrb[103].mxu1  ;;  %v15370_v42 = vmax.f32 %v6096_v21, %v6168_v30  ;;  %v6172_v32 = vrot.slane %v6100_v23, 1  ;;  %v6171_v54 = vrot.slane %v5518_v61, 1  ;;  %v15416_v19 = vmax.f32 %v5514_v49, %v6167_v7  ;;  %v11228_v30 = vld [vmem:[%s16957_s7 + $0x2e0] ss:$8 sps:$4 sm:$0xff]  }
 0x422   :  { %6298 = vrot.lane.b32.xlu0 %v15362_v11, %s11616_s30  ;;  %v15396_v20 = vmax.f32 %v5516_v28, %v6170_v34  ;;  %v15398_v53 = vmax.f32 %v6098_v17, %v6169_v44  ;;  %v6173_v59 = vrot.slane %v6102_v46, 1  ;;  %v11225_v17 = vld [vmem:[%s16957_s7 + $0x1e0] ss:$8 sps:$4 sm:$0xff]   ;;  %v11227_v28 = vld [vmem:[%s16957_s7 + $0x1e4] ss:$8 sps:$4 sm:$0xff]  }
 0x423   :  { %6294 = vrot.lane.b32.xlu1 %v15364_v57, %s11616_s30  ;;  %v15384_v33 = vmax.f32 %v6100_v23, %v6172_v32  ;;  %v15412_v55 = vmax.f32 %v5518_v61, %v6171_v54  ;;  %7164 = vmatprep.subr.bf16.mxu0 %v11227_v28  ;;  %v11234_v34 = vld [vmem:[%s16957_s7 + $0x2f0] ss:$8 sps:$4 sm:$0xff]  }
 0x424   :  { %v15438_v6 = vmax.f32 %v6102_v46, %v6173_v59  ;;  %v6166_v46 = vrot.slane %v15356_v40, 1  ;;  %7165 = vmatpush1.bf16.msra.mxu0 %v11225_v17  ;;  %7206 = vmatpush1.bf16.msra.mxu1 %v11228_v30  ;;  %v11239_v59 = vld [vmem:[%s16957_s7 + $0x204] ss:$8 sps:$4 sm:$0xff]   ;;  %v10111_v17 = vld [vmem:[#allocation4] ss:$0 sm:$0xff] }
 0x425   :  { %v15374_v38 = vpop.f32.mrb[104].mxu0  ;;  %v11257_v30 = vld [vmem:[%s16957_s7 + $0x234] ss:$8 sps:$4 sm:$0xff]  }
 0x426   :  { %v6106_v45 = vpop.f32.mrb[104].mxu1  ;;  %6306 = vrot.lane.b32.xlu0 %v15370_v42, %s11616_s30  ;;  %v15378_v43 = vpop.f32.mrb[105].mxu0 }
 0x427   :  { %v6108_v15 = vpop.f32.mrb[105].mxu1  ;;  %6300 = vrot.lane.b32.xlu1 %v15372_v48, %s11616_s30  ;;  %v15382_v31 = vpop.f32.mrb[106].mxu0  ;;  %v6176_v35 = vrot.slane %v6106_v45, 1  ;;  %v6175_v8 = vrot.slane %v15378_v43, 1 }
 0x428   :  { %v6110_v16 = vpop.f32.mrb[106].mxu1  ;;  %v15386_v63 = vpop.f32.mrb[107].mxu0  ;;  %v6177_v60 = vrot.slane %v6108_v15, 1  ;;  %v6178_v25 = vrot.slane %v15382_v31, 1 }
 0x429   :  { %v15390_v22 = vpop.f32.mrb[107].mxu1  ;;  %v15436_v56 = vmax.f32 %v6106_v45, %v6176_v35  ;;  %v6180_v51 = vrot.slane %v6110_v16, 1  ;;  %v15477_v23 = vmax.f32 %v15378_v43, %v6175_v8  ;;  %v11231_v43 = vld [vmem:[%s16957_s7 + $0x1f0] ss:$8 sps:$4 sm:$0xff]   ;;  %v6179_v44 = vrot.slane %v15386_v63, 1 }
 0x42a   :  { %6314 = vrot.lane.b32.xlu0 %v15384_v33, %s11616_s30  ;;  %v15458_v36 = vmax.f32 %v6108_v15, %v6177_v60  ;;  %v6181_v61 = vrot.slane %v15390_v22, 1  ;;  %v11233_v15 = vld [vmem:[%s16957_s7 + $0x1f4] ss:$8 sps:$4 sm:$0xff]   ;;  %v15586_v8 = vmax.f32 %v15382_v31, %v6178_v25  ;;  %v11255_v31 = vld [vmem:[%s16957_s7 + $0x230] ss:$8 sps:$4 sm:$0xff]  }
 0x42b   :  { %6296 = vrot.lane.b32.xlu1 %v15388_v37, %s11616_s30  ;;  %v15456_v41 = vmax.f32 %v6110_v16, %v6180_v51  ;;  %v15508_v16 = vmax.f32 %v15356_v40, %v6166_v46  ;;  %7166 = vmatprep.subr.bf16.mxu0 %v11233_v15  ;;  %v6174_v40 = vrot.slane %v15374_v38, 1  ;;  %v11261_v46 = vld [vmem:[%s16957_s7 + $0x240] ss:$8 sps:$4 sm:$0xff]   ;;  %v11267_v15 = vld [vmem:[%s16957_s7 + $0x250] ss:$8 sps:$4 sm:$0xff]  }
 0x42c   :  { %v15491_v1 = vmax.f32 %v15390_v22, %v6181_v61  ;;  %v11236_v22 = vld [vmem:[%s16957_s7 + $0x2f4] ss:$8 sps:$4 sm:$0xff]   ;;  %7167 = vmatpush1.bf16.msra.mxu0 %v11231_v43  ;;  %v11258_v61 = vld [vmem:[%s16957_s7 + $0x330] ss:$8 sps:$4 sm:$0xff]   ;;  %v11264_v43 = vld [vmem:[%s16957_s7 + $0x340] ss:$8 sps:$4 sm:$0xff]  }
 0x42d   :  { %v15400_v29 = vpop.f32.mrb[108].mxu0  ;;  %7207 = vmatprep.subr.bf16.mxu1 %v11236_v22  ;;  %7168 = vmatprep.subr.bf16.mxu0 %v11239_v59  ;;  %v15563_v52 = vmax.f32 %v15374_v38, %v6174_v40  ;;  %v11251_v38 = vld [vmem:[%s16957_s7 + $0x224] ss:$8 sps:$4 sm:$0xff]   ;;  %v11272_v22 = vld [vmem:[%s16957_s7 + $0x354] ss:$8 sps:$4 sm:$0xff]  }
 0x42e   :  { %v6116_v0 = vpop.f32.mrb[108].mxu1  ;;  %6310 = vrot.lane.b32.xlu0 %v15396_v20, %s11616_s30  ;;  %v15404_v3 = vpop.f32.mrb[109].mxu0  ;;  %7208 = vmatpush1.bf16.msra.mxu1 %v11234_v34  ;;  %v11269_v34 = vld [vmem:[%s16957_s7 + $0x254] ss:$8 sps:$4 sm:$0xff]   ;;  %v11275_v40 = vld [vmem:[%s16957_s7 + $0x264] ss:$8 sps:$4 sm:$0xff]  }
 0x42f   :  { %v15406_v14 = vpop.f32.mrb[109].mxu1  ;;  %6308 = vrot.lane.b32.xlu1 %v15398_v53, %s11616_s30  ;;  %v15410_v9 = vpop.f32.mrb[110].mxu0  ;;  %v6184_v12 = vrot.slane %v6116_v0, 1  ;;  %v6183_v35 = vrot.slane %v15404_v3, 1  ;;  %v11279_v59 = vld [vmem:[%s16957_s7 + $0x270] ss:$8 sps:$4 sm:$0xff]  }
 0x430   :  { %v6120_v4 = vpop.f32.mrb[110].mxu1  ;;  %v15414_v18 = vpop.f32.mrb[111].mxu0  ;;  %v6185_v45 = vrot.slane %v15406_v14, 1  ;;  %v6186_v28 = vrot.slane %v15410_v9, 1  ;;  %v11291_v25 = vld [vmem:[%s16957_s7 + $0x290] ss:$8 sps:$4 sm:$0xff]  }
 0x431   :  { %v15418_v13 = vpop.f32.mrb[111].mxu1  ;;  %v6188_v21 = vrot.slane %v6120_v4, 1  ;;  %v15465_v49 = vmax.f32 %v6116_v0, %v6184_v12  ;;  %v15524_v0 = vmax.f32 %v15386_v63, %v6179_v44  ;;  %v11242_v63 = vld [vmem:[%s16957_s7 + $0x304] ss:$8 sps:$4 sm:$0xff]   ;;  %v15559_v60 = vmax.f32 %v15404_v3, %v6183_v35  ;;  %v11249_v3 = vld [vmem:[%s16957_s7 + $0x220] ss:$8 sps:$4 sm:$0xff]  }
 0x432   :  { %6312 = vrot.lane.b32.xlu0 %v15412_v55, %s11616_s30  ;;  %v15515_v54 = vmax.f32 %v15406_v14, %v6185_v45  ;;  %v6189_v7 = vrot.slane %v15418_v13, 1  ;;  %v6187_v51 = vrot.slane %v15414_v18, 1  ;;  %7209 = vmatprep.subr.bf16.mxu1 %v11242_v63  ;;  %v11254_v12 = vld [vmem:[%s16957_s7 + $0x324] ss:$8 sps:$4 sm:$0xff]   ;;  %v15612_v39 = vmax.f32 %v15410_v9, %v6186_v28  ;;  %v11270_v44 = vld [vmem:[%s16957_s7 + $0x350] ss:$8 sps:$4 sm:$0xff]  }
 0x433   :  { %6304 = vrot.lane.b32.xlu1 %v15416_v19, %s11616_s30  ;;  %v15488_v32 = vmax.f32 %v6120_v4, %v6188_v21  ;;  %v11237_v4 = vld [vmem:[%s16957_s7 + $0x200] ss:$8 sps:$4 sm:$0xff]   ;;  %7210 = vmatpush1.bf16.msra.mxu1 %v11240_v2  ;;  %v6182_v21 = vrot.slane %v15400_v29, 1  ;;  %v11263_v45 = vld [vmem:[%s16957_s7 + $0x244] ss:$8 sps:$4 sm:$0xff]  }
 0x434   :  { %v15528_v14 = vmax.f32 %v15418_v13, %v6189_v7  ;;  %v11243_v13 = vld [vmem:[%s16957_s7 + $0x210] ss:$8 sps:$4 sm:$0xff]   ;;  %7169 = vmatpush1.bf16.msra.mxu0 %v11237_v4  ;;  %7211 = vmatprep.subr.bf16.mxu1 %v11248_v58  ;;  %v15580_v10 = vmax.f32 %v15414_v18, %v6187_v51  ;;  %v11266_v9 = vld [vmem:[%s16957_s7 + $0x344] ss:$8 sps:$4 sm:$0xff]   ;;  %v11273_v7 = vld [vmem:[%s16957_s7 + $0x260] ss:$8 sps:$4 sm:$0xff]  }
 0x435   :  { %7170 = vmatprep.subr.bf16.mxu0 %v11245_v26  ;;  %v15594_v18 = vmax.f32 %v15400_v29, %v6182_v21  ;;  %v11260_v29 = vld [vmem:[%s16957_s7 + $0x334] ss:$8 sps:$4 sm:$0xff]   ;;  %v11276_v35 = vld [vmem:[%s16957_s7 + $0x360] ss:$8 sps:$4 sm:$0xff]   ;;  %v11278_v4 = vld [vmem:[%s16957_s7 + $0x364] ss:$8 sps:$4 sm:$0xff]  }
 0x436   :  { %6322 = vrot.lane.b32.xlu0 %v15436_v56, %s11616_s30  ;;  %v11281_v2 = vld [vmem:[%s16957_s7 + $0x274] ss:$8 sps:$4 sm:$0xff]   ;;  %v11282_v63 = vld [vmem:[%s16957_s7 + $0x370] ss:$8 sps:$4 sm:$0xff]   ;;  %v11287_v26 = vld [vmem:[%s16957_s7 + $0x284] ss:$8 sps:$4 sm:$0xff]  }
 0x437   :  { %6316 = vrot.lane.b32.xlu1 %v15438_v6, %s11616_s30  ;;  %7212 = vmatpush1.bf16.msra.mxu1 %v11246_v50  ;;  %v11290_v50 = vld [vmem:[%s16957_s7 + $0x4] ss:$8 sps:$4 sm:$0xff]   ;;  %v11285_v58 = vld [vmem:[%s16957_s7 + $0x280] ss:$8 sps:$4 sm:$0xff]   ;;  %v11293_v51 = vld [vmem:[%s16957_s7 + $0x294] ss:$8 sps:$4 sm:$0xff]  }
 0x438   :  { %7171 = vmatpush1.bf16.msra.mxu0 %v11243_v13  ;;  %7213 = vmatprep.subr.bf16.mxu1 %v11254_v12  ;;  %v11284_v13 = vld [vmem:[%s16957_s7 + $0x374] ss:$8 sps:$4 sm:$0xff]   ;;  %v11303_v12 = vld [vmem:[%s16957_s7 + $0x2b0] ss:$8 sps:$4 sm:$0xff]   ;;  %v11314_v21 = vld [vmem:[%s16957_s7 + $0x104] ss:$8 sps:$4 sm:$0xff]  }
 0x439   :  { %7172 = vmatprep.subr.bf16.mxu0 %v11251_v38  ;;  %v11297_v38 = vld [vmem:[%s16957_s7 + $0x2a0] ss:$8 sps:$4 sm:$0xff]  }
 0x43a   :  { %6330 = vrot.lane.b32.xlu0 %v15456_v41, %s11616_s30 }
 0x43b   :  { %6324 = vrot.lane.b32.xlu1 %v15458_v36, %s11616_s30  ;;  %7214 = vmatpush1.bf16.msra.mxu1 %v11252_v27  ;;  %v11305_v27 = vld [vmem:[%s16957_s7 + $0x2b4] ss:$8 sps:$4 sm:$0xff]  }
 0x43c   :  { %7173 = vmatpush1.bf16.msra.mxu0 %v11249_v3  ;;  %7215 = vmatprep.subr.bf16.mxu1 %v11260_v29  ;;  %v11299_v3 = vld [vmem:[%s16957_s7 + $0x2a4] ss:$8 sps:$4 sm:$0xff]  }
 0x43d   :  { %7174 = vmatprep.subr.bf16.mxu0 %v11257_v30  ;;  %v17319_v30 = vld [vmem:[#allocation86_spill] sm:$0xff] }
 0x43e   :  { %6338 = vrot.lane.b32.xlu0 %v15465_v49, %s11616_s30 }
 0x43f   :  { %6320 = vrot.lane.b32.xlu1 %v15477_v23, %s11616_s30  ;;  %7216 = vmatpush1.bf16.msra.mxu1 %v11258_v61  ;;  %v6454_v61 = vsub.s32 3, %v17319_v30 }
 0x440   :  { %7175 = vmatpush1.bf16.msra.mxu0 %v11255_v31  ;;  %7217 = vmatprep.subr.bf16.mxu1 %v11266_v9 }
 0x441   :  { %7176 = vmatprep.subr.bf16.mxu0 %v11263_v45 }
 0x442   :  { %6346 = vrot.lane.b32.xlu0 %v15488_v32, %s11616_s30 }
 0x443   :  { %6332 = vrot.lane.b32.xlu1 %v15491_v1, %s11616_s30  ;;  %7218 = vmatpush1.bf16.msra.mxu1 %v11264_v43 }
 0x444   :  { %7177 = vmatpush1.bf16.msra.mxu0 %v11261_v46  ;;  %7219 = vmatprep.subr.bf16.mxu1 %v11272_v22  ;;  %v6125_v46 = vld [vmem:[%s16958_s5] sm:$0xf] }
 0x445   :  { %7178 = vmatprep.subr.bf16.mxu0 %v11269_v34  ;;  %v15701_v9 = vrot.slane %v6125_v46, %v6454_v61 }
 0x446   :  { %6302 = vrot.lane.b32.xlu0 %v15508_v16, %s11616_s30 }
 0x447   :  { %6340 = vrot.lane.b32.xlu1 %v15515_v54, %s11616_s30  ;;  %7220 = vmatpush1.bf16.msra.mxu1 %v11270_v44 }
 0x448   :  { %7179 = vmatpush1.bf16.msra.mxu0 %v11267_v15  ;;  %7221 = vmatprep.subr.bf16.mxu1 %v11278_v4 }
 0x449   :  { %7180 = vmatprep.subr.bf16.mxu0 %v11275_v40  ;;  %v17320_v40 = vsub.s32 2, %v17319_v30 }
 0x44a   :  { %6328 = vrot.lane.b32.xlu0 %v15524_v0, %s11616_s30 }
 0x44b   :  { %6348 = vrot.lane.b32.xlu1 %v15528_v14, %s11616_s30  ;;  %7222 = vmatpush1.bf16.msra.mxu1 %v11276_v35  ;;  %v15708_v35 = vrot.slane %v6125_v46, %v17320_v40 }
 0x44c   :  { %7181 = vmatpush1.bf16.msra.mxu0 %v11273_v7  ;;  %7223 = vmatprep.subr.bf16.mxu1 %v11284_v13 }
 0x44d   :  { %7182 = vmatprep.subr.bf16.mxu0 %v11281_v2 }
 0x44e   :  { %6336 = vrot.lane.b32.xlu0 %v15559_v60, %s11616_s30 }
 0x44f   :  { %6318 = vrot.lane.b32.xlu1 %v15563_v52, %s11616_s30  ;;  %7224 = vmatpush1.bf16.msra.mxu1 %v11282_v63 }
 0x450   :  { %7183 = vmatpush1.bf16.msra.mxu0 %v11279_v59  ;;  %7588 = vmatprep.subr.bf16.mxu1 %v11290_v50  ;;  %v17321_v59 = vld [vmem:[#allocation88_spill] sm:$0xff] }
 0x451   :  { %7184 = vmatprep.subr.bf16.mxu0 %v11287_v26  ;;  %v15712_v2 = vrot.slane %v6125_v46, %v17321_v59 }
 0x452   :  { %6344 = vrot.lane.b32.xlu0 %v15580_v10, %s11616_s30 }
 0x453   :  { %6326 = vrot.lane.b32.xlu1 %v15586_v8, %s11616_s30 }
 0x454   :  { %7185 = vmatpush1.bf16.msra.mxu0 %v11285_v58 }
 0x455   :  { %7186 = vmatprep.subr.bf16.mxu0 %v11293_v51 }
 0x456   :  { %8667 = vperm.xlu0 %10410, %v10111_v17   ;;  %v15694_v17 = vpop.permute.xlu0 %6531 }
 0x457   :  { %6334 = vrot.lane.b32.xlu1 %v15594_v18, %s11616_s30 }
 0x458   :  { %7187 = vmatpush1.bf16.msra.mxu0 %v11291_v25 }
 0x459   :  { %7188 = vmatprep.subr.bf16.mxu0 %v11299_v3 }
 0x45b   :  { %6342 = vrot.lane.b32.xlu1 %v15612_v39, %s11616_s30 }
 0x45c   :  { %7189 = vmatpush1.bf16.msra.mxu0 %v11297_v38 }
 0x45d   :  { %7190 = vmatprep.subr.bf16.mxu0 %v11305_v27 }
 0x460   :  { %7191 = vmatpush1.bf16.msra.mxu0 %v11303_v12 }
 0x461   :  { %7629 = vmatprep.subr.bf16.mxu0 %v11314_v21 }
 0x48c   :  { %v6287_v28 = vpop.permute.xlu0 %6286 }
 0x48d   :  { %v6291_v31 = vpop.permute.xlu1 %6290 }
 0x490   :  { %v6289_v29 = vpop.permute.xlu0 %6288 }
 0x491   :  { %v6293_v45 = vpop.permute.xlu1 %6292  ;;  %v6351_v34 = vsel %vm6350_vm1, %v6287_v28, %v6289_v29  ;;  %v6352_v22 = vsel %vm6350_vm1, %v6289_v29, %v6291_v31 }
 0x492   :  { %v6353_v43 = vsel %vm6350_vm1, %v6291_v31, %v6293_v45  ;;  %v6410_v15 = vmax.f32 %v15354_v24, %v6293_v45  ;;  %v6407_v63 = vmax.f32 %v15344_v5, %v6351_v34  ;;  %v17322_v24 = vld [vmem:[#allocation87_spill] sm:$0xff]  ;;  %v6408_v50 = vmax.f32 %v15352_v47, %v6352_v22 }
 0x493   :  { %v6409_v4 = vmax.f32 %v15346_v62, %v6353_v43  ;;  %v15717_v26 = vrot.slane %v6125_v46, %v17322_v24 }
 0x494   :  { %v6299_v44 = vpop.permute.xlu0 %6298  ;;  %v6463_v13 = vadd.f32 %v15701_v9, %v6410_v15  ;;  %v6460_v62 = vadd.f32 %v15712_v2, %v6407_v63 }
 0x495   :  { %v6295_v7 = vpop.permute.xlu1 %6294  ;;  %v6462_v25 = vadd.f32 %v15708_v35, %v6409_v4  ;;  %v6461_v5 = vadd.f32 %v15717_v26, %v6408_v50 }
 0x496   :  { %v6537_v27 = vmul.f32 %v15694_v17, %v6463_v13  ;;  %vm6496_vm3 = vcmp.ge.f32.partialorder %v6463_v13, 0.0  ;;  %vm6493_vm11 = vcmp.ge.f32.partialorder %v6460_v62, 0.0  ;;  %v6534_v30 = vmul.f32 %v15694_v17, %v6460_v62 }
 0x497   :  { %v6536_v31 = vmul.f32 %v15694_v17, %v6462_v25  ;;  %vm6495_vm10 = vcmp.ge.f32.partialorder %v6462_v25, 0.0  ;;  %vm6494_vm12 = vcmp.ge.f32.partialorder %v6461_v5, 0.0 }
 0x498   :  { %v6307_v58 = vpop.permute.xlu0 %6306  ;;  %v6569_v61 = vsel %vm6496_vm3, %v6463_v13, %v6537_v27  ;;  %v6566_v22 = vsel %vm6493_vm11, %v6460_v62, %v6534_v30 }
 0x499   :  { %v6301_v51 = vpop.permute.xlu1 %6300  ;;  %v6568_v15 = vsel %vm6495_vm10, %v6462_v25, %v6536_v31  ;;  %v6601_v34 = vpack.c.bf16 %v6569_v61, %v6569_v61 }
 0x49a   :  { %v6356_v3 = vsel %vm6350_vm1, %v6299_v44, %v6301_v51  ;;  %v6414_v12 = vmax.f32 %v15372_v48, %v6301_v51  ;;  %v6600_v27 = vpack.c.bf16 %v6568_v15, %v6568_v15 }
 0x49b   :  { %v6413_v38 = vmax.f32 %v15362_v11, %v6356_v3  ;;  %v6535_v11 = vmul.f32 %v15694_v17, %v6461_v5 }
 0x49c   :  { %v15727_v21 = vpop.permute.xlu0 %6314  ;;  %v6467_v29 = vadd.f32 %v15701_v9, %v6414_v12  ;;  %v15743_v12 = vunpack.c.l.b16 %v6601_v34  ;;  %v15752_v61 = vunpack.c.l.b16 %v6600_v27 }
 0x49d   :  { %v6466_v47 = vadd.f32 %v15708_v35, %v6413_v38  ;;  %v6297_v28 = vpop.permute.xlu1 %6296  ;;  %v6567_v63 = vsel %vm6494_vm12, %v6461_v5, %v6535_v11 }
 0x49e   :  { %v6354_v45 = vsel %vm6350_vm1, %v6295_v7, %v6297_v28  ;;  %v6541_v40 = vmul.f32 %v15694_v17, %v6467_v29  ;;  %v6355_v4 = vsel %vm6350_vm1, %v6297_v28, %v6299_v44  ;;  %vm6500_vm14 = vcmp.ge.f32.partialorder %v6467_v29, 0.0 }
 0x49f   :  { %v6540_v46 = vmul.f32 %v15694_v17, %v6466_v47  ;;  %vm6499_vm13 = vcmp.ge.f32.partialorder %v6466_v47, 0.0  ;;  %v6411_v50 = vmax.f32 %v15364_v57, %v6354_v45  ;;  %v6598_v7 = vpack.c.bf16 %v6566_v22, %v6566_v22 }
 0x4a0   :  { %v6311_v48 = vpop.permute.xlu0 %6310  ;;  %v6412_v25 = vmax.f32 %v15388_v37, %v6355_v4  ;;  %v6599_v62 = vpack.c.bf16 %v6567_v63, %v6567_v63  ;;  %v6573_v31 = vsel %vm6500_vm14, %v6467_v29, %v6541_v40  ;;  %v6856_v29 = vrot.slane %v15743_v12, 2 }
 0x4a1   :  { %v6309_v43 = vpop.permute.xlu1 %6308  ;;  %v6572_v13 = vsel %vm6499_vm13, %v6466_v47, %v6540_v46  ;;  %v6464_v44 = vadd.f32 %v15712_v2, %v6411_v50  ;;  %v6605_v11 = vpack.c.bf16 %v6573_v31, %v6573_v31  ;;  %v15758_v45 = vunpack.c.l.b16 %v6598_v7 }
 0x4a2   :  { %v6359_v3 = vsel %vm6350_vm1, %v6307_v58, %v6309_v43  ;;  %v6604_v30 = vpack.c.bf16 %v6572_v13, %v6572_v13  ;;  %v6418_v57 = vmax.f32 %v15398_v53, %v6309_v43  ;;  %v6465_v37 = vadd.f32 %v15717_v26, %v6412_v25 }
 0x4a3   :  { %v6417_v5 = vmax.f32 %v15370_v42, %v6359_v3  ;;  %v15760_v42 = vunpack.c.l.b16 %v6599_v62  ;;  %vm6497_vm0 = vcmp.ge.f32.partialorder %v6464_v44, 0.0  ;;  %v15776_v3 = vunpack.c.l.b16 %v6605_v11 }
 0x4a4   :  { %v6313_v51 = vpop.permute.xlu0 %6312  ;;  %v15762_v53 = vunpack.c.l.b16 %v6604_v30  ;;  %v6471_v22 = vadd.f32 %v15701_v9, %v6418_v57  ;;  %vm6498_vm2 = vcmp.ge.f32.partialorder %v6465_v37, 0.0 }
 0x4a5   :  { %v15740_v38 = vpop.permute.xlu1 %6304  ;;  %v6470_v43 = vadd.f32 %v15708_v35, %v6417_v5  ;;  %v6360_v34 = vsel %vm6350_vm1, %v6311_v48, %v6313_v51  ;;  %v6361_v40 = vsel %vm6350_vm1, %v6313_v51, %v15727_v21  ;;  %v6842_v48 = vrot.slane %v15752_v61, 2 }
 0x4a6   :  { %v6358_v47 = vsel %vm6350_vm1, %v15740_v38, %v6307_v58  ;;  %v6538_v58 = vmul.f32 %v15694_v17, %v6464_v44  ;;  %v6419_v4 = vmax.f32 %v15396_v20, %v6360_v34  ;;  %v6843_v7 = vrot.slane %v15762_v53, 1 }
 0x4a7   :  { %v6416_v15 = vmax.f32 %v15416_v19, %v6358_v47  ;;  %v6539_v19 = vmul.f32 %v15694_v17, %v6465_v37  ;;  %v6544_v20 = vmul.f32 %v15694_v17, %v6470_v43  ;;  %v6420_v62 = vmax.f32 %v15412_v55, %v6361_v40 }
 0x4a8   :  { %v15755_v46 = vpop.permute.xlu0 %6322  ;;  %v6570_v51 = vsel %vm6497_vm0, %v6464_v44, %v6538_v58  ;;  %vm6503_vm4 = vcmp.ge.f32.partialorder %v6470_v43, 0.0  ;;  %v6545_v30 = vmul.f32 %v15694_v17, %v6471_v22  ;;  %v6472_v5 = vadd.f32 %v15712_v2, %v6419_v4 }
 0x4a9   :  { %v15750_v28 = vpop.permute.xlu1 %6316  ;;  %v6469_v25 = vadd.f32 %v15717_v26, %v6416_v15  ;;  %v6857_v44 = vrot.slane %v15776_v3, 1  ;;  %v6571_v11 = vsel %vm6498_vm2, %v6465_v37, %v6539_v19  ;;  %vm6504_vm5 = vcmp.ge.f32.partialorder %v6471_v22, 0.0 }
 0x4aa   :  { %v6362_v57 = vsel %vm6350_vm1, %v15727_v21, %v15750_v28  ;;  %v6602_v55 = vpack.c.bf16 %v6570_v51, %v6570_v51  ;;  %v6422_v34 = vmax.f32 %v15438_v6, %v15750_v28  ;;  %v6576_v21 = vsel %vm6503_vm4, %v6470_v43, %v6544_v20 }
 0x4ab   :  { %v6543_v58 = vmul.f32 %v15694_v17, %v6469_v25  ;;  %vm6502_vm6 = vcmp.ge.f32.partialorder %v6469_v25, 0.0  ;;  %v6421_v15 = vmax.f32 %v15384_v33, %v6362_v57  ;;  %v6473_v50 = vadd.f32 %v15717_v26, %v6420_v62 }
 0x4ac   :  { %v15785_v31 = vpop.permute.xlu0 %6330  ;;  %v6844_v37 = vsel %vm6809_vm15, %v6843_v7, %v6842_v48  ;;  %v6577_v19 = vsel %vm6504_vm5, %v6471_v22, %v6545_v30  ;;  %v6546_v51 = vmul.f32 %v15694_v17, %v6472_v5  ;;  %v6603_v13 = vpack.c.bf16 %v6571_v11, %v6571_v11 }
 0x4ad   :  { %v15772_v63 = vpop.permute.xlu1 %6324  ;;  %v6858_v33 = vsel %vm6809_vm15, %v6857_v44, %v6856_v29  ;;  %v6575_v57 = vsel %vm6502_vm6, %v6469_v25, %v6543_v58  ;;  %vm6505_vm7 = vcmp.ge.f32.partialorder %v6472_v5, 0.0  ;;  %v15808_v28 = vunpack.c.l.b16 %v6602_v55 }
 0x4ae   :  { %v6608_v43 = vpack.c.bf16 %v6576_v21, %v6576_v21  ;;  %v6474_v20 = vadd.f32 %v15708_v35, %v6421_v15  ;;  %v6475_v62 = vadd.f32 %v15701_v9, %v6422_v34  ;;  %v6609_v48 = vpack.c.bf16 %v6577_v19, %v6577_v19 }
 0x4af   :  { %v6607_v22 = vpack.c.bf16 %v6575_v57, %v6575_v57  ;;  %v6547_v7 = vmul.f32 %v15694_v17, %v6473_v50  ;;  %v6365_v29 = vsel %vm6350_vm1, %v15755_v46, %v15772_v63  ;;  %vm6506_vm9 = vcmp.ge.f32.partialorder %v6473_v50, 0.0 }
 0x4b0   :  { %v15806_v6 = vpop.permute.xlu0 %6338  ;;  %v6578_v25 = vsel %vm6505_vm7, %v6472_v5, %v6546_v51  ;;  %vm6507_vm3 = vcmp.ge.f32.partialorder %v6474_v20, 0.0  ;;  %v6426_v30 = vmax.f32 %v15458_v36, %v15772_v63  ;;  %vm6508_vm10 = vcmp.ge.f32.partialorder %v6475_v62, 0.0 }
 0x4b1   :  { %v15792_v47 = vpop.permute.xlu1 %6320  ;;  %v6548_v44 = vmul.f32 %v15694_v17, %v6474_v20  ;;  %v6549_v11 = vmul.f32 %v15694_v17, %v6475_v62  ;;  %v6425_v58 = vmax.f32 %v15436_v56, %v6365_v29  ;;  %v15821_v55 = vunpack.c.l.b16 %v6603_v13 }
 0x4b2   :  { %v6808_v15 = vrot.slane %v15808_v28, 1  ;;  %v15824_v34 = vunpack.c.l.b16 %v6608_v43  ;;  %v6364_v5 = vsel %vm6350_vm1, %v15792_v47, %v15755_v46  ;;  %v15829_v21 = vunpack.c.l.b16 %v6609_v48 }
 0x4b3   :  { %v15831_v36 = vunpack.c.l.b16 %v6607_v22  ;;  %v6579_v63 = vsel %vm6506_vm9, %v6473_v50, %v6547_v7  ;;  %v6610_v19 = vpack.c.bf16 %v6578_v25, %v6578_v25  ;;  %v6580_v57 = vsel %vm6507_vm3, %v6474_v20, %v6548_v44 }
 0x4b4   :  { %v15833_v51 = vpop.permute.xlu0 %6346  ;;  %v6581_v56 = vsel %vm6508_vm10, %v6475_v62, %v6549_v11  ;;  %v6478_v13 = vadd.f32 %v15708_v35, %v6425_v58  ;;  %v6479_v29 = vadd.f32 %v15701_v9, %v6426_v30  ;;  %v6612_v4 = vpack.c.bf16 %v6580_v57, %v6580_v57 }
 0x4b5   :  { %v6333_v27 = vpop.permute.xlu1 %6332  ;;  %v6613_v40 = vpack.c.bf16 %v6581_v56, %v6581_v56  ;;  %v6424_v46 = vmax.f32 %v15477_v23, %v6364_v5  ;;  %v6611_v7 = vpack.c.bf16 %v6579_v63, %v6579_v63  ;;  %v15852_v5 = vsel %vm6811_vm8, %v15824_v34, %v6844_v37 }
 0x4b6   :  { %v6368_v48 = vsel %vm6350_vm1, %v15785_v31, %v6333_v27  ;;  %vm6511_vm11 = vcmp.ge.f32.partialorder %v6478_v13, 0.0  ;;  %vm6512_vm12 = vcmp.ge.f32.partialorder %v6479_v29, 0.0  ;;  %v6552_v50 = vmul.f32 %v15694_v17, %v6478_v13 }
 0x4b7   :  { %v6553_v20 = vmul.f32 %v15694_v17, %v6479_v29  ;;  %v6477_v25 = vadd.f32 %v15717_v26, %v6424_v46  ;;  %v6429_v23 = vmax.f32 %v15456_v41, %v6368_v48  ;;  %v6430_v11 = vmax.f32 %v15491_v1, %v6333_v27 }
 0x4b8   :  { %v6584_v30 = vsel %vm6511_vm11, %v6478_v13, %v6552_v50  ;;  %v15856_v57 = vsel %vm6811_vm8, %v15829_v21, %v6858_v33  ;;  %v15858_v56 = vunpack.c.l.b16 %v6610_v19  ;;  %v6303_v63 = vpop.permute.xlu0 %6302  ;;  %v15862_v41 = vunpack.c.l.b16 %v6612_v4 }
 0x4b9   :  { %v15837_v43 = vpop.permute.xlu1 %6340  ;;  %v6585_v44 = vsel %vm6512_vm12, %v6479_v29, %v6553_v20  ;;  %v15864_v1 = vunpack.c.l.b16 %v6613_v40  ;;  %v6616_v46 = vpack.c.bf16 %v6584_v30, %v6584_v30  ;;  %vm6510_vm13 = vcmp.ge.f32.partialorder %v6477_v25, 0.0 }
 0x4ba   :  { %v6617_v48 = vpack.c.bf16 %v6585_v44, %v6585_v44  ;;  %v6551_v37 = vmul.f32 %v15694_v17, %v6477_v25  ;;  %v15867_v50 = vunpack.c.l.b16 %v6611_v7  ;;  %v6482_v33 = vadd.f32 %v15708_v35, %v6429_v23 }
 0x4bb   :  { %v6483_v19 = vadd.f32 %v15701_v9, %v6430_v11  ;;  %v6357_v20 = vsel %vm6350_vm1, %v6303_v63, %v15740_v38  ;;  %v6813_v4 = vrot.slane %v15858_v56, 7  ;;  %v15874_v22 = vunpack.c.l.b16 %v6616_v46 }
 0x4bc   :  { %v6583_v40 = vsel %vm6510_vm13, %v6477_v25, %v6551_v37  ;;  %v6415_v30 = vmax.f32 %v15508_v16, %v6357_v20  ;;  %vm6515_vm14 = vcmp.ge.f32.partialorder %v6482_v33, 0.0  ;;  %v6556_v44 = vmul.f32 %v15694_v17, %v6482_v33  ;;  %v6329_v20 = vpop.permute.xlu0 %6328 }
 0x4bd   :  { %v6349_v27 = vpop.permute.xlu1 %6348  ;;  %v17323_v7 = vrot.slane %v15758_v45, 2  ;;  %v6371_v23 = vsel %vm6350_vm1, %v15806_v6, %v15837_v43  ;;  %v6860_v11 = vrot.slane %v15864_v1, 7  ;;  %v15886_v63 = vunpack.c.l.b16 %v6617_v48 }
 0x4be   :  { %vm6516_vm0 = vcmp.ge.f32.partialorder %v6483_v19, 0.0  ;;  %v6615_v46 = vpack.c.bf16 %v6583_v40, %v6583_v40  ;;  %v6557_v37 = vmul.f32 %v15694_v17, %v6483_v19  ;;  %v6468_v29 = vadd.f32 %v15712_v2, %v6415_v30 }
 0x4bf   :  { %v6810_v13 = vsel %vm6809_vm15, %v6808_v15, %v17323_v7  ;;  %v6588_v7 = vsel %vm6515_vm14, %v6482_v33, %v6556_v44  ;;  %v6433_v58 = vmax.f32 %v15465_v49, %v6371_v23  ;;  %v6434_v62 = vmax.f32 %v15515_v54, %v15837_v43 }
 0x4c0   :  { %v6589_v48 = vsel %vm6516_vm0, %v6483_v19, %v6557_v37  ;;  %v6620_v38 = vpack.c.bf16 %v6588_v7, %v6588_v7  ;;  %vm6814_vm2 = vcmask 1043459   ;;  %v6374_v16 = vsel %vm6350_vm1, %v15833_v51, %v6349_v27 }
 0x4c1   :  { %v6319_v15 = vpop.permute.xlu1 %6318  ;;  %v6438_v40 = vmax.f32 %v15528_v14, %v6349_v27  ;;  %vm6501_vm4 = vcmp.ge.f32.partialorder %v6468_v29, 0.0  ;;  %v6542_v33 = vmul.f32 %v15694_v17, %v6468_v29  ;;  %v6486_v30 = vadd.f32 %v15708_v35, %v6433_v58  ;;  %v6337_v58 = vpop.permute.xlu0 %6336 }
 0x4c2   :  { %v6487_v44 = vadd.f32 %v15701_v9, %v6434_v62  ;;  %v6437_v54 = vmax.f32 %v15488_v32, %v6374_v16  ;;  %v6621_v19 = vpack.c.bf16 %v6589_v48, %v6589_v48  ;;  %v15906_v27 = vunpack.c.l.b16 %v6620_v38 }
 0x4c3   :  { %v6491_v43 = vadd.f32 %v15701_v9, %v6438_v40  ;;  %v6574_v23 = vsel %vm6501_vm4, %v6468_v29, %v6542_v33  ;;  %vm6519_vm5 = vcmp.ge.f32.partialorder %v6486_v30, 0.0  ;;  %v6560_v14 = vmul.f32 %v15694_v17, %v6486_v30 }
 0x4c4   :  { %v6606_v37 = vpack.c.bf16 %v6574_v23, %v6574_v23  ;;  %vm6520_vm6 = vcmp.ge.f32.partialorder %v6487_v44, 0.0  ;;  %v6561_v7 = vmul.f32 %v15694_v17, %v6487_v44  ;;  %v6490_v62 = vadd.f32 %v15708_v35, %v6437_v54 }
 0x4c5   :  { %v6327_v25 = vpop.permute.xlu1 %6326  ;;  %v6592_v49 = vsel %vm6519_vm5, %v6486_v30, %v6560_v14  ;;  %vm6524_vm7 = vcmp.ge.f32.partialorder %v6491_v43, 0.0  ;;  %v6565_v32 = vmul.f32 %v15694_v17, %v6491_v43  ;;  %v15911_v9 = vunpack.c.l.b16 %v6615_v46 }
 0x4c6   :  { %v15913_v29 = vunpack.c.l.b16 %v6606_v37  ;;  %v6593_v16 = vsel %vm6520_vm6, %v6487_v44, %v6561_v7  ;;  %v6624_v48 = vpack.c.bf16 %v6592_v49, %v6592_v49  ;;  %vm6523_vm9 = vcmp.ge.f32.partialorder %v6490_v62, 0.0 }
 0x4c7   :  { %v6625_v38 = vpack.c.bf16 %v6593_v16, %v6593_v16  ;;  %v6564_v40 = vmul.f32 %v15694_v17, %v6490_v62  ;;  %v6367_v33 = vsel %vm6350_vm1, %v6329_v20, %v15785_v31  ;;  %v15918_v23 = vunpack.c.l.b16 %v6621_v19  ;;  %v6345_v16 = vpop.permute.xlu0 %6344 }
 0x4c8   :  { %v6812_v30 = vsel %vm6811_vm8, %v15913_v29, %v6810_v13  ;;  %v6597_v46 = vsel %vm6524_vm7, %v6491_v43, %v6565_v32  ;;  %v7244_v49 = vrot.slane %v15913_v29, 6  ;;  %v15927_v44 = vunpack.c.l.b16 %v6624_v48 }
 0x4c9   :  { %v15924_v54 = vsel %vm6814_vm2, %v6813_v4, %v6812_v30  ;;  %v6596_v14 = vsel %vm6523_vm9, %v6490_v62, %v6564_v40  ;;  %v15929_v37 = vunpack.c.l.b16 %v6625_v38  ;;  %v6428_v31 = vmax.f32 %v15524_v0, %v6367_v33  ;;  %v6335_v35 = vpop.permute.xlu1 %6334 }
 0x4ca   :  { %v6628_v7 = vpack.c.bf16 %v6596_v14, %v6596_v14  ;;  %v6363_v19 = vsel %vm6350_vm1, %v6319_v15, %v15792_v47  ;;  %v6629_v13 = vpack.c.bf16 %v6597_v46, %v6597_v46  ;;  %v6370_v4 = vsel %vm6350_vm1, %v6337_v58, %v15806_v6 }
 0x4cb   :  { %v6423_v43 = vmax.f32 %v15563_v52, %v6363_v19  ;;  %v6366_v32 = vsel %vm6350_vm1, %v6327_v25, %v6329_v20  ;;  %v6852_v62 = vrot.slane %v15927_v44, 4  ;;  %v6481_v38 = vadd.f32 %v15717_v26, %v6428_v31 }
 0x4cc   :  { %v15939_v48 = vunpack.c.l.b16 %v6628_v7  ;;  %v6432_v0 = vmax.f32 %v15559_v60, %v6370_v4  ;;  %v6427_v15 = vmax.f32 %v15586_v8, %v6366_v32  ;;  %v6373_v52 = vsel %vm6350_vm1, %v6345_v16, %v15833_v51 }
 0x4cd   :  { %v6476_v47 = vadd.f32 %v15712_v2, %v6423_v43  ;;  %v6369_v40 = vsel %vm6350_vm1, %v6335_v35, %v6337_v58  ;;  %vm6514_vm3 = vcmp.ge.f32.partialorder %v6481_v38, 0.0  ;;  %v6555_v6 = vmul.f32 %v15694_v17, %v6481_v38  ;;  %v6343_v14 = vpop.permute.xlu1 %6342 }
 0x4ce   :  { %v6485_v25 = vadd.f32 %v15717_v26, %v6432_v0  ;;  %v6436_v20 = vmax.f32 %v15580_v10, %v6373_v52  ;;  %v6480_v60 = vadd.f32 %v15712_v2, %v6427_v15  ;;  %v6431_v30 = vmax.f32 %v15594_v18, %v6369_v40 }
 0x4cf   :  { %vm6509_vm10 = vcmp.ge.f32.partialorder %v6476_v47, 0.0  ;;  %v6550_v33 = vmul.f32 %v15694_v17, %v6476_v47  ;;  %vm6817_vm11 = vcmask 1044484   ;;  %vm6820_vm12 = vcmask 1045509  }
 0x4d0   :  { %v6587_v8 = vsel %vm6514_vm3, %v6481_v38, %v6555_v6  ;;  %vm6518_vm13 = vcmp.ge.f32.partialorder %v6485_v25, 0.0  ;;  %v6559_v51 = vmul.f32 %v15694_v17, %v6485_v25  ;;  %v6489_v58 = vadd.f32 %v15717_v26, %v6436_v20 }
 0x4d1   :  { %v6619_v35 = vpack.c.bf16 %v6587_v8, %v6587_v8  ;;  %v6582_v46 = vsel %vm6509_vm10, %v6476_v47, %v6550_v33  ;;  %vm6513_vm14 = vcmp.ge.f32.partialorder %v6480_v60, 0.0  ;;  %v6554_v10 = vmul.f32 %v15694_v17, %v6480_v60 }
 0x4d2   :  { %vm6826_vm0 = vcmask 1047559   ;;  %v6614_v7 = vpack.c.bf16 %v6582_v46, %v6582_v46  ;;  %v6591_v31 = vsel %vm6518_vm13, %v6485_v25, %v6559_v51  ;;  %vm6522_vm4 = vcmp.ge.f32.partialorder %v6489_v58, 0.0 }
 0x4d3   :  { %v6563_v18 = vmul.f32 %v15694_v17, %v6489_v58  ;;  %vm6823_vm5 = vcmask 1046534   ;;  %v15958_v19 = vunpack.c.l.b16 %v6629_v13  ;;  %v6623_v43 = vpack.c.bf16 %v6591_v31, %v6591_v31 }
 0x4d4   :  { %v6586_v4 = vsel %vm6513_vm14, %v6480_v60, %v6554_v10  ;;  %v6484_v32 = vadd.f32 %v15712_v2, %v6431_v30  ;;  %v15961_v26 = vunpack.c.l.b16 %v6614_v7  ;;  %v6372_v47 = vsel %vm6350_vm1, %v6343_v14, %v6345_v16 }
 0x4d5   :  { %v6618_v38 = vpack.c.bf16 %v6586_v4, %v6586_v4  ;;  %v6595_v0 = vsel %vm6522_vm4, %v6489_v58, %v6563_v18  ;;  %v15964_v15 = vunpack.c.l.b16 %v6619_v35  ;;  %v15969_v25 = vunpack.c.l.b16 %v6623_v43 }
 0x4d6   :  { %v6627_v52 = vpack.c.bf16 %v6595_v0, %v6595_v0  ;;  %vm6517_vm6 = vcmp.ge.f32.partialorder %v6484_v32, 0.0  ;;  %v6558_v40 = vmul.f32 %v15694_v17, %v6484_v32  ;;  %v6816_v6 = vrot.slane %v15961_v26, 6 }
 0x4d7   :  { %v7248_v13 = vrot.slane %v15961_v26, 4  ;;  %v15971_v20 = vunpack.c.l.b16 %v6618_v38  ;;  %v6435_v30 = vmax.f32 %v15612_v39, %v6372_v47  ;;  %v6861_v16 = vsel %vm6814_vm2, %v6860_v11, %v15856_v57 }
 0x4d8   :  { %v15973_v33 = vunpack.c.l.b16 %v6627_v52  ;;  %v6590_v60 = vsel %vm6517_vm6, %v6484_v32, %v6558_v40  ;;  %v17324_v58 = vrot.slane %v15886_v63, 6  ;;  %v6864_v46 = vrot.slane %v15918_v23, 5 }
 0x4d9   :  { %v6819_v8 = vrot.slane %v15971_v20, 5  ;;  %v6622_v51 = vpack.c.bf16 %v6590_v60, %v6590_v60  ;;  %v6488_v10 = vadd.f32 %v15712_v2, %v6435_v30  ;;  %v6866_v14 = vrot.slane %v15929_v37, 4 }
 0x4da   :  { %v6863_v35 = vsel %vm6817_vm11, %v17324_v58, %v6861_v16  ;;  %v6868_v39 = vrot.slane %v15958_v19, 3  ;;  %v17325_v7 = vrot.slane %v15862_v41, 7  ;;  %v17326_v18 = vrot.slane %v15874_v22, 6 }
 0x4db   :  { %v15992_v11 = vunpack.c.l.b16 %v6622_v51  ;;  %v6865_v31 = vsel %vm6820_vm12, %v6864_v46, %v6863_v35  ;;  %v6854_v4 = vrot.slane %v15939_v48, 3  ;;  %vm6521_vm7 = vcmp.ge.f32.partialorder %v6488_v10, 0.0  ;;  %v11288_v51 = vld [vmem:[%s16957_s7] ss:$8 sps:$4 sm:$0xff]  }
 0x4dc   :  { %v6847_v57 = vsel %vm6814_vm2, %v17325_v7, %v15852_v5  ;;  %v6562_v2 = vmul.f32 %v15694_v17, %v6488_v10  ;;  %v6867_v32 = vsel %vm6823_vm5, %v6866_v14, %v6865_v31  ;;  %v17327_v38 = vrot.slane %v15906_v27, 5 }
 0x4dd   :  { %v6849_v43 = vsel %vm6817_vm11, %v17326_v18, %v6847_v57  ;;  %v6822_v5 = vrot.slane %v15992_v11, 4  ;;  %v6869_v47 = vsel %vm6826_vm0, %v6868_v39, %v6867_v32  ;;  %v17328_v40 = vrot.slane %v15760_v42, 2 }
 0x4de   :  { %v6851_v0 = vsel %vm6820_vm12, %v17327_v38, %v6849_v43  ;;  %v17329_v60 = vrot.slane %v15821_v55, 1  ;;  %v6594_v30 = vsel %vm6521_vm7, %v6488_v10, %v6562_v2  ;;  %v6873_v16 = vpack.c.b16 %v6869_v47, %v6869_v47  ;;  %v11294_v47 = vld [vmem:[%s16957_s7 + $0x10] ss:$8 sps:$4 sm:$0xff]  }
 0x4df   :  { %v6853_v52 = vsel %vm6823_vm5, %v6852_v62, %v6851_v0  ;;  %v6626_v46 = vpack.c.bf16 %v6594_v30, %v6594_v30  ;;  %v11296_v62 = vld [vmem:[%s16957_s7 + $0x14] ss:$8 sps:$4 sm:$0xff]   ;;  %v6832_v39 = vrot.slane %v15867_v50, 7  ;;  %v6834_v10 = vrot.slane %v15911_v9, 6  ;;  %v11302_v30 = vld [vmem:[%s16957_s7 + $0x24] ss:$8 sps:$4 sm:$0xff]  }
 0x4e0   :  { %v6830_v17 = vsel %vm6809_vm15, %v17329_v60, %v17328_v40  ;;  %v6855_v58 = vsel %vm6826_vm0, %v6854_v4, %v6853_v52  ;;  %9827 = vmatprep.mubr.msk.bf16.mxu1 %vm6350_vm1, %v6873_v16  ;;  %v6836_v7 = vrot.slane %v15964_v15, 5  ;;  %v6838_v57 = vrot.slane %v15969_v25, 4 }
 0x4e1   :  { %v6831_v35 = vsel %vm6811_vm8, %v15831_v36, %v6830_v17  ;;  %v6872_v14 = vpack.c.b16 %v6855_v58, %v6855_v58  ;;  %v6840_v31 = vrot.slane %v15973_v33, 3  ;;  %v17330_v18 = vrot.slane %v15821_v55, 7 }
 0x4e2   :  { %v16033_v4 = vunpack.c.l.b16 %v6626_v46  ;;  %v6833_v2 = vsel %vm6814_vm2, %v6832_v39, %v6831_v35  ;;  %v17331_v32 = vrot.slane %v15831_v36, 6  ;;  %v7260_v0 = vrot.slane %v15867_v50, 5 }
 0x4e3   :  { %v7257_v43 = vsel %vm6809_vm15, %v17330_v18, %v15760_v42  ;;  %7234 = vmatmul.mubr.bf16.vlgmr.msra.gmra.mrb[112].mxu1 %v6872_v14  ;;  %v6835_v52 = vsel %vm6817_vm11, %v6834_v10, %v6833_v2  ;;  %v7262_v40 = vrot.slane %v15911_v9, 4  ;;  %v7264_v60 = vrot.slane %v15964_v15, 3 }
 0x4e4   :  { %v7259_v38 = vsel %vm6811_vm8, %v17331_v32, %v7257_v43  ;;  %7589 = vmatpush1.bf16.msra.mxu1 %v11288_v51  ;;  %v7266_v17 = vrot.slane %v15969_v25, 2  ;;  %v6837_v16 = vsel %vm6820_vm12, %v6836_v7, %v6835_v52  ;;  %v7268_v58 = vrot.slane %v15973_v33, 1 }
 0x4e5   :  { %7590 = vmatprep.subr.bf16.mxu1 %v11296_v62  ;;  %v7261_v51 = vsel %vm6814_vm2, %v7260_v0, %v7259_v38  ;;  %v6818_v35 = vsel %vm6817_vm11, %v6816_v6, %v15924_v54  ;;  %v6839_v46 = vsel %vm6823_vm5, %v6838_v57, %v6837_v16  ;;  %v6825_v62 = vrot.slane %v16033_v4, 3  ;;  %v11300_v54 = vld [vmem:[%s16957_s7 + $0x20] ss:$8 sps:$4 sm:$0xff]   ;;  %v11308_v38 = vld [vmem:[%s16957_s7 + $0x34] ss:$8 sps:$4 sm:$0xff]  }
 0x4e6   :  { %v7263_v14 = vsel %vm6817_vm11, %v7262_v40, %v7261_v51  ;;  %v6821_v39 = vsel %vm6820_vm12, %v6819_v8, %v6818_v35  ;;  %v6841_v10 = vsel %vm6826_vm0, %v6840_v31, %v6839_v46  ;;  %v17332_v43 = vrot.slane %v15776_v3, 7  ;;  %v11312_v0 = vld [vmem:[%s16957_s7 + $0x100] ss:$8 sps:$4 sm:$0xff]   ;;  %v11320_v35 = vld [vmem:[%s16957_s7 + $0x114] ss:$8 sps:$4 sm:$0xff]  }
 0x4e7   :  { %v7265_v18 = vsel %vm6820_vm12, %v7264_v60, %v7263_v14  ;;  %v6824_v7 = vsel %vm6823_vm5, %v6822_v5, %v6821_v39  ;;  %v6871_v6 = vpack.c.b16 %v6841_v10, %v6841_v10  ;;  %v17333_v31 = vrot.slane %v15829_v21, 6 }
 0x4e8   :  { %v7285_v2 = vsel %vm6809_vm15, %v17332_v43, %v15743_v12  ;;  %7591 = vmatpush1.bf16.msra.mxu1 %v11294_v47  ;;  %v7267_v8 = vsel %vm6823_vm5, %v7266_v17, %v7265_v18  ;;  %v6827_v57 = vsel %vm6826_vm0, %v6825_v62, %v6824_v7  ;;  %v17334_v52 = vrot.slane %v15864_v1, 5  ;;  %v11306_v7 = vld [vmem:[%s16957_s7 + $0x30] ss:$8 sps:$4 sm:$0xff]  }
 0x4e9   :  { %v7287_v32 = vsel %vm6811_vm8, %v17333_v31, %v7285_v2  ;;  %7592 = vmatprep.subr.bf16.mxu1 %v11302_v30  ;;  %v7269_v5 = vsel %vm6826_vm0, %v7268_v58, %v7267_v8  ;;  %v6870_v47 = vpack.c.b16 %v6827_v57, %v6827_v57  ;;  %v7292_v60 = vrot.slane %v15918_v23, 3  ;;  %7192 = vmatprep.mubr.bf16.mxu0 %v6871_v6  ;;  %v11318_v31 = vld [vmem:[%s16957_s7 + $0x110] ss:$8 sps:$4 sm:$0xff]  }
 0x4ea   :  { %v7289_v40 = vsel %vm6814_vm2, %v17334_v52, %v7287_v32  ;;  %v7299_v17 = vpack.c.b16 %v7269_v5, %v7269_v5  ;;  %v17335_v30 = vrot.slane %v15886_v63, 4  ;;  %v7294_v51 = vrot.slane %v15929_v37, 2 }
 0x4eb   :  { %v7296_v58 = vrot.slane %v15958_v19, 1  ;;  %v7246_v46 = vrot.slane %v15858_v56, 5  ;;  %7193 = vmatmul.mubr.bf16.vlgmr.msra.gmra.mrb[112].mxu0 %v6870_v47  ;;  %v17336_v39 = vrot.slane %v15808_v28, 7  ;;  %v7250_v10 = vrot.slane %v15971_v20, 3 }
 0x4ec   :  { %v7291_v16 = vsel %vm6817_vm11, %v17335_v30, %v7289_v40  ;;  %7593 = vmatpush1.bf16.msra.mxu1 %v11300_v54  ;;  %7620 = vmatprep.mubr.bf16.mxu1 %v7299_v17  ;;  %v7252_v6 = vrot.slane %v15992_v11, 2  ;;  %v7727_v8 = vrot.slane %v15758_v45, 4  ;;  %v11311_v54 = vld [vmem:[%s16957_s7 + $0x44] ss:$8 sps:$4 sm:$0xff]   ;;  %v8228_v47 = vrot.slane %v15760_v42, 6 }
 0x4ed   :  { %v7293_v14 = vsel %vm6820_vm12, %v7292_v60, %v7291_v16  ;;  %v7243_v62 = vsel %vm6809_vm15, %v17336_v39, %v15758_v45  ;;  %7594 = vmatprep.subr.bf16.mxu1 %v11308_v38  ;;  %7630 = vmatpush1.bf16.msra.mxu0 %v11312_v0  ;;  %v11326_v0 = vld [vmem:[%s16957_s7 + $0x124] ss:$8 sps:$4 sm:$0xff]   ;;  %v7756_v40 = vrot.slane %v15762_v53, 3  ;;  %v7770_v60 = vrot.slane %v15776_v3, 3  ;;  %v11309_v30 = vld [vmem:[%s16957_s7 + $0x40] ss:$8 sps:$4 sm:$0xff]  }
 0x4ee   :  { %v7295_v43 = vsel %vm6823_vm5, %v7294_v51, %v7293_v14  ;;  %v7245_v2 = vsel %vm6811_vm8, %v7244_v49, %v7243_v62  ;;  %v7254_v49 = vrot.slane %v16033_v4, 1  ;;  %7631 = vmatprep.subr.bf16.mxu0 %v11320_v35  ;;  %v8257_v51 = vrot.slane %v15776_v3, 5 }
 0x4ef   :  { %v7297_v57 = vsel %vm6826_vm0, %v7296_v58, %v7295_v43  ;;  %v7247_v32 = vsel %vm6814_vm2, %v7246_v46, %v7245_v2  ;;  %v7728_v58 = vrot.slane %v15808_v28, 3  ;;  %v7772_v35 = vrot.slane %v15829_v21, 2 }
 0x4f0   :  { %v7301_v38 = vpack.c.b16 %v7297_v57, %v7297_v57  ;;  %v7249_v52 = vsel %vm6817_vm11, %v7248_v13, %v7247_v32  ;;  %7595 = vmatpush1.bf16.msra.mxu1 %v11306_v7  ;;  %v11317_v13 = vld [vmem:[%s16957_s7 + $0x54] ss:$8 sps:$4 sm:$0xff]   ;;  %v8229_v39 = vrot.slane %v15821_v55, 5  ;;  %v7774_v62 = vrot.slane %v15864_v1, 1 }
 0x4f1   :  { %v7251_v16 = vsel %vm6820_vm12, %v7250_v10, %v7249_v52  ;;  %7596 = vmatprep.subr.bf16.mxu1 %v11311_v54  ;;  %7632 = vmatpush1.bf16.msra.mxu0 %v11318_v31  ;;  %v11324_v10 = vld [vmem:[%s16957_s7 + $0x120] ss:$8 sps:$4 sm:$0xff]   ;;  %v7758_v43 = vrot.slane %v15824_v34, 2  ;;  %v8231_v57 = vrot.slane %v15831_v36, 4  ;;  %v11332_v54 = vld [vmem:[%s16957_s7 + $0x134] ss:$8 sps:$4 sm:$0xff]  }
 0x4f2   :  { %9884 = vmatprep.mubr.msk.bf16.mxu0 %vm6350_vm1, %v7301_v38  ;;  %v7253_v46 = vsel %vm6823_vm5, %v7252_v6, %v7251_v16  ;;  %v8259_v6 = vrot.slane %v15829_v21, 4  ;;  %7633 = vmatprep.subr.bf16.mxu0 %v11326_v0  ;;  %v7732_v31 = vrot.slane %v15858_v56, 1  ;;  %v7760_v32 = vrot.slane %v15862_v41, 1  ;;  %v11315_v0 = vld [vmem:[%s16957_s7 + $0x50] ss:$8 sps:$4 sm:$0xff]  }
 0x4f3   :  { %v16149_v7 = vsel %vm6826_vm0, %v7254_v49, %v7253_v46  ;;  %v17337_v49 = vrot.slane %v15743_v12, 4  ;;  %v7777_v52 = vrot.slane %v15918_v23, 7  ;;  %v7779_v17 = vrot.slane %v15929_v37, 6 }
 0x4f4   :  { %7597 = vmatpush1.bf16.msra.mxu1 %v11309_v30  ;;  %v7781_v46 = vrot.slane %v15958_v19, 5  ;;  %v17338_v18 = vrot.slane %v15752_v61, 4  ;;  %v7730_v14 = vrot.slane %v15913_v29, 2  ;;  %v8223_v21 = vrot.slane %v15971_v20, 1 }
 0x4f5   :  { %v7771_v38 = vsel %vm6809_vm15, %v7770_v60, %v17337_v49  ;;  %7598 = vmatprep.subr.bf16.mxu1 %v11317_v13  ;;  %v11323_v60 = vld [vmem:[%s16957_s7 + $0x64] ss:$8 sps:$4 sm:$0xff]   ;;  %7634 = vmatpush1.bf16.msra.mxu0 %v11324_v10  ;;  %v11330_v49 = vld [vmem:[%s16957_s7 + $0x130] ss:$8 sps:$4 sm:$0xff]   ;;  %v8261_v13 = vrot.slane %v15864_v1, 3  ;;  %v7767_v1 = vrot.slane %v15939_v48, 5 }
 0x4f6   :  { %v7773_v2 = vsel %vm6811_vm8, %v7772_v35, %v7771_v38  ;;  %v7757_v35 = vsel %vm6809_vm15, %v7756_v40, %v17338_v18  ;;  %v7763_v38 = vrot.slane %v15906_v27, 7  ;;  %7635 = vmatprep.subr.bf16.mxu0 %v11332_v54  ;;  %v11338_v10 = vld [vmem:[%s16957_s7 + $0x144] ss:$8 sps:$4 sm:$0xff]   ;;  %v11321_v54 = vld [vmem:[%s16957_s7 + $0x60] ss:$8 sps:$4 sm:$0xff]  }
 0x4f7   :  { %v7775_v30 = vsel %vm6814_vm2, %v7774_v62, %v7773_v2  ;;  %v7759_v62 = vsel %vm6811_vm8, %v7758_v43, %v7757_v35  ;;  %v7765_v2 = vrot.slane %v15927_v44, 6 }
 0x4f8   :  { %v7776_v16 = vsel %vm6817_vm11, %v15886_v63, %v7775_v30  ;;  %v7761_v40 = vsel %vm6814_vm2, %v7760_v32, %v7759_v62  ;;  %7599 = vmatpush1.bf16.msra.mxu1 %v11315_v0  ;;  %v8230_v30 = vsel %vm6809_vm15, %v8229_v39, %v8228_v47  ;;  %v11329_v32 = vld [vmem:[%s16957_s7 + $0x74] ss:$8 sps:$4 sm:$0xff]   ;;  %v8235_v47 = vrot.slane %v15911_v9, 2 }
 0x4f9   :  { %v7778_v18 = vsel %vm6820_vm12, %v7777_v52, %v7776_v16  ;;  %v7762_v43 = vsel %vm6817_vm11, %v15874_v22, %v7761_v40  ;;  %v8233_v52 = vrot.slane %v15867_v50, 3  ;;  %7600 = vmatprep.subr.bf16.mxu1 %v11323_v60  ;;  %7636 = vmatpush1.bf16.msra.mxu0 %v11330_v49  ;;  %v11336_v16 = vld [vmem:[%s16957_s7 + $0x140] ss:$8 sps:$4 sm:$0xff]   ;;  %v8232_v35 = vsel %vm6811_vm8, %v8231_v57, %v8230_v30  ;;  %v11344_v60 = vld [vmem:[%s16957_s7 + $0x154] ss:$8 sps:$4 sm:$0xff]  }
 0x4fa   :  { %v7780_v5 = vsel %vm6823_vm5, %v7779_v17, %v7778_v18  ;;  %v7764_v0 = vsel %vm6820_vm12, %v7763_v38, %v7762_v43  ;;  %v8263_v39 = vrot.slane %v15886_v63, 2  ;;  %7637 = vmatprep.subr.bf16.mxu0 %v11338_v10  ;;  %v8240_v38 = vrot.slane %v15973_v33, 7  ;;  %v11335_v43 = vld [vmem:[%s16957_s7 + $0x84] ss:$8 sps:$4 sm:$0xff]  }
 0x4fb   :  { %v16212_v17 = vsel %vm6826_vm0, %v7781_v46, %v7780_v5  ;;  %v7766_v49 = vsel %vm6823_vm5, %v7765_v2, %v7764_v0  ;;  %v8234_v62 = vsel %vm6814_vm2, %v8233_v52, %v8232_v35  ;;  %v8237_v5 = vrot.slane %v15964_v15, 1  ;;  %v11327_v2 = vld [vmem:[%s16957_s7 + $0x70] ss:$8 sps:$4 sm:$0xff]   ;;  %v11350_v30 = vld [vmem:[%s16957_s7 + $0x164] ss:$8 sps:$4 sm:$0xff]  }
 0x4fc   :  { %v16225_v46 = vsel %vm6826_vm0, %v7767_v1, %v7766_v49  ;;  %v8236_v57 = vsel %vm6817_vm11, %v8235_v47, %v8234_v62  ;;  %v7729_v63 = vsel %vm6809_vm15, %v7728_v58, %v7727_v8  ;;  %v8217_v10 = vrot.slane %v15913_v29, 4  ;;  %7601 = vmatpush1.bf16.msra.mxu1 %v11321_v54  ;;  %v11342_v29 = vld [vmem:[%s16957_s7 + $0x150] ss:$8 sps:$4 sm:$0xff]  }
 0x4fd   :  { %v8238_v18 = vsel %vm6820_vm12, %v8237_v5, %v8236_v57  ;;  %v7731_v40 = vsel %vm6811_vm8, %v7730_v14, %v7729_v63  ;;  %v7735_v1 = vrot.slane %v15971_v20, 7  ;;  %7602 = vmatprep.subr.bf16.mxu1 %v11329_v32  ;;  %7638 = vmatpush1.bf16.msra.mxu0 %v11336_v16  ;;  %v7737_v14 = vrot.slane %v15992_v11, 6  ;;  %v11356_v20 = vld [vmem:[%s16957_s7 + $0x174] ss:$8 sps:$4 sm:$0xff]  }
 0x4fe   :  { %v8239_v8 = vsel %vm6823_vm5, %v15969_v25, %v8238_v18  ;;  %v7733_v58 = vsel %vm6814_vm2, %v7732_v31, %v7731_v40  ;;  %v7739_v54 = vrot.slane %v16033_v4, 5  ;;  %7639 = vmatprep.subr.bf16.mxu0 %v11344_v60  ;;  %v17339_v16 = vrot.slane %v15743_v12, 6  ;;  %v11333_v12 = vld [vmem:[%s16957_s7 + $0x80] ss:$8 sps:$4 sm:$0xff]  }
 0x4ff   :  { %v16258_v52 = vsel %vm6826_vm0, %v8240_v38, %v8239_v8  ;;  %v7734_v32 = vsel %vm6817_vm11, %v15961_v26, %v7733_v58  ;;  %v8265_v0 = vrot.slane %v15918_v23, 1  ;;  %v8221_v35 = vrot.slane %v15961_v26, 2 }
 0x500   :  { %v8258_v31 = vsel %vm6809_vm15, %v8257_v51, %v17339_v16  ;;  %v7736_v47 = vsel %vm6820_vm12, %v7735_v1, %v7734_v32  ;;  %v8268_v49 = vrot.slane %v15958_v19, 7  ;;  %7603 = vmatpush1.bf16.msra.mxu1 %v11327_v2  ;;  %v17340_v23 = vrot.slane %v15758_v45, 6  ;;  %v11341_v19 = vld [vmem:[%s16957_s7 + $0x94] ss:$8 sps:$4 sm:$0xff]   ;;  %v11354_v32 = vld [vmem:[%s16957_s7 + $0x170] ss:$8 sps:$4 sm:$0xff]  }
 0x501   :  { %v8260_v60 = vsel %vm6811_vm8, %v8259_v6, %v8258_v31  ;;  %v7738_v3 = vsel %vm6823_vm5, %v7737_v14, %v7736_v47  ;;  %v17341_v26 = vrot.slane %v15808_v28, 5  ;;  %v8249_v6 = vrot.slane %v15874_v22, 2  ;;  %7604 = vmatprep.subr.bf16.mxu1 %v11335_v43  ;;  %7640 = vmatpush1.bf16.msra.mxu0 %v11342_v29 }
 0x502   :  { %v8262_v51 = vsel %vm6814_vm2, %v8261_v13, %v8260_v60  ;;  %v11348_v13 = vld [vmem:[%s16957_s7 + $0x160] ss:$8 sps:$4 sm:$0xff]   ;;  %v16293_v45 = vsel %vm6826_vm0, %v7739_v54, %v7738_v3  ;;  %7641 = vmatprep.subr.bf16.mxu0 %v11350_v30  ;;  %v17342_v38 = vrot.slane %v15858_v56, 3  ;;  %v8226_v2 = vrot.slane %v16033_v4, 7  ;;  %v11339_v4 = vld [vmem:[%s16957_s7 + $0x90] ss:$8 sps:$4 sm:$0xff]  }
 0x503   :  { %v8216_v62 = vsel %vm6809_vm15, %v17341_v26, %v17340_v23  ;;  %v8264_v28 = vsel %vm6817_vm11, %v8263_v39, %v8262_v51  ;;  %v17343_v18 = vrot.slane %v15752_v61, 6  ;;  %v17344_v40 = vrot.slane %v15762_v53, 5  ;;  %v11347_v30 = vld [vmem:[%s16957_s7 + $0xa4] ss:$8 sps:$4 sm:$0xff]   ;;  %v11360_v3 = vld [vmem:[%s16957_s7 + $0x180] ss:$8 sps:$4 sm:$0xff]  }
 0x504   :  { %v8218_v5 = vsel %vm6811_vm8, %v8217_v10, %v8216_v62  ;;  %v8266_v57 = vsel %vm6820_vm12, %v8265_v0, %v8264_v28  ;;  %v17345_v43 = vrot.slane %v15824_v34, 4  ;;  %v8251_v56 = vrot.slane %v15906_v27, 1  ;;  %7605 = vmatpush1.bf16.msra.mxu1 %v11333_v12  ;;  %v11362_v0 = vld [vmem:[%s16957_s7 + $0x184] ss:$8 sps:$4 sm:$0xff]   ;;  %v11353_v12 = vld [vmem:[%s16957_s7 + $0xb4] ss:$8 sps:$4 sm:$0xff]  }
 0x505   :  { %v8220_v63 = vsel %vm6814_vm2, %v17342_v38, %v8218_v5  ;;  %v8244_v39 = vsel %vm6809_vm15, %v17344_v40, %v17343_v18  ;;  %v8267_v10 = vsel %vm6823_vm5, %v15929_v37, %v8266_v57  ;;  %v17346_v37 = vrot.slane %v15862_v41, 3  ;;  %7606 = vmatprep.subr.bf16.mxu1 %v11341_v19  ;;  %7642 = vmatpush1.bf16.msra.mxu0 %v11348_v13  ;;  %v11368_v51 = vld [vmem:[%s16957_s7 + $0x194] ss:$8 sps:$4 sm:$0xff]   ;;  %v11351_v23 = vld [vmem:[%s16957_s7 + $0xb0] ss:$8 sps:$4 sm:$0xff]  }
 0x506   :  { %v8222_v1 = vsel %vm6817_vm11, %v8221_v35, %v8220_v63  ;;  %v8246_v29 = vsel %vm6811_vm8, %v17345_v43, %v8244_v39  ;;  %v16321_v8 = vsel %vm6826_vm0, %v8268_v49, %v8267_v10  ;;  %v8254_v54 = vrot.slane %v15939_v48, 7  ;;  %7643 = vmatprep.subr.bf16.mxu0 %v11356_v20  ;;  %v11357_v20 = vld [vmem:[%s16957_s7 + $0xc0] ss:$8 sps:$4 sm:$0xff]   ;;  %v11380_v38 = vld [vmem:[%s16957_s7 + $0x1b4] ss:$8 sps:$4 sm:$0xff]  }
 0x507   :  { %v8224_v58 = vsel %vm6820_vm12, %v8223_v21, %v8222_v1  ;;  %v8248_v14 = vsel %vm6814_vm2, %v17346_v37, %v8246_v29  ;;  %v7270_v26 = vrot.slane %v15762_v53, 7  ;;  %v7742_v62 = vrot.slane %v15821_v55, 3  ;;  %v11359_v21 = vld [vmem:[%s16957_s7 + $0xc4] ss:$8 sps:$4 sm:$0xff]   ;;  %v11369_v37 = vld [vmem:[%s16957_s7 + $0xe0] ss:$8 sps:$4 sm:$0xff]  }
 0x508   :  { %v8225_v16 = vsel %vm6823_vm5, %v15992_v11, %v8224_v58  ;;  %v8250_v31 = vsel %vm6817_vm11, %v8249_v6, %v8248_v14  ;;  %7607 = vmatpush1.bf16.msra.mxu1 %v11339_v4  ;;  %v11345_v11 = vld [vmem:[%s16957_s7 + $0xa0] ss:$8 sps:$4 sm:$0xff]   ;;  %v11366_v6 = vld [vmem:[%s16957_s7 + $0x190] ss:$8 sps:$4 sm:$0xff]   ;;  %v7272_v19 = vrot.slane %v15824_v34, 6  ;;  %v7744_v13 = vrot.slane %v15831_v36, 2 }
 0x509   :  { %v16341_v35 = vsel %vm6826_vm0, %v8226_v2, %v8225_v16  ;;  %v8252_v47 = vsel %vm6820_vm12, %v8251_v56, %v8250_v31  ;;  %7608 = vmatprep.subr.bf16.mxu1 %v11347_v30  ;;  %7644 = vmatpush1.bf16.msra.mxu0 %v11354_v32  ;;  %v11374_v53 = vld [vmem:[%s16957_s7 + $0x1a4] ss:$8 sps:$4 sm:$0xff]   ;;  %v7741_v55 = vrot.slane %v15760_v42, 4  ;;  %v7274_v28 = vrot.slane %v15862_v41, 5  ;;  %v11365_v34 = vld [vmem:[%s16957_s7 + $0xd4] ss:$8 sps:$4 sm:$0xff]  }
 0x50a   :  { %v8253_v60 = vsel %vm6823_vm5, %v15927_v44, %v8252_v47  ;;  %7645 = vmatprep.subr.bf16.mxu0 %v11362_v0  ;;  %v7276_v5 = vrot.slane %v15874_v22, 4  ;;  %v11372_v36 = vld [vmem:[%s16957_s7 + $0x1a0] ss:$8 sps:$4 sm:$0xff]   ;;  %v7271_v42 = vsel %vm6809_vm15, %v7270_v26, %v15752_v61  ;;  %v7278_v22 = vrot.slane %v15906_v27, 3  ;;  %v11377_v14 = vld [vmem:[%s16957_s7 + $0xf4] ss:$8 sps:$4 sm:$0xff]  }
 0x50b   :  { %v16350_v49 = vsel %vm6826_vm0, %v8254_v54, %v8253_v60  ;;  %v7743_v41 = vsel %vm6809_vm15, %v7742_v62, %v7741_v55  ;;  %v7746_v57 = vrot.slane %v15867_v50, 1  ;;  %v7273_v63 = vsel %vm6811_vm8, %v7272_v19, %v7271_v42  ;;  %v11363_v50 = vld [vmem:[%s16957_s7 + $0xd0] ss:$8 sps:$4 sm:$0xff]   ;;  %v11389_v32 = vld [vmem:[%s16957_s7 + $0x394] ss:$8 sps:$4 sm:$0xff]  }
 0x50c   :  { %7609 = vmatpush1.bf16.msra.mxu1 %v11345_v11  ;;  %v7280_v2 = vrot.slane %v15927_v44, 2  ;;  %v7745_v18 = vsel %vm6811_vm8, %v7744_v13, %v7743_v41  ;;  %v7275_v40 = vsel %vm6814_vm2, %v7274_v28, %v7273_v63  ;;  %v7282_v61 = vrot.slane %v15939_v48, 1  ;;  %v11371_v44 = vld [vmem:[%s16957_s7 + $0xe4] ss:$8 sps:$4 sm:$0xff]   ;;  %v11378_v48 = vld [vmem:[%s16957_s7 + $0x1b0] ss:$8 sps:$4 sm:$0xff]  }
 0x50d   :  { %7610 = vmatprep.subr.bf16.mxu1 %v11353_v12  ;;  %7646 = vmatpush1.bf16.msra.mxu0 %v11360_v3  ;;  %v7749_v27 = vrot.slane %v15964_v15, 7  ;;  %v7277_v39 = vsel %vm6817_vm11, %v7276_v5, %v7275_v40  ;;  %v7751_v10 = vrot.slane %v15969_v25, 6  ;;  %v7747_v1 = vsel %vm6814_vm2, %v7746_v57, %v7745_v18  ;;  %v11383_v25 = vld [vmem:[%s16957_s7 + $0x384] ss:$8 sps:$4 sm:$0xff]   ;;  %v11375_v16 = vld [vmem:[%s16957_s7 + $0xf0] ss:$8 sps:$4 sm:$0xff]  }
 0x50e   :  { %7647 = vmatprep.subr.bf16.mxu0 %v11368_v51  ;;  %v7279_v15 = vsel %vm6820_vm12, %v7278_v22, %v7277_v39  ;;  %v7753_v43 = vrot.slane %v15973_v33, 5  ;;  %v7748_v56 = vsel %vm6817_vm11, %v15911_v9, %v7747_v1  ;;  %v11381_v9 = vld [vmem:[%s16957_s7 + $0x380] ss:$8 sps:$4 sm:$0xff]   ;;  %v11386_v0 = vld [vmem:[%s16957_s7 + $0x484] ss:$8 sps:$4 sm:$0xff]   ;;  %v7298_v12 = vpack.c.b16 %v16149_v7, %v16149_v7 }
 0x50f   :  { %v7281_v29 = vsel %vm6823_vm5, %v7280_v2, %v7279_v15  ;;  %v7750_v58 = vsel %vm6820_vm12, %v7749_v27, %v7748_v56  ;;  %v11387_v47 = vld [vmem:[%s16957_s7 + $0x390] ss:$8 sps:$4 sm:$0xff]   ;;  %v11395_v60 = vld [vmem:[%s16957_s7 + $0x3a4] ss:$8 sps:$4 sm:$0xff]   ;;  %v11384_v11 = vld [vmem:[%s16957_s7 + $0x480] ss:$8 sps:$4 sm:$0xff]  }
 0x510   :  { %7611 = vmatpush1.bf16.msra.mxu1 %v11351_v23  ;;  %v7283_v4 = vsel %vm6826_vm0, %v7282_v61, %v7281_v29  ;;  %v7752_v33 = vsel %vm6823_vm5, %v7751_v10, %v7750_v58  ;;  %v11392_v3 = vld [vmem:[%s16957_s7 + $0x494] ss:$8 sps:$4 sm:$0xff]   ;;  %v11393_v51 = vld [vmem:[%s16957_s7 + $0x3a0] ss:$8 sps:$4 sm:$0xff]   ;;  %v7786_v23 = vpack.c.b16 %v16212_v17, %v16212_v17  ;;  %v11390_v7 = vld [vmem:[%s16957_s7 + $0x490] ss:$8 sps:$4 sm:$0xff]  }
 0x511   :  { %7612 = vmatprep.subr.bf16.mxu1 %v11359_v21  ;;  %7648 = vmatpush1.bf16.msra.mxu0 %v11366_v6  ;;  %v7754_v54 = vsel %vm6826_vm0, %v7753_v43, %v7752_v33  ;;  %v7300_v30 = vpack.c.b16 %v7283_v4, %v7283_v4  ;;  %v11401_v26 = vld [vmem:[%s16957_s7 + $0x3b4] ss:$8 sps:$4 sm:$0xff]   ;;  %v11398_v62 = vld [vmem:[%s16957_s7 + $0x4a4] ss:$8 sps:$4 sm:$0xff]   ;;  %v11399_v17 = vld [vmem:[%s16957_s7 + $0x3b0] ss:$8 sps:$4 sm:$0xff]  }
 0x512   :  { %7649 = vmatprep.subr.bf16.mxu0 %v11374_v53  ;;  %v7784_v31 = vpack.c.b16 %v7754_v54, %v7754_v54  ;;  %v11407_v21 = vld [vmem:[%s16957_s7 + $0x3c4] ss:$8 sps:$4 sm:$0xff]   ;;  %v11396_v6 = vld [vmem:[%s16957_s7 + $0x4a0] ss:$8 sps:$4 sm:$0xff]   ;;  %v11404_v19 = vld [vmem:[%s16957_s7 + $0x4b4] ss:$8 sps:$4 sm:$0xff]  }
 0x513   :  { %v11405_v13 = vld [vmem:[%s16957_s7 + $0x3c0] ss:$8 sps:$4 sm:$0xff]   ;;  %v11413_v53 = vld [vmem:[%s16957_s7 + $0x3d4] ss:$8 sps:$4 sm:$0xff]   ;;  %v11402_v55 = vld [vmem:[%s16957_s7 + $0x4b0] ss:$8 sps:$4 sm:$0xff]  }
 0x514   :  { %7613 = vmatpush1.bf16.msra.mxu1 %v11357_v20  ;;  %v11410_v28 = vld [vmem:[%s16957_s7 + $0x4c4] ss:$8 sps:$4 sm:$0xff]   ;;  %v11411_v5 = vld [vmem:[%s16957_s7 + $0x3d0] ss:$8 sps:$4 sm:$0xff]   ;;  %v11417_v42 = vld [vmem:[%s16957_s7 + $0x3e0] ss:$8 sps:$4 sm:$0xff]  }
 0x515   :  { %7614 = vmatprep.subr.bf16.mxu1 %v11365_v34  ;;  %7650 = vmatpush1.bf16.msra.mxu0 %v11372_v36  ;;  %v11419_v20 = vld [vmem:[%s16957_s7 + $0x3e4] ss:$8 sps:$4 sm:$0xff]   ;;  %v11408_v34 = vld [vmem:[%s16957_s7 + $0x4c0] ss:$8 sps:$4 sm:$0xff]   ;;  %v11416_v36 = vld [vmem:[%s16957_s7 + $0x4d4] ss:$8 sps:$4 sm:$0xff]  }
 0x516   :  { %7651 = vmatprep.subr.bf16.mxu0 %v11380_v38  ;;  %v11425_v22 = vld [vmem:[%s16957_s7 + $0x3f4] ss:$8 sps:$4 sm:$0xff]   ;;  %v11414_v41 = vld [vmem:[%s16957_s7 + $0x4d0] ss:$8 sps:$4 sm:$0xff]   ;;  %v11422_v57 = vld [vmem:[%s16957_s7 + $0x4e4] ss:$8 sps:$4 sm:$0xff]  }
 0x517   :  { %v11423_v38 = vld [vmem:[%s16957_s7 + $0x3f0] ss:$8 sps:$4 sm:$0xff]   ;;  %v11431_v63 = vld [vmem:[%s16957_s7 + $0x404] ss:$8 sps:$4 sm:$0xff]   ;;  %v11420_v2 = vld [vmem:[%s16957_s7 + $0x4e0] ss:$8 sps:$4 sm:$0xff]  }
 0x518   :  { %7615 = vmatpush1.bf16.msra.mxu1 %v11363_v50  ;;  %v11428_v18 = vld [vmem:[%s16957_s7 + $0x4f4] ss:$8 sps:$4 sm:$0xff]   ;;  %v11429_v40 = vld [vmem:[%s16957_s7 + $0x400] ss:$8 sps:$4 sm:$0xff]   ;;  %v11426_v27 = vld [vmem:[%s16957_s7 + $0x4f0] ss:$8 sps:$4 sm:$0xff]  }
 0x519   :  { %7616 = vmatprep.subr.bf16.mxu1 %v11371_v44  ;;  %7652 = vmatpush1.bf16.msra.mxu0 %v11378_v48  ;;  %v11437_v61 = vld [vmem:[%s16957_s7 + $0x414] ss:$8 sps:$4 sm:$0xff]   ;;  %v11434_v50 = vld [vmem:[%s16957_s7 + $0x504] ss:$8 sps:$4 sm:$0xff]   ;;  %v11435_v39 = vld [vmem:[%s16957_s7 + $0x410] ss:$8 sps:$4 sm:$0xff]  }
 0x51a   :  { %8073 = vmatprep.subr.bf16.mxu0 %v11383_v25  ;;  %v11443_v10 = vld [vmem:[%s16957_s7 + $0x424] ss:$8 sps:$4 sm:$0xff]   ;;  %v11432_v44 = vld [vmem:[%s16957_s7 + $0x500] ss:$8 sps:$4 sm:$0xff]   ;;  %v11440_v48 = vld [vmem:[%s16957_s7 + $0x514] ss:$8 sps:$4 sm:$0xff]  }
 0x51b   :  { %v11441_v15 = vld [vmem:[%s16957_s7 + $0x420] ss:$8 sps:$4 sm:$0xff]   ;;  %v11449_v1 = vld [vmem:[%s16957_s7 + $0x434] ss:$8 sps:$4 sm:$0xff]   ;;  %v11438_v43 = vld [vmem:[%s16957_s7 + $0x510] ss:$8 sps:$4 sm:$0xff]  }
 0x51c   :  { %7617 = vmatpush1.bf16.msra.mxu1 %v11369_v37  ;;  %7662 = vmatmul.mubr.bf16.vlgmr.msra.gmra.mrb[116].mxu0 %v7300_v30  ;;  %v11446_v29 = vld [vmem:[%s16957_s7 + $0x524] ss:$8 sps:$4 sm:$0xff]   ;;  %v11447_v25 = vld [vmem:[%s16957_s7 + $0x430] ss:$8 sps:$4 sm:$0xff]   ;;  %v11444_v4 = vld [vmem:[%s16957_s7 + $0x520] ss:$8 sps:$4 sm:$0xff]  }
 0x51d   :  { %7618 = vmatprep.subr.bf16.mxu1 %v11377_v14  ;;  %8074 = vmatpush1.bf16.msra.mxu0 %v11381_v9  ;;  %v11455_v56 = vld [vmem:[%s16957_s7 + $0x444] ss:$8 sps:$4 sm:$0xff]   ;;  %v11452_v58 = vld [vmem:[%s16957_s7 + $0x534] ss:$8 sps:$4 sm:$0xff]   ;;  %v11453_v37 = vld [vmem:[%s16957_s7 + $0x440] ss:$8 sps:$4 sm:$0xff]  }
 0x51e   :  { %8105 = vmatprep.mubr.bf16.mxu0 %v7784_v31  ;;  %8075 = vmatprep.subr.bf16.mxu0 %v11389_v32  ;;  %v11461_v33 = vld [vmem:[%s16957_s7 + $0x454] ss:$8 sps:$4 sm:$0xff]   ;;  %v11450_v14 = vld [vmem:[%s16957_s7 + $0x530] ss:$8 sps:$4 sm:$0xff]   ;;  %v11458_v9 = vld [vmem:[%s16957_s7 + $0x544] ss:$8 sps:$4 sm:$0xff]  }
 0x51f   :  { %v11459_v54 = vld [vmem:[%s16957_s7 + $0x450] ss:$8 sps:$4 sm:$0xff]   ;;  %v11467_v30 = vld [vmem:[%s16957_s7 + $0x464] ss:$8 sps:$4 sm:$0xff]   ;;  %v11456_v32 = vld [vmem:[%s16957_s7 + $0x540] ss:$8 sps:$4 sm:$0xff]  }
 0x520   :  { %7619 = vmatpush1.bf16.msra.mxu1 %v11375_v16  ;;  %v7785_v16 = vpack.c.b16 %v16225_v46, %v16225_v46  ;;  %v11464_v31 = vld [vmem:[%s16957_s7 + $0x554] ss:$8 sps:$4 sm:$0xff]   ;;  %v11462_v46 = vld [vmem:[%s16957_s7 + $0x550] ss:$8 sps:$4 sm:$0xff]  }
 0x521   :  { %8114 = vmatprep.subr.bf16.mxu1 %v11386_v0  ;;  %8076 = vmatpush1.bf16.msra.mxu0 %v11387_v47  ;;  %v11465_v0 = vld [vmem:[%s16957_s7 + $0x460] ss:$8 sps:$4 sm:$0xff]   ;;  %v8271_v47 = vpack.c.b16 %v16258_v52, %v16258_v52  ;;  %v11471_v52 = vld [vmem:[%s16957_s7 + $0x470] ss:$8 sps:$4 sm:$0xff]  }
 0x522   :  { %8077 = vmatprep.subr.bf16.mxu0 %v11395_v60  ;;  %v11473_v60 = vld [vmem:[%s16957_s7 + $0x474] ss:$8 sps:$4 sm:$0xff]  }
 0x523   :  { %7621 = vmatmul.mubr.bf16.vlgmr.msra.gmra.mrb[116].mxu1 %v7298_v12  ;;  %v11482_v12 = vld [vmem:[%s16957_s7 + $0x644] ss:$8 sps:$4 sm:$0xff]  }
 0x524   :  { %8115 = vmatpush1.bf16.msra.mxu1 %v11384_v11  ;;  %9997 = vmatprep.mubr.msk.bf16.mxu1 %vm6350_vm1, %v7786_v23  ;;  %v11470_v11 = vld [vmem:[%s16957_s7 + $0x564] ss:$8 sps:$4 sm:$0xff]   ;;  %v11480_v23 = vld [vmem:[%s16957_s7 + $0x640] ss:$8 sps:$4 sm:$0xff]  }
 0x525   :  { %8116 = vmatprep.subr.bf16.mxu1 %v11392_v3  ;;  %8078 = vmatpush1.bf16.msra.mxu0 %v11393_v51  ;;  %v11468_v3 = vld [vmem:[%s16957_s7 + $0x560] ss:$8 sps:$4 sm:$0xff]   ;;  %v11476_v51 = vld [vmem:[%s16957_s7 + $0x574] ss:$8 sps:$4 sm:$0xff]  }
 0x526   :  { %8079 = vmatprep.subr.bf16.mxu0 %v11401_v26  ;;  %v7783_v26 = vpack.c.b16 %v16293_v45, %v16293_v45  ;;  %v11486_v45 = vld [vmem:[%s16957_s7 + $0x650] ss:$8 sps:$4 sm:$0xff]  }
 0x528   :  { %8117 = vmatpush1.bf16.msra.mxu1 %v11390_v7  ;;  %v11488_v7 = vld [vmem:[%s16957_s7 + $0x654] ss:$8 sps:$4 sm:$0xff]  }
 0x529   :  { %8118 = vmatprep.subr.bf16.mxu1 %v11398_v62  ;;  %8080 = vmatpush1.bf16.msra.mxu0 %v11399_v17  ;;  %v11474_v62 = vld [vmem:[%s16957_s7 + $0x570] ss:$8 sps:$4 sm:$0xff]   ;;  %v8273_v17 = vpack.c.b16 %v16321_v8, %v16321_v8  ;;  %v11477_v8 = vld [vmem:[%s16957_s7 + $0x580] ss:$8 sps:$4 sm:$0xff]  }
 0x52a   :  { %8081 = vmatprep.subr.bf16.mxu0 %v11407_v21  ;;  %v11479_v21 = vld [vmem:[%s16957_s7 + $0x584] ss:$8 sps:$4 sm:$0xff]  }
 0x52c   :  { %8119 = vmatpush1.bf16.msra.mxu1 %v11396_v6  ;;  %v11494_v6 = vld [vmem:[%s16957_s7 + $0x664] ss:$8 sps:$4 sm:$0xff]  }
 0x52d   :  { %8120 = vmatprep.subr.bf16.mxu1 %v11404_v19  ;;  %8082 = vmatpush1.bf16.msra.mxu0 %v11405_v13  ;;  %v11485_v19 = vld [vmem:[%s16957_s7 + $0x594] ss:$8 sps:$4 sm:$0xff]   ;;  %v11492_v13 = vld [vmem:[%s16957_s7 + $0x660] ss:$8 sps:$4 sm:$0xff]  }
 0x52e   :  { %8083 = vmatprep.subr.bf16.mxu0 %v11413_v53  ;;  %v11500_v53 = vld [vmem:[%s16957_s7 + $0x674] ss:$8 sps:$4 sm:$0xff]  }
 0x530   :  { %8121 = vmatpush1.bf16.msra.mxu1 %v11402_v55  ;;  %v11483_v55 = vld [vmem:[%s16957_s7 + $0x590] ss:$8 sps:$4 sm:$0xff]  }
 0x531   :  { %8122 = vmatprep.subr.bf16.mxu1 %v11410_v28  ;;  %8084 = vmatpush1.bf16.msra.mxu0 %v11411_v5  ;;  %v11491_v28 = vld [vmem:[%s16957_s7 + $0x5a4] ss:$8 sps:$4 sm:$0xff]   ;;  %v11498_v5 = vld [vmem:[%s16957_s7 + $0x670] ss:$8 sps:$4 sm:$0xff]  }
 0x532   :  { %8085 = vmatprep.subr.bf16.mxu0 %v11419_v20  ;;  %v11506_v20 = vld [vmem:[%s16957_s7 + $0x684] ss:$8 sps:$4 sm:$0xff]  }
 0x534   :  { %8123 = vmatpush1.bf16.msra.mxu1 %v11408_v34  ;;  %v11489_v34 = vld [vmem:[%s16957_s7 + $0x5a0] ss:$8 sps:$4 sm:$0xff]  }
 0x535   :  { %8124 = vmatprep.subr.bf16.mxu1 %v11416_v36  ;;  %8086 = vmatpush1.bf16.msra.mxu0 %v11417_v42  ;;  %v11497_v36 = vld [vmem:[%s16957_s7 + $0x5b4] ss:$8 sps:$4 sm:$0xff]   ;;  %v11504_v42 = vld [vmem:[%s16957_s7 + $0x680] ss:$8 sps:$4 sm:$0xff]  }
 0x536   :  { %8087 = vmatprep.subr.bf16.mxu0 %v11425_v22  ;;  %v11512_v22 = vld [vmem:[%s16957_s7 + $0x694] ss:$8 sps:$4 sm:$0xff]  }
 0x538   :  { %8125 = vmatpush1.bf16.msra.mxu1 %v11414_v41  ;;  %v11495_v41 = vld [vmem:[%s16957_s7 + $0x5b0] ss:$8 sps:$4 sm:$0xff]  }
 0x539   :  { %8126 = vmatprep.subr.bf16.mxu1 %v11422_v57  ;;  %8088 = vmatpush1.bf16.msra.mxu0 %v11423_v38  ;;  %v11503_v57 = vld [vmem:[%s16957_s7 + $0x5c4] ss:$8 sps:$4 sm:$0xff]   ;;  %v11510_v38 = vld [vmem:[%s16957_s7 + $0x690] ss:$8 sps:$4 sm:$0xff]  }
 0x53a   :  { %8089 = vmatprep.subr.bf16.mxu0 %v11431_v63  ;;  %v11518_v63 = vld [vmem:[%s16957_s7 + $0x6a4] ss:$8 sps:$4 sm:$0xff]  }
 0x53c   :  { %8127 = vmatpush1.bf16.msra.mxu1 %v11420_v2  ;;  %v11501_v2 = vld [vmem:[%s16957_s7 + $0x5c0] ss:$8 sps:$4 sm:$0xff]  }
 0x53d   :  { %8128 = vmatprep.subr.bf16.mxu1 %v11428_v18  ;;  %8090 = vmatpush1.bf16.msra.mxu0 %v11429_v40  ;;  %v11509_v18 = vld [vmem:[%s16957_s7 + $0x5d4] ss:$8 sps:$4 sm:$0xff]   ;;  %v11516_v40 = vld [vmem:[%s16957_s7 + $0x6a0] ss:$8 sps:$4 sm:$0xff]  }
 0x53e   :  { %8091 = vmatprep.subr.bf16.mxu0 %v11437_v61  ;;  %v11524_v61 = vld [vmem:[%s16957_s7 + $0x6b4] ss:$8 sps:$4 sm:$0xff]  }
 0x540   :  { %8129 = vmatpush1.bf16.msra.mxu1 %v11426_v27  ;;  %v11507_v27 = vld [vmem:[%s16957_s7 + $0x5d0] ss:$8 sps:$4 sm:$0xff]  }
 0x541   :  { %8130 = vmatprep.subr.bf16.mxu1 %v11434_v50  ;;  %8092 = vmatpush1.bf16.msra.mxu0 %v11435_v39  ;;  %v11515_v50 = vld [vmem:[%s16957_s7 + $0x5e4] ss:$8 sps:$4 sm:$0xff]   ;;  %v11522_v39 = vld [vmem:[%s16957_s7 + $0x6b0] ss:$8 sps:$4 sm:$0xff]  }
 0x542   :  { %8093 = vmatprep.subr.bf16.mxu0 %v11443_v10  ;;  %v11530_v10 = vld [vmem:[%s16957_s7 + $0x6c4] ss:$8 sps:$4 sm:$0xff]  }
 0x544   :  { %8131 = vmatpush1.bf16.msra.mxu1 %v11432_v44  ;;  %v11513_v44 = vld [vmem:[%s16957_s7 + $0x5e0] ss:$8 sps:$4 sm:$0xff]  }
 0x545   :  { %8132 = vmatprep.subr.bf16.mxu1 %v11440_v48  ;;  %8094 = vmatpush1.bf16.msra.mxu0 %v11441_v15  ;;  %v11521_v48 = vld [vmem:[%s16957_s7 + $0x5f4] ss:$8 sps:$4 sm:$0xff]   ;;  %v11528_v15 = vld [vmem:[%s16957_s7 + $0x6c0] ss:$8 sps:$4 sm:$0xff]  }
 0x546   :  { %8095 = vmatprep.subr.bf16.mxu0 %v11449_v1  ;;  %v11536_v1 = vld [vmem:[%s16957_s7 + $0x6d4] ss:$8 sps:$4 sm:$0xff]  }
 0x548   :  { %8133 = vmatpush1.bf16.msra.mxu1 %v11438_v43  ;;  %v11519_v43 = vld [vmem:[%s16957_s7 + $0x5f0] ss:$8 sps:$4 sm:$0xff]  }
 0x549   :  { %8134 = vmatprep.subr.bf16.mxu1 %v11446_v29  ;;  %8096 = vmatpush1.bf16.msra.mxu0 %v11447_v25  ;;  %v11527_v29 = vld [vmem:[%s16957_s7 + $0x604] ss:$8 sps:$4 sm:$0xff]   ;;  %v11534_v25 = vld [vmem:[%s16957_s7 + $0x6d0] ss:$8 sps:$4 sm:$0xff]  }
 0x54a   :  { %8097 = vmatprep.subr.bf16.mxu0 %v11455_v56  ;;  %v11542_v56 = vld [vmem:[%s16957_s7 + $0x6e4] ss:$8 sps:$4 sm:$0xff]  }
 0x54c   :  { %8135 = vmatpush1.bf16.msra.mxu1 %v11444_v4  ;;  %v11525_v4 = vld [vmem:[%s16957_s7 + $0x600] ss:$8 sps:$4 sm:$0xff]  }
 0x54d   :  { %8136 = vmatprep.subr.bf16.mxu1 %v11452_v58  ;;  %8098 = vmatpush1.bf16.msra.mxu0 %v11453_v37  ;;  %v11533_v58 = vld [vmem:[%s16957_s7 + $0x614] ss:$8 sps:$4 sm:$0xff]   ;;  %v11540_v37 = vld [vmem:[%s16957_s7 + $0x6e0] ss:$8 sps:$4 sm:$0xff]  }
 0x54e   :  { %8099 = vmatprep.subr.bf16.mxu0 %v11461_v33  ;;  %v11548_v33 = vld [vmem:[%s16957_s7 + $0x6f4] ss:$8 sps:$4 sm:$0xff]  }
 0x550   :  { %8137 = vmatpush1.bf16.msra.mxu1 %v11450_v14  ;;  %v11531_v14 = vld [vmem:[%s16957_s7 + $0x610] ss:$8 sps:$4 sm:$0xff]  }
 0x551   :  { %8560 = vmatprep.subr.bf16.mxu1 %v11458_v9  ;;  %8100 = vmatpush1.bf16.msra.mxu0 %v11459_v54  ;;  %v11539_v9 = vld [vmem:[%s16957_s7 + $0x624] ss:$8 sps:$4 sm:$0xff]   ;;  %v11546_v54 = vld [vmem:[%s16957_s7 + $0x6f0] ss:$8 sps:$4 sm:$0xff]  }
 0x552   :  { %8101 = vmatprep.subr.bf16.mxu0 %v11467_v30  ;;  %v11537_v30 = vld [vmem:[%s16957_s7 + $0x620] ss:$8 sps:$4 sm:$0xff]  }
 0x553   :  { %8147 = vmatmul.mubr.bf16.vlgmr.msra.gmra.mrb[120].mxu1 %v7785_v16  ;;  %v8272_v16 = vpack.c.b16 %v16350_v49, %v16350_v49  ;;  %v11551_v49 = vld [vmem:[%s16959_s10 + $0x4] ss:$8 sps:$4 sm:$0xff]  }
 0x554   :  { %8561 = vmatpush1.bf16.msra.mxu1 %v11456_v32  ;;  %8592 = vmatprep.mubr.bf16.mxu1 %v8271_v47  ;;  %v11545_v32 = vld [vmem:[%s16957_s7 + $0x634] ss:$8 sps:$4 sm:$0xff]   ;;  %v11549_v47 = vld [vmem:[%s16959_s10] ss:$8 sps:$4 sm:$0xff]  }
 0x555   :  { %8562 = vmatprep.subr.bf16.mxu1 %v11464_v31  ;;  %8102 = vmatpush1.bf16.msra.mxu0 %v11465_v0  ;;  %v11543_v31 = vld [vmem:[%s16957_s7 + $0x630] ss:$8 sps:$4 sm:$0xff]   ;;  %v8270_v0 = vpack.c.b16 %v16341_v35, %v16341_v35  ;;  %v11557_v35 = vld [vmem:[%s16959_s10 + $0x24] ss:$8 sps:$4 sm:$0xff]  }
 0x556   :  { %8103 = vmatprep.subr.bf16.mxu0 %v11473_v60  ;;  %v11552_v60 = vld [vmem:[%s16959_s10 + $0x10] ss:$8 sps:$4 sm:$0xff]  }
 0x558   :  { %8563 = vmatpush1.bf16.msra.mxu1 %v11462_v46  ;;  %v11554_v46 = vld [vmem:[%s16959_s10 + $0x14] ss:$8 sps:$4 sm:$0xff]  }
 0x559   :  { %8564 = vmatprep.subr.bf16.mxu1 %v11470_v11  ;;  %8104 = vmatpush1.bf16.msra.mxu0 %v11471_v52  ;;  %v11555_v52 = vld [vmem:[%s16959_s10 + $0x20] ss:$8 sps:$4 sm:$0xff]  }
 0x55a   :  { %8601 = vmatprep.subr.bf16.mxu0 %v11482_v12 }
 0x55c   :  { %8565 = vmatpush1.bf16.msra.mxu1 %v11468_v3  ;;  %8106 = vmatmul.mubr.bf16.vlgmr.msra.gmra.mrb[120].mxu0 %v7783_v26  ;;  %v11560_v3 = vld [vmem:[%s16959_s10 + $0x34] ss:$8 sps:$4 sm:$0xff]   ;;  %v11558_v26 = vld [vmem:[%s16959_s10 + $0x30] ss:$8 sps:$4 sm:$0xff]  }
 0x55d   :  { %8566 = vmatprep.subr.bf16.mxu1 %v11476_v51  ;;  %8602 = vmatpush1.bf16.msra.mxu0 %v11480_v23 }
 0x55e   :  { %10110 = vmatprep.mubr.msk.bf16.mxu0 %vm6350_vm1, %v8273_v17  ;;  %8603 = vmatprep.subr.bf16.mxu0 %v11488_v7  ;;  %v11563_v7 = vld [vmem:[%s16959_s10 + $0x44] ss:$8 sps:$4 sm:$0xff]   ;;  %v11561_v17 = vld [vmem:[%s16959_s10 + $0x40] ss:$8 sps:$4 sm:$0xff]  }
 0x560   :  { %8567 = vmatpush1.bf16.msra.mxu1 %v11474_v62 }
 0x561   :  { %8568 = vmatprep.subr.bf16.mxu1 %v11479_v21  ;;  %8604 = vmatpush1.bf16.msra.mxu0 %v11486_v45 }
 0x562   :  { %8605 = vmatprep.subr.bf16.mxu0 %v11494_v6  ;;  %v11566_v6 = vld [vmem:[%s16959_s10 + $0x54] ss:$8 sps:$4 sm:$0xff]  }
 0x564   :  { %8569 = vmatpush1.bf16.msra.mxu1 %v11477_v8 }
 0x565   :  { %8570 = vmatprep.subr.bf16.mxu1 %v11485_v19  ;;  %8606 = vmatpush1.bf16.msra.mxu0 %v11492_v13 }
 0x566   :  { %8607 = vmatprep.subr.bf16.mxu0 %v11500_v53  ;;  %v11564_v53 = vld [vmem:[%s16959_s10 + $0x50] ss:$8 sps:$4 sm:$0xff]  }
 0x568   :  { %8571 = vmatpush1.bf16.msra.mxu1 %v11483_v55  ;;  %v11569_v55 = vld [vmem:[%s16959_s10 + $0x64] ss:$8 sps:$4 sm:$0xff]  }
 0x569   :  { %8572 = vmatprep.subr.bf16.mxu1 %v11491_v28  ;;  %8608 = vmatpush1.bf16.msra.mxu0 %v11498_v5  ;;  %v11567_v28 = vld [vmem:[%s16959_s10 + $0x60] ss:$8 sps:$4 sm:$0xff]   ;;  %v11572_v5 = vld [vmem:[%s16959_s10 + $0x74] ss:$8 sps:$4 sm:$0xff]  }
 0x56a   :  { %8609 = vmatprep.subr.bf16.mxu0 %v11506_v20  ;;  %v11570_v20 = vld [vmem:[%s16959_s10 + $0x70] ss:$8 sps:$4 sm:$0xff]  }
 0x56c   :  { %8573 = vmatpush1.bf16.msra.mxu1 %v11489_v34  ;;  %v11575_v34 = vld [vmem:[%s16959_s10 + $0x84] ss:$8 sps:$4 sm:$0xff]  }
 0x56d   :  { %8574 = vmatprep.subr.bf16.mxu1 %v11497_v36  ;;  %8610 = vmatpush1.bf16.msra.mxu0 %v11504_v42  ;;  %v11573_v36 = vld [vmem:[%s16959_s10 + $0x80] ss:$8 sps:$4 sm:$0xff]   ;;  %v11578_v42 = vld [vmem:[%s16959_s10 + $0x94] ss:$8 sps:$4 sm:$0xff]  }
 0x56e   :  { %8611 = vmatprep.subr.bf16.mxu0 %v11512_v22  ;;  %v11576_v22 = vld [vmem:[%s16959_s10 + $0x90] ss:$8 sps:$4 sm:$0xff]  }
 0x570   :  { %8575 = vmatpush1.bf16.msra.mxu1 %v11495_v41  ;;  %v11581_v41 = vld [vmem:[%s16959_s10 + $0xa4] ss:$8 sps:$4 sm:$0xff]  }
 0x571   :  { %8576 = vmatprep.subr.bf16.mxu1 %v11503_v57  ;;  %8612 = vmatpush1.bf16.msra.mxu0 %v11510_v38  ;;  %v11579_v57 = vld [vmem:[%s16959_s10 + $0xa0] ss:$8 sps:$4 sm:$0xff]   ;;  %v11584_v38 = vld [vmem:[%s16959_s10 + $0xb4] ss:$8 sps:$4 sm:$0xff]  }
 0x572   :  { %8613 = vmatprep.subr.bf16.mxu0 %v11518_v63  ;;  %v11582_v63 = vld [vmem:[%s16959_s10 + $0xb0] ss:$8 sps:$4 sm:$0xff]  }
 0x574   :  { %8577 = vmatpush1.bf16.msra.mxu1 %v11501_v2  ;;  %v11587_v2 = vld [vmem:[%s16959_s10 + $0xc4] ss:$8 sps:$4 sm:$0xff]  }
 0x575   :  { %8578 = vmatprep.subr.bf16.mxu1 %v11509_v18  ;;  %8614 = vmatpush1.bf16.msra.mxu0 %v11516_v40  ;;  %v11585_v18 = vld [vmem:[%s16959_s10 + $0xc0] ss:$8 sps:$4 sm:$0xff]   ;;  %v11588_v40 = vld [vmem:[%s16959_s10 + $0xd0] ss:$8 sps:$4 sm:$0xff]  }
 0x576   :  { %8615 = vmatprep.subr.bf16.mxu0 %v11524_v61  ;;  %v11590_v61 = vld [vmem:[%s16959_s10 + $0xd4] ss:$8 sps:$4 sm:$0xff]  }
 0x578   :  { %8579 = vmatpush1.bf16.msra.mxu1 %v11507_v27  ;;  %v11593_v27 = vld [vmem:[%s16959_s10 + $0xe4] ss:$8 sps:$4 sm:$0xff]  }
 0x579   :  { %8580 = vmatprep.subr.bf16.mxu1 %v11515_v50  ;;  %8616 = vmatpush1.bf16.msra.mxu0 %v11522_v39 }
 0x57a   :  { %8617 = vmatprep.subr.bf16.mxu0 %v11530_v10  ;;  %v11591_v10 = vld [vmem:[%s16959_s10 + $0xe0] ss:$8 sps:$4 sm:$0xff]  }
 0x57c   :  { %8581 = vmatpush1.bf16.msra.mxu1 %v11513_v44 }
 0x57d   :  { %8582 = vmatprep.subr.bf16.mxu1 %v11521_v48  ;;  %8618 = vmatpush1.bf16.msra.mxu0 %v11528_v15  ;;  %v11596_v48 = vld [vmem:[%s16959_s10 + $0xf4] ss:$8 sps:$4 sm:$0xff]  }
 0x57e   :  { %8619 = vmatprep.subr.bf16.mxu0 %v11536_v1  ;;  %v11594_v1 = vld [vmem:[%s16959_s10 + $0xf0] ss:$8 sps:$4 sm:$0xff]  }
 0x580   :  { %8583 = vmatpush1.bf16.msra.mxu1 %v11519_v43  ;;  %v26_v43 = vstv %s16960_s12 }
 0x581   :  { %8584 = vmatprep.subr.bf16.mxu1 %v11527_v29  ;;  %8620 = vmatpush1.bf16.msra.mxu0 %v11534_v25  ;;  %v11597_v29 = vld [vmem:[%s16961_s13 + $0x40] sm:$0xff]   ;;  %27 = vst [vmem:[#allocation5] sm:$0x1] %v26_v43 }
 0x582   :  { %8621 = vmatprep.subr.bf16.mxu0 %v11542_v56  ;;  %v11598_v56 = vld [vmem:[%s16961_s13] sm:$0xff]  }
 0x583   :  { %v8708_v43 = vld [vmem:[%s16963_s11] sm:$0x3] }
 0x584   :  { %8585 = vmatpush1.bf16.msra.mxu1 %v11525_v4 }
 0x585   :  { %8586 = vmatprep.subr.bf16.mxu1 %v11533_v58  ;;  %8622 = vmatpush1.bf16.msra.mxu0 %v11540_v37  ;;  %v11599_v37 = vld [vmem:[%s16961_s13 + $0x48] sm:$0xff]  }
 0x586   :  { %8623 = vmatprep.subr.bf16.mxu0 %v11548_v33 }
 0x588   :  { %8587 = vmatpush1.bf16.msra.mxu1 %v11531_v14 }
 0x589   :  { %8588 = vmatprep.subr.bf16.mxu1 %v11539_v9  ;;  %8624 = vmatpush1.bf16.msra.mxu0 %v11546_v54  ;;  %v11600_v9 = vld [vmem:[%s16961_s13 + $0x8] sm:$0xff]  }
 0x58a   :  { %8880 = vmatprep.subr.bf16.mxu0 %v11551_v49  ;;  %v11604_v49 = vld [vmem:[%s16961_s13 + $0x18] sm:$0xff]  }
 0x58c   :  { %8589 = vmatpush1.bf16.msra.mxu1 %v11537_v30  ;;  %8634 = vmatmul.mubr.bf16.vlgmr.msra.gmra.mrb[124].mxu0 %v8272_v16 }
 0x58d   :  { %8590 = vmatprep.subr.bf16.mxu1 %v11545_v32  ;;  %8881 = vmatpush1.bf16.msra.mxu0 %v11549_v47  ;;  %v11601_v32 = vld [vmem:[%s16961_s13 + $0x50] sm:$0xff]   ;;  %v10144_v47 = vld [vmem:[#allocation5] ss:$0 sm:$0xff] }
 0x58e   :  { %8882 = vmatprep.subr.bf16.mxu0 %v11554_v46  ;;  %8930 = vperm.xlu1 %10411, %v10144_v47   ;;  %v11606_v46 = vld [vmem:[%s16961_s13 + $0x20] sm:$0xff]  }
 0x590   :  { %8591 = vmatpush1.bf16.msra.mxu1 %v11543_v31  ;;  %v11602_v31 = vld [vmem:[%s16961_s13 + $0x10] sm:$0xff]  }
 0x591   :  { %8883 = vmatpush1.bf16.msra.mxu0 %v11552_v60  ;;  %10162 = vmatprep.subr.bf16.mxu1 %v11597_v29  ;;  %v11605_v60 = vld [vmem:[%s16961_s13 + $0x60] sm:$0xff]   ;;  %v8713_v29 = vrot.slane %v8708_v43, %v17321_v59 }
 0x592   :  { %8884 = vmatprep.subr.bf16.mxu0 %v11557_v35  ;;  %v11607_v35 = vld [vmem:[%s16961_s13 + $0x68] sm:$0xff]  }
 0x593   :  { %8593 = vmatmul.mubr.bf16.vlgmr.msra.gmra.mrb[124].mxu1 %v8270_v0  ;;  %v11603_v0 = vld [vmem:[%s16961_s13 + $0x58] sm:$0xff]  }
 0x594   :  { %10163 = vmatpush3.bf16.msra.mxu1 %v11598_v56 }
 0x595   :  { %8885 = vmatpush1.bf16.msra.mxu0 %v11555_v52  ;;  %10164 = vmatprep.subr.bf16.mxu1 %v11599_v37 }
 0x596   :  { %8886 = vmatprep.subr.bf16.mxu0 %v11560_v3 }
 0x598   :  { %10165 = vmatpush3.bf16.msra.mxu1 %v11600_v9 }
 0x599   :  { %8887 = vmatpush1.bf16.msra.mxu0 %v11558_v26  ;;  %10166 = vmatprep.subr.bf16.mxu1 %v11601_v32 }
 0x59a   :  { %8888 = vmatprep.subr.bf16.mxu0 %v11563_v7 }
 0x59c   :  { %10167 = vmatpush3.bf16.msra.mxu1 %v11602_v31 }
 0x59d   :  { %8889 = vmatpush1.bf16.msra.mxu0 %v11561_v17  ;;  %10168 = vmatprep.subr.bf16.mxu1 %v11603_v0 }
 0x59e   :  { %8890 = vmatprep.subr.bf16.mxu0 %v11566_v6 }
 0x5a0   :  { %10169 = vmatpush3.bf16.msra.mxu1 %v11604_v49 }
 0x5a1   :  { %8891 = vmatpush1.bf16.msra.mxu0 %v11564_v53  ;;  %10170 = vmatprep.subr.bf16.mxu1 %v11605_v60 }
 0x5a2   :  { %8892 = vmatprep.subr.bf16.mxu0 %v11569_v55  ;;  %v8644_v55 = vld [vmem:[%s16962_s8] sm:$0x3] }
 0x5a4   :  { %10171 = vmatpush3.bf16.msra.mxu1 %v11606_v46 }
 0x5a5   :  { %8893 = vmatpush1.bf16.msra.mxu0 %v11567_v28  ;;  %10172 = vmatprep.subr.bf16.mxu1 %v11607_v35 }
 0x5a6   :  { %8894 = vmatprep.subr.bf16.mxu0 %v11572_v5 }
 0x5a9   :  { %8895 = vmatpush1.bf16.msra.mxu0 %v11570_v20  ;;  %v8649_v20 = vrot.slane %v8644_v55, %v17321_v59 }
 0x5aa   :  { %8896 = vmatprep.subr.bf16.mxu0 %v11575_v34 }
 0x5ad   :  { %8897 = vmatpush1.bf16.msra.mxu0 %v11573_v36 }
 0x5ae   :  { %8898 = vmatprep.subr.bf16.mxu0 %v11578_v42  ;;  %v8653_v42 = vrot.slane %v8644_v55, %v17322_v24 }
 0x5b1   :  { %8899 = vmatpush1.bf16.msra.mxu0 %v11576_v22 }
 0x5b2   :  { %8900 = vmatprep.subr.bf16.mxu0 %v11581_v41 }
 0x5b5   :  { %8901 = vmatpush1.bf16.msra.mxu0 %v11579_v57 }
 0x5b6   :  { %v7235_v11 = vpop.f32.mrb[112].mxu1  ;;  %8902 = vmatprep.subr.bf16.mxu0 %v11584_v38 }
 0x5b7   :  { %v7237_v12 = vpop.f32.mrb[113].mxu1 }
 0x5b8   :  { %v7239_v51 = vpop.f32.mrb[114].mxu1 }
 0x5b9   :  { %v7240_v23 = vpop.f32.mrb[115].mxu1  ;;  %8903 = vmatpush1.bf16.msra.mxu0 %v11582_v63 }
 0x5ba   :  { %8904 = vmatprep.subr.bf16.mxu0 %v11587_v2  ;;  %v8668_v2 = vpop.permute.xlu0 %8667 }
 0x5bd   :  { %8905 = vmatpush1.bf16.msra.mxu0 %v11585_v18 }
 0x5be   :  { %v7194_v62 = vpop.f32.mrb[112].mxu0  ;;  %8906 = vmatprep.subr.bf16.mxu0 %v11590_v61 }
 0x5bf   :  { %v7236_v21 = vadd.f32 %v7235_v11, %v7194_v62  ;;  %v7196_v45 = vpop.f32.mrb[113].mxu0  ;;  %v11608_v11 = vld [vmem:[%s16961_s13 + $0x28] sm:$0xff]  }
 0x5c0   :  { %v7238_v8 = vadd.f32 %v7237_v12, %v7196_v45  ;;  %v7198_v19 = vpop.f32.mrb[114].mxu0  ;;  %10173 = vmatpush3.bf16.msra.mxu1 %v11608_v11 }
 0x5c1   :  { %v7199_v13 = vpop.f32.mrb[115].mxu0  ;;  %8907 = vmatpush1.bf16.msra.mxu0 %v11588_v40 }
 0x5c2   :  { %8908 = vmatprep.subr.bf16.mxu0 %v11593_v27 }
 0x5c5   :  { %8909 = vmatpush1.bf16.msra.mxu0 %v11591_v10 }
 0x5c6   :  { %8910 = vmatprep.subr.bf16.mxu0 %v11596_v48  ;;  %v11610_v48 = vld [vmem:[%s16961_s13 + $0x30] sm:$0xff]  }
 0x5c9   :  { %8911 = vmatpush1.bf16.msra.mxu0 %v11594_v1  ;;  %v11612_v1 = vld [vmem:[%s16961_s13 + $0x38] sm:$0xff]  }
 0x5ef   :  { %v7663_v50 = vpop.f32.mrb[116].mxu0 }
 0x5f0   :  { %v7665_v39 = vpop.f32.mrb[117].mxu0 }
 0x5f1   :  { %v7667_v44 = vpop.f32.mrb[118].mxu0 }
 0x5f2   :  { %v7668_v15 = vpop.f32.mrb[119].mxu0  ;;  %v11609_v44 = vld [vmem:[%s16961_s13 + $0x70] sm:$0xff]  }
 0x5f3   :  { %v11611_v15 = vld [vmem:[%s16961_s13 + $0x78] sm:$0xff]   ;;  %10174 = vmatprep.subr.bf16.mxu1 %v11609_v44 }
 0x5f4   :  { %10175 = vmatpush3.bf16.msra.mxu1 %v11610_v48 }
 0x5f5   :  { %10176 = vmatprep.subr.bf16.mxu1 %v11611_v15 }
 0x5f6   :  { %v7622_v25 = vpop.f32.mrb[116].mxu1 }
 0x5f7   :  { %v7623_v4 = vadd.f32 %v7622_v25, %v7236_v21  ;;  %v7624_v58 = vpop.f32.mrb[117].mxu1  ;;  %v8717_v25 = vrot.slane %v8708_v43, %v17322_v24  ;;  %v10145_v24 = vld [vmem:[%s16964_s14] ss:$0 sm:$0xff] }
 0x5f8   :  { %v7625_v33 = vadd.f32 %v7624_v58, %v7238_v8  ;;  %v7626_v14 = vpop.f32.mrb[118].mxu1  ;;  %10177 = vmatpush3.bf16.msra.mxu1 %v11612_v1 }
 0x5f9   :  { %v7664_v54 = vadd.f32 %v7663_v50, %v7623_v4  ;;  %v7627_v30 = vpop.f32.mrb[119].mxu1 }
 0x5fa   :  { %v7666_v16 = vadd.f32 %v7665_v39, %v7625_v33 }
 0x60d   :  { %v8931_v4 = vpop.permute.xlu1 %8930 }
 0x626   :  { %v8148_v52 = vpop.f32.mrb[120].mxu1 }
 0x627   :  { %v8150_v12 = vpop.f32.mrb[121].mxu1 }
 0x628   :  { %v8152_v3 = vpop.f32.mrb[122].mxu1 }
 0x629   :  { %v8153_v51 = vpop.f32.mrb[123].mxu1 }
 0x62f   :  { %v8107_v23 = vpop.f32.mrb[120].mxu0 }
 0x630   :  { %v8149_v26 = vadd.f32 %v8148_v52, %v8107_v23  ;;  %v8109_v7 = vpop.f32.mrb[121].mxu0 }
 0x631   :  { %v8151_v62 = vadd.f32 %v8150_v12, %v8109_v7  ;;  %v8111_v17 = vpop.f32.mrb[122].mxu0 }
 0x632   :  { %v8155_v21 = vadd.f32 %v8149_v26, %v7664_v54  ;;  %v8112_v45 = vpop.f32.mrb[123].mxu0 }
 0x633   :  { %v8156_v6 = vadd.f32 %v8151_v62, %v7666_v16 }
 0x65f   :  { %v8635_v8 = vpop.f32.mrb[124].mxu0 }
 0x660   :  { %v8637_v19 = vpop.f32.mrb[125].mxu0 }
 0x661   :  { %v8639_v13 = vpop.f32.mrb[126].mxu0 }
 0x662   :  { %v8640_v53 = vpop.f32.mrb[127].mxu0 }
 0x666   :  { %v8594_v28 = vpop.f32.mrb[124].mxu1 }
 0x667   :  { %v8636_v5 = vadd.f32 %v8635_v8, %v8594_v28  ;;  %v8596_v34 = vpop.f32.mrb[125].mxu1 }
 0x668   :  { %v8638_v36 = vadd.f32 %v8637_v19, %v8596_v34  ;;  %v8598_v22 = vpop.f32.mrb[126].mxu1 }
 0x669   :  { %v8642_v41 = vadd.f32 %v8636_v5, %v8155_v21  ;;  %v8599_v57 = vpop.f32.mrb[127].mxu1 }
 0x66a   :  { %v8643_v38 = vadd.f32 %v8638_v36, %v8156_v6 }
 0x66b   :  { %v8656_v63 = vadd.f32 %v8649_v20, %v8642_v41 }
 0x66c   :  { %v8657_v18 = vadd.f32 %v8653_v42, %v8643_v38 }
 0x66d   :  { %vm8659_vm1 = vcmp.ge.f32.partialorder %v8656_v63, 0.0  ;;  %v8670_v40 = vmul.f32 %v8668_v2, %v8656_v63 }
 0x66e   :  { %vm8660_vm15 = vcmp.ge.f32.partialorder %v8657_v18, 0.0  ;;  %v8671_v61 = vmul.f32 %v8668_v2, %v8657_v18 }
 0x66f   :  { %v8672_v27 = vsel %vm8659_vm1, %v8656_v63, %v8670_v40 }
 0x670   :  { %v8673_v50 = vsel %vm8660_vm15, %v8657_v18, %v8671_v61  ;;  %v8674_v10 = vpack.c.bf16 %v8672_v27, %v8672_v27 }
 0x671   :  { %v8675_v39 = vpack.c.bf16 %v8673_v50, %v8673_v50 }
 0x673   :  { %8912 = vmatprep.mubr.bf16.mxu0 %v8675_v39 }
 0x674   :  { %8913 = vmatmul.mubr.bf16.vlgmr.msra.gmra.mrb[128].mxu0 %v8674_v10 }
 0x747   :  { %v8914_v56 = vpop.f32.mrb[128].mxu0 }
 0x748   :  { %v8915_v58 = vadd.f32 %v8914_v56, %v8713_v29  ;;  %v8916_v37 = vpop.f32.mrb[129].mxu0 }
 0x749   :  { %v8917_v33 = vadd.f32 %v8916_v37, %v8717_v25  ;;  %v8918_v14 = vpop.f32.mrb[130].mxu0 }
 0x74a   :  { %vm8922_vm8 = vcmp.ge.f32.partialorder %v8915_v58, 0.0  ;;  %v8933_v9 = vmul.f32 %v8931_v4, %v8915_v58  ;;  %v8919_v54 = vpop.f32.mrb[131].mxu0 }
 0x74b   :  { %vm8923_vm2 = vcmp.ge.f32.partialorder %v8917_v33, 0.0  ;;  %v8934_v30 = vmul.f32 %v8931_v4, %v8917_v33 }
 0x74c   :  { %v8935_v32 = vsel %vm8922_vm8, %v8915_v58, %v8933_v9 }
 0x74d   :  { %v8936_v16 = vsel %vm8923_vm2, %v8917_v33, %v8934_v30  ;;  %v8937_v0 = vpack.c.bf16 %v8935_v32, %v8935_v32 }
 0x74e   :  { %v8938_v31 = vpack.c.bf16 %v8936_v16, %v8936_v16 }
 0x750   :  { %9106 = vmatprep.mubr.bf16.mxu1 %v8938_v31 }
 0x751   :  { %9107 = vmatmul.mubr.bf16.vlgmr.msra.gmra.mrb[128].mxu1 %v8937_v0 }
 0x824   :  { %v10178_v59 = vpop.f32.mrb[128].mxu1 }
 0x825   :  { %v10179_v47 = vpop.f32.mrb[129].mxu1 }
 0x826   :  { %v10180_v49 = vadd.f32 %v10179_v47, %v10178_v59  ;;  %v10181_v60 = vpop.f32.mrb[130].mxu1 }
 0x827   :  { %v10182_v46 = vpop.f32.mrb[131].mxu1 }
 0x828   :  { %v9109_v35 = vadd.f32 %v10180_v49, %v10145_v24 }
 0x82a   :  { %v9114_v11 = vmul.f32 %v9109_v35, %v9109_v35 }
 0x82c   :  { %9115 = vadd.xlane.f32.xlu0 %v9114_v11 }
 0x8b9   :  { %v9116_v52 = vpop.xlane.xlu0 %9115 }
 0x8ba   :  { %v9117_v12 = vmax.f32 %v9116_v52, 1e-24 }
 0x8bc   :  { %11613 = vrsqrt.f32 %v9117_v12 }
 0x8c6   :  { %v11614_v3 = vpop.eup %11613 }
 0x8c7   :  { %v9119_v51 = vmul.f32 %v11614_v3, %v9109_v35 }
 0x8c9   :  { %9120 = vst [vmem:[%s16965_s15] sm:$0xff] %v9119_v51 }

</bundles_post_ra>
